<compile_context>
chip_gen: v7x
topology: tpu7x:2x2x1
jax: 0.10.0
libtpu: 0.0.40
codegen_flags: <defaults>
</compile_context>

<pallas_src>
import functools

import numpy as np
import jax
import jax.numpy as jnp
from jax.experimental import pallas as pl
from jax.experimental.pallas import tpu as pltpu


# ----------------------------------------------------------------------------
# Pallas kernel: full 4-layer ONN forward for one batch block (row-stacked).
# ----------------------------------------------------------------------------
def onn_kernel(xr_ref, xi_ref,
               ar_ref, ai_ref, adm_ref, asp_ref,
               br_ref, bi_ref, bdm_ref, bsp_ref,
               hr_ref, hi_ref, pc_ref, ps_ref,
               our_ref, oui_ref,
               sr_ref, si_ref, *, precision):
    f32 = jnp.float32
    M = ar_ref.shape[0]
    nL = hr_ref.shape[0]
    bb = xr_ref.shape[0] // M          # batch elements in this block

    def mm(x, y):                      # x @ y
        return jnp.dot(x, y, preferred_element_type=f32, precision=precision)

    def mm_t(x, c):                    # x @ c^T without materializing c^T
        return jax.lax.dot_general(x, c, (((1,), (1,)), ((), ())),
                                   preferred_element_type=f32,
                                   precision=precision)

    def right_cmul(xr, xi, cr, cdm, csp):
        # Gauss 3-mult complex product: (xr + i xi) @ (cr + i ci)^T,
        # with cdm = ci - cr and csp = cr + ci precomputed on the host.
        # Runs batch-wide on the row-stacked (bb*M, M) field -> one big matmul.
        k1 = mm_t(xr + xi, cr)
        k2 = mm_t(xr, cdm)
        k3 = mm_t(xi, csp)
        return k1 - k3, k1 + k2

    def left_cmul(cr, ci, csp, yr, yi):
        # Gauss 3-mult complex product: (cr + i ci) @ (yr + i yi),
        # with csp = cr + ci precomputed on the host (per batch element).
        k1 = mm(csp, yr)
        k2 = mm(cr, yi - yr)
        k3 = mm(ci, yr + yi)
        return k1 - k3, k1 + k2

    Ar, Ai = ar_ref[...], ai_ref[...]
    Adm, Asp = adm_ref[...], asp_ref[...]
    Br, Bi = br_ref[...], bi_ref[...]
    Bdm, Bsp = bdm_ref[...], bsp_ref[...]

    xr = xr_ref[...]
    xi = xi_ref[...]

    for l in range(nL):                          # static unroll over optical layers
        # ---- spectrum: A @ u @ A^T == fft2(fftshift(u)), then * H_l ----------
        tr, ti = right_cmul(xr, xi, Ar, Adm, Asp)        # batched right multiply
        hr = hr_ref[l]                                    # (M, M), untiled
        hi = hi_ref[l]
        for b in range(bb):                               # per-batch left multiply
            r0 = b * M                                    # multiple of 8 -> aligned
            sr, si = left_cmul(Ar, Ai, Asp, tr[r0:r0 + M, :], ti[r0:r0 + M, :])
            # Fresnel transfer function fused here so H_l never needs batch-tiling.
            sr_ref[r0:r0 + M, :] = sr * hr - si * hi
            si_ref[r0:r0 + M, :] = sr * hi + si * hr
        vr = sr_ref[...]
        vi = si_ref[...]

        # ---- back to space: B @ V @ B^T == ifftshift(ifft2(V)) ---------------
        wr, wi = right_cmul(vr, vi, Br, Bdm, Bsp)        # batched right multiply
        last = (l == nL - 1)
        if not last:
            # phase mask of the NEXT layer, fused into this layer's epilogue
            # (layer 0 of the model has phi == 0, so masks start at layer 1).
            pc = pc_ref[l]                                # (M, M), untiled
            ps = ps_ref[l]
        for b in range(bb):
            r0 = b * M
            zr, zi = left_cmul(Br, Bi, Bsp, wr[r0:r0 + M, :], wi[r0:r0 + M, :])
            if last:
                our_ref[r0:r0 + M, :] = zr               # write output directly
                oui_ref[r0:r0 + M, :] = zi
            else:
                sr_ref[r0:r0 + M, :] = zr * pc - zi * ps  # u *= exp(i*phi_{l+1})
                si_ref[r0:r0 + M, :] = zr * ps + zi * pc
        if not last:
            xr = sr_ref[...]
            xi = si_ref[...]


# ----------------------------------------------------------------------------
# Host-side glue: build DFT / shift / transfer-function matrices.
# ----------------------------------------------------------------------------
def build_optics(M, L, lambda0, zs):
    n = np.arange(M)
    F = np.exp(-2j * np.pi * np.outer(n, n) / M)        # unnormalized DFT matrix
    Fi = np.exp(+2j * np.pi * np.outer(n, n) / M) / M   # inverse DFT matrix
    S = np.zeros((M, M), dtype=np.float64)
    S[n, (n + M // 2) % M] = 1.0                        # fftshift permutation (M even)
    A = F @ S                                           # fft2(fftshift(u)) = A u A^T
    B = S @ Fi                                          # ifftshift(ifft2(U)) = B U B^T

    dx = L / M
    fx = np.fft.fftfreq(M, d=dx)
    FX, FY = np.meshgrid(fx, fx, indexing="ij")
    H = np.stack([np.exp(-1j * np.pi * lambda0 * z * (FX ** 2 + FY ** 2)) for z in zs])
    return A, B, H


def onn_forward(ur, ui, A, Bmat, H, phi, *, batch_block=None,
                precision=jax.lax.Precision.HIGHEST):
    Bsz, M, _ = ur.shape
    nL = H.shape[0]
    bb = Bsz if batch_block is None else batch_block    # batch per grid step
    assert Bsz % bb == 0 and M % 8 == 0
    nblk = Bsz // bb
    f32 = jnp.float32

    # Real / imag parts of the constant propagation matrices plus the Gauss
    # 3-mult combinations (Ci - Cr, Cr + Ci), precomputed once on the host.
    def combos(C):
        Cr = np.real(C).astype(np.float32)
        Ci = np.imag(C).astype(np.float32)
        return (jnp.asarray(Cr), jnp.asarray(Ci),
                jnp.asarray(Ci - Cr), jnp.asarray(Cr + Ci))

    Ar, Ai, Adm, Asp = combos(A)
    Br_, Bi_, Bdm, Bsp = combos(Bmat)

    # Transfer functions / phase masks stay UNTILED (nL, M, M): they are fused
    # per batch element inside the kernel, so no factor-bb HBM/VMEM blow-up.
    Hr = jnp.asarray(np.real(H).astype(np.float32))
    Hi = jnp.asarray(np.imag(H).astype(np.float32))

    phi = jnp.asarray(phi, f32)
    masks = phi[1:] if nL > 1 else jnp.zeros((1, M, M), f32)   # layer 0 has phi == 0
    pc = jnp.cos(masks)                                        # computed once, on host side
    ps = jnp.sin(masks)
    n_mask = pc.shape[0]

    # Field carried row-stacked: rows [b*M : (b+1)*M] hold batch element b.
    xr = jnp.asarray(ur, f32).reshape(Bsz * M, M)
    xi = jnp.asarray(ui, f32).reshape(Bsz * M, M)

    u_spec = pl.BlockSpec((bb * M, M), lambda g: (g, 0))
    m_spec = pl.BlockSpec((M, M), lambda g: (0, 0))
    h_spec = pl.BlockSpec((nL, M, M), lambda g: (0, 0, 0))
    p_spec = pl.BlockSpec((n_mask, M, M), lambda g: (0, 0, 0))

    kernel = functools.partial(onn_kernel, precision=precision)

    our, oui = pl.pallas_call(
        kernel,
        out_shape=(jax.ShapeDtypeStruct((Bsz * M, M), f32),
                   jax.ShapeDtypeStruct((Bsz * M, M), f32)),
        grid=(nblk,),
        in_specs=[u_spec, u_spec,
                  m_spec, m_spec, m_spec, m_spec,
                  m_spec, m_spec, m_spec, m_spec,
                  h_spec, h_spec, p_spec, p_spec],
        out_specs=(u_spec, u_spec),
        scratch_shapes=[pltpu.VMEM((bb * M, M), f32),
                        pltpu.VMEM((bb * M, M), f32)],
        compiler_params=pltpu.CompilerParams(
            dimension_semantics=("parallel",)),
    )(xr, xi, Ar, Ai, Adm, Asp, Br_, Bi_, Bdm, Bsp, Hr, Hi, pc, ps)

    return our.reshape(Bsz, M, M), oui.reshape(Bsz, M, M)


# ----------------------------------------------------------------------------
# Pure-JAX reference (jnp.fft) for a correctness check.
# ----------------------------------------------------------------------------
def ref_forward(ur, ui, H, phi):
    u = (ur + 1j * ui).astype(jnp.complex64)
    Hc = jnp.asarray(H, jnp.complex64)
    phi = jnp.asarray(phi, jnp.float32)
    for l in range(H.shape[0]):
        u = u * jnp.exp(1j * phi[l]).astype(jnp.complex64)
        U = jnp.fft.fft2(jnp.fft.fftshift(u, axes=(-2, -1)))
        U = U * Hc[l]
        u = jnp.fft.ifftshift(jnp.fft.ifft2(U), axes=(-2, -1))
    return u


if __name__ == "__main__":
    # Small, deterministic configuration consistent with the module.
    M = 16                 # grid samples per side
    L = 1e-3               # physical side length [m]
    lambda0 = 532e-9       # wavelength [m]
    z = [0.05, 0.04, 0.03, 0.02]   # propagation distances layer0 .. DiffLayer3
    Bsz = 2                # batch

    key = jax.random.PRNGKey(0)
    k1, k2, k3 = jax.random.split(key, 3)
    ur = jax.random.normal(k1, (Bsz, M, M), dtype=jnp.float32)
    ui = jax.random.normal(k2, (Bsz, M, M), dtype=jnp.float32)

    # Deterministic "learned" phase masks for DiffLayer1..3; layer0 has phi = 0.
    phases = jax.random.uniform(k3, (3, M, M), minval=0.0, maxval=2.0 * np.pi,
                                dtype=jnp.float32)
    phi_all = jnp.concatenate([jnp.zeros((1, M, M), jnp.float32), phases], axis=0)

    A, Bmat, H = build_optics(M, L, lambda0, z)
    u_ref = np.asarray(ref_forward(ur, ui, H, phi_all))

    def run_and_check(precision):
        our, oui = onn_forward(ur, ui, A, Bmat, H, phi_all, precision=precision)
        our = jax.block_until_ready(our)
        oui = jax.block_until_ready(oui)
        np.testing.assert_allclose(np.asarray(our), u_ref.real, rtol=2e-2, atol=2e-2)
        np.testing.assert_allclose(np.asarray(oui), u_ref.imag, rtol=2e-2, atol=2e-2)
        return our, oui

    try:
        # Precision.HIGH (bf16_3x) halves MXU passes vs HIGHEST and is the safe
        # accuracy floor for the unnormalized-DFT intermediates.
        run_and_check(jax.lax.Precision.HIGH)
    except Exception:
        # Fallback: some Mosaic dot_general lowerings only plumb DEFAULT/HIGHEST,
        # and bf16_3x could fall short of tolerance at much larger field sizes.
        run_and_check(jax.lax.Precision.HIGHEST)

    print("KERNEL_OK")
</pallas_src>

<mosaic_0001>
module attributes {stable_mosaic.version = 11 : i64} {
  func.func @onn_kernel(%arg0: i32, %arg1: memref<32x16xf32, #tpu.memory_space<vmem>>, %arg2: memref<32x16xf32, #tpu.memory_space<vmem>>, %arg3: memref<16x16xf32, #tpu.memory_space<vmem>>, %arg4: memref<16x16xf32, #tpu.memory_space<vmem>>, %arg5: memref<16x16xf32, #tpu.memory_space<vmem>>, %arg6: memref<16x16xf32, #tpu.memory_space<vmem>>, %arg7: memref<16x16xf32, #tpu.memory_space<vmem>>, %arg8: memref<16x16xf32, #tpu.memory_space<vmem>>, %arg9: memref<16x16xf32, #tpu.memory_space<vmem>>, %arg10: memref<16x16xf32, #tpu.memory_space<vmem>>, %arg11: memref<4x16x16xf32, #tpu.memory_space<vmem>>, %arg12: memref<4x16x16xf32, #tpu.memory_space<vmem>>, %arg13: memref<3x16x16xf32, #tpu.memory_space<vmem>>, %arg14: memref<3x16x16xf32, #tpu.memory_space<vmem>>, %arg15: memref<32x16xf32, #tpu.memory_space<vmem>>, %arg16: memref<32x16xf32, #tpu.memory_space<vmem>>, %arg17: memref<32x16xf32, #tpu.memory_space<vmem>>, %arg18: memref<32x16xf32, #tpu.memory_space<vmem>>) attributes {dimension_semantics = [#tpu.dimension_semantics<parallel>], iteration_bounds = array<i64: 1>, scalar_prefetch = 0 : i64, scratch_operands = 2 : i64, tpu.core_type = #tpu.core_type<tc>, window_params = [{transform_indices = @transform_0, window_bounds = array<i64: 32, 16>}, {transform_indices = @transform_1, window_bounds = array<i64: 32, 16>}, {pipeline_mode = #tpu.pipeline_mode<synchronous>, transform_indices = @transform_2, window_bounds = array<i64: 16, 16>}, {pipeline_mode = #tpu.pipeline_mode<synchronous>, transform_indices = @transform_3, window_bounds = array<i64: 16, 16>}, {pipeline_mode = #tpu.pipeline_mode<synchronous>, transform_indices = @transform_4, window_bounds = array<i64: 16, 16>}, {pipeline_mode = #tpu.pipeline_mode<synchronous>, transform_indices = @transform_5, window_bounds = array<i64: 16, 16>}, {pipeline_mode = #tpu.pipeline_mode<synchronous>, transform_indices = @transform_6, window_bounds = array<i64: 16, 16>}, {pipeline_mode = #tpu.pipeline_mode<synchronous>, transform_indices = @transform_7, window_bounds = array<i64: 16, 16>}, {pipeline_mode = #tpu.pipeline_mode<synchronous>, transform_indices = @transform_8, window_bounds = array<i64: 16, 16>}, {pipeline_mode = #tpu.pipeline_mode<synchronous>, transform_indices = @transform_9, window_bounds = array<i64: 16, 16>}, {pipeline_mode = #tpu.pipeline_mode<synchronous>, transform_indices = @transform_10, window_bounds = array<i64: 4, 16, 16>}, {pipeline_mode = #tpu.pipeline_mode<synchronous>, transform_indices = @transform_11, window_bounds = array<i64: 4, 16, 16>}, {pipeline_mode = #tpu.pipeline_mode<synchronous>, transform_indices = @transform_12, window_bounds = array<i64: 3, 16, 16>}, {pipeline_mode = #tpu.pipeline_mode<synchronous>, transform_indices = @transform_13, window_bounds = array<i64: 3, 16, 16>}, {transform_indices = @transform_14, window_bounds = array<i64: 32, 16>}, {transform_indices = @transform_15, window_bounds = array<i64: 32, 16>}]} {
    %c0 = arith.constant 0 : index
    %c0_0 = arith.constant 0 : index
    %0 = vector.load %arg3[%c0, %c0_0] : memref<16x16xf32, #tpu.memory_space<vmem>>, vector<16x16xf32>
    %c0_1 = arith.constant 0 : index
    %c0_2 = arith.constant 0 : index
    %1 = vector.load %arg4[%c0_1, %c0_2] : memref<16x16xf32, #tpu.memory_space<vmem>>, vector<16x16xf32>
    %c0_3 = arith.constant 0 : index
    %c0_4 = arith.constant 0 : index
    %2 = vector.load %arg5[%c0_3, %c0_4] : memref<16x16xf32, #tpu.memory_space<vmem>>, vector<16x16xf32>
    %c0_5 = arith.constant 0 : index
    %c0_6 = arith.constant 0 : index
    %3 = vector.load %arg6[%c0_5, %c0_6] : memref<16x16xf32, #tpu.memory_space<vmem>>, vector<16x16xf32>
    %c0_7 = arith.constant 0 : index
    %c0_8 = arith.constant 0 : index
    %4 = vector.load %arg7[%c0_7, %c0_8] : memref<16x16xf32, #tpu.memory_space<vmem>>, vector<16x16xf32>
    %c0_9 = arith.constant 0 : index
    %c0_10 = arith.constant 0 : index
    %5 = vector.load %arg8[%c0_9, %c0_10] : memref<16x16xf32, #tpu.memory_space<vmem>>, vector<16x16xf32>
    %c0_11 = arith.constant 0 : index
    %c0_12 = arith.constant 0 : index
    %6 = vector.load %arg9[%c0_11, %c0_12] : memref<16x16xf32, #tpu.memory_space<vmem>>, vector<16x16xf32>
    %c0_13 = arith.constant 0 : index
    %c0_14 = arith.constant 0 : index
    %7 = vector.load %arg10[%c0_13, %c0_14] : memref<16x16xf32, #tpu.memory_space<vmem>>, vector<16x16xf32>
    %c0_15 = arith.constant 0 : index
    %c0_16 = arith.constant 0 : index
    %8 = vector.load %arg1[%c0_15, %c0_16] : memref<32x16xf32, #tpu.memory_space<vmem>>, vector<32x16xf32>
    %c0_17 = arith.constant 0 : index
    %c0_18 = arith.constant 0 : index
    %9 = vector.load %arg2[%c0_17, %c0_18] : memref<32x16xf32, #tpu.memory_space<vmem>>, vector<32x16xf32>
    %10 = arith.addf %8, %9 : vector<32x16xf32>
    %cst = arith.constant dense<0.000000e+00> : vector<32x16xf32>
    %11 = tpu.matmul %10, %0, %cst {dimension_numbers = #tpu.dot_dimension_numbers<[1], [1], [0], [0], [0, 0, 1, 0], [], []>, precision = #tpu.contract_precision<fp32>} : vector<32x16xf32>, vector<16x16xf32>, vector<32x16xf32> -> vector<32x16xf32>
    %cst_19 = arith.constant dense<0.000000e+00> : vector<32x16xf32>
    %12 = tpu.matmul %8, %2, %cst_19 {dimension_numbers = #tpu.dot_dimension_numbers<[1], [1], [0], [0], [0, 0, 1, 0], [], []>, precision = #tpu.contract_precision<fp32>} : vector<32x16xf32>, vector<16x16xf32>, vector<32x16xf32> -> vector<32x16xf32>
    %cst_20 = arith.constant dense<0.000000e+00> : vector<32x16xf32>
    %13 = tpu.matmul %9, %3, %cst_20 {dimension_numbers = #tpu.dot_dimension_numbers<[1], [1], [0], [0], [0, 0, 1, 0], [], []>, precision = #tpu.contract_precision<fp32>} : vector<32x16xf32>, vector<16x16xf32>, vector<32x16xf32> -> vector<32x16xf32>
    %14 = arith.subf %11, %13 : vector<32x16xf32>
    %15 = arith.addf %11, %12 : vector<32x16xf32>
    %c0_21 = arith.constant 0 : index
    %c0_22 = arith.constant 0 : index
    %c0_23 = arith.constant 0 : index
    %16 = vector.load %arg11[%c0_21, %c0_22, %c0_23] : memref<4x16x16xf32, #tpu.memory_space<vmem>>, vector<1x16x16xf32>
    %17 = vector.shape_cast %16 : vector<1x16x16xf32> to vector<16x16xf32>
    %c0_24 = arith.constant 0 : index
    %c0_25 = arith.constant 0 : index
    %c0_26 = arith.constant 0 : index
    %18 = vector.load %arg12[%c0_24, %c0_25, %c0_26] : memref<4x16x16xf32, #tpu.memory_space<vmem>>, vector<1x16x16xf32>
    %19 = vector.shape_cast %18 : vector<1x16x16xf32> to vector<16x16xf32>
    %20 = vector.extract_strided_slice %14 {offsets = [0, 0], sizes = [16, 16], strides = [1, 1]} : vector<32x16xf32> to vector<16x16xf32>
    %21 = vector.extract_strided_slice %15 {offsets = [0, 0], sizes = [16, 16], strides = [1, 1]} : vector<32x16xf32> to vector<16x16xf32>
    %cst_27 = arith.constant dense<0.000000e+00> : vector<16x16xf32>
    %22 = tpu.matmul %3, %20, %cst_27 {dimension_numbers = #tpu.dot_dimension_numbers<[1], [0], [0], [1], [0, 0, 1, 1], [], []>, precision = #tpu.contract_precision<fp32>} : vector<16x16xf32>, vector<16x16xf32>, vector<16x16xf32> -> vector<16x16xf32>
    %23 = arith.subf %21, %20 : vector<16x16xf32>
    %cst_28 = arith.constant dense<0.000000e+00> : vector<16x16xf32>
    %24 = tpu.matmul %0, %23, %cst_28 {dimension_numbers = #tpu.dot_dimension_numbers<[1], [0], [0], [1], [0, 0, 1, 1], [], []>, precision = #tpu.contract_precision<fp32>} : vector<16x16xf32>, vector<16x16xf32>, vector<16x16xf32> -> vector<16x16xf32>
    %25 = arith.addf %20, %21 : vector<16x16xf32>
    %cst_29 = arith.constant dense<0.000000e+00> : vector<16x16xf32>
    %26 = tpu.matmul %1, %25, %cst_29 {dimension_numbers = #tpu.dot_dimension_numbers<[1], [0], [0], [1], [0, 0, 1, 1], [], []>, precision = #tpu.contract_precision<fp32>} : vector<16x16xf32>, vector<16x16xf32>, vector<16x16xf32> -> vector<16x16xf32>
    %27 = arith.subf %22, %26 : vector<16x16xf32>
    %28 = arith.addf %22, %24 : vector<16x16xf32>
    %29 = arith.mulf %27, %17 : vector<16x16xf32>
    %30 = arith.mulf %28, %19 : vector<16x16xf32>
    %31 = arith.subf %29, %30 : vector<16x16xf32>
    %c0_30 = arith.constant 0 : index
    %c0_31 = arith.constant 0 : index
    %32 = vector.load %arg17[%c0_30, %c0_31] : memref<32x16xf32, #tpu.memory_space<vmem>>, vector<16x16xf32>
    tpu.vector_store %arg17[%c0_30, %c0_31], %31 {strides = array<i32>} : memref<32x16xf32, #tpu.memory_space<vmem>>, vector<16x16xf32>,
    %33 = arith.mulf %27, %19 : vector<16x16xf32>
    %34 = arith.mulf %28, %17 : vector<16x16xf32>
    %35 = arith.addf %33, %34 : vector<16x16xf32>
    %c0_32 = arith.constant 0 : index
    %c0_33 = arith.constant 0 : index
    %36 = vector.load %arg18[%c0_32, %c0_33] : memref<32x16xf32, #tpu.memory_space<vmem>>, vector<16x16xf32>
    tpu.vector_store %arg18[%c0_32, %c0_33], %35 {strides = array<i32>} : memref<32x16xf32, #tpu.memory_space<vmem>>, vector<16x16xf32>,
    %37 = vector.extract_strided_slice %14 {offsets = [16, 0], sizes = [16, 16], strides = [1, 1]} : vector<32x16xf32> to vector<16x16xf32>
    %38 = vector.extract_strided_slice %15 {offsets = [16, 0], sizes = [16, 16], strides = [1, 1]} : vector<32x16xf32> to vector<16x16xf32>
    %cst_34 = arith.constant dense<0.000000e+00> : vector<16x16xf32>
    %39 = tpu.matmul %3, %37, %cst_34 {dimension_numbers = #tpu.dot_dimension_numbers<[1], [0], [0], [1], [0, 0, 1, 1], [], []>, precision = #tpu.contract_precision<fp32>} : vector<16x16xf32>, vector<16x16xf32>, vector<16x16xf32> -> vector<16x16xf32>
    %40 = arith.subf %38, %37 : vector<16x16xf32>
    %cst_35 = arith.constant dense<0.000000e+00> : vector<16x16xf32>
    %41 = tpu.matmul %0, %40, %cst_35 {dimension_numbers = #tpu.dot_dimension_numbers<[1], [0], [0], [1], [0, 0, 1, 1], [], []>, precision = #tpu.contract_precision<fp32>} : vector<16x16xf32>, vector<16x16xf32>, vector<16x16xf32> -> vector<16x16xf32>
    %42 = arith.addf %37, %38 : vector<16x16xf32>
    %cst_36 = arith.constant dense<0.000000e+00> : vector<16x16xf32>
    %43 = tpu.matmul %1, %42, %cst_36 {dimension_numbers = #tpu.dot_dimension_numbers<[1], [0], [0], [1], [0, 0, 1, 1], [], []>, precision = #tpu.contract_precision<fp32>} : vector<16x16xf32>, vector<16x16xf32>, vector<16x16xf32> -> vector<16x16xf32>
    %44 = arith.subf %39, %43 : vector<16x16xf32>
    %45 = arith.addf %39, %41 : vector<16x16xf32>
    %46 = arith.mulf %44, %17 : vector<16x16xf32>
    %47 = arith.mulf %45, %19 : vector<16x16xf32>
    %48 = arith.subf %46, %47 : vector<16x16xf32>
    %c16 = arith.constant 16 : index
    %c0_37 = arith.constant 0 : index
    %49 = vector.load %arg17[%c16, %c0_37] : memref<32x16xf32, #tpu.memory_space<vmem>>, vector<16x16xf32>
    tpu.vector_store %arg17[%c16, %c0_37], %48 {strides = array<i32>} : memref<32x16xf32, #tpu.memory_space<vmem>>, vector<16x16xf32>,
    %50 = arith.mulf %44, %19 : vector<16x16xf32>
    %51 = arith.mulf %45, %17 : vector<16x16xf32>
    %52 = arith.addf %50, %51 : vector<16x16xf32>
    %c16_38 = arith.constant 16 : index
    %c0_39 = arith.constant 0 : index
    %53 = vector.load %arg18[%c16_38, %c0_39] : memref<32x16xf32, #tpu.memory_space<vmem>>, vector<16x16xf32>
    tpu.vector_store %arg18[%c16_38, %c0_39], %52 {strides = array<i32>} : memref<32x16xf32, #tpu.memory_space<vmem>>, vector<16x16xf32>,
    %c0_40 = arith.constant 0 : index
    %c0_41 = arith.constant 0 : index
    %54 = vector.load %arg17[%c0_40, %c0_41] : memref<32x16xf32, #tpu.memory_space<vmem>>, vector<32x16xf32>
    %c0_42 = arith.constant 0 : index
    %c0_43 = arith.constant 0 : index
    %55 = vector.load %arg18[%c0_42, %c0_43] : memref<32x16xf32, #tpu.memory_space<vmem>>, vector<32x16xf32>
    %56 = arith.addf %54, %55 : vector<32x16xf32>
    %cst_44 = arith.constant dense<0.000000e+00> : vector<32x16xf32>
    %57 = tpu.matmul %56, %4, %cst_44 {dimension_numbers = #tpu.dot_dimension_numbers<[1], [1], [0], [0], [0, 0, 1, 0], [], []>, precision = #tpu.contract_precision<fp32>} : vector<32x16xf32>, vector<16x16xf32>, vector<32x16xf32> -> vector<32x16xf32>
    %cst_45 = arith.constant dense<0.000000e+00> : vector<32x16xf32>
    %58 = tpu.matmul %54, %6, %cst_45 {dimension_numbers = #tpu.dot_dimension_numbers<[1], [1], [0], [0], [0, 0, 1, 0], [], []>, precision = #tpu.contract_precision<fp32>} : vector<32x16xf32>, vector<16x16xf32>, vector<32x16xf32> -> vector<32x16xf32>
    %cst_46 = arith.constant dense<0.000000e+00> : vector<32x16xf32>
    %59 = tpu.matmul %55, %7, %cst_46 {dimension_numbers = #tpu.dot_dimension_numbers<[1], [1], [0], [0], [0, 0, 1, 0], [], []>, precision = #tpu.contract_precision<fp32>} : vector<32x16xf32>, vector<16x16xf32>, vector<32x16xf32> -> vector<32x16xf32>
    %60 = arith.subf %57, %59 : vector<32x16xf32>
    %61 = arith.addf %57, %58 : vector<32x16xf32>
    %c0_47 = arith.constant 0 : index
    %c0_48 = arith.constant 0 : index
    %c0_49 = arith.constant 0 : index
    %62 = vector.load %arg13[%c0_47, %c0_48, %c0_49] : memref<3x16x16xf32, #tpu.memory_space<vmem>>, vector<1x16x16xf32>
    %63 = vector.shape_cast %62 : vector<1x16x16xf32> to vector<16x16xf32>
    %c0_50 = arith.constant 0 : index
    %c0_51 = arith.constant 0 : index
    %c0_52 = arith.constant 0 : index
    %64 = vector.load %arg14[%c0_50, %c0_51, %c0_52] : memref<3x16x16xf32, #tpu.memory_space<vmem>>, vector<1x16x16xf32>
    %65 = vector.shape_cast %64 : vector<1x16x16xf32> to vector<16x16xf32>
    %66 = vector.extract_strided_slice %60 {offsets = [0, 0], sizes = [16, 16], strides = [1, 1]} : vector<32x16xf32> to vector<16x16xf32>
    %67 = vector.extract_strided_slice %61 {offsets = [0, 0], sizes = [16, 16], strides = [1, 1]} : vector<32x16xf32> to vector<16x16xf32>
    %cst_53 = arith.constant dense<0.000000e+00> : vector<16x16xf32>
    %68 = tpu.matmul %7, %66, %cst_53 {dimension_numbers = #tpu.dot_dimension_numbers<[1], [0], [0], [1], [0, 0, 1, 1], [], []>, precision = #tpu.contract_precision<fp32>} : vector<16x16xf32>, vector<16x16xf32>, vector<16x16xf32> -> vector<16x16xf32>
    %69 = arith.subf %67, %66 : vector<16x16xf32>
    %cst_54 = arith.constant dense<0.000000e+00> : vector<16x16xf32>
    %70 = tpu.matmul %4, %69, %cst_54 {dimension_numbers = #tpu.dot_dimension_numbers<[1], [0], [0], [1], [0, 0, 1, 1], [], []>, precision = #tpu.contract_precision<fp32>} : vector<16x16xf32>, vector<16x16xf32>, vector<16x16xf32> -> vector<16x16xf32>
    %71 = arith.addf %66, %67 : vector<16x16xf32>
    %cst_55 = arith.constant dense<0.000000e+00> : vector<16x16xf32>
    %72 = tpu.matmul %5, %71, %cst_55 {dimension_numbers = #tpu.dot_dimension_numbers<[1], [0], [0], [1], [0, 0, 1, 1], [], []>, precision = #tpu.contract_precision<fp32>} : vector<16x16xf32>, vector<16x16xf32>, vector<16x16xf32> -> vector<16x16xf32>
    %73 = arith.subf %68, %72 : vector<16x16xf32>
    %74 = arith.addf %68, %70 : vector<16x16xf32>
    %75 = arith.mulf %73, %63 : vector<16x16xf32>
    %76 = arith.mulf %74, %65 : vector<16x16xf32>
    %77 = arith.subf %75, %76 : vector<16x16xf32>
    %c0_56 = arith.constant 0 : index
    %c0_57 = arith.constant 0 : index
    %78 = vector.load %arg17[%c0_56, %c0_57] : memref<32x16xf32, #tpu.memory_space<vmem>>, vector<16x16xf32>
    tpu.vector_store %arg17[%c0_56, %c0_57], %77 {strides = array<i32>} : memref<32x16xf32, #tpu.memory_space<vmem>>, vector<16x16xf32>,
    %79 = arith.mulf %73, %65 : vector<16x16xf32>
    %80 = arith.mulf %74, %63 : vector<16x16xf32>
    %81 = arith.addf %79, %80 : vector<16x16xf32>
    %c0_58 = arith.constant 0 : index
    %c0_59 = arith.constant 0 : index
    %82 = vector.load %arg18[%c0_58, %c0_59] : memref<32x16xf32, #tpu.memory_space<vmem>>, vector<16x16xf32>
    tpu.vector_store %arg18[%c0_58, %c0_59], %81 {strides = array<i32>} : memref<32x16xf32, #tpu.memory_space<vmem>>, vector<16x16xf32>,
    %83 = vector.extract_strided_slice %60 {offsets = [16, 0], sizes = [16, 16], strides = [1, 1]} : vector<32x16xf32> to vector<16x16xf32>
    %84 = vector.extract_strided_slice %61 {offsets = [16, 0], sizes = [16, 16], strides = [1, 1]} : vector<32x16xf32> to vector<16x16xf32>
    %cst_60 = arith.constant dense<0.000000e+00> : vector<16x16xf32>
    %85 = tpu.matmul %7, %83, %cst_60 {dimension_numbers = #tpu.dot_dimension_numbers<[1], [0], [0], [1], [0, 0, 1, 1], [], []>, precision = #tpu.contract_precision<fp32>} : vector<16x16xf32>, vector<16x16xf32>, vector<16x16xf32> -> vector<16x16xf32>
    %86 = arith.subf %84, %83 : vector<16x16xf32>
    %cst_61 = arith.constant dense<0.000000e+00> : vector<16x16xf32>
    %87 = tpu.matmul %4, %86, %cst_61 {dimension_numbers = #tpu.dot_dimension_numbers<[1], [0], [0], [1], [0, 0, 1, 1], [], []>, precision = #tpu.contract_precision<fp32>} : vector<16x16xf32>, vector<16x16xf32>, vector<16x16xf32> -> vector<16x16xf32>
    %88 = arith.addf %83, %84 : vector<16x16xf32>
    %cst_62 = arith.constant dense<0.000000e+00> : vector<16x16xf32>
    %89 = tpu.matmul %5, %88, %cst_62 {dimension_numbers = #tpu.dot_dimension_numbers<[1], [0], [0], [1], [0, 0, 1, 1], [], []>, precision = #tpu.contract_precision<fp32>} : vector<16x16xf32>, vector<16x16xf32>, vector<16x16xf32> -> vector<16x16xf32>
    %90 = arith.subf %85, %89 : vector<16x16xf32>
    %91 = arith.addf %85, %87 : vector<16x16xf32>
    %92 = arith.mulf %90, %63 : vector<16x16xf32>
    %93 = arith.mulf %91, %65 : vector<16x16xf32>
    %94 = arith.subf %92, %93 : vector<16x16xf32>
    %c16_63 = arith.constant 16 : index
    %c0_64 = arith.constant 0 : index
    %95 = vector.load %arg17[%c16_63, %c0_64] : memref<32x16xf32, #tpu.memory_space<vmem>>, vector<16x16xf32>
    tpu.vector_store %arg17[%c16_63, %c0_64], %94 {strides = array<i32>} : memref<32x16xf32, #tpu.memory_space<vmem>>, vector<16x16xf32>,
    %96 = arith.mulf %90, %65 : vector<16x16xf32>
    %97 = arith.mulf %91, %63 : vector<16x16xf32>
    %98 = arith.addf %96, %97 : vector<16x16xf32>
    %c16_65 = arith.constant 16 : index
    %c0_66 = arith.constant 0 : index
    %99 = vector.load %arg18[%c16_65, %c0_66] : memref<32x16xf32, #tpu.memory_space<vmem>>, vector<16x16xf32>
    tpu.vector_store %arg18[%c16_65, %c0_66], %98 {strides = array<i32>} : memref<32x16xf32, #tpu.memory_space<vmem>>, vector<16x16xf32>,
    %c0_67 = arith.constant 0 : index
    %c0_68 = arith.constant 0 : index
    %100 = vector.load %arg17[%c0_67, %c0_68] : memref<32x16xf32, #tpu.memory_space<vmem>>, vector<32x16xf32>
    %c0_69 = arith.constant 0 : index
    %c0_70 = arith.constant 0 : index
    %101 = vector.load %arg18[%c0_69, %c0_70] : memref<32x16xf32, #tpu.memory_space<vmem>>, vector<32x16xf32>
    %102 = arith.addf %100, %101 : vector<32x16xf32>
    %cst_71 = arith.constant dense<0.000000e+00> : vector<32x16xf32>
    %103 = tpu.matmul %102, %0, %cst_71 {dimension_numbers = #tpu.dot_dimension_numbers<[1], [1], [0], [0], [0, 0, 1, 0], [], []>, precision = #tpu.contract_precision<fp32>} : vector<32x16xf32>, vector<16x16xf32>, vector<32x16xf32> -> vector<32x16xf32>
    %cst_72 = arith.constant dense<0.000000e+00> : vector<32x16xf32>
    %104 = tpu.matmul %100, %2, %cst_72 {dimension_numbers = #tpu.dot_dimension_numbers<[1], [1], [0], [0], [0, 0, 1, 0], [], []>, precision = #tpu.contract_precision<fp32>} : vector<32x16xf32>, vector<16x16xf32>, vector<32x16xf32> -> vector<32x16xf32>
    %cst_73 = arith.constant dense<0.000000e+00> : vector<32x16xf32>
    %105 = tpu.matmul %101, %3, %cst_73 {dimension_numbers = #tpu.dot_dimension_numbers<[1], [1], [0], [0], [0, 0, 1, 0], [], []>, precision = #tpu.contract_precision<fp32>} : vector<32x16xf32>, vector<16x16xf32>, vector<32x16xf32> -> vector<32x16xf32>
    %106 = arith.subf %103, %105 : vector<32x16xf32>
    %107 = arith.addf %103, %104 : vector<32x16xf32>
    %c1 = arith.constant 1 : index
    %c0_74 = arith.constant 0 : index
    %c0_75 = arith.constant 0 : index
    %108 = vector.load %arg11[%c1, %c0_74, %c0_75] : memref<4x16x16xf32, #tpu.memory_space<vmem>>, vector<1x16x16xf32>
    %109 = vector.shape_cast %108 : vector<1x16x16xf32> to vector<16x16xf32>
    %c1_76 = arith.constant 1 : index
    %c0_77 = arith.constant 0 : index
    %c0_78 = arith.constant 0 : index
    %110 = vector.load %arg12[%c1_76, %c0_77, %c0_78] : memref<4x16x16xf32, #tpu.memory_space<vmem>>, vector<1x16x16xf32>
    %111 = vector.shape_cast %110 : vector<1x16x16xf32> to vector<16x16xf32>
    %112 = vector.extract_strided_slice %106 {offsets = [0, 0], sizes = [16, 16], strides = [1, 1]} : vector<32x16xf32> to vector<16x16xf32>
    %113 = vector.extract_strided_slice %107 {offsets = [0, 0], sizes = [16, 16], strides = [1, 1]} : vector<32x16xf32> to vector<16x16xf32>
    %cst_79 = arith.constant dense<0.000000e+00> : vector<16x16xf32>
    %114 = tpu.matmul %3, %112, %cst_79 {dimension_numbers = #tpu.dot_dimension_numbers<[1], [0], [0], [1], [0, 0, 1, 1], [], []>, precision = #tpu.contract_precision<fp32>} : vector<16x16xf32>, vector<16x16xf32>, vector<16x16xf32> -> vector<16x16xf32>
    %115 = arith.subf %113, %112 : vector<16x16xf32>
    %cst_80 = arith.constant dense<0.000000e+00> : vector<16x16xf32>
    %116 = tpu.matmul %0, %115, %cst_80 {dimension_numbers = #tpu.dot_dimension_numbers<[1], [0], [0], [1], [0, 0, 1, 1], [], []>, precision = #tpu.contract_precision<fp32>} : vector<16x16xf32>, vector<16x16xf32>, vector<16x16xf32> -> vector<16x16xf32>
    %117 = arith.addf %112, %113 : vector<16x16xf32>
    %cst_81 = arith.constant dense<0.000000e+00> : vector<16x16xf32>
    %118 = tpu.matmul %1, %117, %cst_81 {dimension_numbers = #tpu.dot_dimension_numbers<[1], [0], [0], [1], [0, 0, 1, 1], [], []>, precision = #tpu.contract_precision<fp32>} : vector<16x16xf32>, vector<16x16xf32>, vector<16x16xf32> -> vector<16x16xf32>
    %119 = arith.subf %114, %118 : vector<16x16xf32>
    %120 = arith.addf %114, %116 : vector<16x16xf32>
    %121 = arith.mulf %119, %109 : vector<16x16xf32>
    %122 = arith.mulf %120, %111 : vector<16x16xf32>
    %123 = arith.subf %121, %122 : vector<16x16xf32>
    %c0_82 = arith.constant 0 : index
    %c0_83 = arith.constant 0 : index
    %124 = vector.load %arg17[%c0_82, %c0_83] : memref<32x16xf32, #tpu.memory_space<vmem>>, vector<16x16xf32>
    tpu.vector_store %arg17[%c0_82, %c0_83], %123 {strides = array<i32>} : memref<32x16xf32, #tpu.memory_space<vmem>>, vector<16x16xf32>,
    %125 = arith.mulf %119, %111 : vector<16x16xf32>
    %126 = arith.mulf %120, %109 : vector<16x16xf32>
    %127 = arith.addf %125, %126 : vector<16x16xf32>
    %c0_84 = arith.constant 0 : index
    %c0_85 = arith.constant 0 : index
    %128 = vector.load %arg18[%c0_84, %c0_85] : memref<32x16xf32, #tpu.memory_space<vmem>>, vector<16x16xf32>
    tpu.vector_store %arg18[%c0_84, %c0_85], %127 {strides = array<i32>} : memref<32x16xf32, #tpu.memory_space<vmem>>, vector<16x16xf32>,
    %129 = vector.extract_strided_slice %106 {offsets = [16, 0], sizes = [16, 16], strides = [1, 1]} : vector<32x16xf32> to vector<16x16xf32>
    %130 = vector.extract_strided_slice %107 {offsets = [16, 0], sizes = [16, 16], strides = [1, 1]} : vector<32x16xf32> to vector<16x16xf32>
    %cst_86 = arith.constant dense<0.000000e+00> : vector<16x16xf32>
    %131 = tpu.matmul %3, %129, %cst_86 {dimension_numbers = #tpu.dot_dimension_numbers<[1], [0], [0], [1], [0, 0, 1, 1], [], []>, precision = #tpu.contract_precision<fp32>} : vector<16x16xf32>, vector<16x16xf32>, vector<16x16xf32> -> vector<16x16xf32>
    %132 = arith.subf %130, %129 : vector<16x16xf32>
    %cst_87 = arith.constant dense<0.000000e+00> : vector<16x16xf32>
    %133 = tpu.matmul %0, %132, %cst_87 {dimension_numbers = #tpu.dot_dimension_numbers<[1], [0], [0], [1], [0, 0, 1, 1], [], []>, precision = #tpu.contract_precision<fp32>} : vector<16x16xf32>, vector<16x16xf32>, vector<16x16xf32> -> vector<16x16xf32>
    %134 = arith.addf %129, %130 : vector<16x16xf32>
    %cst_88 = arith.constant dense<0.000000e+00> : vector<16x16xf32>
    %135 = tpu.matmul %1, %134, %cst_88 {dimension_numbers = #tpu.dot_dimension_numbers<[1], [0], [0], [1], [0, 0, 1, 1], [], []>, precision = #tpu.contract_precision<fp32>} : vector<16x16xf32>, vector<16x16xf32>, vector<16x16xf32> -> vector<16x16xf32>
    %136 = arith.subf %131, %135 : vector<16x16xf32>
    %137 = arith.addf %131, %133 : vector<16x16xf32>
    %138 = arith.mulf %136, %109 : vector<16x16xf32>
    %139 = arith.mulf %137, %111 : vector<16x16xf32>
    %140 = arith.subf %138, %139 : vector<16x16xf32>
    %c16_89 = arith.constant 16 : index
    %c0_90 = arith.constant 0 : index
    %141 = vector.load %arg17[%c16_89, %c0_90] : memref<32x16xf32, #tpu.memory_space<vmem>>, vector<16x16xf32>
    tpu.vector_store %arg17[%c16_89, %c0_90], %140 {strides = array<i32>} : memref<32x16xf32, #tpu.memory_space<vmem>>, vector<16x16xf32>,
    %142 = arith.mulf %136, %111 : vector<16x16xf32>
    %143 = arith.mulf %137, %109 : vector<16x16xf32>
    %144 = arith.addf %142, %143 : vector<16x16xf32>
    %c16_91 = arith.constant 16 : index
    %c0_92 = arith.constant 0 : index
    %145 = vector.load %arg18[%c16_91, %c0_92] : memref<32x16xf32, #tpu.memory_space<vmem>>, vector<16x16xf32>
    tpu.vector_store %arg18[%c16_91, %c0_92], %144 {strides = array<i32>} : memref<32x16xf32, #tpu.memory_space<vmem>>, vector<16x16xf32>,
    %c0_93 = arith.constant 0 : index
    %c0_94 = arith.constant 0 : index
    %146 = vector.load %arg17[%c0_93, %c0_94] : memref<32x16xf32, #tpu.memory_space<vmem>>, vector<32x16xf32>
    %c0_95 = arith.constant 0 : index
    %c0_96 = arith.constant 0 : index
    %147 = vector.load %arg18[%c0_95, %c0_96] : memref<32x16xf32, #tpu.memory_space<vmem>>, vector<32x16xf32>
    %148 = arith.addf %146, %147 : vector<32x16xf32>
    %cst_97 = arith.constant dense<0.000000e+00> : vector<32x16xf32>
    %149 = tpu.matmul %148, %4, %cst_97 {dimension_numbers = #tpu.dot_dimension_numbers<[1], [1], [0], [0], [0, 0, 1, 0], [], []>, precision = #tpu.contract_precision<fp32>} : vector<32x16xf32>, vector<16x16xf32>, vector<32x16xf32> -> vector<32x16xf32>
    %cst_98 = arith.constant dense<0.000000e+00> : vector<32x16xf32>
    %150 = tpu.matmul %146, %6, %cst_98 {dimension_numbers = #tpu.dot_dimension_numbers<[1], [1], [0], [0], [0, 0, 1, 0], [], []>, precision = #tpu.contract_precision<fp32>} : vector<32x16xf32>, vector<16x16xf32>, vector<32x16xf32> -> vector<32x16xf32>
    %cst_99 = arith.constant dense<0.000000e+00> : vector<32x16xf32>
    %151 = tpu.matmul %147, %7, %cst_99 {dimension_numbers = #tpu.dot_dimension_numbers<[1], [1], [0], [0], [0, 0, 1, 0], [], []>, precision = #tpu.contract_precision<fp32>} : vector<32x16xf32>, vector<16x16xf32>, vector<32x16xf32> -> vector<32x16xf32>
    %152 = arith.subf %149, %151 : vector<32x16xf32>
    %153 = arith.addf %149, %150 : vector<32x16xf32>
    %c1_100 = arith.constant 1 : index
    %c0_101 = arith.constant 0 : index
    %c0_102 = arith.constant 0 : index
    %154 = vector.load %arg13[%c1_100, %c0_101, %c0_102] : memref<3x16x16xf32, #tpu.memory_space<vmem>>, vector<1x16x16xf32>
    %155 = vector.shape_cast %154 : vector<1x16x16xf32> to vector<16x16xf32>
    %c1_103 = arith.constant 1 : index
    %c0_104 = arith.constant 0 : index
    %c0_105 = arith.constant 0 : index
    %156 = vector.load %arg14[%c1_103, %c0_104, %c0_105] : memref<3x16x16xf32, #tpu.memory_space<vmem>>, vector<1x16x16xf32>
    %157 = vector.shape_cast %156 : vector<1x16x16xf32> to vector<16x16xf32>
    %158 = vector.extract_strided_slice %152 {offsets = [0, 0], sizes = [16, 16], strides = [1, 1]} : vector<32x16xf32> to vector<16x16xf32>
    %159 = vector.extract_strided_slice %153 {offsets = [0, 0], sizes = [16, 16], strides = [1, 1]} : vector<32x16xf32> to vector<16x16xf32>
    %cst_106 = arith.constant dense<0.000000e+00> : vector<16x16xf32>
    %160 = tpu.matmul %7, %158, %cst_106 {dimension_numbers = #tpu.dot_dimension_numbers<[1], [0], [0], [1], [0, 0, 1, 1], [], []>, precision = #tpu.contract_precision<fp32>} : vector<16x16xf32>, vector<16x16xf32>, vector<16x16xf32> -> vector<16x16xf32>
    %161 = arith.subf %159, %158 : vector<16x16xf32>
    %cst_107 = arith.constant dense<0.000000e+00> : vector<16x16xf32>
    %162 = tpu.matmul %4, %161, %cst_107 {dimension_numbers = #tpu.dot_dimension_numbers<[1], [0], [0], [1], [0, 0, 1, 1], [], []>, precision = #tpu.contract_precision<fp32>} : vector<16x16xf32>, vector<16x16xf32>, vector<16x16xf32> -> vector<16x16xf32>
    %163 = arith.addf %158, %159 : vector<16x16xf32>
    %cst_108 = arith.constant dense<0.000000e+00> : vector<16x16xf32>
    %164 = tpu.matmul %5, %163, %cst_108 {dimension_numbers = #tpu.dot_dimension_numbers<[1], [0], [0], [1], [0, 0, 1, 1], [], []>, precision = #tpu.contract_precision<fp32>} : vector<16x16xf32>, vector<16x16xf32>, vector<16x16xf32> -> vector<16x16xf32>
    %165 = arith.subf %160, %164 : vector<16x16xf32>
    %166 = arith.addf %160, %162 : vector<16x16xf32>
    %167 = arith.mulf %165, %155 : vector<16x16xf32>
    %168 = arith.mulf %166, %157 : vector<16x16xf32>
    %169 = arith.subf %167, %168 : vector<16x16xf32>
    %c0_109 = arith.constant 0 : index
    %c0_110 = arith.constant 0 : index
    %170 = vector.load %arg17[%c0_109, %c0_110] : memref<32x16xf32, #tpu.memory_space<vmem>>, vector<16x16xf32>
    tpu.vector_store %arg17[%c0_109, %c0_110], %169 {strides = array<i32>} : memref<32x16xf32, #tpu.memory_space<vmem>>, vector<16x16xf32>,
    %171 = arith.mulf %165, %157 : vector<16x16xf32>
    %172 = arith.mulf %166, %155 : vector<16x16xf32>
    %173 = arith.addf %171, %172 : vector<16x16xf32>
    %c0_111 = arith.constant 0 : index
    %c0_112 = arith.constant 0 : index
    %174 = vector.load %arg18[%c0_111, %c0_112] : memref<32x16xf32, #tpu.memory_space<vmem>>, vector<16x16xf32>
    tpu.vector_store %arg18[%c0_111, %c0_112], %173 {strides = array<i32>} : memref<32x16xf32, #tpu.memory_space<vmem>>, vector<16x16xf32>,
    %175 = vector.extract_strided_slice %152 {offsets = [16, 0], sizes = [16, 16], strides = [1, 1]} : vector<32x16xf32> to vector<16x16xf32>
    %176 = vector.extract_strided_slice %153 {offsets = [16, 0], sizes = [16, 16], strides = [1, 1]} : vector<32x16xf32> to vector<16x16xf32>
    %cst_113 = arith.constant dense<0.000000e+00> : vector<16x16xf32>
    %177 = tpu.matmul %7, %175, %cst_113 {dimension_numbers = #tpu.dot_dimension_numbers<[1], [0], [0], [1], [0, 0, 1, 1], [], []>, precision = #tpu.contract_precision<fp32>} : vector<16x16xf32>, vector<16x16xf32>, vector<16x16xf32> -> vector<16x16xf32>
    %178 = arith.subf %176, %175 : vector<16x16xf32>
    %cst_114 = arith.constant dense<0.000000e+00> : vector<16x16xf32>
    %179 = tpu.matmul %4, %178, %cst_114 {dimension_numbers = #tpu.dot_dimension_numbers<[1], [0], [0], [1], [0, 0, 1, 1], [], []>, precision = #tpu.contract_precision<fp32>} : vector<16x16xf32>, vector<16x16xf32>, vector<16x16xf32> -> vector<16x16xf32>
    %180 = arith.addf %175, %176 : vector<16x16xf32>
    %cst_115 = arith.constant dense<0.000000e+00> : vector<16x16xf32>
    %181 = tpu.matmul %5, %180, %cst_115 {dimension_numbers = #tpu.dot_dimension_numbers<[1], [0], [0], [1], [0, 0, 1, 1], [], []>, precision = #tpu.contract_precision<fp32>} : vector<16x16xf32>, vector<16x16xf32>, vector<16x16xf32> -> vector<16x16xf32>
    %182 = arith.subf %177, %181 : vector<16x16xf32>
    %183 = arith.addf %177, %179 : vector<16x16xf32>
    %184 = arith.mulf %182, %155 : vector<16x16xf32>
    %185 = arith.mulf %183, %157 : vector<16x16xf32>
    %186 = arith.subf %184, %185 : vector<16x16xf32>
    %c16_116 = arith.constant 16 : index
    %c0_117 = arith.constant 0 : index
    %187 = vector.load %arg17[%c16_116, %c0_117] : memref<32x16xf32, #tpu.memory_space<vmem>>, vector<16x16xf32>
    tpu.vector_store %arg17[%c16_116, %c0_117], %186 {strides = array<i32>} : memref<32x16xf32, #tpu.memory_space<vmem>>, vector<16x16xf32>,
    %188 = arith.mulf %182, %157 : vector<16x16xf32>
    %189 = arith.mulf %183, %155 : vector<16x16xf32>
    %190 = arith.addf %188, %189 : vector<16x16xf32>
    %c16_118 = arith.constant 16 : index
    %c0_119 = arith.constant 0 : index
    %191 = vector.load %arg18[%c16_118, %c0_119] : memref<32x16xf32, #tpu.memory_space<vmem>>, vector<16x16xf32>
    tpu.vector_store %arg18[%c16_118, %c0_119], %190 {strides = array<i32>} : memref<32x16xf32, #tpu.memory_space<vmem>>, vector<16x16xf32>,
    %c0_120 = arith.constant 0 : index
    %c0_121 = arith.constant 0 : index
    %192 = vector.load %arg17[%c0_120, %c0_121] : memref<32x16xf32, #tpu.memory_space<vmem>>, vector<32x16xf32>
    %c0_122 = arith.constant 0 : index
    %c0_123 = arith.constant 0 : index
    %193 = vector.load %arg18[%c0_122, %c0_123] : memref<32x16xf32, #tpu.memory_space<vmem>>, vector<32x16xf32>
    %194 = arith.addf %192, %193 : vector<32x16xf32>
    %cst_124 = arith.constant dense<0.000000e+00> : vector<32x16xf32>
    %195 = tpu.matmul %194, %0, %cst_124 {dimension_numbers = #tpu.dot_dimension_numbers<[1], [1], [0], [0], [0, 0, 1, 0], [], []>, precision = #tpu.contract_precision<fp32>} : vector<32x16xf32>, vector<16x16xf32>, vector<32x16xf32> -> vector<32x16xf32>
    %cst_125 = arith.constant dense<0.000000e+00> : vector<32x16xf32>
    %196 = tpu.matmul %192, %2, %cst_125 {dimension_numbers = #tpu.dot_dimension_numbers<[1], [1], [0], [0], [0, 0, 1, 0], [], []>, precision = #tpu.contract_precision<fp32>} : vector<32x16xf32>, vector<16x16xf32>, vector<32x16xf32> -> vector<32x16xf32>
    %cst_126 = arith.constant dense<0.000000e+00> : vector<32x16xf32>
    %197 = tpu.matmul %193, %3, %cst_126 {dimension_numbers = #tpu.dot_dimension_numbers<[1], [1], [0], [0], [0, 0, 1, 0], [], []>, precision = #tpu.contract_precision<fp32>} : vector<32x16xf32>, vector<16x16xf32>, vector<32x16xf32> -> vector<32x16xf32>
    %198 = arith.subf %195, %197 : vector<32x16xf32>
    %199 = arith.addf %195, %196 : vector<32x16xf32>
    %c2 = arith.constant 2 : index
    %c0_127 = arith.constant 0 : index
    %c0_128 = arith.constant 0 : index
    %200 = vector.load %arg11[%c2, %c0_127, %c0_128] : memref<4x16x16xf32, #tpu.memory_space<vmem>>, vector<1x16x16xf32>
    %201 = vector.shape_cast %200 : vector<1x16x16xf32> to vector<16x16xf32>
    %c2_129 = arith.constant 2 : index
    %c0_130 = arith.constant 0 : index
    %c0_131 = arith.constant 0 : index
    %202 = vector.load %arg12[%c2_129, %c0_130, %c0_131] : memref<4x16x16xf32, #tpu.memory_space<vmem>>, vector<1x16x16xf32>
    %203 = vector.shape_cast %202 : vector<1x16x16xf32> to vector<16x16xf32>
    %204 = vector.extract_strided_slice %198 {offsets = [0, 0], sizes = [16, 16], strides = [1, 1]} : vector<32x16xf32> to vector<16x16xf32>
    %205 = vector.extract_strided_slice %199 {offsets = [0, 0], sizes = [16, 16], strides = [1, 1]} : vector<32x16xf32> to vector<16x16xf32>
    %cst_132 = arith.constant dense<0.000000e+00> : vector<16x16xf32>
    %206 = tpu.matmul %3, %204, %cst_132 {dimension_numbers = #tpu.dot_dimension_numbers<[1], [0], [0], [1], [0, 0, 1, 1], [], []>, precision = #tpu.contract_precision<fp32>} : vector<16x16xf32>, vector<16x16xf32>, vector<16x16xf32> -> vector<16x16xf32>
    %207 = arith.subf %205, %204 : vector<16x16xf32>
    %cst_133 = arith.constant dense<0.000000e+00> : vector<16x16xf32>
    %208 = tpu.matmul %0, %207, %cst_133 {dimension_numbers = #tpu.dot_dimension_numbers<[1], [0], [0], [1], [0, 0, 1, 1], [], []>, precision = #tpu.contract_precision<fp32>} : vector<16x16xf32>, vector<16x16xf32>, vector<16x16xf32> -> vector<16x16xf32>
    %209 = arith.addf %204, %205 : vector<16x16xf32>
    %cst_134 = arith.constant dense<0.000000e+00> : vector<16x16xf32>
    %210 = tpu.matmul %1, %209, %cst_134 {dimension_numbers = #tpu.dot_dimension_numbers<[1], [0], [0], [1], [0, 0, 1, 1], [], []>, precision = #tpu.contract_precision<fp32>} : vector<16x16xf32>, vector<16x16xf32>, vector<16x16xf32> -> vector<16x16xf32>
    %211 = arith.subf %206, %210 : vector<16x16xf32>
    %212 = arith.addf %206, %208 : vector<16x16xf32>
    %213 = arith.mulf %211, %201 : vector<16x16xf32>
    %214 = arith.mulf %212, %203 : vector<16x16xf32>
    %215 = arith.subf %213, %214 : vector<16x16xf32>
    %c0_135 = arith.constant 0 : index
    %c0_136 = arith.constant 0 : index
    %216 = vector.load %arg17[%c0_135, %c0_136] : memref<32x16xf32, #tpu.memory_space<vmem>>, vector<16x16xf32>
    tpu.vector_store %arg17[%c0_135, %c0_136], %215 {strides = array<i32>} : memref<32x16xf32, #tpu.memory_space<vmem>>, vector<16x16xf32>,
    %217 = arith.mulf %211, %203 : vector<16x16xf32>
    %218 = arith.mulf %212, %201 : vector<16x16xf32>
    %219 = arith.addf %217, %218 : vector<16x16xf32>
    %c0_137 = arith.constant 0 : index
    %c0_138 = arith.constant 0 : index
    %220 = vector.load %arg18[%c0_137, %c0_138] : memref<32x16xf32, #tpu.memory_space<vmem>>, vector<16x16xf32>
    tpu.vector_store %arg18[%c0_137, %c0_138], %219 {strides = array<i32>} : memref<32x16xf32, #tpu.memory_space<vmem>>, vector<16x16xf32>,
    %221 = vector.extract_strided_slice %198 {offsets = [16, 0], sizes = [16, 16], strides = [1, 1]} : vector<32x16xf32> to vector<16x16xf32>
    %222 = vector.extract_strided_slice %199 {offsets = [16, 0], sizes = [16, 16], strides = [1, 1]} : vector<32x16xf32> to vector<16x16xf32>
    %cst_139 = arith.constant dense<0.000000e+00> : vector<16x16xf32>
    %223 = tpu.matmul %3, %221, %cst_139 {dimension_numbers = #tpu.dot_dimension_numbers<[1], [0], [0], [1], [0, 0, 1, 1], [], []>, precision = #tpu.contract_precision<fp32>} : vector<16x16xf32>, vector<16x16xf32>, vector<16x16xf32> -> vector<16x16xf32>
    %224 = arith.subf %222, %221 : vector<16x16xf32>
    %cst_140 = arith.constant dense<0.000000e+00> : vector<16x16xf32>
    %225 = tpu.matmul %0, %224, %cst_140 {dimension_numbers = #tpu.dot_dimension_numbers<[1], [0], [0], [1], [0, 0, 1, 1], [], []>, precision = #tpu.contract_precision<fp32>} : vector<16x16xf32>, vector<16x16xf32>, vector<16x16xf32> -> vector<16x16xf32>
    %226 = arith.addf %221, %222 : vector<16x16xf32>
    %cst_141 = arith.constant dense<0.000000e+00> : vector<16x16xf32>
    %227 = tpu.matmul %1, %226, %cst_141 {dimension_numbers = #tpu.dot_dimension_numbers<[1], [0], [0], [1], [0, 0, 1, 1], [], []>, precision = #tpu.contract_precision<fp32>} : vector<16x16xf32>, vector<16x16xf32>, vector<16x16xf32> -> vector<16x16xf32>
    %228 = arith.subf %223, %227 : vector<16x16xf32>
    %229 = arith.addf %223, %225 : vector<16x16xf32>
    %230 = arith.mulf %228, %201 : vector<16x16xf32>
    %231 = arith.mulf %229, %203 : vector<16x16xf32>
    %232 = arith.subf %230, %231 : vector<16x16xf32>
    %c16_142 = arith.constant 16 : index
    %c0_143 = arith.constant 0 : index
    %233 = vector.load %arg17[%c16_142, %c0_143] : memref<32x16xf32, #tpu.memory_space<vmem>>, vector<16x16xf32>
    tpu.vector_store %arg17[%c16_142, %c0_143], %232 {strides = array<i32>} : memref<32x16xf32, #tpu.memory_space<vmem>>, vector<16x16xf32>,
    %234 = arith.mulf %228, %203 : vector<16x16xf32>
    %235 = arith.mulf %229, %201 : vector<16x16xf32>
    %236 = arith.addf %234, %235 : vector<16x16xf32>
    %c16_144 = arith.constant 16 : index
    %c0_145 = arith.constant 0 : index
    %237 = vector.load %arg18[%c16_144, %c0_145] : memref<32x16xf32, #tpu.memory_space<vmem>>, vector<16x16xf32>
    tpu.vector_store %arg18[%c16_144, %c0_145], %236 {strides = array<i32>} : memref<32x16xf32, #tpu.memory_space<vmem>>, vector<16x16xf32>,
    %c0_146 = arith.constant 0 : index
    %c0_147 = arith.constant 0 : index
    %238 = vector.load %arg17[%c0_146, %c0_147] : memref<32x16xf32, #tpu.memory_space<vmem>>, vector<32x16xf32>
    %c0_148 = arith.constant 0 : index
    %c0_149 = arith.constant 0 : index
    %239 = vector.load %arg18[%c0_148, %c0_149] : memref<32x16xf32, #tpu.memory_space<vmem>>, vector<32x16xf32>
    %240 = arith.addf %238, %239 : vector<32x16xf32>
    %cst_150 = arith.constant dense<0.000000e+00> : vector<32x16xf32>
    %241 = tpu.matmul %240, %4, %cst_150 {dimension_numbers = #tpu.dot_dimension_numbers<[1], [1], [0], [0], [0, 0, 1, 0], [], []>, precision = #tpu.contract_precision<fp32>} : vector<32x16xf32>, vector<16x16xf32>, vector<32x16xf32> -> vector<32x16xf32>
    %cst_151 = arith.constant dense<0.000000e+00> : vector<32x16xf32>
    %242 = tpu.matmul %238, %6, %cst_151 {dimension_numbers = #tpu.dot_dimension_numbers<[1], [1], [0], [0], [0, 0, 1, 0], [], []>, precision = #tpu.contract_precision<fp32>} : vector<32x16xf32>, vector<16x16xf32>, vector<32x16xf32> -> vector<32x16xf32>
    %cst_152 = arith.constant dense<0.000000e+00> : vector<32x16xf32>
    %243 = tpu.matmul %239, %7, %cst_152 {dimension_numbers = #tpu.dot_dimension_numbers<[1], [1], [0], [0], [0, 0, 1, 0], [], []>, precision = #tpu.contract_precision<fp32>} : vector<32x16xf32>, vector<16x16xf32>, vector<32x16xf32> -> vector<32x16xf32>
    %244 = arith.subf %241, %243 : vector<32x16xf32>
    %245 = arith.addf %241, %242 : vector<32x16xf32>
    %c2_153 = arith.constant 2 : index
    %c0_154 = arith.constant 0 : index
    %c0_155 = arith.constant 0 : index
    %246 = vector.load %arg13[%c2_153, %c0_154, %c0_155] : memref<3x16x16xf32, #tpu.memory_space<vmem>>, vector<1x16x16xf32>
    %247 = vector.shape_cast %246 : vector<1x16x16xf32> to vector<16x16xf32>
    %c2_156 = arith.constant 2 : index
    %c0_157 = arith.constant 0 : index
    %c0_158 = arith.constant 0 : index
    %248 = vector.load %arg14[%c2_156, %c0_157, %c0_158] : memref<3x16x16xf32, #tpu.memory_space<vmem>>, vector<1x16x16xf32>
    %249 = vector.shape_cast %248 : vector<1x16x16xf32> to vector<16x16xf32>
    %250 = vector.extract_strided_slice %244 {offsets = [0, 0], sizes = [16, 16], strides = [1, 1]} : vector<32x16xf32> to vector<16x16xf32>
    %251 = vector.extract_strided_slice %245 {offsets = [0, 0], sizes = [16, 16], strides = [1, 1]} : vector<32x16xf32> to vector<16x16xf32>
    %cst_159 = arith.constant dense<0.000000e+00> : vector<16x16xf32>
    %252 = tpu.matmul %7, %250, %cst_159 {dimension_numbers = #tpu.dot_dimension_numbers<[1], [0], [0], [1], [0, 0, 1, 1], [], []>, precision = #tpu.contract_precision<fp32>} : vector<16x16xf32>, vector<16x16xf32>, vector<16x16xf32> -> vector<16x16xf32>
    %253 = arith.subf %251, %250 : vector<16x16xf32>
    %cst_160 = arith.constant dense<0.000000e+00> : vector<16x16xf32>
    %254 = tpu.matmul %4, %253, %cst_160 {dimension_numbers = #tpu.dot_dimension_numbers<[1], [0], [0], [1], [0, 0, 1, 1], [], []>, precision = #tpu.contract_precision<fp32>} : vector<16x16xf32>, vector<16x16xf32>, vector<16x16xf32> -> vector<16x16xf32>
    %255 = arith.addf %250, %251 : vector<16x16xf32>
    %cst_161 = arith.constant dense<0.000000e+00> : vector<16x16xf32>
    %256 = tpu.matmul %5, %255, %cst_161 {dimension_numbers = #tpu.dot_dimension_numbers<[1], [0], [0], [1], [0, 0, 1, 1], [], []>, precision = #tpu.contract_precision<fp32>} : vector<16x16xf32>, vector<16x16xf32>, vector<16x16xf32> -> vector<16x16xf32>
    %257 = arith.subf %252, %256 : vector<16x16xf32>
    %258 = arith.addf %252, %254 : vector<16x16xf32>
    %259 = arith.mulf %257, %247 : vector<16x16xf32>
    %260 = arith.mulf %258, %249 : vector<16x16xf32>
    %261 = arith.subf %259, %260 : vector<16x16xf32>
    %c0_162 = arith.constant 0 : index
    %c0_163 = arith.constant 0 : index
    %262 = vector.load %arg17[%c0_162, %c0_163] : memref<32x16xf32, #tpu.memory_space<vmem>>, vector<16x16xf32>
    tpu.vector_store %arg17[%c0_162, %c0_163], %261 {strides = array<i32>} : memref<32x16xf32, #tpu.memory_space<vmem>>, vector<16x16xf32>,
    %263 = arith.mulf %257, %249 : vector<16x16xf32>
    %264 = arith.mulf %258, %247 : vector<16x16xf32>
    %265 = arith.addf %263, %264 : vector<16x16xf32>
    %c0_164 = arith.constant 0 : index
    %c0_165 = arith.constant 0 : index
    %266 = vector.load %arg18[%c0_164, %c0_165] : memref<32x16xf32, #tpu.memory_space<vmem>>, vector<16x16xf32>
    tpu.vector_store %arg18[%c0_164, %c0_165], %265 {strides = array<i32>} : memref<32x16xf32, #tpu.memory_space<vmem>>, vector<16x16xf32>,
    %267 = vector.extract_strided_slice %244 {offsets = [16, 0], sizes = [16, 16], strides = [1, 1]} : vector<32x16xf32> to vector<16x16xf32>
    %268 = vector.extract_strided_slice %245 {offsets = [16, 0], sizes = [16, 16], strides = [1, 1]} : vector<32x16xf32> to vector<16x16xf32>
    %cst_166 = arith.constant dense<0.000000e+00> : vector<16x16xf32>
    %269 = tpu.matmul %7, %267, %cst_166 {dimension_numbers = #tpu.dot_dimension_numbers<[1], [0], [0], [1], [0, 0, 1, 1], [], []>, precision = #tpu.contract_precision<fp32>} : vector<16x16xf32>, vector<16x16xf32>, vector<16x16xf32> -> vector<16x16xf32>
    %270 = arith.subf %268, %267 : vector<16x16xf32>
    %cst_167 = arith.constant dense<0.000000e+00> : vector<16x16xf32>
    %271 = tpu.matmul %4, %270, %cst_167 {dimension_numbers = #tpu.dot_dimension_numbers<[1], [0], [0], [1], [0, 0, 1, 1], [], []>, precision = #tpu.contract_precision<fp32>} : vector<16x16xf32>, vector<16x16xf32>, vector<16x16xf32> -> vector<16x16xf32>
    %272 = arith.addf %267, %268 : vector<16x16xf32>
    %cst_168 = arith.constant dense<0.000000e+00> : vector<16x16xf32>
    %273 = tpu.matmul %5, %272, %cst_168 {dimension_numbers = #tpu.dot_dimension_numbers<[1], [0], [0], [1], [0, 0, 1, 1], [], []>, precision = #tpu.contract_precision<fp32>} : vector<16x16xf32>, vector<16x16xf32>, vector<16x16xf32> -> vector<16x16xf32>
    %274 = arith.subf %269, %273 : vector<16x16xf32>
    %275 = arith.addf %269, %271 : vector<16x16xf32>
    %276 = arith.mulf %274, %247 : vector<16x16xf32>
    %277 = arith.mulf %275, %249 : vector<16x16xf32>
    %278 = arith.subf %276, %277 : vector<16x16xf32>
    %c16_169 = arith.constant 16 : index
    %c0_170 = arith.constant 0 : index
    %279 = vector.load %arg17[%c16_169, %c0_170] : memref<32x16xf32, #tpu.memory_space<vmem>>, vector<16x16xf32>
    tpu.vector_store %arg17[%c16_169, %c0_170], %278 {strides = array<i32>} : memref<32x16xf32, #tpu.memory_space<vmem>>, vector<16x16xf32>,
    %280 = arith.mulf %274, %249 : vector<16x16xf32>
    %281 = arith.mulf %275, %247 : vector<16x16xf32>
    %282 = arith.addf %280, %281 : vector<16x16xf32>
    %c16_171 = arith.constant 16 : index
    %c0_172 = arith.constant 0 : index
    %283 = vector.load %arg18[%c16_171, %c0_172] : memref<32x16xf32, #tpu.memory_space<vmem>>, vector<16x16xf32>
    tpu.vector_store %arg18[%c16_171, %c0_172], %282 {strides = array<i32>} : memref<32x16xf32, #tpu.memory_space<vmem>>, vector<16x16xf32>,
    %c0_173 = arith.constant 0 : index
    %c0_174 = arith.constant 0 : index
    %284 = vector.load %arg17[%c0_173, %c0_174] : memref<32x16xf32, #tpu.memory_space<vmem>>, vector<32x16xf32>
    %c0_175 = arith.constant 0 : index
    %c0_176 = arith.constant 0 : index
    %285 = vector.load %arg18[%c0_175, %c0_176] : memref<32x16xf32, #tpu.memory_space<vmem>>, vector<32x16xf32>
    %286 = arith.addf %284, %285 : vector<32x16xf32>
    %cst_177 = arith.constant dense<0.000000e+00> : vector<32x16xf32>
    %287 = tpu.matmul %286, %0, %cst_177 {dimension_numbers = #tpu.dot_dimension_numbers<[1], [1], [0], [0], [0, 0, 1, 0], [], []>, precision = #tpu.contract_precision<fp32>} : vector<32x16xf32>, vector<16x16xf32>, vector<32x16xf32> -> vector<32x16xf32>
    %cst_178 = arith.constant dense<0.000000e+00> : vector<32x16xf32>
    %288 = tpu.matmul %284, %2, %cst_178 {dimension_numbers = #tpu.dot_dimension_numbers<[1], [1], [0], [0], [0, 0, 1, 0], [], []>, precision = #tpu.contract_precision<fp32>} : vector<32x16xf32>, vector<16x16xf32>, vector<32x16xf32> -> vector<32x16xf32>
    %cst_179 = arith.constant dense<0.000000e+00> : vector<32x16xf32>
    %289 = tpu.matmul %285, %3, %cst_179 {dimension_numbers = #tpu.dot_dimension_numbers<[1], [1], [0], [0], [0, 0, 1, 0], [], []>, precision = #tpu.contract_precision<fp32>} : vector<32x16xf32>, vector<16x16xf32>, vector<32x16xf32> -> vector<32x16xf32>
    %290 = arith.subf %287, %289 : vector<32x16xf32>
    %291 = arith.addf %287, %288 : vector<32x16xf32>
    %c3 = arith.constant 3 : index
    %c0_180 = arith.constant 0 : index
    %c0_181 = arith.constant 0 : index
    %292 = vector.load %arg11[%c3, %c0_180, %c0_181] : memref<4x16x16xf32, #tpu.memory_space<vmem>>, vector<1x16x16xf32>
    %293 = vector.shape_cast %292 : vector<1x16x16xf32> to vector<16x16xf32>
    %c3_182 = arith.constant 3 : index
    %c0_183 = arith.constant 0 : index
    %c0_184 = arith.constant 0 : index
    %294 = vector.load %arg12[%c3_182, %c0_183, %c0_184] : memref<4x16x16xf32, #tpu.memory_space<vmem>>, vector<1x16x16xf32>
    %295 = vector.shape_cast %294 : vector<1x16x16xf32> to vector<16x16xf32>
    %296 = vector.extract_strided_slice %290 {offsets = [0, 0], sizes = [16, 16], strides = [1, 1]} : vector<32x16xf32> to vector<16x16xf32>
    %297 = vector.extract_strided_slice %291 {offsets = [0, 0], sizes = [16, 16], strides = [1, 1]} : vector<32x16xf32> to vector<16x16xf32>
    %cst_185 = arith.constant dense<0.000000e+00> : vector<16x16xf32>
    %298 = tpu.matmul %3, %296, %cst_185 {dimension_numbers = #tpu.dot_dimension_numbers<[1], [0], [0], [1], [0, 0, 1, 1], [], []>, precision = #tpu.contract_precision<fp32>} : vector<16x16xf32>, vector<16x16xf32>, vector<16x16xf32> -> vector<16x16xf32>
    %299 = arith.subf %297, %296 : vector<16x16xf32>
    %cst_186 = arith.constant dense<0.000000e+00> : vector<16x16xf32>
    %300 = tpu.matmul %0, %299, %cst_186 {dimension_numbers = #tpu.dot_dimension_numbers<[1], [0], [0], [1], [0, 0, 1, 1], [], []>, precision = #tpu.contract_precision<fp32>} : vector<16x16xf32>, vector<16x16xf32>, vector<16x16xf32> -> vector<16x16xf32>
    %301 = arith.addf %296, %297 : vector<16x16xf32>
    %cst_187 = arith.constant dense<0.000000e+00> : vector<16x16xf32>
    %302 = tpu.matmul %1, %301, %cst_187 {dimension_numbers = #tpu.dot_dimension_numbers<[1], [0], [0], [1], [0, 0, 1, 1], [], []>, precision = #tpu.contract_precision<fp32>} : vector<16x16xf32>, vector<16x16xf32>, vector<16x16xf32> -> vector<16x16xf32>
    %303 = arith.subf %298, %302 : vector<16x16xf32>
    %304 = arith.addf %298, %300 : vector<16x16xf32>
    %305 = arith.mulf %303, %293 : vector<16x16xf32>
    %306 = arith.mulf %304, %295 : vector<16x16xf32>
    %307 = arith.subf %305, %306 : vector<16x16xf32>
    %c0_188 = arith.constant 0 : index
    %c0_189 = arith.constant 0 : index
    %308 = vector.load %arg17[%c0_188, %c0_189] : memref<32x16xf32, #tpu.memory_space<vmem>>, vector<16x16xf32>
    tpu.vector_store %arg17[%c0_188, %c0_189], %307 {strides = array<i32>} : memref<32x16xf32, #tpu.memory_space<vmem>>, vector<16x16xf32>,
    %309 = arith.mulf %303, %295 : vector<16x16xf32>
    %310 = arith.mulf %304, %293 : vector<16x16xf32>
    %311 = arith.addf %309, %310 : vector<16x16xf32>
    %c0_190 = arith.constant 0 : index
    %c0_191 = arith.constant 0 : index
    %312 = vector.load %arg18[%c0_190, %c0_191] : memref<32x16xf32, #tpu.memory_space<vmem>>, vector<16x16xf32>
    tpu.vector_store %arg18[%c0_190, %c0_191], %311 {strides = array<i32>} : memref<32x16xf32, #tpu.memory_space<vmem>>, vector<16x16xf32>,
    %313 = vector.extract_strided_slice %290 {offsets = [16, 0], sizes = [16, 16], strides = [1, 1]} : vector<32x16xf32> to vector<16x16xf32>
    %314 = vector.extract_strided_slice %291 {offsets = [16, 0], sizes = [16, 16], strides = [1, 1]} : vector<32x16xf32> to vector<16x16xf32>
    %cst_192 = arith.constant dense<0.000000e+00> : vector<16x16xf32>
    %315 = tpu.matmul %3, %313, %cst_192 {dimension_numbers = #tpu.dot_dimension_numbers<[1], [0], [0], [1], [0, 0, 1, 1], [], []>, precision = #tpu.contract_precision<fp32>} : vector<16x16xf32>, vector<16x16xf32>, vector<16x16xf32> -> vector<16x16xf32>
    %316 = arith.subf %314, %313 : vector<16x16xf32>
    %cst_193 = arith.constant dense<0.000000e+00> : vector<16x16xf32>
    %317 = tpu.matmul %0, %316, %cst_193 {dimension_numbers = #tpu.dot_dimension_numbers<[1], [0], [0], [1], [0, 0, 1, 1], [], []>, precision = #tpu.contract_precision<fp32>} : vector<16x16xf32>, vector<16x16xf32>, vector<16x16xf32> -> vector<16x16xf32>
    %318 = arith.addf %313, %314 : vector<16x16xf32>
    %cst_194 = arith.constant dense<0.000000e+00> : vector<16x16xf32>
    %319 = tpu.matmul %1, %318, %cst_194 {dimension_numbers = #tpu.dot_dimension_numbers<[1], [0], [0], [1], [0, 0, 1, 1], [], []>, precision = #tpu.contract_precision<fp32>} : vector<16x16xf32>, vector<16x16xf32>, vector<16x16xf32> -> vector<16x16xf32>
    %320 = arith.subf %315, %319 : vector<16x16xf32>
    %321 = arith.addf %315, %317 : vector<16x16xf32>
    %322 = arith.mulf %320, %293 : vector<16x16xf32>
    %323 = arith.mulf %321, %295 : vector<16x16xf32>
    %324 = arith.subf %322, %323 : vector<16x16xf32>
    %c16_195 = arith.constant 16 : index
    %c0_196 = arith.constant 0 : index
    %325 = vector.load %arg17[%c16_195, %c0_196] : memref<32x16xf32, #tpu.memory_space<vmem>>, vector<16x16xf32>
    tpu.vector_store %arg17[%c16_195, %c0_196], %324 {strides = array<i32>} : memref<32x16xf32, #tpu.memory_space<vmem>>, vector<16x16xf32>,
    %326 = arith.mulf %320, %295 : vector<16x16xf32>
    %327 = arith.mulf %321, %293 : vector<16x16xf32>
    %328 = arith.addf %326, %327 : vector<16x16xf32>
    %c16_197 = arith.constant 16 : index
    %c0_198 = arith.constant 0 : index
    %329 = vector.load %arg18[%c16_197, %c0_198] : memref<32x16xf32, #tpu.memory_space<vmem>>, vector<16x16xf32>
    tpu.vector_store %arg18[%c16_197, %c0_198], %328 {strides = array<i32>} : memref<32x16xf32, #tpu.memory_space<vmem>>, vector<16x16xf32>,
    %c0_199 = arith.constant 0 : index
    %c0_200 = arith.constant 0 : index
    %330 = vector.load %arg17[%c0_199, %c0_200] : memref<32x16xf32, #tpu.memory_space<vmem>>, vector<32x16xf32>
    %c0_201 = arith.constant 0 : index
    %c0_202 = arith.constant 0 : index
    %331 = vector.load %arg18[%c0_201, %c0_202] : memref<32x16xf32, #tpu.memory_space<vmem>>, vector<32x16xf32>
    %332 = arith.addf %330, %331 : vector<32x16xf32>
    %cst_203 = arith.constant dense<0.000000e+00> : vector<32x16xf32>
    %333 = tpu.matmul %332, %4, %cst_203 {dimension_numbers = #tpu.dot_dimension_numbers<[1], [1], [0], [0], [0, 0, 1, 0], [], []>, precision = #tpu.contract_precision<fp32>} : vector<32x16xf32>, vector<16x16xf32>, vector<32x16xf32> -> vector<32x16xf32>
    %cst_204 = arith.constant dense<0.000000e+00> : vector<32x16xf32>
    %334 = tpu.matmul %330, %6, %cst_204 {dimension_numbers = #tpu.dot_dimension_numbers<[1], [1], [0], [0], [0, 0, 1, 0], [], []>, precision = #tpu.contract_precision<fp32>} : vector<32x16xf32>, vector<16x16xf32>, vector<32x16xf32> -> vector<32x16xf32>
    %cst_205 = arith.constant dense<0.000000e+00> : vector<32x16xf32>
    %335 = tpu.matmul %331, %7, %cst_205 {dimension_numbers = #tpu.dot_dimension_numbers<[1], [1], [0], [0], [0, 0, 1, 0], [], []>, precision = #tpu.contract_precision<fp32>} : vector<32x16xf32>, vector<16x16xf32>, vector<32x16xf32> -> vector<32x16xf32>
    %336 = arith.subf %333, %335 : vector<32x16xf32>
    %337 = arith.addf %333, %334 : vector<32x16xf32>
    %338 = vector.extract_strided_slice %336 {offsets = [0, 0], sizes = [16, 16], strides = [1, 1]} : vector<32x16xf32> to vector<16x16xf32>
    %339 = vector.extract_strided_slice %337 {offsets = [0, 0], sizes = [16, 16], strides = [1, 1]} : vector<32x16xf32> to vector<16x16xf32>
    %cst_206 = arith.constant dense<0.000000e+00> : vector<16x16xf32>
    %340 = tpu.matmul %7, %338, %cst_206 {dimension_numbers = #tpu.dot_dimension_numbers<[1], [0], [0], [1], [0, 0, 1, 1], [], []>, precision = #tpu.contract_precision<fp32>} : vector<16x16xf32>, vector<16x16xf32>, vector<16x16xf32> -> vector<16x16xf32>
    %341 = arith.subf %339, %338 : vector<16x16xf32>
    %cst_207 = arith.constant dense<0.000000e+00> : vector<16x16xf32>
    %342 = tpu.matmul %4, %341, %cst_207 {dimension_numbers = #tpu.dot_dimension_numbers<[1], [0], [0], [1], [0, 0, 1, 1], [], []>, precision = #tpu.contract_precision<fp32>} : vector<16x16xf32>, vector<16x16xf32>, vector<16x16xf32> -> vector<16x16xf32>
    %343 = arith.addf %338, %339 : vector<16x16xf32>
    %cst_208 = arith.constant dense<0.000000e+00> : vector<16x16xf32>
    %344 = tpu.matmul %5, %343, %cst_208 {dimension_numbers = #tpu.dot_dimension_numbers<[1], [0], [0], [1], [0, 0, 1, 1], [], []>, precision = #tpu.contract_precision<fp32>} : vector<16x16xf32>, vector<16x16xf32>, vector<16x16xf32> -> vector<16x16xf32>
    %345 = arith.subf %340, %344 : vector<16x16xf32>
    %346 = arith.addf %340, %342 : vector<16x16xf32>
    %c0_209 = arith.constant 0 : index
    %c0_210 = arith.constant 0 : index
    %347 = vector.load %arg15[%c0_209, %c0_210] : memref<32x16xf32, #tpu.memory_space<vmem>>, vector<16x16xf32>
    tpu.vector_store %arg15[%c0_209, %c0_210], %345 {strides = array<i32>} : memref<32x16xf32, #tpu.memory_space<vmem>>, vector<16x16xf32>,
    %c0_211 = arith.constant 0 : index
    %c0_212 = arith.constant 0 : index
    %348 = vector.load %arg16[%c0_211, %c0_212] : memref<32x16xf32, #tpu.memory_space<vmem>>, vector<16x16xf32>
    tpu.vector_store %arg16[%c0_211, %c0_212], %346 {strides = array<i32>} : memref<32x16xf32, #tpu.memory_space<vmem>>, vector<16x16xf32>,
    %349 = vector.extract_strided_slice %336 {offsets = [16, 0], sizes = [16, 16], strides = [1, 1]} : vector<32x16xf32> to vector<16x16xf32>
    %350 = vector.extract_strided_slice %337 {offsets = [16, 0], sizes = [16, 16], strides = [1, 1]} : vector<32x16xf32> to vector<16x16xf32>
    %cst_213 = arith.constant dense<0.000000e+00> : vector<16x16xf32>
    %351 = tpu.matmul %7, %349, %cst_213 {dimension_numbers = #tpu.dot_dimension_numbers<[1], [0], [0], [1], [0, 0, 1, 1], [], []>, precision = #tpu.contract_precision<fp32>} : vector<16x16xf32>, vector<16x16xf32>, vector<16x16xf32> -> vector<16x16xf32>
    %352 = arith.subf %350, %349 : vector<16x16xf32>
    %cst_214 = arith.constant dense<0.000000e+00> : vector<16x16xf32>
    %353 = tpu.matmul %4, %352, %cst_214 {dimension_numbers = #tpu.dot_dimension_numbers<[1], [0], [0], [1], [0, 0, 1, 1], [], []>, precision = #tpu.contract_precision<fp32>} : vector<16x16xf32>, vector<16x16xf32>, vector<16x16xf32> -> vector<16x16xf32>
    %354 = arith.addf %349, %350 : vector<16x16xf32>
    %cst_215 = arith.constant dense<0.000000e+00> : vector<16x16xf32>
    %355 = tpu.matmul %5, %354, %cst_215 {dimension_numbers = #tpu.dot_dimension_numbers<[1], [0], [0], [1], [0, 0, 1, 1], [], []>, precision = #tpu.contract_precision<fp32>} : vector<16x16xf32>, vector<16x16xf32>, vector<16x16xf32> -> vector<16x16xf32>
    %356 = arith.subf %351, %355 : vector<16x16xf32>
    %357 = arith.addf %351, %353 : vector<16x16xf32>
    %c16_216 = arith.constant 16 : index
    %c0_217 = arith.constant 0 : index
    %358 = vector.load %arg15[%c16_216, %c0_217] : memref<32x16xf32, #tpu.memory_space<vmem>>, vector<16x16xf32>
    tpu.vector_store %arg15[%c16_216, %c0_217], %356 {strides = array<i32>} : memref<32x16xf32, #tpu.memory_space<vmem>>, vector<16x16xf32>,
    %c16_218 = arith.constant 16 : index
    %c0_219 = arith.constant 0 : index
    %359 = vector.load %arg16[%c16_218, %c0_219] : memref<32x16xf32, #tpu.memory_space<vmem>>, vector<16x16xf32>
    tpu.vector_store %arg16[%c16_218, %c0_219], %357 {strides = array<i32>} : memref<32x16xf32, #tpu.memory_space<vmem>>, vector<16x16xf32>,
    return
  }
  func.func @transform_0(%arg0: i32) -> (i32, i32) {
    %c0_i32 = arith.constant 0 : i32
    %c0_i32_0 = arith.constant 0 : i32
    return %arg0, %c0_i32 : i32, i32
  }
  func.func @transform_1(%arg0: i32) -> (i32, i32) {
    %c0_i32 = arith.constant 0 : i32
    %c0_i32_0 = arith.constant 0 : i32
    return %arg0, %c0_i32 : i32, i32
  }
  func.func @transform_2(%arg0: i32) -> (i32, i32) {
    %c0_i32 = arith.constant 0 : i32
    %c0_i32_0 = arith.constant 0 : i32
    %c0_i32_1 = arith.constant 0 : i32
    return %c0_i32, %c0_i32_0 : i32, i32
  }
  func.func @transform_3(%arg0: i32) -> (i32, i32) {
    %c0_i32 = arith.constant 0 : i32
    %c0_i32_0 = arith.constant 0 : i32
    %c0_i32_1 = arith.constant 0 : i32
    return %c0_i32, %c0_i32_0 : i32, i32
  }
  func.func @transform_4(%arg0: i32) -> (i32, i32) {
    %c0_i32 = arith.constant 0 : i32
    %c0_i32_0 = arith.constant 0 : i32
    %c0_i32_1 = arith.constant 0 : i32
    return %c0_i32, %c0_i32_0 : i32, i32
  }
  func.func @transform_5(%arg0: i32) -> (i32, i32) {
    %c0_i32 = arith.constant 0 : i32
    %c0_i32_0 = arith.constant 0 : i32
    %c0_i32_1 = arith.constant 0 : i32
    return %c0_i32, %c0_i32_0 : i32, i32
  }
  func.func @transform_6(%arg0: i32) -> (i32, i32) {
    %c0_i32 = arith.constant 0 : i32
    %c0_i32_0 = arith.constant 0 : i32
    %c0_i32_1 = arith.constant 0 : i32
    return %c0_i32, %c0_i32_0 : i32, i32
  }
  func.func @transform_7(%arg0: i32) -> (i32, i32) {
    %c0_i32 = arith.constant 0 : i32
    %c0_i32_0 = arith.constant 0 : i32
    %c0_i32_1 = arith.constant 0 : i32
    return %c0_i32, %c0_i32_0 : i32, i32
  }
  func.func @transform_8(%arg0: i32) -> (i32, i32) {
    %c0_i32 = arith.constant 0 : i32
    %c0_i32_0 = arith.constant 0 : i32
    %c0_i32_1 = arith.constant 0 : i32
    return %c0_i32, %c0_i32_0 : i32, i32
  }
  func.func @transform_9(%arg0: i32) -> (i32, i32) {
    %c0_i32 = arith.constant 0 : i32
    %c0_i32_0 = arith.constant 0 : i32
    %c0_i32_1 = arith.constant 0 : i32
    return %c0_i32, %c0_i32_0 : i32, i32
  }
  func.func @transform_10(%arg0: i32) -> (i32, i32, i32) {
    %c0_i32 = arith.constant 0 : i32
    %c0_i32_0 = arith.constant 0 : i32
    %c0_i32_1 = arith.constant 0 : i32
    %c0_i32_2 = arith.constant 0 : i32
    return %c0_i32, %c0_i32_0, %c0_i32_1 : i32, i32, i32
  }
  func.func @transform_11(%arg0: i32) -> (i32, i32, i32) {
    %c0_i32 = arith.constant 0 : i32
    %c0_i32_0 = arith.constant 0 : i32
    %c0_i32_1 = arith.constant 0 : i32
    %c0_i32_2 = arith.constant 0 : i32
    return %c0_i32, %c0_i32_0, %c0_i32_1 : i32, i32, i32
  }
  func.func @transform_12(%arg0: i32) -> (i32, i32, i32) {
    %c0_i32 = arith.constant 0 : i32
    %c0_i32_0 = arith.constant 0 : i32
    %c0_i32_1 = arith.constant 0 : i32
    %c0_i32_2 = arith.constant 0 : i32
    return %c0_i32, %c0_i32_0, %c0_i32_1 : i32, i32, i32
  }
  func.func @transform_13(%arg0: i32) -> (i32, i32, i32) {
    %c0_i32 = arith.constant 0 : i32
    %c0_i32_0 = arith.constant 0 : i32
    %c0_i32_1 = arith.constant 0 : i32
    %c0_i32_2 = arith.constant 0 : i32
    return %c0_i32, %c0_i32_0, %c0_i32_1 : i32, i32, i32
  }
  func.func @transform_14(%arg0: i32) -> (i32, i32) {
    %c0_i32 = arith.constant 0 : i32
    %c0_i32_0 = arith.constant 0 : i32
    return %arg0, %c0_i32 : i32, i32
  }
  func.func @transform_15(%arg0: i32) -> (i32, i32) {
    %c0_i32 = arith.constant 0 : i32
    %c0_i32_0 = arith.constant 0 : i32
    return %arg0, %c0_i32 : i32, i32
  }
}

</mosaic_0001>

<bundles_post_ra>
// kernel: tpu_custom_call.1
= control target key start
LH: loop header
LB: loop body
LE: loop exit
PB: predicated region body
PF: predicated region fallthrough
CT: control target
= control target key end

     0   :  { %21 = vsyncpa [#allocation5], 0  ;;  %s51408_s0 = inlined_call_operand.vmem [shape: f32[32,16], index: 0, kind: input, shape index: {}]   ;;  %s51409_s1 = inlined_call_operand.vmem [shape: f32[32,16], index: 1, kind: input, shape index: {}]   ;;  %s51410_s2 = inlined_call_operand.hbm [shape: f32[16,16], index: 2, kind: input, shape index: {}]   ;;  %s51411_s3 = inlined_call_operand.hbm [shape: f32[16,16], index: 3, kind: input, shape index: {}]   ;;  %s51412_s4 = inlined_call_operand.hbm [shape: f32[16,16], index: 4, kind: input, shape index: {}]   ;;  %s51413_s5 = inlined_call_operand.hbm [shape: f32[16,16], index: 5, kind: input, shape index: {}]   ;;  %s51414_s6 = inlined_call_operand.hbm [shape: f32[16,16], index: 6, kind: input, shape index: {}]   ;;  %s51415_s7 = inlined_call_operand.hbm [shape: f32[16,16], index: 7, kind: input, shape index: {}]   ;;  %s51416_s8 = inlined_call_operand.hbm [shape: f32[16,16], index: 8, kind: input, shape index: {}]   ;;  %s51417_s9 = inlined_call_operand.hbm [shape: f32[16,16], index: 9, kind: input, shape index: {}]   ;;  %s51418_s10 = inlined_call_operand.vmem [shape: f32[4,16,16], index: 10, kind: input, shape index: {}]   ;;  %s51419_s11 = inlined_call_operand.vmem [shape: f32[4,16,16], index: 11, kind: input, shape index: {}]   ;;  %s51420_s12 = inlined_call_operand.hbm [shape: f32[3,16,16], index: 12, kind: input, shape index: {}]   ;;  %s51421_s13 = inlined_call_operand.hbm [shape: f32[3,16,16], index: 13, kind: input, shape index: {}]   ;;  %s51422_s14 = inlined_call_operand.vmem [shape: f32[32,16], index: 14, kind: output, shape index: {0}]   ;;  %s51423_s15 = inlined_call_operand.vmem [shape: f32[32,16], index: 15, kind: output, shape index: {1}]  }
   0x1   :  { %22 = vsyncpa [#allocation7], 0 }
   0x2   :  { %23 = vsyncpa [#allocation10], 0 }
   0x3   :  { %24 = vsyncpa [#allocation13], 0 }
   0x4   :  { %25 = vsyncpa [#allocation16], 0 }
   0x5   :  { %26 = vsyncpa [#allocation19], 0  ;;  %s47734_s18 = smov [#allocation6]   ;;  %s47735_s20 = smov [#allocation9]  }
   0x6   :  { %s48_s19 = sshll.u32 %s47734_s18, 4  ;;  %s72_s21 = sshll.u32 %s47735_s20, 4  ;;  %s49_s19 = int_to_ptr.vmem [resolvable:$true] %s48_s19  ;;  %s47826_s21 = int_to_ptr.vmem [resolvable:$true] %s72_s21 }
   0x7   :  { %s47502_s24 = scalar_lea.hbm %s51411_s3, 256 }
   0x8   :  { %p47503_p0 = scmp.ne.s32.totalorder %s51411_s3, %s47502_s24  ;;  %p47506_p1 = scmp.lt.u32.totalorder %s47502_s24, %s51411_s3 }
   0xa   :  { %p47508_p2 = pnand %p47506_p1, %p47503_p0 }
   0xc   :  { %47511 = shalt.err (!%p47508_p2)
}
   0xd   :  { %s47512_s29 = scalar_lea.vmem %s49_s19, 256  ;;  %p47517_p4 = scmp.lt.s32.totalorder %s49_s19, %s49_s19 }
   0xe   :  { %p47513_p3 = scmp.ne.s32.totalorder %s49_s19, %s47512_s29  ;;  %p47518_p5 = scmp.lt.s32.totalorder %s47512_s29, %s47512_s29 }
  0x10   :  { %p47519_p6 = por %p47518_p5, %p47517_p4 }
  0x12   :  { %p47520_p7 = pnand %p47519_p6, %p47513_p3 }
  0x14   :  { %47523 = shalt.err (!%p47520_p7)
}
  0x15   :  { %s47736_s30 = smov 128   ;;  %s47737_s16 = smov 8  }
  0x16   :  { %54 = dma.hbm_to_vmem [thread:$0]  %s51411_s3, 256, %s49_s19, [#allocation7], %s47736_s30, %s47736_s30, %s47737_s16  }
  0x17   :  { %s47524_s23 = scalar_lea.hbm %s51413_s5, 256 }
  0x18   :  { %p47525_p8 = scmp.ne.s32.totalorder %s51413_s5, %s47524_s23  ;;  %p47528_p9 = scmp.lt.u32.totalorder %s47524_s23, %s51413_s5 }
  0x1a   :  { %p47530_p10 = pnand %p47528_p9, %p47525_p8 }
  0x1c   :  { %47533 = shalt.err (!%p47530_p10)
}
  0x1d   :  { %s47534_s28 = scalar_lea.vmem %s47826_s21, 256  ;;  %p47539_p12 = scmp.lt.s32.totalorder %s47826_s21, %s47826_s21 }
  0x1e   :  { %p47535_p11 = scmp.ne.s32.totalorder %s47826_s21, %s47534_s28  ;;  %p47540_p13 = scmp.lt.s32.totalorder %s47534_s28, %s47534_s28 }
  0x20   :  { %p47541_p0 = por %p47540_p13, %p47539_p12 }
  0x22   :  { %p47542_p1 = pnand %p47541_p0, %p47535_p11 }
  0x24   :  { %47545 = shalt.err (!%p47542_p1)
}
  0x25   :  { %78 = dma.hbm_to_vmem [thread:$0]  %s51413_s5, 256, %s47826_s21, [#allocation10], %s47736_s30, %s47736_s30, %s47737_s16  }
  0x26   :  { %s47738_s29 = smov [#allocation12]   ;;  %s47739_s18 = smov [#allocation15]  }
  0x27   :  { %s96_s17 = sshll.u32 %s47738_s29, 4  ;;  %s120_s20 = sshll.u32 %s47739_s18, 4  ;;  %s97_s17 = int_to_ptr.vmem [resolvable:$true] %s96_s17  ;;  %s47863_s20 = int_to_ptr.vmem [resolvable:$true] %s120_s20 }
  0x28   :  { %s47546_s24 = scalar_lea.hbm %s51415_s7, 256 }
  0x29   :  { %p47547_p2 = scmp.ne.s32.totalorder %s51415_s7, %s47546_s24  ;;  %p47550_p3 = scmp.lt.u32.totalorder %s47546_s24, %s51415_s7 }
  0x2b   :  { %p47552_p4 = pnand %p47550_p3, %p47547_p2 }
  0x2d   :  { %47555 = shalt.err (!%p47552_p4)
}
  0x2e   :  { %s47556_s5 = scalar_lea.vmem %s97_s17, 256  ;;  %p47561_p6 = scmp.lt.s32.totalorder %s97_s17, %s97_s17 }
  0x2f   :  { %p47557_p5 = scmp.ne.s32.totalorder %s97_s17, %s47556_s5  ;;  %p47562_p7 = scmp.lt.s32.totalorder %s47556_s5, %s47556_s5 }
  0x31   :  { %p47563_p8 = por %p47562_p7, %p47561_p6 }
  0x33   :  { %p47564_p9 = pnand %p47563_p8, %p47557_p5 }
  0x35   :  { %47567 = shalt.err (!%p47564_p9)
}
  0x36   :  { %102 = dma.hbm_to_vmem [thread:$0]  %s51415_s7, 256, %s97_s17, [#allocation13], %s47736_s30, %s47736_s30, %s47737_s16  }
  0x37   :  { %s47568_s18 = scalar_lea.hbm %s51417_s9, 256 }
  0x38   :  { %p47569_p10 = scmp.ne.s32.totalorder %s51417_s9, %s47568_s18  ;;  %p47572_p11 = scmp.lt.u32.totalorder %s47568_s18, %s51417_s9 }
  0x3a   :  { %p47574_p12 = pnand %p47572_p11, %p47569_p10 }
  0x3c   :  { %47577 = shalt.err (!%p47574_p12)
}
  0x3d   :  { %s47578_s26 = scalar_lea.vmem %s47863_s20, 256  ;;  %p47583_p0 = scmp.lt.s32.totalorder %s47863_s20, %s47863_s20 }
  0x3e   :  { %p47579_p13 = scmp.ne.s32.totalorder %s47863_s20, %s47578_s26  ;;  %p47584_p1 = scmp.lt.s32.totalorder %s47578_s26, %s47578_s26 }
  0x40   :  { %p47585_p2 = por %p47584_p1, %p47583_p0 }
  0x42   :  { %p47586_p3 = pnand %p47585_p2, %p47579_p13 }
  0x44   :  { %47589 = shalt.err (!%p47586_p3)
}
  0x45   :  { %126 = dma.hbm_to_vmem [thread:$0]  %s51417_s9, 256, %s47863_s20, [#allocation16], %s47736_s30, %s47736_s30, %s47737_s16  }
  0x46   :  { %s47740_s27 = smov [#allocation4]   ;;  %s47741_s5 = smov [#allocation8]  }
  0x47   :  { %s36_s28 = sshll.u32 %s47740_s27, 4  ;;  %s60_s21 = sshll.u32 %s47741_s5, 4  ;;  %s37_s28 = int_to_ptr.vmem [resolvable:$true] %s36_s28  ;;  %s47900_s21 = int_to_ptr.vmem [resolvable:$true] %s60_s21 }
  0x48   :  { %s47590_s29 = scalar_lea.hbm %s51410_s2, 256 }
  0x49   :  { %p47591_p4 = scmp.ne.s32.totalorder %s51410_s2, %s47590_s29  ;;  %p47594_p5 = scmp.lt.u32.totalorder %s47590_s29, %s51410_s2 }
  0x4b   :  { %p47596_p6 = pnand %p47594_p5, %p47591_p4 }
  0x4d   :  { %47599 = shalt.err (!%p47596_p6)
}
  0x4e   :  { %s47600_s9 = scalar_lea.vmem %s37_s28, 256  ;;  %p47605_p8 = scmp.lt.s32.totalorder %s37_s28, %s37_s28 }
  0x4f   :  { %p47601_p7 = scmp.ne.s32.totalorder %s37_s28, %s47600_s9  ;;  %p47606_p9 = scmp.lt.s32.totalorder %s47600_s9, %s47600_s9 }
  0x51   :  { %p47607_p10 = por %p47606_p9, %p47605_p8 }
  0x53   :  { %p47608_p11 = pnand %p47607_p10, %p47601_p7 }
  0x55   :  { %47611 = shalt.err (!%p47608_p11)
}
  0x56   :  { %42 = dma.hbm_to_vmem [thread:$0]  %s51410_s2, 256, %s37_s28, [#allocation5], %s47736_s30, %s47736_s30, %s47737_s16  }
  0x57   :  { %s47612_s17 = scalar_lea.hbm %s51412_s4, 256 }
  0x58   :  { %p47613_p12 = scmp.ne.s32.totalorder %s51412_s4, %s47612_s17  ;;  %p47616_p13 = scmp.lt.u32.totalorder %s47612_s17, %s51412_s4 }
  0x5a   :  { %p47618_p0 = pnand %p47616_p13, %p47613_p12 }
  0x5c   :  { %47621 = shalt.err (!%p47618_p0)
}
  0x5d   :  { %s47622_s29 = scalar_lea.vmem %s47900_s21, 256  ;;  %p47627_p2 = scmp.lt.s32.totalorder %s47900_s21, %s47900_s21 }
  0x5e   :  { %p47623_p1 = scmp.ne.s32.totalorder %s47900_s21, %s47622_s29  ;;  %p47628_p3 = scmp.lt.s32.totalorder %s47622_s29, %s47622_s29 }
  0x60   :  { %p47629_p4 = por %p47628_p3, %p47627_p2 }
  0x62   :  { %p47630_p5 = pnand %p47629_p4, %p47623_p1 }
  0x64   :  { %47633 = shalt.err (!%p47630_p5)
}
  0x65   :  { %66 = dma.hbm_to_vmem [thread:$0]  %s51412_s4, 256, %s47900_s21, [#allocation7], %s47736_s30, %s47736_s30, %s47737_s16  }
  0x66   :  { %s47742_s18 = smov [#allocation11]   ;;  %s47743_s23 = smov [#allocation14]  }
  0x67   :  { %s84_s22 = sshll.u32 %s47742_s18, 4  ;;  %s108_s24 = sshll.u32 %s47743_s23, 4  ;;  %s85_s22 = int_to_ptr.vmem [resolvable:$true] %s84_s22  ;;  %s47937_s24 = int_to_ptr.vmem [resolvable:$true] %s108_s24 }
  0x68   :  { %s47634_s25 = scalar_lea.hbm %s51414_s6, 256 }
  0x69   :  { %p47635_p6 = scmp.ne.s32.totalorder %s51414_s6, %s47634_s25  ;;  %p47638_p7 = scmp.lt.u32.totalorder %s47634_s25, %s51414_s6 }
  0x6b   :  { %p47640_p8 = pnand %p47638_p7, %p47635_p6 }
  0x6d   :  { %47643 = shalt.err (!%p47640_p8)
}
  0x6e   :  { %s47644_s4 = scalar_lea.vmem %s85_s22, 256  ;;  %p47649_p10 = scmp.lt.s32.totalorder %s85_s22, %s85_s22 }
  0x6f   :  { %p47645_p9 = scmp.ne.s32.totalorder %s85_s22, %s47644_s4  ;;  %p47650_p11 = scmp.lt.s32.totalorder %s47644_s4, %s47644_s4 }
  0x71   :  { %p47651_p12 = por %p47650_p11, %p47649_p10 }
  0x73   :  { %p47652_p13 = pnand %p47651_p12, %p47645_p9 }
  0x75   :  { %47655 = shalt.err (!%p47652_p13)
}
  0x76   :  { %90 = dma.hbm_to_vmem [thread:$0]  %s51414_s6, 256, %s85_s22, [#allocation10], %s47736_s30, %s47736_s30, %s47737_s16  }
  0x77   :  { %s47656_s29 = scalar_lea.hbm %s51416_s8, 256 }
  0x78   :  { %p47657_p0 = scmp.ne.s32.totalorder %s51416_s8, %s47656_s29  ;;  %p47660_p1 = scmp.lt.u32.totalorder %s47656_s29, %s51416_s8 }
  0x7a   :  { %p47662_p2 = pnand %p47660_p1, %p47657_p0 }
  0x7c   :  { %47665 = shalt.err (!%p47662_p2)
}
  0x7d   :  { %s47666_s9 = scalar_lea.vmem %s47937_s24, 256  ;;  %p47671_p4 = scmp.lt.s32.totalorder %s47937_s24, %s47937_s24 }
  0x7e   :  { %p47667_p3 = scmp.ne.s32.totalorder %s47937_s24, %s47666_s9  ;;  %p47672_p5 = scmp.lt.s32.totalorder %s47666_s9, %s47666_s9 }
  0x80   :  { %p47673_p6 = por %p47672_p5, %p47671_p4 }
  0x82   :  { %p47674_p7 = pnand %p47673_p6, %p47667_p3 }
  0x84   :  { %47677 = shalt.err (!%p47674_p7)
}
  0x85   :  { %114 = dma.hbm_to_vmem [thread:$0]  %s51416_s8, 256, %s47937_s24, [#allocation13], %s47736_s30, %s47736_s30, %s47737_s16  }
  0x86   :  { %s47744_s20 = smov [#allocation17]   ;;  %s47745_s26 = smov [#allocation18]  }
  0x87   :  { %s136_s25 = sshll.u32 %s47744_s20, 4  ;;  %s148_s7 = sshll.u32 %s47745_s26, 4  ;;  %s137_s25 = int_to_ptr.vmem [resolvable:$true] %s136_s25  ;;  %s47974_s7 = int_to_ptr.vmem [resolvable:$true] %s148_s7 }
  0x88   :  { %s47678_s4 = scalar_lea.hbm %s51420_s12, 768 }
  0x89   :  { %p47679_p8 = scmp.ne.s32.totalorder %s51420_s12, %s47678_s4  ;;  %p47682_p9 = scmp.lt.u32.totalorder %s47678_s4, %s51420_s12 }
  0x8b   :  { %p47684_p10 = pnand %p47682_p9, %p47679_p8 }
  0x8d   :  { %47687 = shalt.err (!%p47684_p10)
}
  0x8e   :  { %s47688_s8 = scalar_lea.vmem %s137_s25, 768  ;;  %p47693_p12 = scmp.lt.s32.totalorder %s137_s25, %s137_s25 }
  0x8f   :  { %p47689_p11 = scmp.ne.s32.totalorder %s137_s25, %s47688_s8  ;;  %p47694_p13 = scmp.lt.s32.totalorder %s47688_s8, %s47688_s8 }
  0x91   :  { %p47695_p0 = por %p47694_p13, %p47693_p12 }
  0x93   :  { %p47696_p1 = pnand %p47695_p0, %p47689_p11 }
  0x95   :  { %47699 = shalt.err (!%p47696_p1)
}
  0x96   :  { %142 = dma.hbm_to_vmem [thread:$0]  %s51420_s12, 768, %s137_s25, [#allocation16], %s47736_s30, %s47736_s30, %s47737_s16  }
  0x97   :  { %s47700_s18 = scalar_lea.hbm %s51421_s13, 768 }
  0x98   :  { %p47701_p2 = scmp.ne.s32.totalorder %s51421_s13, %s47700_s18  ;;  %p47704_p3 = scmp.lt.u32.totalorder %s47700_s18, %s51421_s13 }
  0x9a   :  { %p47706_p4 = pnand %p47704_p3, %p47701_p2 }
  0x9c   :  { %47709 = shalt.err (!%p47706_p4)
}
  0x9d   :  { %s47710_s20 = scalar_lea.vmem %s47974_s7, 768  ;;  %p47715_p6 = scmp.lt.s32.totalorder %s47974_s7, %s47974_s7 }
  0x9e   :  { %p47711_p5 = scmp.ne.s32.totalorder %s47974_s7, %s47710_s20  ;;  %p47716_p7 = scmp.lt.s32.totalorder %s47710_s20, %s47710_s20 }
  0xa0   :  { %p47717_p8 = por %p47716_p7, %p47715_p6 }
  0xa2   :  { %p47718_p9 = pnand %p47717_p8, %p47711_p5 }
  0xa4   :  { %47721 = shalt.err (!%p47718_p9)
}
  0xa5   :  { %154 = dma.hbm_to_vmem [thread:$0]  %s51421_s13, 768, %s47974_s7, [#allocation19], %s47736_s30, %s47736_s30, %s47737_s16  }
  0xa6   :  { %47722 = dma.done.wait [#allocation5], 256  }
  0xa7   :  { %47723 = vsyncadd [#allocation5], 4294967040 }
  0xa8   :  { %47724 = dma.done.wait [#allocation7], 512  }
  0xa9   :  { %47725 = vsyncadd [#allocation7], 4294966784 }
  0xaa   :  { %47726 = dma.done.wait [#allocation10], 512  }
  0xab   :  { %47727 = vsyncadd [#allocation10], 4294966784 }
  0xac   :  { %47728 = dma.done.wait [#allocation13], 512  }
  0xad   :  { %47729 = vsyncadd [#allocation13], 4294966784 }
  0xae   :  { %47730 = dma.done.wait [#allocation16], 1024  }
  0xaf   :  { %47731 = vsyncadd [#allocation16], 4294966272 }
  0xb0   :  { %47732 = dma.done.wait [#allocation19], 768  }
  0xb1   :  { %47733 = vsyncadd [#allocation19], 4294966528  ;;  %vm213_vm0 = vcmask 130048   ;;  %v185_v0 = vld [vmem:[#allocation4] sm:$0xff]  ;;  %v186_v1 = vld [vmem:[#allocation4 + $0x8] sm:$0xff] }
  0xb2   :  { %v189_v2 = vld [vmem:[#allocation8] sm:$0xff]  ;;  %v227_v3 = vsel %vm213_vm0, %v185_v0, 0  ;;  %v230_v4 = vsel %vm213_vm0, %v186_v1, 0  ;;  %v190_v5 = vld [vmem:[#allocation8 + $0x8] sm:$0xff]  ;;  %v203_v40 = vld [vmem:[%s51408_s0 + $0x10] sm:$0xff] }
  0xb3   :  { %v833_v6 = vsel %vm213_vm0, %v189_v2, 0  ;;  %v201_v7 = vld [vmem:[%s51408_s0] sm:$0xff]  ;;  %v48022_v9 = vand.u32 4294901760, %v227_v3  ;;  %v48024_v10 = vand.u32 4294901760, %v230_v4  ;;  %v836_v11 = vsel %vm213_vm0, %v190_v5, 0  ;;  %v202_v13 = vld [vmem:[%s51408_s0 + $0x8] sm:$0xff] }
  0xb4   :  { %v48020_v8 = vld [vmem:[%s51409_s1] sm:$0xff]  ;;  %v839_v12 = vand.u32 4294901760, %v833_v6  ;;  %v48033_v14 = vld [vmem:[%s51409_s1 + $0x8] sm:$0xff]  ;;  %v842_v15 = vand.u32 4294901760, %v836_v11  ;;  %v821_v17 = vsel %vm213_vm0, %v201_v7, 0  ;;  %v824_v30 = vsel %vm213_vm0, %v202_v13, 0 }
  0xb5   :  { %51654 = vst [vmem:[#allocation26_spill] sm:$0xff] %v48022_v9  ;;  %51655 = vst [vmem:[#allocation27_spill] sm:$0xff] %v48024_v10  ;;  %v209_v16 = vadd.f32 %v48020_v8, %v201_v7  ;;  %v210_v18 = vadd.f32 %v48033_v14, %v202_v13  ;;  %v48040_v19 = vpack.c.bf16 %v48024_v10, %v48022_v9  ;;  %v48042_v20 = vand.u32 4294901760, %v821_v17  ;;  %v48094_v41 = vld [vmem:[%s51409_s1 + $0x10] sm:$0xff]  ;;  %v204_v58 = vld [vmem:[%s51408_s0 + $0x18] sm:$0xff] }
  0xb6   :  { %v48045_v21 = vsub.f32 %v227_v3, %v48022_v9  ;;  %v48047_v22 = vpack.c.bf16 %v842_v15, %v839_v12  ;;  %v48065_v29 = vsub.f32 %v230_v4, %v48024_v10  ;;  %v48068_v31 = vsub.f32 %v833_v6, %v839_v12  ;;  %v48131_v59 = vld [vmem:[%s51409_s1 + $0x18] sm:$0xff] }
  0xb7   :  { %51656 = vst [vmem:[#allocation28_spill] sm:$0xff] %v48040_v19  ;;  %v215_v23 = vsel %vm213_vm0, %v209_v16, 0  ;;  %v218_v24 = vsel %vm213_vm0, %v210_v18, 0  ;;  %44803 = vmatprep.subr.bf16.mxu0 %v48040_v19  ;;  %v48055_v26 = vsub.f32 %v821_v17, %v48042_v20  ;;  %v48083_v37 = vand.u32 4294901760, %v824_v30 }
  0xb8   :  { %51657 = vst [vmem:[#allocation29_spill] sm:$0xff] %v48045_v21  ;;  %51658 = vst [vmem:[#allocation30_spill] sm:$0xff] %v48047_v22  ;;  %v48052_v25 = vand.u32 4294901760, %v215_v23  ;;  %v48057_v27 = vand.u32 4294901760, %v218_v24  ;;  %v48060_v28 = vand.u32 4294901760, %v48045_v21  ;;  %44827 = vmatprep.subr.bf16.mxu1 %v48047_v22  ;;  %44805 = vmatpush3.bf16.xpose.msra.mxu0 %v48040_v19  ;;  %v48081_v36 = vand.u32 4294901760, %v48065_v29 }
  0xb9   :  { %51660 = vst [vmem:[#allocation32_spill] sm:$0xff] %v48065_v29  ;;  %44829 = vmatpush3.bf16.xpose.msra.mxu1 %v48047_v22  ;;  %v907_v33 = vand.u32 4294901760, %v48055_v26  ;;  %v948_v38 = vand.u32 4294901760, %v48068_v31  ;;  %v48086_v39 = vsub.f32 %v836_v11, %v842_v15  ;;  %v48106_v47 = vsub.f32 %v824_v30, %v48083_v37 }
  0xba   :  { %51659 = vst [vmem:[#allocation31_spill] sm:$0xff] %v48060_v28  ;;  %v48072_v32 = vsub.f32 %v215_v23, %v48052_v25  ;;  %v48076_v34 = vsub.f32 %v218_v24, %v48057_v27  ;;  %v343_v35 = vsub.f32 %v48045_v21, %v48060_v28  ;;  %51661 = vst [vmem:[#allocation33_spill] sm:$0xff] %v48081_v36  ;;  %v827_v63 = vsel %vm213_vm0, %v203_v40, 0 }
  0xbb   :  { %v908_v43 = vsub.f32 %v48055_v26, %v907_v33  ;;  %v350_v46 = vsub.f32 %v48065_v29, %v48081_v36  ;;  %v949_v48 = vsub.f32 %v48068_v31, %v948_v38  ;;  %v955_v49 = vand.u32 4294901760, %v48086_v39 }
  0xbc   :  { %v301_v42 = vand.u32 4294901760, %v48072_v32  ;;  %v311_v44 = vand.u32 4294901760, %v48076_v34  ;;  %v48101_v45 = vand.u32 4294901760, %v343_v35  ;;  %v211_v53 = vadd.f32 %v48094_v41, %v203_v40 }
  0xbd   :  { %v909_v51 = vand.u32 4294901760, %v908_v43  ;;  %v48119_v54 = vand.u32 4294901760, %v350_v46  ;;  %v917_v55 = vand.u32 4294901760, %v48106_v47  ;;  %v950_v56 = vand.u32 4294901760, %v949_v48 }
  0xbe   :  { %51662 = vst [vmem:[#allocation34_spill] sm:$0xff] %v48101_v45  ;;  %v302_v50 = vsub.f32 %v48072_v32, %v301_v42  ;;  %v312_v52 = vsub.f32 %v48076_v34, %v311_v44  ;;  %v956_v57 = vsub.f32 %v48086_v39, %v955_v49  ;;  %v221_v62 = vsel %vm213_vm0, %v211_v53, 0 }
  0xbf   :  { %51663 = vst [vmem:[#allocation35_spill] sm:$0xff] %v48119_v54  ;;  %41410 = vmatprep.mubr.f32.mxu1 %v909_v51  ;;  %v48137_v0 = vpack.c.bf16 %v48119_v54, %v48101_v45  ;;  %v918_v1 = vsub.f32 %v48106_v47, %v917_v55  ;;  %v48142_v3 = vand.u32 4294901760, %v221_v62  ;;  %v48144_v4 = vand.u32 4294901760, %v827_v63 }
  0xc0   :  { %v303_v60 = vand.u32 4294901760, %v302_v50  ;;  %v313_v61 = vand.u32 4294901760, %v312_v52  ;;  %v957_v2 = vand.u32 4294901760, %v956_v57  ;;  %v212_v5 = vadd.f32 %v48131_v59, %v204_v58 }
  0xc1   :  { %51664 = vst [vmem:[#allocation36_spill] sm:$0xff] %v48137_v0  ;;  %v830_v6 = vsel %vm213_vm0, %v204_v58, 0  ;;  %v48150_v7 = vpack.c.bf16 %v48065_v29, %v48045_v21  ;;  %44807 = vmatprep.subr.bf16.mxu0 %v48137_v0  ;;  %v919_v11 = vand.u32 4294901760, %v918_v1  ;;  %v48156_v13 = vsub.f32 %v221_v62, %v48142_v3  ;;  %v192_v62 = vld [vmem:[#allocation9 + $0x8] sm:$0xff] }
  0xc2   :  { %41350 = vmatprep.mubr.f32.mxu0 %v303_v60  ;;  %v48153_v12 = vpack.c.bf16 %v957_v2, %v950_v56  ;;  %v48158_v15 = vand.u32 4294901760, %v830_v6  ;;  %v48162_v16 = vsub.f32 %v827_v63, %v48144_v4  ;;  %v224_v17 = vsel %vm213_vm0, %v212_v5, 0 }
  0xc3   :  { %51665 = vst [vmem:[#allocation37_spill] sm:$0xff] %v48150_v7  ;;  %41351 = vmatmul.mubr.f32.vlgmr.msra.gmra.mrb[0].mxu0 %v313_v61  ;;  %v48167_v18 = vpack.c.bf16 %v48086_v39, %v48068_v31  ;;  %41411 = vmatmul.mubr.f32.vlgmr.msra.gmra.mrb[0].mxu1 %v919_v11  ;;  %v321_v23 = vand.u32 4294901760, %v48156_v13  ;;  %v48171_v24 = vand.u32 4294901760, %v224_v17  ;;  %v48208_v60 = vpack.c.bf16 %v955_v49, %v948_v38  ;;  %v191_v61 = vld [vmem:[#allocation9] sm:$0xff] }
  0xc4   :  { %51666 = vst [vmem:[#allocation38_spill] sm:$0xff] %v48153_v12  ;;  %44809 = vmatpush3.bf16.xpose.msra.mxu0 %v48137_v0  ;;  %44831 = vmatprep.subr.bf16.mxu1 %v48153_v12  ;;  %v48174_v30 = vsub.f32 %v830_v6, %v48158_v15  ;;  %v927_v35 = vand.u32 4294901760, %v48162_v16  ;;  %v48214_v63 = vpack.c.bf16 %v48081_v36, %v48060_v28  ;;  %v1439_v31 = vsel %vm213_vm0, %v191_v61, 0 }
  0xc5   :  { %51667 = vst [vmem:[#allocation39_spill] sm:$0xff] %v48167_v18  ;;  %44833 = vmatpush3.bf16.xpose.msra.mxu1 %v48153_v12  ;;  %44811 = vmatprep.subr.bf16.mxu0 %v48150_v7  ;;  %v322_v40 = vsub.f32 %v48156_v13, %v321_v23  ;;  %v48183_v43 = vsub.f32 %v224_v17, %v48171_v24  ;;  %51668 = vst [vmem:[#allocation40_spill] sm:$0xff] %v48208_v60  ;;  %v1442_v39 = vsel %vm213_vm0, %v192_v62, 0 }
  0xc6   :  { %v937_v46 = vand.u32 4294901760, %v48174_v30  ;;  %44835 = vmatprep.subr.bf16.mxu1 %v48167_v18  ;;  %v928_v48 = vsub.f32 %v48162_v16, %v927_v35  ;;  %51669 = vst [vmem:[#allocation41_spill] sm:$0xff] %v48214_v63  ;;  %v48226_v38 = vand.u32 4294901760, %v1439_v31  ;;  %v48228_v49 = vand.u32 4294901760, %v1442_v39 }
  0xc7   :  { %v323_v50 = vand.u32 4294901760, %v322_v40  ;;  %v331_v51 = vand.u32 4294901760, %v48183_v43  ;;  %v1427_v1 = vsel %vm213_vm0, %v48020_v8, 0 }
  0xc8   :  { %v938_v52 = vsub.f32 %v48174_v30, %v937_v46  ;;  %v929_v53 = vand.u32 4294901760, %v928_v48  ;;  %51670 = vst [vmem:[#allocation42_spill] sm:$0xff] %v48226_v38  ;;  %51671 = vst [vmem:[#allocation43_spill] sm:$0xff] %v48228_v49  ;;  %v48240_v2 = vsub.f32 %v1439_v31, %v48226_v38  ;;  %v48243_v5 = vsub.f32 %v1442_v39, %v48228_v49 }
  0xc9   :  { %41353 = vmatprep.mubr.f32.mxu0 %v323_v50  ;;  %v332_v56 = vsub.f32 %v48183_v43, %v331_v51  ;;  %v48254_v8 = vand.u32 4294901760, %v1427_v1 }
  0xca   :  { %v939_v57 = vand.u32 4294901760, %v938_v52  ;;  %41413 = vmatprep.mubr.f32.mxu1 %v929_v53  ;;  %51672 = vst [vmem:[#allocation44_spill] sm:$0xff] %v48240_v2  ;;  %51673 = vst [vmem:[#allocation45_spill] sm:$0xff] %v48243_v5 }
  0xcb   :  { %v333_v58 = vand.u32 4294901760, %v332_v56 }
  0xcc   :  { %41414 = vmatmul.mubr.f32.gmra.mrb[2].mxu1 %v939_v57 }
  0xcd   :  { %41420 = vmatprep.mubr.f32.mxu1 %v48042_v20  ;;  %41354 = vmatmul.mubr.f32.gmra.mrb[2].mxu0 %v333_v58 }
  0xce   :  { %41360 = vmatprep.mubr.f32.mxu0 %v48052_v25 }
  0xd0   :  { %41421 = vmatmul.mubr.f32.vlgmr.msra.gmra.mrb[0].mxu1 %v48083_v37 }
  0xd1   :  { %44837 = vmatpush3.bf16.xpose.msra.mxu1 %v48167_v18  ;;  %41423 = vmatprep.mubr.f32.mxu1 %v48144_v4 }
  0xd2   :  { %41361 = vmatmul.mubr.f32.vlgmr.msra.gmra.mrb[0].mxu0 %v48057_v27  ;;  %44839 = vmatprep.subr.bf16.mxu1 %v48047_v22 }
  0xd3   :  { %44813 = vmatpush3.bf16.xpose.msra.mxu0 %v48150_v7  ;;  %41363 = vmatprep.mubr.f32.mxu0 %v48142_v3 }
  0xd4   :  { %41424 = vmatmul.mubr.f32.gmra.mrb[2].mxu1 %v48158_v15  ;;  %44815 = vmatprep.subr.bf16.mxu0 %v48040_v19 }
  0xd5   :  { %41430 = vmatprep.mubr.f32.mxu1 %v48055_v26  ;;  %v1430_v26 = vsel %vm213_vm0, %v48033_v14, 0 }
  0xd6   :  { %41364 = vmatmul.mubr.f32.gmra.mrb[2].mxu0 %v48171_v24  ;;  %v48266_v14 = vand.u32 4294901760, %v1430_v26 }
  0xd7   :  { %41370 = vmatprep.mubr.f32.mxu0 %v48072_v32  ;;  %v48258_v32 = vand.u32 4294901760, %v48240_v2 }
  0xd8   :  { %41431 = vmatmul.mubr.f32.vlgmr.msra.gmra.mrb[0].mxu1 %v48106_v47  ;;  %v1436_v47 = vsel %vm213_vm0, %v48131_v59, 0  ;;  %v1522_v11 = vsub.f32 %v1430_v26, %v48266_v14 }
  0xd9   :  { %44841 = vmatpush3.bf16.xpose.msra.mxu1 %v48047_v22  ;;  %41433 = vmatprep.mubr.f32.mxu1 %v48162_v16  ;;  %51674 = vst [vmem:[#allocation46_spill] sm:$0xff] %v48258_v32  ;;  %v48289_v59 = vand.u32 4294901760, %v1436_v47 }
  0xda   :  { %41371 = vmatmul.mubr.f32.vlgmr.msra.gmra.mrb[0].mxu0 %v48076_v34  ;;  %44843 = vmatprep.subr.bf16.mxu1 %v48208_v60  ;;  %v1433_v34 = vsel %vm213_vm0, %v48094_v41, 0  ;;  %v48279_v41 = vpack.c.bf16 %v48228_v49, %v48226_v38 }
  0xdb   :  { %44817 = vmatpush3.bf16.xpose.msra.mxu0 %v48040_v19  ;;  %41373 = vmatprep.mubr.f32.mxu0 %v48156_v13 }
  0xdc   :  { %41434 = vmatmul.mubr.f32.gmra.mrb[2].mxu1 %v48174_v30  ;;  %44819 = vmatprep.subr.bf16.mxu0 %v48214_v63  ;;  %51676 = vst [vmem:[#allocation48_spill] sm:$0xff] %v48279_v41  ;;  %v1523_v30 = vand.u32 4294901760, %v1522_v11 }
  0xdd   :  { %41440 = vmatprep.mubr.f32.mxu1 %v907_v33  ;;  %v48261_v33 = vand.u32 4294901760, %v48243_v5 }
  0xde   :  { %41374 = vmatmul.mubr.f32.gmra.mrb[2].mxu0 %v48183_v43 }
  0xdf   :  { %41380 = vmatprep.mubr.f32.mxu0 %v301_v42  ;;  %51675 = vst [vmem:[#allocation47_spill] sm:$0xff] %v48261_v33  ;;  %v48270_v42 = vsub.f32 %v1427_v1, %v48254_v8  ;;  %v1562_v6 = vsub.f32 %v48243_v5, %v48261_v33 }
  0xe0   :  { %41441 = vmatmul.mubr.f32.vlgmr.msra.gmra.mrb[0].mxu1 %v917_v55  ;;  %v1555_v55 = vsub.f32 %v48240_v2, %v48258_v32 }
  0xe1   :  { %44845 = vmatpush3.bf16.xpose.msra.mxu1 %v48208_v60  ;;  %41443 = vmatprep.mubr.f32.mxu1 %v927_v35  ;;  %v1513_v13 = vand.u32 4294901760, %v48270_v42  ;;  %v1542_v35 = vsub.f32 %v1436_v47, %v48289_v59 }
  0xe2   :  { %41381 = vmatmul.mubr.f32.vlgmr.msra.gmra.mrb[0].mxu0 %v311_v44  ;;  %44847 = vmatprep.subr.bf16.mxu1 %v48047_v22  ;;  %v48272_v44 = vand.u32 4294901760, %v1433_v34  ;;  %v48297_v17 = vand.u32 4294901760, %v1555_v55 }
  0xe3   :  { %44821 = vmatpush3.bf16.xpose.msra.mxu0 %v48214_v63  ;;  %41383 = vmatprep.mubr.f32.mxu0 %v321_v23  ;;  %v48299_v23 = vand.u32 4294901760, %v1562_v6  ;;  %v1514_v40 = vsub.f32 %v48270_v42, %v1513_v13  ;;  %v1543_v48 = vand.u32 4294901760, %v1542_v35  ;;  %v188_v6 = vld [vmem:[#allocation6 + $0x8] sm:$0xff] }
  0xe4   :  { %41444 = vmatmul.mubr.f32.gmra.mrb[2].mxu1 %v937_v46  ;;  %44823 = vmatprep.subr.bf16.mxu0 %v48040_v19  ;;  %v1532_v16 = vsub.f32 %v1433_v34, %v48272_v44  ;;  %51677 = vst [vmem:[#allocation49_spill] sm:$0xff] %v48297_v17 }
  0xe5   :  { %41450 = vmatprep.mubr.f32.mxu1 %v48042_v20  ;;  %51678 = vst [vmem:[#allocation50_spill] sm:$0xff] %v48299_v23  ;;  %v48309_v46 = vpack.c.bf16 %v48299_v23, %v48297_v17 }
  0xe6   :  { %41384 = vmatmul.mubr.f32.gmra.mrb[2].mxu0 %v331_v51  ;;  %v1533_v43 = vand.u32 4294901760, %v1532_v16  ;;  %v48321_v51 = vpack.c.bf16 %v48243_v5, %v48240_v2 }
  0xe7   :  { %41390 = vmatprep.mubr.f32.mxu0 %v48052_v25  ;;  %51679 = vst [vmem:[#allocation51_spill] sm:$0xff] %v48309_v46 }
  0xe8   :  { %41451 = vmatmul.mubr.f32.vlgmr.msra.gmra.mrb[0].mxu1 %v48083_v37  ;;  %v1534_v50 = vsub.f32 %v1532_v16, %v1533_v43  ;;  %51680 = vst [vmem:[#allocation52_spill] sm:$0xff] %v48321_v51 }
  0xe9   :  { %44849 = vmatpush3.bf16.xpose.msra.mxu1 %v48047_v22  ;;  %41453 = vmatprep.mubr.f32.mxu1 %v48144_v4 }
  0xea   :  { %41391 = vmatmul.mubr.f32.vlgmr.msra.gmra.mrb[0].mxu0 %v48057_v27 }
  0xeb   :  { %44825 = vmatpush3.bf16.xpose.msra.mxu0 %v48040_v19  ;;  %41393 = vmatprep.mubr.f32.mxu0 %v48142_v3 }
  0xec   :  { %41454 = vmatmul.mubr.f32.gmra.mrb[2].mxu1 %v48158_v15  ;;  %44851 = vmatprep.subr.bf16.mxu0 %v48279_v41 }
  0xed   :  { %41460 = vmatprep.mubr.f32.mxu1 %v48042_v20  ;;  %v1524_v20 = vsub.f32 %v1522_v11, %v1523_v30 }
  0xee   :  { %41394 = vmatmul.mubr.f32.gmra.mrb[2].mxu0 %v48171_v24 }
  0xef   :  { %41400 = vmatprep.mubr.f32.mxu0 %v48052_v25  ;;  %v1515_v25 = vand.u32 4294901760, %v1514_v40 }
  0xf0   :  { %41461 = vmatmul.mubr.f32.vlgmr.msra.gmra.mrb[0].mxu1 %v48083_v37  ;;  %v1525_v37 = vand.u32 4294901760, %v1524_v20 }
  0xf1   :  { %41463 = vmatprep.mubr.f32.mxu1 %v48144_v4  ;;  %v1544_v4 = vsub.f32 %v1542_v35, %v1543_v48 }
  0xf2   :  { %41401 = vmatmul.mubr.f32.vlgmr.msra.gmra.mrb[0].mxu0 %v48057_v27  ;;  %v1535_v27 = vand.u32 4294901760, %v1534_v50 }
  0xf3   :  { %44853 = vmatpush3.bf16.xpose.msra.mxu0 %v48279_v41  ;;  %41403 = vmatprep.mubr.f32.mxu0 %v48142_v3  ;;  %v1545_v3 = vand.u32 4294901760, %v1544_v4 }
  0xf4   :  { %41464 = vmatmul.mubr.f32.gmra.mrb[2].mxu1 %v48158_v15  ;;  %44855 = vmatprep.subr.bf16.mxu0 %v48309_v46  ;;  %v48334_v15 = vpack.c.bf16 %v48261_v33, %v48258_v32 }
  0xf5   :  { %41530 = vmatprep.mubr.f32.mxu1 %v48297_v17 }
  0xf6   :  { %41404 = vmatmul.mubr.f32.gmra.mrb[2].mxu0 %v48171_v24  ;;  %51681 = vst [vmem:[#allocation53_spill] sm:$0xff] %v48334_v15  ;;  %v187_v24 = vld [vmem:[#allocation6] sm:$0xff] }
  0xf7   :  { %41470 = vmatprep.mubr.f32.mxu0 %v1515_v25  ;;  %v3053_v52 = vsel %vm213_vm0, %v187_v24, 0 }
  0xf8   :  { %v48350_v53 = vand.u32 4294901760, %v3053_v52 }
  0xfa   :  { %41471 = vmatmul.mubr.f32.vlgmr.msra.gmra.mrb[4].mxu0 %v1525_v37  ;;  %51682 = vst [vmem:[#allocation54_spill] sm:$0xff] %v48350_v53  ;;  %v48353_v56 = vsub.f32 %v3053_v52, %v48350_v53 }
  0xfb   :  { %44857 = vmatpush3.bf16.xpose.msra.mxu0 %v48309_v46  ;;  %41473 = vmatprep.mubr.f32.mxu0 %v1535_v27 }
  0xfc   :  { %44859 = vmatprep.subr.bf16.mxu0 %v48321_v51  ;;  %51683 = vst [vmem:[#allocation55_spill] sm:$0xff] %v48353_v56  ;;  %v48356_v57 = vand.u32 4294901760, %v48353_v56 }
  0xfe   :  { %41474 = vmatmul.mubr.f32.gmra.mrb[6].mxu0 %v1545_v3  ;;  %51684 = vst [vmem:[#allocation56_spill] sm:$0xff] %v48356_v57  ;;  %v3128_v58 = vsub.f32 %v48353_v56, %v48356_v57 }
  0xff   :  { %41480 = vmatprep.mubr.f32.mxu0 %v48254_v8 }
 0x100   :  { %v48360_v61 = vand.u32 4294901760, %v3128_v58 }
 0x102   :  { %41481 = vmatmul.mubr.f32.vlgmr.msra.gmra.mrb[4].mxu0 %v48266_v14  ;;  %51685 = vst [vmem:[#allocation57_spill] sm:$0xff] %v48360_v61 }
 0x103   :  { %44861 = vmatpush3.bf16.xpose.msra.mxu0 %v48321_v51  ;;  %41483 = vmatprep.mubr.f32.mxu0 %v48272_v44 }
 0x104   :  { %44863 = vmatprep.subr.bf16.mxu0 %v48279_v41 }
 0x106   :  { %41484 = vmatmul.mubr.f32.gmra.mrb[6].mxu0 %v48289_v59 }
 0x107   :  { %41490 = vmatprep.mubr.f32.mxu0 %v48270_v42 }
 0x10a   :  { %41491 = vmatmul.mubr.f32.vlgmr.msra.gmra.mrb[4].mxu0 %v1522_v11  ;;  %v3056_v11 = vsel %vm213_vm0, %v188_v6, 0 }
 0x10b   :  { %44865 = vmatpush3.bf16.xpose.msra.mxu0 %v48279_v41  ;;  %41493 = vmatprep.mubr.f32.mxu0 %v1532_v16 }
 0x10c   :  { %44867 = vmatprep.subr.bf16.mxu0 %v48334_v15 }
 0x10e   :  { %41494 = vmatmul.mubr.f32.gmra.mrb[6].mxu0 %v1542_v35 }
 0x10f   :  { %41500 = vmatprep.mubr.f32.mxu0 %v1513_v13 }
 0x112   :  { %41501 = vmatmul.mubr.f32.vlgmr.msra.gmra.mrb[4].mxu0 %v1523_v30 }
 0x113   :  { %44869 = vmatpush3.bf16.xpose.msra.mxu0 %v48334_v15  ;;  %41503 = vmatprep.mubr.f32.mxu0 %v1533_v43 }
 0x114   :  { %44871 = vmatprep.subr.bf16.mxu0 %v48279_v41 }
 0x116   :  { %41504 = vmatmul.mubr.f32.gmra.mrb[6].mxu0 %v1543_v48 }
 0x117   :  { %41510 = vmatprep.mubr.f32.mxu0 %v48254_v8 }
 0x11a   :  { %41511 = vmatmul.mubr.f32.vlgmr.msra.gmra.mrb[4].mxu0 %v48266_v14 }
 0x11b   :  { %44873 = vmatpush3.bf16.xpose.msra.mxu0 %v48279_v41  ;;  %41513 = vmatprep.mubr.f32.mxu0 %v48272_v44 }
 0x11e   :  { %41514 = vmatmul.mubr.f32.gmra.mrb[6].mxu0 %v48289_v59 }
 0x11f   :  { %41520 = vmatprep.mubr.f32.mxu0 %v48254_v8 }
 0x122   :  { %41521 = vmatmul.mubr.f32.vlgmr.msra.gmra.mrb[4].mxu0 %v48266_v14 }
 0x123   :  { %41523 = vmatprep.mubr.f32.mxu0 %v48272_v44 }
 0x126   :  { %41524 = vmatmul.mubr.f32.gmra.mrb[6].mxu0 %v48289_v59  ;;  %v48364_v59 = vand.u32 4294901760, %v3056_v11 }
 0x127   :  { %41614 = vmatprep.mubr.f32.mxu0 %v48360_v61 }
 0x128   :  { %51686 = vst [vmem:[#allocation58_spill] sm:$0xff] %v48364_v59  ;;  %v48367_v13 = vsub.f32 %v3056_v11, %v48364_v59 }
 0x12a   :  { %51687 = vst [vmem:[#allocation59_spill] sm:$0xff] %v48367_v13  ;;  %v48370_v16 = vand.u32 4294901760, %v48367_v13 }
 0x12c   :  { %51688 = vst [vmem:[#allocation60_spill] sm:$0xff] %v48370_v16  ;;  %v3138_v35 = vsub.f32 %v48367_v13, %v48370_v16 }
 0x12e   :  { %v48374_v24 = vand.u32 4294901760, %v3138_v35 }
 0x130   :  { %51689 = vst [vmem:[#allocation61_spill] sm:$0xff] %v48374_v24 }
 0x1c3   :  { %v41462_v62 = vpop.f32.mrb[0].mxu1 }
 0x1c4   :  { %v1404_v31 = vpop.f32.mrb[1].mxu1 }
 0x1c5   :  { %v41402_v39 = vpop.f32.mrb[0].mxu0 }
 0x1c6   :  { %v2037_v1 = vadd.f32 %v41462_v62, %v41402_v39  ;;  %v798_v26 = vpop.f32.mrb[1].mxu0 }
 0x1c7   :  { %v2036_v8 = vadd.f32 %v1404_v31, %v798_v26  ;;  %v41465_v34 = vpop.f32.mrb[2].mxu1 }
 0x1c8   :  { %v1416_v14 = vpop.f32.mrb[3].mxu1 }
 0x1c9   :  { %v41405_v42 = vpop.f32.mrb[2].mxu0 }
 0x1ca   :  { %v2039_v44 = vadd.f32 %v41465_v34, %v41405_v42  ;;  %v810_v47 = vpop.f32.mrb[3].mxu0 }
 0x1cb   :  { %v2038_v55 = vadd.f32 %v1416_v14, %v810_v47 }
 0x1f5   :  { %v41522_v30 = vpop.f32.mrb[4].mxu0 }
 0x1f6   :  { %v2033_v40 = vsub.f32 %v41402_v39, %v41522_v30  ;;  %v2010_v43 = vpop.f32.mrb[5].mxu0 }
 0x1f7   :  { %v2032_v20 = vsub.f32 %v798_v26, %v2010_v43 }
 0x1f8   :  { %v2048_v48 = vand.u32 4294901760, %v2033_v40  ;;  %v2547_v25 = vsub.f32 %v2037_v1, %v2033_v40  ;;  %v3051_v50 = vadd.f32 %v2037_v1, %v2033_v40 }
 0x1f9   :  { %v2045_v37 = vand.u32 4294901760, %v2032_v20  ;;  %v2546_v4 = vsub.f32 %v2036_v8, %v2032_v20  ;;  %v3050_v27 = vadd.f32 %v2036_v8, %v2032_v20  ;;  %v41525_v3 = vpop.f32.mrb[6].mxu0 }
 0x1fa   :  { %v2140_v52 = vsub.f32 %v2033_v40, %v2048_v48  ;;  %v2552_v58 = vand.u32 4294901760, %v2547_v25  ;;  %v3062_v62 = vand.u32 4294901760, %v3051_v50  ;;  %v2035_v31 = vsub.f32 %v41405_v42, %v41525_v3  ;;  %v2022_v34 = vpop.f32.mrb[7].mxu0 }
 0x1fb   :  { %v48376_v14 = vpack.c.bf16 %v2048_v48, %v2045_v37  ;;  %v2133_v6 = vsub.f32 %v2032_v20, %v2045_v37  ;;  %v2549_v39 = vand.u32 4294901760, %v2546_v4  ;;  %v3059_v11 = vand.u32 4294901760, %v3050_v27 }
 0x1fc   :  { %v2644_v26 = vsub.f32 %v2547_v25, %v2552_v58  ;;  %v3154_v30 = vsub.f32 %v3051_v50, %v3062_v62  ;;  %v3584_v43 = vand.u32 4294901760, %v2035_v31  ;;  %v4083_v1 = vsub.f32 %v2039_v44, %v2035_v31 }
 0x1fd   :  { %v48378_v15 = vpack.c.bf16 %v2552_v58, %v2549_v39  ;;  %v2637_v8 = vsub.f32 %v2546_v4, %v2549_v39  ;;  %v48380_v51 = vpack.c.bf16 %v3062_v62, %v3059_v11  ;;  %v3147_v35 = vsub.f32 %v3050_v27, %v3059_v11  ;;  %44875 = vmatprep.subr.bf16.mxu1 %v48376_v14 }
 0x1fe   :  { %v48383_v40 = vsub.f32 %v2035_v31, %v3584_v43  ;;  %v4088_v42 = vand.u32 4294901760, %v4083_v1  ;;  %v4587_v48 = vadd.f32 %v2039_v44, %v2035_v31  ;;  %v2034_v3 = vsub.f32 %v810_v47, %v2022_v34  ;;  %44877 = vmatpush3.bf16.msra.mxu1 %v48376_v14 }
 0x1ff   :  { %44923 = vmatprep.subr.bf16.mxu0 %v48380_v51  ;;  %v2134_v20 = vand.u32 4294901760, %v2133_v6  ;;  %v2141_v25 = vand.u32 4294901760, %v2140_v52  ;;  %v44882_v50 = vpack.c.bf16 %v2140_v52, %v2133_v6  ;;  %v3148_v37 = vand.u32 4294901760, %v3147_v35 }
 0x200   :  { %v4180_v58 = vsub.f32 %v4083_v1, %v4088_v42  ;;  %v4592_v4 = vand.u32 4294901760, %v4587_v48  ;;  %v3581_v62 = vand.u32 4294901760, %v2034_v3  ;;  %v4082_v39 = vsub.f32 %v2038_v55, %v2034_v3  ;;  %44925 = vmatpush3.bf16.msra.mxu0 %v48380_v51 }
 0x201   :  { %v4586_v27 = vadd.f32 %v2038_v55, %v2034_v3  ;;  %41531 = vmatmul.mubr.f32.vlgmr.msra.gmra.mrb[4].mxu1 %v48299_v23  ;;  %v2135_v11 = vsub.f32 %v2133_v6, %v2134_v20  ;;  %v2142_v44 = vsub.f32 %v2140_v52, %v2141_v25  ;;  %v3149_v47 = vsub.f32 %v3147_v35, %v3148_v37 }
 0x202   :  { %v48389_v31 = vsub.f32 %v4587_v48, %v4592_v4  ;;  %v48391_v34 = vpack.c.bf16 %v3584_v43, %v3581_v62  ;;  %v3669_v46 = vsub.f32 %v2034_v3, %v3581_v62  ;;  %v4085_v41 = vand.u32 4294901760, %v4082_v39  ;;  %41537 = vmatprep.mubr.f32.mxu1 %v48226_v38 }
 0x203   :  { %v4589_v1 = vand.u32 4294901760, %v4586_v27  ;;  %41615 = vmatmul.mubr.f32.vlgmr.msra.gmra.mrb[8].mxu0 %v48374_v24  ;;  %v2136_v63 = vand.u32 4294901760, %v2135_v11  ;;  %v2143_v60 = vand.u32 4294901760, %v2142_v44  ;;  %v3150_v7 = vand.u32 4294901760, %v3149_v47 }
 0x204   :  { %v48395_v55 = vpack.c.bf16 %v4088_v42, %v4085_v41  ;;  %v4173_v18 = vsub.f32 %v4082_v39, %v4085_v41  ;;  %v3155_v6 = vand.u32 4294901760, %v3154_v30  ;;  %v44930_v52 = vpack.c.bf16 %v3154_v30, %v3147_v35  ;;  %41621 = vmatprep.mubr.f32.mxu0 %v48350_v53 }
 0x205   :  { %v48398_v48 = vpack.c.bf16 %v4592_v4, %v4589_v1  ;;  %v4677_v43 = vsub.f32 %v4586_v27, %v4589_v1  ;;  %v44878_v3 = vpack.c.bf16 %v2143_v60, %v2136_v63  ;;  %v48400_v62 = vpack.c.bf16 %v2141_v25, %v2134_v20 }
 0x206   :  { %v3156_v12 = vsub.f32 %v3154_v30, %v3155_v6  ;;  %v48402_v22 = vpack.c.bf16 %v3155_v6, %v3148_v37  ;;  %v2638_v0 = vand.u32 4294901760, %v2637_v8  ;;  %v2645_v11 = vand.u32 4294901760, %v2644_v26 }
 0x207   :  { %44879 = vmatprep.subr.bf16.mxu1 %v44878_v3  ;;  %v4174_v44 = vand.u32 4294901760, %v4173_v18  ;;  %v4181_v42 = vand.u32 4294901760, %v4180_v58  ;;  %v48404_v47 = vpack.c.bf16 %v2644_v26, %v2637_v8  ;;  %v48406_v41 = vpack.c.bf16 %v4180_v58, %v4173_v18 }
 0x208   :  { %44881 = vmatpush3.bf16.msra.mxu1 %v44878_v3  ;;  %v3157_v35 = vand.u32 4294901760, %v3156_v12  ;;  %v2639_v4 = vsub.f32 %v2637_v8, %v2638_v0  ;;  %v2646_v39 = vsub.f32 %v2644_v26, %v2645_v11  ;;  %v48408_v27 = vpack.c.bf16 %v2645_v11, %v2638_v0 }
 0x209   :  { %44883 = vmatprep.subr.bf16.mxu1 %v44882_v50  ;;  %v4175_v60 = vsub.f32 %v4173_v18, %v4174_v44  ;;  %v4182_v63 = vsub.f32 %v4180_v58, %v4181_v42  ;;  %v48410_v30 = vpack.c.bf16 %v4181_v42, %v4174_v44  ;;  %v3670_v20 = vand.u32 4294901760, %v3669_v46 }
 0x20a   :  { %v44926_v25 = vpack.c.bf16 %v3157_v35, %v3150_v7  ;;  %v2640_v37 = vand.u32 4294901760, %v2639_v4  ;;  %v2647_v1 = vand.u32 4294901760, %v2646_v39  ;;  %v3677_v6 = vand.u32 4294901760, %v48383_v40 }
 0x20b   :  { %41538 = vmatmul.mubr.f32.vlgmr.msra.gmra.mrb[4].mxu1 %v48228_v49  ;;  %v4176_v19 = vand.u32 4294901760, %v4175_v60  ;;  %v4183_v3 = vand.u32 4294901760, %v4182_v63  ;;  %v3671_v12 = vsub.f32 %v3669_v46, %v3670_v20  ;;  %v48415_v26 = vpack.c.bf16 %v48383_v40, %v3669_v46 }
 0x20c   :  { %44927 = vmatprep.subr.bf16.mxu0 %v44926_v25  ;;  %44885 = vmatpush3.bf16.msra.mxu1 %v44882_v50  ;;  %v44902_v0 = vpack.c.bf16 %v2647_v1, %v2640_v37  ;;  %v3678_v18 = vsub.f32 %v48383_v40, %v3677_v6  ;;  %v48418_v8 = vpack.c.bf16 %v3677_v6, %v3670_v20  ;;  %v4678_v7 = vand.u32 4294901760, %v4677_v43 }
 0x20d   :  { %44929 = vmatpush3.bf16.msra.mxu0 %v44926_v25  ;;  %44887 = vmatprep.subr.bf16.mxu1 %v48376_v14  ;;  %v44974_v58 = vpack.c.bf16 %v4183_v3, %v4176_v19  ;;  %v3672_v11 = vand.u32 4294901760, %v3671_v12  ;;  %v4685_v44 = vand.u32 4294901760, %v48389_v31  ;;  %v48423_v42 = vpack.c.bf16 %v48389_v31, %v4677_v43 }
 0x20e   :  { %44931 = vmatprep.subr.bf16.mxu0 %v44930_v52  ;;  %41544 = vmatprep.mubr.f32.mxu1 %v48240_v2  ;;  %v3679_v46 = vand.u32 4294901760, %v3678_v18  ;;  %v4679_v50 = vsub.f32 %v4677_v43, %v4678_v7 }
 0x20f   :  { %v4686_v40 = vsub.f32 %v48389_v31, %v4685_v44  ;;  %v48427_v35 = vpack.c.bf16 %v4685_v44, %v4678_v7 }
 0x210   :  { %41622 = vmatmul.mubr.f32.vlgmr.msra.gmra.mrb[8].mxu0 %v48364_v59  ;;  %v48430_v4 = vpack.c.bf16 %v3679_v46, %v3672_v11  ;;  %v4680_v19 = vand.u32 4294901760, %v4679_v50 }
 0x211   :  { %44933 = vmatpush3.bf16.msra.mxu0 %v44930_v52  ;;  %41628 = vmatprep.mubr.f32.mxu0 %v48353_v56  ;;  %v4687_v39 = vand.u32 4294901760, %v4686_v40 }
 0x212   :  { %44935 = vmatprep.subr.bf16.mxu0 %v48380_v51 }
 0x213   :  { %41545 = vmatmul.mubr.f32.vlgmr.msra.gmra.mrb[4].mxu1 %v48243_v5  ;;  %v48435_v60 = vpack.c.bf16 %v4687_v39, %v4680_v19  ;;  %v48609_v39 = vld [vmem:[%s51418_s10 + $0x8] sm:$0xff] }
 0x214   :  { %44889 = vmatpush3.bf16.msra.mxu1 %v48376_v14  ;;  %41551 = vmatprep.mubr.f32.mxu1 %v48258_v32 }
 0x215   :  { %44891 = vmatprep.subr.bf16.mxu1 %v48400_v62 }
 0x218   :  { %41629 = vmatmul.mubr.f32.vlgmr.msra.gmra.mrb[8].mxu0 %v48367_v13 }
 0x219   :  { %44937 = vmatpush3.bf16.msra.mxu0 %v48380_v51  ;;  %41635 = vmatprep.mubr.f32.mxu0 %v48356_v57 }
 0x21a   :  { %44939 = vmatprep.subr.bf16.mxu0 %v48402_v22 }
 0x21b   :  { %41552 = vmatmul.mubr.f32.vlgmr.msra.gmra.mrb[4].mxu1 %v48261_v33 }
 0x21c   :  { %44893 = vmatpush3.bf16.msra.mxu1 %v48400_v62  ;;  %41558 = vmatprep.mubr.f32.mxu1 %v48226_v38 }
 0x21d   :  { %44895 = vmatprep.subr.bf16.mxu1 %v48376_v14 }
 0x220   :  { %41636 = vmatmul.mubr.f32.vlgmr.msra.gmra.mrb[8].mxu0 %v48370_v16 }
 0x221   :  { %44941 = vmatpush3.bf16.msra.mxu0 %v48402_v22  ;;  %41642 = vmatprep.mubr.f32.mxu0 %v48350_v53  ;;  %v197_v22 = vld [vmem:[#allocation14] sm:$0xff] }
 0x222   :  { %44943 = vmatprep.subr.bf16.mxu0 %v48380_v51 }
 0x223   :  { %41559 = vmatmul.mubr.f32.vlgmr.msra.gmra.mrb[4].mxu1 %v48228_v49 }
 0x224   :  { %44897 = vmatpush3.bf16.msra.mxu1 %v48376_v14  ;;  %41565 = vmatprep.mubr.f32.mxu1 %v48226_v38  ;;  %v5741_v14 = vsel %vm213_vm0, %v197_v22, 0 }
 0x225   :  { %44899 = vmatprep.subr.bf16.mxu1 %v48378_v15  ;;  %v5747_v52 = vand.u32 4294901760, %v5741_v14 }
 0x227   :  { %v48570_v6 = vsub.f32 %v5741_v14, %v5747_v52 }
 0x228   :  { %41643 = vmatmul.mubr.f32.vlgmr.msra.gmra.mrb[8].mxu0 %v48364_v59 }
 0x229   :  { %44945 = vmatpush3.bf16.msra.mxu0 %v48380_v51  ;;  %41649 = vmatprep.mubr.f32.mxu0 %v48350_v53  ;;  %v198_v51 = vld [vmem:[#allocation14 + $0x8] sm:$0xff] }
 0x22a   :  { %44971 = vmatprep.subr.bf16.mxu0 %v48395_v55  ;;  %v5744_v31 = vsel %vm213_vm0, %v198_v51, 0  ;;  %v48619_v51 = vld [vmem:[%s51418_s10] sm:$0xff] }
 0x22b   :  { %41566 = vmatmul.mubr.f32.vlgmr.msra.gmra.mrb[4].mxu1 %v48228_v49  ;;  %v5750_v43 = vand.u32 4294901760, %v5744_v31 }
 0x22c   :  { %44901 = vmatpush3.bf16.msra.mxu1 %v48378_v15  ;;  %41572 = vmatprep.mubr.f32.mxu1 %v48101_v45 }
 0x22d   :  { %44903 = vmatprep.subr.bf16.mxu1 %v44902_v0  ;;  %v48572_v3 = vsub.f32 %v5744_v31, %v5750_v43 }
 0x22f   :  { %41573 = vmatmul.mubr.f32.vlgmr.msra.gmra.mrb[6].mxu1 %v48119_v54  ;;  %v5863_v18 = vand.u32 4294901760, %v48572_v3 }
 0x230   :  { %41650 = vmatmul.mubr.f32.vlgmr.msra.gmra.mrb[8].mxu0 %v48364_v59  ;;  %44905 = vmatpush3.bf16.msra.mxu1 %v44902_v0  ;;  %v5856_v0 = vand.u32 4294901760, %v48570_v6 }
 0x231   :  { %44973 = vmatpush3.bf16.msra.mxu0 %v48395_v55  ;;  %44907 = vmatprep.subr.bf16.mxu1 %v48404_v47  ;;  %v5864_v11 = vsub.f32 %v48572_v3, %v5863_v18 }
 0x232   :  { %44975 = vmatprep.subr.bf16.mxu0 %v44974_v58  ;;  %41698 = vmatprep.mubr.f32.mxu0 %v48101_v45 }
 0x233   :  { %41579 = vmatprep.mubr.f32.mxu1 %v48022_v9  ;;  %v5865_v50 = vand.u32 4294901760, %v5864_v11 }
 0x234   :  { %41699 = vmatmul.mubr.f32.vlgmr.msra.gmra.mrb[10].mxu0 %v48119_v54 }
 0x235   :  { %44977 = vmatpush3.bf16.msra.mxu0 %v44974_v58  ;;  %41705 = vmatprep.mubr.f32.mxu0 %v48022_v9  ;;  %v5857_v58 = vsub.f32 %v48570_v6, %v5856_v0 }
 0x236   :  { %44979 = vmatprep.subr.bf16.mxu0 %v48406_v41 }
 0x237   :  { %41580 = vmatmul.mubr.f32.vlgmr.msra.gmra.mrb[6].mxu1 %v48024_v10  ;;  %v5858_v46 = vand.u32 4294901760, %v5857_v58 }
 0x238   :  { %44909 = vmatpush3.bf16.msra.mxu1 %v48404_v47  ;;  %41586 = vmatprep.mubr.f32.mxu1 %v48045_v21 }
 0x239   :  { %44911 = vmatprep.subr.bf16.mxu1 %v48378_v15 }
 0x23c   :  { %41706 = vmatmul.mubr.f32.vlgmr.msra.gmra.mrb[10].mxu0 %v48024_v10 }
 0x23d   :  { %44981 = vmatpush3.bf16.msra.mxu0 %v48406_v41  ;;  %41712 = vmatprep.mubr.f32.mxu0 %v48045_v21  ;;  %v48560_v41 = vpack.c.bf16 %v5750_v43, %v5747_v52 }
 0x23e   :  { %44983 = vmatprep.subr.bf16.mxu0 %v48395_v55 }
 0x23f   :  { %41587 = vmatmul.mubr.f32.vlgmr.msra.gmra.mrb[6].mxu1 %v48065_v29  ;;  %51692 = vst [vmem:[#allocation64_spill] sm:$0xff] %v48560_v41 }
 0x240   :  { %44913 = vmatpush3.bf16.msra.mxu1 %v48378_v15  ;;  %41593 = vmatprep.mubr.f32.mxu1 %v48060_v28 }
 0x241   :  { %44915 = vmatprep.subr.bf16.mxu1 %v48408_v27 }
 0x244   :  { %41713 = vmatmul.mubr.f32.vlgmr.msra.gmra.mrb[10].mxu0 %v48065_v29 }
 0x245   :  { %44985 = vmatpush3.bf16.msra.mxu0 %v48395_v55  ;;  %41719 = vmatprep.mubr.f32.mxu0 %v48060_v28 }
 0x246   :  { %44987 = vmatprep.subr.bf16.mxu0 %v48410_v30 }
 0x247   :  { %41594 = vmatmul.mubr.f32.vlgmr.msra.gmra.mrb[6].mxu1 %v48081_v36 }
 0x248   :  { %44917 = vmatpush3.bf16.msra.mxu1 %v48408_v27  ;;  %41600 = vmatprep.mubr.f32.mxu1 %v48022_v9 }
 0x249   :  { %44919 = vmatprep.subr.bf16.mxu1 %v48378_v15 }
 0x24c   :  { %41720 = vmatmul.mubr.f32.vlgmr.msra.gmra.mrb[10].mxu0 %v48081_v36 }
 0x24d   :  { %44989 = vmatpush3.bf16.msra.mxu0 %v48410_v30  ;;  %41726 = vmatprep.mubr.f32.mxu0 %v48022_v9 }
 0x24e   :  { %44991 = vmatprep.subr.bf16.mxu0 %v48395_v55 }
 0x24f   :  { %41601 = vmatmul.mubr.f32.vlgmr.msra.gmra.mrb[6].mxu1 %v48024_v10 }
 0x250   :  { %44921 = vmatpush3.bf16.msra.mxu1 %v48378_v15  ;;  %41607 = vmatprep.mubr.f32.mxu1 %v48022_v9  ;;  %v193_v15 = vld [vmem:[#allocation11] sm:$0xff] }
 0x251   :  { %44947 = vmatprep.subr.bf16.mxu1 %v48391_v34 }
 0x254   :  { %41727 = vmatmul.mubr.f32.vlgmr.msra.gmra.mrb[10].mxu0 %v48024_v10 }
 0x255   :  { %44993 = vmatpush3.bf16.msra.mxu0 %v48395_v55  ;;  %41733 = vmatprep.mubr.f32.mxu0 %v48022_v9  ;;  %v5135_v55 = vsel %vm213_vm0, %v193_v15, 0  ;;  %v48624_v15 = vld [vmem:[%s51419_s11] sm:$0xff] }
 0x256   :  { %v48556_v47 = vand.u32 4294901760, %v5135_v55 }
 0x257   :  { %41608 = vmatmul.mubr.f32.vlgmr.msra.gmra.mrb[6].mxu1 %v48024_v10 }
 0x258   :  { %44949 = vmatpush3.bf16.msra.mxu1 %v48391_v34  ;;  %41656 = vmatprep.mubr.f32.mxu1 %v48297_v17  ;;  %51690 = vst [vmem:[#allocation62_spill] sm:$0xff] %v48556_v47  ;;  %v48575_v12 = vsub.f32 %v5135_v55, %v48556_v47 }
 0x259   :  { %44951 = vmatprep.subr.bf16.mxu1 %v48430_v4 }
 0x25a   :  { %51694 = vst [vmem:[#allocation66_spill] sm:$0xff] %v48575_v12 }
 0x25b   :  { %41657 = vmatmul.mubr.f32.vlgmr.msra.gmra.mrb[8].mxu1 %v48299_v23 }
 0x25c   :  { %44953 = vmatpush3.bf16.msra.mxu1 %v48430_v4  ;;  %41663 = vmatprep.mubr.f32.mxu1 %v48226_v38  ;;  %v48598_v4 = vpack.c.bf16 %v5865_v50, %v5858_v46  ;;  %v48638_v50 = vpack.c.bf16 %v5863_v18, %v5856_v0 }
 0x25d   :  { %44955 = vmatprep.subr.bf16.mxu1 %v48415_v26  ;;  %41734 = vmatmul.mubr.f32.vlgmr.msra.gmra.mrb[10].mxu0 %v48024_v10 }
 0x25e   :  { %51699 = vst [vmem:[#allocation71_spill] sm:$0xff] %v48598_v4  ;;  %51701 = vst [vmem:[#allocation73_spill] sm:$0xff] %v48638_v50 }
 0x263   :  { %41664 = vmatmul.mubr.f32.vlgmr.msra.gmra.mrb[8].mxu1 %v48228_v49 }
 0x264   :  { %44957 = vmatpush3.bf16.msra.mxu1 %v48415_v26  ;;  %41670 = vmatprep.mubr.f32.mxu1 %v48240_v2 }
 0x265   :  { %44959 = vmatprep.subr.bf16.mxu1 %v48391_v34 }
 0x26b   :  { %41671 = vmatmul.mubr.f32.vlgmr.msra.gmra.mrb[8].mxu1 %v48243_v5 }
 0x26c   :  { %44961 = vmatpush3.bf16.msra.mxu1 %v48391_v34  ;;  %41677 = vmatprep.mubr.f32.mxu1 %v48258_v32 }
 0x26d   :  { %44963 = vmatprep.subr.bf16.mxu1 %v48418_v8 }
 0x273   :  { %41678 = vmatmul.mubr.f32.vlgmr.msra.gmra.mrb[8].mxu1 %v48261_v33 }
 0x274   :  { %44965 = vmatpush3.bf16.msra.mxu1 %v48418_v8  ;;  %41684 = vmatprep.mubr.f32.mxu1 %v48226_v38  ;;  %v48583_v8 = vand.u32 4294901760, %v48575_v12 }
 0x275   :  { %44967 = vmatprep.subr.bf16.mxu1 %v48391_v34 }
 0x276   :  { %51696 = vst [vmem:[#allocation68_spill] sm:$0xff] %v48583_v8  ;;  %v5251_v44 = vsub.f32 %v48575_v12, %v48583_v8 }
 0x278   :  { %v48594_v40 = vand.u32 4294901760, %v5251_v44 }
 0x27b   :  { %41685 = vmatmul.mubr.f32.vlgmr.msra.gmra.mrb[8].mxu1 %v48228_v49 }
 0x27c   :  { %44969 = vmatpush3.bf16.msra.mxu1 %v48391_v34  ;;  %41691 = vmatprep.mubr.f32.mxu1 %v48226_v38  ;;  %v194_v34 = vld [vmem:[#allocation11 + $0x8] sm:$0xff] }
 0x27d   :  { %44995 = vmatprep.subr.bf16.mxu1 %v48398_v48  ;;  %v5138_v62 = vsel %vm213_vm0, %v194_v34, 0 }
 0x283   :  { %41692 = vmatmul.mubr.f32.vlgmr.msra.gmra.mrb[8].mxu1 %v48228_v49 }
 0x284   :  { %44997 = vmatpush3.bf16.msra.mxu1 %v48398_v48  ;;  %41740 = vmatprep.mubr.f32.mxu1 %v48360_v61 }
 0x285   :  { %44999 = vmatprep.subr.bf16.mxu1 %v48435_v60 }
 0x287   :  { %41741 = vmatmul.mubr.f32.vlgmr.msra.gmra.mrb[10].mxu1 %v48374_v24 }
 0x288   :  { %45001 = vmatpush3.bf16.msra.mxu1 %v48435_v60  ;;  %41747 = vmatprep.mubr.f32.mxu1 %v48350_v53  ;;  %v48614_v60 = vld [vmem:[%s51419_s11 + $0x8] sm:$0xff] }
 0x289   :  { %45003 = vmatprep.subr.bf16.mxu1 %v48423_v42 }
 0x28f   :  { %41748 = vmatmul.mubr.f32.vlgmr.msra.gmra.mrb[10].mxu1 %v48364_v59 }
 0x290   :  { %45005 = vmatpush3.bf16.msra.mxu1 %v48423_v42  ;;  %41754 = vmatprep.mubr.f32.mxu1 %v48353_v56 }
 0x291   :  { %45007 = vmatprep.subr.bf16.mxu1 %v48398_v48 }
 0x297   :  { %41755 = vmatmul.mubr.f32.vlgmr.msra.gmra.mrb[10].mxu1 %v48367_v13 }
 0x298   :  { %45009 = vmatpush3.bf16.msra.mxu1 %v48398_v48  ;;  %41761 = vmatprep.mubr.f32.mxu1 %v48356_v57 }
 0x299   :  { %45011 = vmatprep.subr.bf16.mxu1 %v48427_v35 }
 0x29f   :  { %41762 = vmatmul.mubr.f32.vlgmr.msra.gmra.mrb[10].mxu1 %v48370_v16 }
 0x2a0   :  { %45013 = vmatpush3.bf16.msra.mxu1 %v48427_v35  ;;  %41768 = vmatprep.mubr.f32.mxu1 %v48350_v53 }
 0x2a1   :  { %45015 = vmatprep.subr.bf16.mxu1 %v48398_v48 }
 0x2a7   :  { %41769 = vmatmul.mubr.f32.vlgmr.msra.gmra.mrb[10].mxu1 %v48364_v59 }
 0x2a8   :  { %45017 = vmatpush3.bf16.msra.mxu1 %v48398_v48  ;;  %41775 = vmatprep.mubr.f32.mxu1 %v48350_v53  ;;  %v48558_v48 = vand.u32 4294901760, %v5138_v62 }
 0x2a9   :  { %45043 = vmatprep.subr.bf16.mxu1 %v48560_v41 }
 0x2aa   :  { %51691 = vst [vmem:[#allocation63_spill] sm:$0xff] %v48558_v48  ;;  %v48564_v27 = vpack.c.bf16 %v48558_v48, %v48556_v47  ;;  %v48578_v26 = vsub.f32 %v5138_v62, %v48558_v48 }
 0x2ac   :  { %51693 = vst [vmem:[#allocation65_spill] sm:$0xff] %v48564_v27  ;;  %45019 = vmatprep.subr.bf16.mxu0 %v48564_v27  ;;  %51695 = vst [vmem:[#allocation67_spill] sm:$0xff] %v48578_v26  ;;  %v48586_v7 = vand.u32 4294901760, %v48578_v26  ;;  %v48692_v29 = vpack.c.bf16 %v48578_v26, %v48575_v12 }
 0x2ad   :  { %45021 = vmatpush3.bf16.xpose.msra.mxu0 %v48564_v27 }
 0x2ae   :  { %51697 = vst [vmem:[#allocation69_spill] sm:$0xff] %v48586_v7  ;;  %v5258_v42 = vsub.f32 %v48578_v26, %v48586_v7  ;;  %51703 = vst [vmem:[#allocation75_spill] sm:$0xff] %v48692_v29 }
 0x2af   :  { %41776 = vmatmul.mubr.f32.vlgmr.msra.gmra.mrb[10].mxu1 %v48364_v59 }
 0x2b0   :  { %v48596_v35 = vand.u32 4294901760, %v5258_v42 }
 0x2b1   :  { %45045 = vmatpush3.bf16.xpose.msra.mxu1 %v48560_v41 }
 0x2b2   :  { %51698 = vst [vmem:[#allocation70_spill] sm:$0xff] %v48596_v35  ;;  %v48602_v19 = vpack.c.bf16 %v48596_v35, %v48594_v40  ;;  %45047 = vmatprep.subr.bf16.mxu1 %v48598_v4 }
 0x2b4   :  { %51700 = vst [vmem:[#allocation72_spill] sm:$0xff] %v48602_v19  ;;  %45023 = vmatprep.subr.bf16.mxu0 %v48602_v19 }
 0x2fe   :  { %v41567_v63 = vpop.f32.mrb[4].mxu1 }
 0x2ff   :  { %v2536_v30 = vpop.f32.mrb[5].mxu1 }
 0x303   :  { %v41651_v20 = vpop.f32.mrb[8].mxu0 }
 0x304   :  { %v3561_v25 = vsub.f32 %v41567_v63, %v41651_v20  ;;  %v3550_v37 = vpop.f32.mrb[9].mxu0 }
 0x305   :  { %v3560_v1 = vsub.f32 %v2536_v30, %v3550_v37 }
 0x306   :  { %v3565_v55 = vmul.f32 %v3561_v25, %v48609_v39  ;;  %v3573_v52 = vmul.f32 %v3561_v25, %v48614_v60 }
 0x307   :  { %v3564_v20 = vmul.f32 %v3560_v1, %v48619_v51  ;;  %v3572_v37 = vmul.f32 %v3560_v1, %v48624_v15 }
 0x32a   :  { %v41609_v22 = vpop.f32.mrb[6].mxu1 }
 0x32b   :  { %v3563_v14 = vadd.f32 %v41609_v22, %v41567_v63  ;;  %v3040_v31 = vpop.f32.mrb[7].mxu1 }
 0x32c   :  { %v3562_v34 = vadd.f32 %v3040_v31, %v2536_v30 }
 0x32d   :  { %v3567_v43 = vmul.f32 %v3563_v14, %v48614_v60  ;;  %v3575_v62 = vmul.f32 %v3563_v14, %v48609_v39 }
 0x32e   :  { %v3566_v58 = vmul.f32 %v3562_v34, %v48624_v15  ;;  %v3574_v11 = vmul.f32 %v3562_v34, %v48619_v51 }
 0x32f   :  { %v3569_v44 = vsub.f32 %v3565_v55, %v3567_v43  ;;  %v3577_v63 = vadd.f32 %v3575_v62, %v3573_v52 }
 0x330   :  { %v3568_v42 = vsub.f32 %v3564_v20, %v3566_v58  ;;  %v3576_v30 = vadd.f32 %v3574_v11, %v3572_v37  ;;  %v41735_v46 = vpop.f32.mrb[10].mxu0 }
 0x331   :  { %3571 = vst.msk [vmem:[#allocation2 + $0x8] sm:$0xff] %vm213_vm0, %v3569_v44  ;;  %3579 = vst.msk [vmem:[#allocation3 + $0x8] sm:$0xff] %vm213_vm0, %v3577_v63  ;;  %v4576_v25 = vpop.f32.mrb[11].mxu0 }
 0x332   :  { %3570 = vst.msk [vmem:[#allocation2] sm:$0xff] %vm213_vm0, %v3568_v42  ;;  %3578 = vst.msk [vmem:[#allocation3] sm:$0xff] %vm213_vm0, %v3576_v30 }
 0x338   :  { %v5111_v1 = vld [vmem:[#allocation2 + $0x8] sm:$0xff] }
 0x339   :  { %v48640_v22 = vld [vmem:[#allocation3 + $0x8] sm:$0xff]  ;;  %v5110_v14 = vld [vmem:[#allocation2] sm:$0xff]  ;;  %v5732_v31 = vsel %vm213_vm0, %v5111_v1, 0 }
 0x33a   :  { %v48643_v34 = vld [vmem:[#allocation3] sm:$0xff]  ;;  %v5119_v55 = vadd.f32 %v48640_v22, %v5111_v1  ;;  %v5729_v52 = vsel %vm213_vm0, %v5110_v14, 0  ;;  %v48647_v43 = vand.u32 4294901760, %v5732_v31 }
 0x33b   :  { %v5118_v62 = vadd.f32 %v48643_v34, %v5110_v14  ;;  %v48650_v20 = vand.u32 4294901760, %v5729_v52 }
 0x33c   :  { %v5126_v0 = vsel %vm213_vm0, %v5119_v55, 0  ;;  %v48654_v18 = vsub.f32 %v5732_v31, %v48647_v43 }
 0x33d   :  { %v5123_v37 = vsel %vm213_vm0, %v5118_v62, 0  ;;  %v48657_v58 = vand.u32 4294901760, %v5126_v0  ;;  %v48660_v11 = vsub.f32 %v5729_v52, %v48650_v20 }
 0x33e   :  { %v48662_v44 = vand.u32 4294901760, %v5123_v37  ;;  %v51450_v63 = vand.u32 4294901760, %v48654_v18 }
 0x33f   :  { %v48666_v42 = vsub.f32 %v5126_v0, %v48657_v58  ;;  %v51453_v30 = vand.u32 4294901760, %v48660_v11 }
 0x340   :  { %v48670_v1 = vsub.f32 %v5123_v37, %v48662_v44  ;;  %v5826_v14 = vsub.f32 %v48654_v18, %v51450_v63  ;;  %v48688_v63 = vpack.c.bf16 %v48572_v3, %v48570_v6 }
 0x341   :  { %v51456_v31 = vand.u32 4294901760, %v48666_v42  ;;  %v5816_v55 = vsub.f32 %v48660_v11, %v51453_v30 }
 0x342   :  { %v51457_v52 = vand.u32 4294901760, %v48670_v1  ;;  %v5827_v36 = vand.u32 4294901760, %v5826_v14  ;;  %51702 = vst [vmem:[#allocation74_spill] sm:$0xff] %v48688_v63 }
 0x343   :  { %v5220_v62 = vsub.f32 %v48666_v42, %v51456_v31  ;;  %v5817_v0 = vand.u32 4294901760, %v5816_v55 }
 0x344   :  { %v5210_v37 = vsub.f32 %v48670_v1, %v51457_v52 }
 0x345   :  { %41842 = vmatprep.mubr.f32.mxu1 %v5817_v0  ;;  %v5221_v30 = vand.u32 4294901760, %v5220_v62 }
 0x346   :  { %v5211_v28 = vand.u32 4294901760, %v5210_v37  ;;  %41843 = vmatmul.mubr.f32.vlgmr.msra.gmra.mrb[12].mxu1 %v5827_v36 }
 0x347   :  { %45049 = vmatpush3.bf16.xpose.msra.mxu1 %v48598_v4 }
 0x348   :  { %41782 = vmatprep.mubr.f32.mxu0 %v5211_v28  ;;  %45051 = vmatprep.subr.bf16.mxu1 %v48688_v63 }
 0x349   :  { %41783 = vmatmul.mubr.f32.vlgmr.msra.gmra.mrb[12].mxu0 %v5221_v30 }
 0x34a   :  { %45025 = vmatpush3.bf16.xpose.msra.mxu0 %v48602_v19 }
 0x34b   :  { %45027 = vmatprep.subr.bf16.mxu0 %v48692_v29 }
 0x356   :  { %v41693_v6 = vpop.f32.mrb[8].mxu1 }
 0x357   :  { %v5093_v3 = vadd.f32 %v41735_v46, %v41693_v6  ;;  %v4072_v14 = vpop.f32.mrb[9].mxu1 }
 0x358   :  { %v5092_v55 = vadd.f32 %v4576_v25, %v4072_v14 }
 0x359   :  { %v5097_v31 = vmul.f32 %v5093_v3, %v48614_v60  ;;  %v5105_v28 = vmul.f32 %v5093_v3, %v48609_v39 }
 0x35a   :  { %v5096_v4 = vmul.f32 %v5092_v55, %v48624_v15  ;;  %v5104_v19 = vmul.f32 %v5092_v55, %v48619_v51 }
 0x382   :  { %v41777_v36 = vpop.f32.mrb[10].mxu1 }
 0x383   :  { %v5091_v62 = vsub.f32 %v41693_v6, %v41777_v36  ;;  %v5080_v0 = vpop.f32.mrb[11].mxu1 }
 0x384   :  { %v5090_v37 = vsub.f32 %v4072_v14, %v5080_v0 }
 0x385   :  { %v5095_v30 = vmul.f32 %v5091_v62, %v48609_v39  ;;  %v5103_v52 = vmul.f32 %v5091_v62, %v48614_v60 }
 0x386   :  { %v5094_v46 = vmul.f32 %v5090_v37, %v48619_v51  ;;  %v5102_v25 = vmul.f32 %v5090_v37, %v48624_v15 }
 0x387   :  { %v5099_v21 = vsub.f32 %v5095_v30, %v5097_v31  ;;  %v5107_v6 = vadd.f32 %v5105_v28, %v5103_v52 }
 0x388   :  { %v5098_v36 = vsub.f32 %v5094_v46, %v5096_v4  ;;  %v5106_v14 = vadd.f32 %v5104_v19, %v5102_v25 }
 0x389   :  { %5101 = vst.msk [vmem:[#allocation2 + $0x18] sm:$0xff] %vm213_vm0, %v5099_v21  ;;  %5109 = vst.msk [vmem:[#allocation3 + $0x18] sm:$0xff] %vm213_vm0, %v5107_v6 }
 0x38a   :  { %5100 = vst.msk [vmem:[#allocation2 + $0x10] sm:$0xff] %vm213_vm0, %v5098_v36  ;;  %5108 = vst.msk [vmem:[#allocation3 + $0x10] sm:$0xff] %vm213_vm0, %v5106_v14 }
 0x390   :  { %v5113_v39 = vld [vmem:[#allocation2 + $0x18] sm:$0xff] }
 0x391   :  { %v48710_v60 = vld [vmem:[#allocation3 + $0x18] sm:$0xff]  ;;  %v5112_v3 = vld [vmem:[#allocation2 + $0x10] sm:$0xff]  ;;  %v5738_v51 = vsel %vm213_vm0, %v5113_v39, 0 }
 0x392   :  { %v48713_v55 = vld [vmem:[#allocation3 + $0x10] sm:$0xff]  ;;  %v5121_v15 = vadd.f32 %v48710_v60, %v5113_v39  ;;  %v5735_v4 = vsel %vm213_vm0, %v5112_v3, 0  ;;  %v48717_v19 = vand.u32 4294901760, %v5738_v51 }
 0x393   :  { %v5120_v21 = vadd.f32 %v48713_v55, %v5112_v3  ;;  %v48720_v31 = vand.u32 4294901760, %v5735_v4 }
 0x394   :  { %v5132_v52 = vsel %vm213_vm0, %v5121_v15, 0  ;;  %v48724_v62 = vsub.f32 %v5738_v51, %v48717_v19 }
 0x395   :  { %v5129_v0 = vsel %vm213_vm0, %v5120_v21, 0  ;;  %v48727_v37 = vand.u32 4294901760, %v5132_v52  ;;  %v5834_v28 = vsub.f32 %v5735_v4, %v48720_v31 }
 0x396   :  { %v48730_v30 = vand.u32 4294901760, %v5129_v0  ;;  %v5845_v46 = vand.u32 4294901760, %v48724_v62 }
 0x397   :  { %v48734_v25 = vsub.f32 %v5132_v52, %v48727_v37  ;;  %v5835_v6 = vand.u32 4294901760, %v5834_v28 }
 0x398   :  { %v5228_v36 = vsub.f32 %v5129_v0, %v48730_v30  ;;  %v5846_v14 = vsub.f32 %v48724_v62, %v5845_v46  ;;  %v48759_v0 = vpack.c.bf16 %v48586_v7, %v48583_v8 }
 0x399   :  { %v5239_v39 = vand.u32 4294901760, %v48734_v25  ;;  %v5836_v3 = vsub.f32 %v5834_v28, %v5835_v6 }
 0x39a   :  { %v5229_v51 = vand.u32 4294901760, %v5228_v36  ;;  %v5847_v10 = vand.u32 4294901760, %v5846_v14  ;;  %51704 = vst [vmem:[#allocation76_spill] sm:$0xff] %v48759_v0 }
 0x39b   :  { %v5240_v15 = vsub.f32 %v48734_v25, %v5239_v39  ;;  %v5837_v4 = vand.u32 4294901760, %v5836_v3 }
 0x39c   :  { %v5230_v21 = vsub.f32 %v5228_v36, %v5229_v51 }
 0x39d   :  { %41845 = vmatprep.mubr.f32.mxu1 %v5837_v4  ;;  %v5241_v52 = vand.u32 4294901760, %v5240_v15  ;;  %v51705_v4 = vand.u32 4294901760, %v48660_v11 }
 0x39e   :  { %v5231_v9 = vand.u32 4294901760, %v5230_v21  ;;  %41846 = vmatmul.mubr.f32.gmra.mrb[14].mxu1 %v5847_v10  ;;  %v200_v10 = vld [vmem:[#allocation15 + $0x8] sm:$0xff]  ;;  %v51706_v21 = vand.u32 4294901760, %v48670_v1 }
 0x39f   :  { %41852 = vmatprep.mubr.f32.mxu1 %v48650_v20  ;;  %v6350_v3 = vsel %vm213_vm0, %v200_v10, 0 }
 0x3a0   :  { %41785 = vmatprep.mubr.f32.mxu0 %v5231_v9  ;;  %v199_v9 = vld [vmem:[#allocation15] sm:$0xff] }
 0x3a1   :  { %41786 = vmatmul.mubr.f32.gmra.mrb[14].mxu0 %v5241_v52  ;;  %v6347_v14 = vsel %vm213_vm0, %v199_v9, 0  ;;  %v6338_v9 = vsel %vm213_vm0, %v48640_v22, 0 }
 0x3a2   :  { %41792 = vmatprep.mubr.f32.mxu0 %v48662_v44  ;;  %41853 = vmatmul.mubr.f32.vlgmr.msra.gmra.mrb[12].mxu1 %v48647_v43  ;;  %v48769_v15 = vand.u32 4294901760, %v6347_v14 }
 0x3a3   :  { %41855 = vmatprep.mubr.f32.mxu1 %v48720_v31  ;;  %45053 = vmatpush3.bf16.xpose.msra.mxu1 %v48688_v63 }
 0x3a4   :  { %45055 = vmatprep.subr.bf16.mxu1 %v48560_v41  ;;  %v48781_v52 = vsub.f32 %v6347_v14, %v48769_v15 }
 0x3a5   :  { %41793 = vmatmul.mubr.f32.vlgmr.msra.gmra.mrb[12].mxu0 %v48657_v58 }
 0x3a6   :  { %41795 = vmatprep.mubr.f32.mxu0 %v48730_v30  ;;  %45029 = vmatpush3.bf16.xpose.msra.mxu0 %v48692_v29 }
 0x3a7   :  { %41856 = vmatmul.mubr.f32.gmra.mrb[14].mxu1 %v48717_v19  ;;  %45031 = vmatprep.subr.bf16.mxu0 %v48564_v27 }
 0x3a8   :  { %41862 = vmatprep.mubr.f32.mxu1 %v48660_v11  ;;  %v51708_v11 = vand.u32 4294901760, %v48666_v42 }
 0x3a9   :  { %41796 = vmatmul.mubr.f32.gmra.mrb[14].mxu0 %v48727_v37 }
 0x3aa   :  { %41802 = vmatprep.mubr.f32.mxu0 %v48670_v1  ;;  %v6335_v1 = vsel %vm213_vm0, %v48643_v34, 0  ;;  %v6341_v34 = vsel %vm213_vm0, %v48713_v55, 0 }
 0x3ab   :  { %41863 = vmatmul.mubr.f32.vlgmr.msra.gmra.mrb[12].mxu1 %v48654_v18 }
 0x3ac   :  { %41865 = vmatprep.mubr.f32.mxu1 %v5834_v28  ;;  %45057 = vmatpush3.bf16.xpose.msra.mxu1 %v48560_v41  ;;  %v48771_v28 = vand.u32 4294901760, %v6350_v3 }
 0x3ad   :  { %41803 = vmatmul.mubr.f32.vlgmr.msra.gmra.mrb[12].mxu0 %v48666_v42  ;;  %45059 = vmatprep.subr.bf16.mxu1 %v48638_v50  ;;  %v48801_v42 = vand.u32 4294901760, %v6335_v1 }
 0x3ae   :  { %41805 = vmatprep.mubr.f32.mxu0 %v5228_v36  ;;  %45033 = vmatpush3.bf16.xpose.msra.mxu0 %v48564_v27  ;;  %v51707_v36 = vand.u32 4294901760, %v48654_v18  ;;  %v48795_v18 = vand.u32 4294901760, %v48781_v52 }
 0x3af   :  { %41866 = vmatmul.mubr.f32.gmra.mrb[14].mxu1 %v48724_v62  ;;  %45035 = vmatprep.subr.bf16.mxu0 %v48759_v0  ;;  %v48784_v62 = vsub.f32 %v6350_v3, %v48771_v28  ;;  %v6420_v55 = vsub.f32 %v6335_v1, %v48801_v42 }
 0x3b0   :  { %41872 = vmatprep.mubr.f32.mxu1 %v51705_v4  ;;  %v6463_v10 = vsub.f32 %v48781_v52, %v48795_v18 }
 0x3b1   :  { %41806 = vmatmul.mubr.f32.gmra.mrb[14].mxu0 %v48734_v25  ;;  %v48824_v25 = vand.u32 4294901760, %v6341_v34 }
 0x3b2   :  { %41812 = vmatprep.mubr.f32.mxu0 %v51706_v21  ;;  %v48834_v3 = vand.u32 4294901760, %v6463_v10 }
 0x3b3   :  { %41873 = vmatmul.mubr.f32.vlgmr.msra.gmra.mrb[12].mxu1 %v51707_v36  ;;  %v6440_v36 = vsub.f32 %v6341_v34, %v48824_v25 }
 0x3b4   :  { %41875 = vmatprep.mubr.f32.mxu1 %v5835_v6  ;;  %45061 = vmatpush3.bf16.xpose.msra.mxu1 %v48638_v50  ;;  %v48798_v6 = vand.u32 4294901760, %v48784_v62 }
 0x3b5   :  { %41813 = vmatmul.mubr.f32.vlgmr.msra.gmra.mrb[12].mxu0 %v51708_v11  ;;  %45063 = vmatprep.subr.bf16.mxu1 %v48560_v41 }
 0x3b6   :  { %41815 = vmatprep.mubr.f32.mxu0 %v5229_v51  ;;  %45037 = vmatpush3.bf16.xpose.msra.mxu0 %v48759_v0  ;;  %v48815_v51 = vand.u32 4294901760, %v6338_v9  ;;  %v6470_v22 = vsub.f32 %v48784_v62, %v48798_v6 }
 0x3b7   :  { %41876 = vmatmul.mubr.f32.gmra.mrb[14].mxu1 %v5845_v46  ;;  %45039 = vmatprep.subr.bf16.mxu0 %v48564_v27  ;;  %v48813_v46 = vpack.c.bf16 %v48771_v28, %v48769_v15 }
 0x3b8   :  { %41882 = vmatprep.mubr.f32.mxu1 %v48650_v20  ;;  %v6430_v14 = vsub.f32 %v6338_v9, %v48815_v51  ;;  %v48836_v4 = vand.u32 4294901760, %v6470_v22  ;;  %v6441_v22 = vand.u32 4294901760, %v6440_v36 }
 0x3b9   :  { %41816 = vmatmul.mubr.f32.gmra.mrb[14].mxu0 %v5239_v39  ;;  %51709 = vst [vmem:[#allocation77_spill] sm:$0xff] %v48813_v46  ;;  %v6344_v39 = vsel %vm213_vm0, %v48710_v60, 0  ;;  %v6421_v60 = vand.u32 4294901760, %v6420_v55 }
 0x3ba   :  { %41822 = vmatprep.mubr.f32.mxu0 %v48662_v44  ;;  %v6449_v21 = vand.u32 4294901760, %v6344_v39  ;;  %v6431_v11 = vand.u32 4294901760, %v6430_v14  ;;  %v48845_v1 = vpack.c.bf16 %v48836_v4, %v48834_v3  ;;  %v6442_v34 = vsub.f32 %v6440_v36, %v6441_v22 }
 0x3bb   :  { %41883 = vmatmul.mubr.f32.vlgmr.msra.gmra.mrb[12].mxu1 %v48647_v43  ;;  %v6422_v10 = vsub.f32 %v6420_v55, %v6421_v60 }
 0x3bc   :  { %41885 = vmatprep.mubr.f32.mxu1 %v48720_v31  ;;  %45065 = vmatpush3.bf16.xpose.msra.mxu1 %v48560_v41  ;;  %51710 = vst [vmem:[#allocation78_spill] sm:$0xff] %v48845_v1  ;;  %v6450_v9 = vsub.f32 %v6344_v39, %v6449_v21 }
 0x3bd   :  { %41823 = vmatmul.mubr.f32.vlgmr.msra.gmra.mrb[12].mxu0 %v48657_v58 }
 0x3be   :  { %41825 = vmatprep.mubr.f32.mxu0 %v48730_v30  ;;  %45041 = vmatpush3.bf16.xpose.msra.mxu0 %v48564_v27 }
 0x3bf   :  { %41886 = vmatmul.mubr.f32.gmra.mrb[14].mxu1 %v48717_v19  ;;  %45067 = vmatprep.subr.bf16.mxu0 %v48813_v46 }
 0x3c0   :  { %41892 = vmatprep.mubr.f32.mxu1 %v48650_v20  ;;  %v6432_v20 = vsub.f32 %v6430_v14, %v6431_v11 }
 0x3c1   :  { %41826 = vmatmul.mubr.f32.gmra.mrb[14].mxu0 %v48727_v37 }
 0x3c2   :  { %41832 = vmatprep.mubr.f32.mxu0 %v48662_v44  ;;  %v6423_v44 = vand.u32 4294901760, %v6422_v10 }
 0x3c3   :  { %41893 = vmatmul.mubr.f32.vlgmr.msra.gmra.mrb[12].mxu1 %v48647_v43  ;;  %v6451_v43 = vand.u32 4294901760, %v6450_v9 }
 0x3c4   :  { %41895 = vmatprep.mubr.f32.mxu1 %v48720_v31  ;;  %v6433_v31 = vand.u32 4294901760, %v6432_v20 }
 0x3c5   :  { %41833 = vmatmul.mubr.f32.vlgmr.msra.gmra.mrb[12].mxu0 %v48657_v58  ;;  %v6452_v39 = vsub.f32 %v6450_v9, %v6451_v43  ;;  %v48857_v58 = vpack.c.bf16 %v48784_v62, %v48781_v52 }
 0x3c6   :  { %41835 = vmatprep.mubr.f32.mxu0 %v48730_v30  ;;  %45069 = vmatpush3.bf16.xpose.msra.mxu0 %v48813_v46  ;;  %v6443_v30 = vand.u32 4294901760, %v6442_v34 }
 0x3c7   :  { %41896 = vmatmul.mubr.f32.gmra.mrb[14].mxu1 %v48717_v19  ;;  %45071 = vmatprep.subr.bf16.mxu0 %v48845_v1  ;;  %51711 = vst [vmem:[#allocation79_spill] sm:$0xff] %v48857_v58  ;;  %v6453_v19 = vand.u32 4294901760, %v6452_v39 }
 0x3c8   :  { %41962 = vmatprep.mubr.f32.mxu1 %v48834_v3 }
 0x3c9   :  { %41836 = vmatmul.mubr.f32.gmra.mrb[14].mxu0 %v48727_v37  ;;  %v48868_v37 = vpack.c.bf16 %v48798_v6, %v48795_v18 }
 0x3ca   :  { %41902 = vmatprep.mubr.f32.mxu0 %v6423_v44 }
 0x3cb   :  { %51712 = vst [vmem:[#allocation80_spill] sm:$0xff] %v48868_v37 }
 0x3cd   :  { %41903 = vmatmul.mubr.f32.vlgmr.msra.gmra.mrb[16].mxu0 %v6433_v31 }
 0x3ce   :  { %41905 = vmatprep.mubr.f32.mxu0 %v6443_v30  ;;  %45073 = vmatpush3.bf16.xpose.msra.mxu0 %v48845_v1 }
 0x3cf   :  { %45075 = vmatprep.subr.bf16.mxu0 %v48857_v58 }
 0x3d1   :  { %41906 = vmatmul.mubr.f32.gmra.mrb[18].mxu0 %v6453_v19  ;;  %v196_v19 = vld [vmem:[#allocation12 + $0x8] sm:$0xff] }
 0x3d2   :  { %41912 = vmatprep.mubr.f32.mxu0 %v48801_v42 }
 0x3d5   :  { %41913 = vmatmul.mubr.f32.vlgmr.msra.gmra.mrb[16].mxu0 %v48815_v51 }
 0x3d6   :  { %41915 = vmatprep.mubr.f32.mxu0 %v48824_v25  ;;  %45077 = vmatpush3.bf16.xpose.msra.mxu0 %v48857_v58 }
 0x3d7   :  { %45079 = vmatprep.subr.bf16.mxu0 %v48813_v46 }
 0x3d9   :  { %41916 = vmatmul.mubr.f32.gmra.mrb[18].mxu0 %v6449_v21 }
 0x3da   :  { %41922 = vmatprep.mubr.f32.mxu0 %v6420_v55  ;;  %v195_v55 = vld [vmem:[#allocation12] sm:$0xff] }
 0x3dd   :  { %41923 = vmatmul.mubr.f32.vlgmr.msra.gmra.mrb[16].mxu0 %v6430_v14  ;;  %v7961_v14 = vsel %vm213_vm0, %v195_v55, 0  ;;  %v7964_v55 = vsel %vm213_vm0, %v196_v19, 0 }
 0x3de   :  { %41925 = vmatprep.mubr.f32.mxu0 %v6440_v36  ;;  %45081 = vmatpush3.bf16.xpose.msra.mxu0 %v48813_v46 }
 0x3df   :  { %45083 = vmatprep.subr.bf16.mxu0 %v48868_v37 }
 0x3e1   :  { %41926 = vmatmul.mubr.f32.gmra.mrb[18].mxu0 %v6450_v9 }
 0x3e2   :  { %41932 = vmatprep.mubr.f32.mxu0 %v6421_v60  ;;  %v48882_v60 = vand.u32 4294901760, %v7961_v14 }
 0x3e4   :  { %v48885_v36 = vsub.f32 %v7961_v14, %v48882_v60  ;;  %v48896_v14 = vand.u32 4294901760, %v7964_v55 }
 0x3e5   :  { %41933 = vmatmul.mubr.f32.vlgmr.msra.gmra.mrb[16].mxu0 %v6431_v11 }
 0x3e6   :  { %41935 = vmatprep.mubr.f32.mxu0 %v6441_v22  ;;  %45085 = vmatpush3.bf16.xpose.msra.mxu0 %v48868_v37  ;;  %v48888_v11 = vand.u32 4294901760, %v48885_v36 }
 0x3e7   :  { %45087 = vmatprep.subr.bf16.mxu0 %v48813_v46 }
 0x3e8   :  { %v8036_v9 = vsub.f32 %v48885_v36, %v48888_v11 }
 0x3e9   :  { %41936 = vmatmul.mubr.f32.gmra.mrb[18].mxu0 %v6451_v43 }
 0x3ea   :  { %41942 = vmatprep.mubr.f32.mxu0 %v48801_v42 }
 0x3ed   :  { %41943 = vmatmul.mubr.f32.vlgmr.msra.gmra.mrb[16].mxu0 %v48815_v51 }
 0x3ee   :  { %41945 = vmatprep.mubr.f32.mxu0 %v48824_v25  ;;  %45089 = vmatpush3.bf16.xpose.msra.mxu0 %v48813_v46 }
 0x3f1   :  { %41946 = vmatmul.mubr.f32.gmra.mrb[18].mxu0 %v6449_v21 }
 0x3f2   :  { %41952 = vmatprep.mubr.f32.mxu0 %v48801_v42  ;;  %v48892_v42 = vand.u32 4294901760, %v8036_v9  ;;  %v48899_v9 = vsub.f32 %v7964_v55, %v48896_v14 }
 0x3f4   :  { %v48902_v37 = vand.u32 4294901760, %v48899_v9 }
 0x3f5   :  { %41953 = vmatmul.mubr.f32.vlgmr.msra.gmra.mrb[16].mxu0 %v48815_v51 }
 0x3f6   :  { %41955 = vmatprep.mubr.f32.mxu0 %v48824_v25 }
 0x3f9   :  { %41956 = vmatmul.mubr.f32.gmra.mrb[18].mxu0 %v6449_v21 }
 0x3fa   :  { %42046 = vmatprep.mubr.f32.mxu0 %v48892_v42 }
 0x496   :  { %v41894_v51 = vpop.f32.mrb[12].mxu1 }
 0x497   :  { %v6312_v25 = vpop.f32.mrb[13].mxu1 }
 0x498   :  { %v41834_v21 = vpop.f32.mrb[12].mxu0 }
 0x499   :  { %v6945_v10 = vadd.f32 %v41894_v51, %v41834_v21  ;;  %v5706_v22 = vpop.f32.mrb[13].mxu0 }
 0x49a   :  { %v6944_v20 = vadd.f32 %v6312_v25, %v5706_v22  ;;  %v41897_v43 = vpop.f32.mrb[14].mxu1  ;;  %v8046_v25 = vsub.f32 %v48899_v9, %v48902_v37 }
 0x49b   :  { %v6324_v44 = vpop.f32.mrb[15].mxu1 }
 0x49c   :  { %v41837_v34 = vpop.f32.mrb[14].mxu0  ;;  %v48906_v41 = vand.u32 4294901760, %v8046_v25 }
 0x49d   :  { %v6947_v31 = vadd.f32 %v41897_v43, %v41837_v34  ;;  %v5718_v39 = vpop.f32.mrb[15].mxu0 }
 0x49e   :  { %v6946_v30 = vadd.f32 %v6324_v44, %v5718_v39 }
 0x4c8   :  { %v41954_v51 = vpop.f32.mrb[16].mxu0 }
 0x4c9   :  { %v6941_v58 = vsub.f32 %v41834_v21, %v41954_v51  ;;  %v6918_v1 = vpop.f32.mrb[17].mxu0 }
 0x4ca   :  { %v6940_v43 = vsub.f32 %v5706_v22, %v6918_v1 }
 0x4cb   :  { %v6956_v46 = vand.u32 4294901760, %v6941_v58  ;;  %v7455_v44 = vsub.f32 %v6945_v10, %v6941_v58  ;;  %v7959_v0 = vadd.f32 %v6945_v10, %v6941_v58 }
 0x4cc   :  { %v6953_v50 = vand.u32 4294901760, %v6940_v43  ;;  %v7454_v19 = vsub.f32 %v6944_v20, %v6940_v43  ;;  %v7958_v29 = vadd.f32 %v6944_v20, %v6940_v43  ;;  %v41957_v63 = vpop.f32.mrb[18].mxu0 }
 0x4cd   :  { %v7048_v55 = vsub.f32 %v6941_v58, %v6956_v46  ;;  %v7460_v27 = vand.u32 4294901760, %v7455_v44  ;;  %v7970_v54 = vand.u32 4294901760, %v7959_v0  ;;  %v6943_v45 = vsub.f32 %v41837_v34, %v41957_v63  ;;  %v6930_v16 = vpop.f32.mrb[19].mxu0 }
 0x4ce   :  { %v48908_v33 = vpack.c.bf16 %v6956_v46, %v6953_v50  ;;  %v7041_v57 = vsub.f32 %v6940_v43, %v6953_v50  ;;  %v7457_v21 = vand.u32 4294901760, %v7454_v19  ;;  %v7967_v51 = vand.u32 4294901760, %v7958_v29 }
 0x4cf   :  { %v7552_v1 = vsub.f32 %v7455_v44, %v7460_v27  ;;  %v8062_v22 = vsub.f32 %v7959_v0, %v7970_v54  ;;  %v8492_v13 = vand.u32 4294901760, %v6943_v45  ;;  %v8991_v10 = vsub.f32 %v6947_v31, %v6943_v45 }
 0x4d0   :  { %v48910_v32 = vpack.c.bf16 %v7460_v27, %v7457_v21  ;;  %v7545_v20 = vsub.f32 %v7454_v19, %v7457_v21  ;;  %v48912_v5 = vpack.c.bf16 %v7970_v54, %v7967_v51  ;;  %v8055_v25 = vsub.f32 %v7958_v29, %v7967_v51  ;;  %45091 = vmatprep.subr.bf16.mxu1 %v48908_v33 }
 0x4d1   :  { %v48915_v58 = vsub.f32 %v6943_v45, %v8492_v13  ;;  %v8996_v63 = vand.u32 4294901760, %v8991_v10  ;;  %v9495_v46 = vadd.f32 %v6947_v31, %v6943_v45  ;;  %v6942_v34 = vsub.f32 %v5718_v39, %v6930_v16  ;;  %45093 = vmatpush3.bf16.msra.mxu1 %v48908_v33 }
 0x4d2   :  { %45139 = vmatprep.subr.bf16.mxu0 %v48912_v5  ;;  %v7042_v50 = vand.u32 4294901760, %v7041_v57  ;;  %v7049_v0 = vand.u32 4294901760, %v7048_v55  ;;  %v45098_v43 = vpack.c.bf16 %v7048_v55, %v7041_v57  ;;  %v8056_v27 = vand.u32 4294901760, %v8055_v25 }
 0x4d3   :  { %v9088_v44 = vsub.f32 %v8991_v10, %v8996_v63  ;;  %v9500_v19 = vand.u32 4294901760, %v9495_v46  ;;  %v8489_v54 = vand.u32 4294901760, %v6942_v34  ;;  %v8990_v21 = vsub.f32 %v6946_v30, %v6942_v34  ;;  %45141 = vmatpush3.bf16.msra.mxu0 %v48912_v5 }
 0x4d4   :  { %v9494_v29 = vadd.f32 %v6946_v30, %v6942_v34  ;;  %41963 = vmatmul.mubr.f32.vlgmr.msra.gmra.mrb[16].mxu1 %v48836_v4  ;;  %v7043_v51 = vsub.f32 %v7041_v57, %v7042_v50  ;;  %v7050_v45 = vsub.f32 %v7048_v55, %v7049_v0  ;;  %v8057_v16 = vsub.f32 %v8055_v25, %v8056_v27 }
 0x4d5   :  { %v48921_v31 = vsub.f32 %v9495_v46, %v9500_v19  ;;  %v48923_v39 = vpack.c.bf16 %v8492_v13, %v8489_v54  ;;  %v8577_v56 = vsub.f32 %v6942_v34, %v8489_v54  ;;  %v8993_v59 = vand.u32 4294901760, %v8990_v21  ;;  %41969 = vmatprep.mubr.f32.mxu1 %v48769_v15 }
 0x4d6   :  { %v9497_v10 = vand.u32 4294901760, %v9494_v29  ;;  %42047 = vmatmul.mubr.f32.vlgmr.msra.gmra.mrb[20].mxu0 %v48906_v41  ;;  %v7044_v2 = vand.u32 4294901760, %v7043_v51  ;;  %v7051_v49 = vand.u32 4294901760, %v7050_v45  ;;  %v8058_v53 = vand.u32 4294901760, %v8057_v16 }
 0x4d7   :  { %v48927_v30 = vpack.c.bf16 %v8996_v63, %v8993_v59  ;;  %v9081_v24 = vsub.f32 %v8990_v21, %v8993_v59  ;;  %v8063_v57 = vand.u32 4294901760, %v8062_v22  ;;  %v45146_v55 = vpack.c.bf16 %v8062_v22, %v8055_v25  ;;  %42053 = vmatprep.mubr.f32.mxu0 %v48882_v60 }
 0x4d8   :  { %v48930_v46 = vpack.c.bf16 %v9500_v19, %v9497_v10  ;;  %v9585_v13 = vsub.f32 %v9494_v29, %v9497_v10  ;;  %v45094_v34 = vpack.c.bf16 %v7051_v49, %v7044_v2  ;;  %v48932_v54 = vpack.c.bf16 %v7049_v0, %v7042_v50 }
 0x4d9   :  { %v8064_v38 = vsub.f32 %v8062_v22, %v8063_v57  ;;  %v48934_v23 = vpack.c.bf16 %v8063_v57, %v8056_v27  ;;  %v7546_v61 = vand.u32 4294901760, %v7545_v20  ;;  %v7553_v51 = vand.u32 4294901760, %v7552_v1 }
 0x4da   :  { %45095 = vmatprep.subr.bf16.mxu1 %v45094_v34  ;;  %v9082_v45 = vand.u32 4294901760, %v9081_v24  ;;  %v9089_v63 = vand.u32 4294901760, %v9088_v44  ;;  %v48936_v16 = vpack.c.bf16 %v7552_v1, %v7545_v20  ;;  %v48938_v59 = vpack.c.bf16 %v9088_v44, %v9081_v24 }
 0x4db   :  { %45097 = vmatpush3.bf16.msra.mxu1 %v45094_v34  ;;  %v8065_v25 = vand.u32 4294901760, %v8064_v38  ;;  %v7547_v19 = vsub.f32 %v7545_v20, %v7546_v61  ;;  %v7554_v21 = vsub.f32 %v7552_v1, %v7553_v51  ;;  %v48940_v29 = vpack.c.bf16 %v7553_v51, %v7546_v61 }
 0x4dc   :  { %45099 = vmatprep.subr.bf16.mxu1 %v45098_v43  ;;  %v9083_v49 = vsub.f32 %v9081_v24, %v9082_v45  ;;  %v9090_v2 = vsub.f32 %v9088_v44, %v9089_v63  ;;  %v48942_v22 = vpack.c.bf16 %v9089_v63, %v9082_v45  ;;  %v8578_v50 = vand.u32 4294901760, %v8577_v56 }
 0x4dd   :  { %v45142_v0 = vpack.c.bf16 %v8065_v25, %v8058_v53  ;;  %v7548_v27 = vand.u32 4294901760, %v7547_v19  ;;  %v7555_v10 = vand.u32 4294901760, %v7554_v21  ;;  %v8585_v57 = vand.u32 4294901760, %v48915_v58 }
 0x4de   :  { %41970 = vmatmul.mubr.f32.vlgmr.msra.gmra.mrb[16].mxu1 %v48771_v28  ;;  %v9084_v17 = vand.u32 4294901760, %v9083_v49  ;;  %v9091_v34 = vand.u32 4294901760, %v9090_v2  ;;  %v8579_v38 = vsub.f32 %v8577_v56, %v8578_v50  ;;  %v48947_v1 = vpack.c.bf16 %v48915_v58, %v8577_v56  ;;  %v49096_v2 = vld [vmem:[#allocation18] sm:$0xff] }
 0x4df   :  { %45143 = vmatprep.subr.bf16.mxu0 %v45142_v0  ;;  %45101 = vmatpush3.bf16.msra.mxu1 %v45098_v43  ;;  %v45118_v61 = vpack.c.bf16 %v7555_v10, %v7548_v27  ;;  %v8586_v24 = vsub.f32 %v48915_v58, %v8585_v57  ;;  %v48950_v20 = vpack.c.bf16 %v8585_v57, %v8578_v50  ;;  %v9586_v53 = vand.u32 4294901760, %v9585_v13 }
 0x4e0   :  { %45145 = vmatpush3.bf16.msra.mxu0 %v45142_v0  ;;  %45103 = vmatprep.subr.bf16.mxu1 %v48908_v33  ;;  %v45190_v44 = vpack.c.bf16 %v9091_v34, %v9084_v17  ;;  %v8580_v51 = vand.u32 4294901760, %v8579_v38  ;;  %v9593_v45 = vand.u32 4294901760, %v48921_v31  ;;  %v48955_v63 = vpack.c.bf16 %v48921_v31, %v9585_v13 }
 0x4e1   :  { %45147 = vmatprep.subr.bf16.mxu0 %v45146_v55  ;;  %41976 = vmatprep.mubr.f32.mxu1 %v48781_v52  ;;  %v8587_v56 = vand.u32 4294901760, %v8586_v24  ;;  %v9587_v43 = vsub.f32 %v9585_v13, %v9586_v53 }
 0x4e2   :  { %v9594_v58 = vsub.f32 %v48921_v31, %v9593_v45  ;;  %v48959_v25 = vpack.c.bf16 %v9593_v45, %v9586_v53 }
 0x4e3   :  { %42054 = vmatmul.mubr.f32.vlgmr.msra.gmra.mrb[20].mxu0 %v48896_v14  ;;  %v48962_v19 = vpack.c.bf16 %v8587_v56, %v8580_v51  ;;  %v9588_v17 = vand.u32 4294901760, %v9587_v43 }
 0x4e4   :  { %45149 = vmatpush3.bf16.msra.mxu0 %v45146_v55  ;;  %42060 = vmatprep.mubr.f32.mxu0 %v48885_v36  ;;  %v9595_v21 = vand.u32 4294901760, %v9594_v58 }
 0x4e5   :  { %45151 = vmatprep.subr.bf16.mxu0 %v48912_v5 }
 0x4e6   :  { %41977 = vmatmul.mubr.f32.vlgmr.msra.gmra.mrb[16].mxu1 %v48784_v62  ;;  %v48967_v49 = vpack.c.bf16 %v9595_v21, %v9588_v17 }
 0x4e7   :  { %45105 = vmatpush3.bf16.msra.mxu1 %v48908_v33  ;;  %41983 = vmatprep.mubr.f32.mxu1 %v48795_v18 }
 0x4e8   :  { %45107 = vmatprep.subr.bf16.mxu1 %v48932_v54 }
 0x4eb   :  { %42061 = vmatmul.mubr.f32.vlgmr.msra.gmra.mrb[20].mxu0 %v48899_v9 }
 0x4ec   :  { %45153 = vmatpush3.bf16.msra.mxu0 %v48912_v5  ;;  %42067 = vmatprep.mubr.f32.mxu0 %v48888_v11 }
 0x4ed   :  { %45155 = vmatprep.subr.bf16.mxu0 %v48934_v23 }
 0x4ee   :  { %41984 = vmatmul.mubr.f32.vlgmr.msra.gmra.mrb[16].mxu1 %v48798_v6 }
 0x4ef   :  { %45109 = vmatpush3.bf16.msra.mxu1 %v48932_v54  ;;  %41990 = vmatprep.mubr.f32.mxu1 %v48769_v15 }
 0x4f0   :  { %45111 = vmatprep.subr.bf16.mxu1 %v48908_v33 }
 0x4f3   :  { %42068 = vmatmul.mubr.f32.vlgmr.msra.gmra.mrb[20].mxu0 %v48902_v37 }
 0x4f4   :  { %45157 = vmatpush3.bf16.msra.mxu0 %v48934_v23  ;;  %42074 = vmatprep.mubr.f32.mxu0 %v48882_v60  ;;  %v51716_v23 = vld [vmem:[#allocation38_spill] sm:$0xff] }
 0x4f5   :  { %45159 = vmatprep.subr.bf16.mxu0 %v48912_v5 }
 0x4f6   :  { %41991 = vmatmul.mubr.f32.vlgmr.msra.gmra.mrb[16].mxu1 %v48771_v28 }
 0x4f7   :  { %45113 = vmatpush3.bf16.msra.mxu1 %v48908_v33  ;;  %41997 = vmatprep.mubr.f32.mxu1 %v48769_v15  ;;  %v51715_v33 = vld [vmem:[#allocation30_spill] sm:$0xff] }
 0x4f8   :  { %45115 = vmatprep.subr.bf16.mxu1 %v48910_v32 }
 0x4fb   :  { %42075 = vmatmul.mubr.f32.vlgmr.msra.gmra.mrb[20].mxu0 %v48896_v14 }
 0x4fc   :  { %45161 = vmatpush3.bf16.msra.mxu0 %v48912_v5  ;;  %42081 = vmatprep.mubr.f32.mxu0 %v48882_v60  ;;  %v51713_v5 = vld [vmem:[#allocation28_spill] sm:$0xff] }
 0x4fd   :  { %45187 = vmatprep.subr.bf16.mxu0 %v48927_v30 }
 0x4fe   :  { %41998 = vmatmul.mubr.f32.vlgmr.msra.gmra.mrb[16].mxu1 %v48771_v28 }
 0x4ff   :  { %45117 = vmatpush3.bf16.msra.mxu1 %v48910_v32  ;;  %42004 = vmatprep.mubr.f32.mxu1 %v48594_v40 }
 0x500   :  { %45119 = vmatprep.subr.bf16.mxu1 %v45118_v61 }
 0x502   :  { %42005 = vmatmul.mubr.f32.vlgmr.msra.gmra.mrb[18].mxu1 %v48596_v35 }
 0x503   :  { %42082 = vmatmul.mubr.f32.vlgmr.msra.gmra.mrb[20].mxu0 %v48896_v14  ;;  %45121 = vmatpush3.bf16.msra.mxu1 %v45118_v61 }
 0x504   :  { %45189 = vmatpush3.bf16.msra.mxu0 %v48927_v30  ;;  %45123 = vmatprep.subr.bf16.mxu1 %v48936_v16 }
 0x505   :  { %45191 = vmatprep.subr.bf16.mxu0 %v45190_v44  ;;  %42130 = vmatprep.mubr.f32.mxu0 %v48594_v40 }
 0x506   :  { %42011 = vmatprep.mubr.f32.mxu1 %v48556_v47 }
 0x507   :  { %42131 = vmatmul.mubr.f32.vlgmr.msra.gmra.mrb[22].mxu0 %v48596_v35 }
 0x508   :  { %45193 = vmatpush3.bf16.msra.mxu0 %v45190_v44  ;;  %42137 = vmatprep.mubr.f32.mxu0 %v48556_v47 }
 0x509   :  { %45195 = vmatprep.subr.bf16.mxu0 %v48938_v59 }
 0x50a   :  { %42012 = vmatmul.mubr.f32.vlgmr.msra.gmra.mrb[18].mxu1 %v48558_v48 }
 0x50b   :  { %45125 = vmatpush3.bf16.msra.mxu1 %v48936_v16  ;;  %42018 = vmatprep.mubr.f32.mxu1 %v48575_v12  ;;  %v49090_v16 = vld [vmem:[#allocation17 + $0x8] sm:$0xff] }
 0x50c   :  { %45127 = vmatprep.subr.bf16.mxu1 %v48910_v32 }
 0x50f   :  { %42138 = vmatmul.mubr.f32.vlgmr.msra.gmra.mrb[22].mxu0 %v48558_v48 }
 0x510   :  { %45197 = vmatpush3.bf16.msra.mxu0 %v48938_v59  ;;  %42144 = vmatprep.mubr.f32.mxu0 %v48575_v12  ;;  %v49092_v59 = vld [vmem:[#allocation18 + $0x8] sm:$0xff] }
 0x511   :  { %45199 = vmatprep.subr.bf16.mxu0 %v48927_v30 }
 0x512   :  { %42019 = vmatmul.mubr.f32.vlgmr.msra.gmra.mrb[18].mxu1 %v48578_v26 }
 0x513   :  { %45129 = vmatpush3.bf16.msra.mxu1 %v48910_v32  ;;  %42025 = vmatprep.mubr.f32.mxu1 %v48583_v8 }
 0x514   :  { %45131 = vmatprep.subr.bf16.mxu1 %v48940_v29 }
 0x517   :  { %42145 = vmatmul.mubr.f32.vlgmr.msra.gmra.mrb[22].mxu0 %v48578_v26 }
 0x518   :  { %45201 = vmatpush3.bf16.msra.mxu0 %v48927_v30  ;;  %42151 = vmatprep.mubr.f32.mxu0 %v48583_v8  ;;  %v51734_v8 = vld [vmem:[#allocation54_spill] sm:$0xff] }
 0x519   :  { %45203 = vmatprep.subr.bf16.mxu0 %v48942_v22 }
 0x51a   :  { %42026 = vmatmul.mubr.f32.vlgmr.msra.gmra.mrb[18].mxu1 %v48586_v7 }
 0x51b   :  { %45133 = vmatpush3.bf16.msra.mxu1 %v48940_v29  ;;  %42032 = vmatprep.mubr.f32.mxu1 %v48556_v47  ;;  %v49094_v29 = vld [vmem:[#allocation17] sm:$0xff] }
 0x51c   :  { %45135 = vmatprep.subr.bf16.mxu1 %v48910_v32 }
 0x51f   :  { %42152 = vmatmul.mubr.f32.vlgmr.msra.gmra.mrb[22].mxu0 %v48586_v7 }
 0x520   :  { %45205 = vmatpush3.bf16.msra.mxu0 %v48942_v22  ;;  %42158 = vmatprep.mubr.f32.mxu0 %v48556_v47 }
 0x521   :  { %45207 = vmatprep.subr.bf16.mxu0 %v48927_v30 }
 0x522   :  { %42033 = vmatmul.mubr.f32.vlgmr.msra.gmra.mrb[18].mxu1 %v48558_v48 }
 0x523   :  { %45137 = vmatpush3.bf16.msra.mxu1 %v48910_v32  ;;  %42039 = vmatprep.mubr.f32.mxu1 %v48556_v47  ;;  %v51714_v32 = vld [vmem:[#allocation36_spill] sm:$0xff] }
 0x524   :  { %45163 = vmatprep.subr.bf16.mxu1 %v48923_v39 }
 0x527   :  { %42159 = vmatmul.mubr.f32.vlgmr.msra.gmra.mrb[22].mxu0 %v48558_v48 }
 0x528   :  { %45209 = vmatpush3.bf16.msra.mxu0 %v48927_v30  ;;  %42165 = vmatprep.mubr.f32.mxu0 %v48556_v47  ;;  %v51735_v47 = vld [vmem:[#allocation43_spill] sm:$0xff] }
 0x529   :  { %45235 = vmatprep.subr.bf16.mxu0 %v51713_v5 }
 0x52a   :  { %42040 = vmatmul.mubr.f32.vlgmr.msra.gmra.mrb[18].mxu1 %v48558_v48 }
 0x52b   :  { %45165 = vmatpush3.bf16.msra.mxu1 %v48923_v39  ;;  %42088 = vmatprep.mubr.f32.mxu1 %v48834_v3 }
 0x52c   :  { %45167 = vmatprep.subr.bf16.mxu1 %v48962_v19 }
 0x52e   :  { %42089 = vmatmul.mubr.f32.vlgmr.msra.gmra.mrb[20].mxu1 %v48836_v4 }
 0x52f   :  { %45169 = vmatpush3.bf16.msra.mxu1 %v48962_v19  ;;  %42095 = vmatprep.mubr.f32.mxu1 %v48769_v15 }
 0x530   :  { %45171 = vmatprep.subr.bf16.mxu1 %v48947_v1  ;;  %42166 = vmatmul.mubr.f32.vlgmr.msra.gmra.mrb[22].mxu0 %v48558_v48 }
 0x531   :  { %45237 = vmatpush3.bf16.xpose.msra.mxu0 %v51713_v5 }
 0x532   :  { %45239 = vmatprep.subr.bf16.mxu0 %v51714_v32 }
 0x536   :  { %42096 = vmatmul.mubr.f32.vlgmr.msra.gmra.mrb[20].mxu1 %v48771_v28 }
 0x537   :  { %45173 = vmatpush3.bf16.msra.mxu1 %v48947_v1  ;;  %42102 = vmatprep.mubr.f32.mxu1 %v48781_v52 }
 0x538   :  { %45175 = vmatprep.subr.bf16.mxu1 %v48923_v39 }
 0x53e   :  { %42103 = vmatmul.mubr.f32.vlgmr.msra.gmra.mrb[20].mxu1 %v48784_v62 }
 0x53f   :  { %45177 = vmatpush3.bf16.msra.mxu1 %v48923_v39  ;;  %42109 = vmatprep.mubr.f32.mxu1 %v48795_v18 }
 0x540   :  { %45179 = vmatprep.subr.bf16.mxu1 %v48950_v20 }
 0x546   :  { %42110 = vmatmul.mubr.f32.vlgmr.msra.gmra.mrb[20].mxu1 %v48798_v6 }
 0x547   :  { %45181 = vmatpush3.bf16.msra.mxu1 %v48950_v20  ;;  %42116 = vmatprep.mubr.f32.mxu1 %v48769_v15 }
 0x548   :  { %45183 = vmatprep.subr.bf16.mxu1 %v48923_v39 }
 0x54e   :  { %42117 = vmatmul.mubr.f32.vlgmr.msra.gmra.mrb[20].mxu1 %v48771_v28 }
 0x54f   :  { %45185 = vmatpush3.bf16.msra.mxu1 %v48923_v39  ;;  %42123 = vmatprep.mubr.f32.mxu1 %v48769_v15 }
 0x550   :  { %45211 = vmatprep.subr.bf16.mxu1 %v48930_v46 }
 0x556   :  { %42124 = vmatmul.mubr.f32.vlgmr.msra.gmra.mrb[20].mxu1 %v48771_v28 }
 0x557   :  { %45213 = vmatpush3.bf16.msra.mxu1 %v48930_v46  ;;  %42172 = vmatprep.mubr.f32.mxu1 %v48892_v42 }
 0x558   :  { %45215 = vmatprep.subr.bf16.mxu1 %v48967_v49 }
 0x55a   :  { %42173 = vmatmul.mubr.f32.vlgmr.msra.gmra.mrb[22].mxu1 %v48906_v41 }
 0x55b   :  { %45217 = vmatpush3.bf16.msra.mxu1 %v48967_v49  ;;  %42179 = vmatprep.mubr.f32.mxu1 %v48882_v60 }
 0x55c   :  { %45219 = vmatprep.subr.bf16.mxu1 %v48955_v63 }
 0x562   :  { %42180 = vmatmul.mubr.f32.vlgmr.msra.gmra.mrb[22].mxu1 %v48896_v14 }
 0x563   :  { %45221 = vmatpush3.bf16.msra.mxu1 %v48955_v63  ;;  %42186 = vmatprep.mubr.f32.mxu1 %v48885_v36 }
 0x564   :  { %45223 = vmatprep.subr.bf16.mxu1 %v48930_v46 }
 0x56a   :  { %42187 = vmatmul.mubr.f32.vlgmr.msra.gmra.mrb[22].mxu1 %v48899_v9 }
 0x56b   :  { %45225 = vmatpush3.bf16.msra.mxu1 %v48930_v46  ;;  %42193 = vmatprep.mubr.f32.mxu1 %v48888_v11 }
 0x56c   :  { %45227 = vmatprep.subr.bf16.mxu1 %v48959_v25 }
 0x572   :  { %42194 = vmatmul.mubr.f32.vlgmr.msra.gmra.mrb[22].mxu1 %v48902_v37 }
 0x573   :  { %45229 = vmatpush3.bf16.msra.mxu1 %v48959_v25  ;;  %42200 = vmatprep.mubr.f32.mxu1 %v48882_v60 }
 0x574   :  { %45231 = vmatprep.subr.bf16.mxu1 %v48930_v46 }
 0x57a   :  { %42201 = vmatmul.mubr.f32.vlgmr.msra.gmra.mrb[22].mxu1 %v48896_v14 }
 0x57b   :  { %45233 = vmatpush3.bf16.msra.mxu1 %v48930_v46  ;;  %42207 = vmatprep.mubr.f32.mxu1 %v48882_v60 }
 0x57c   :  { %45259 = vmatprep.subr.bf16.mxu1 %v51715_v33 }
 0x582   :  { %42208 = vmatmul.mubr.f32.vlgmr.msra.gmra.mrb[22].mxu1 %v48896_v14 }
 0x584   :  { %45261 = vmatpush3.bf16.xpose.msra.mxu1 %v51715_v33 }
 0x585   :  { %45263 = vmatprep.subr.bf16.mxu1 %v51716_v23 }
 0x5d1   :  { %v41999_v31 = vpop.f32.mrb[16].mxu1 }
 0x5d2   :  { %v7444_v39 = vpop.f32.mrb[17].mxu1 }
 0x5d6   :  { %v42083_v30 = vpop.f32.mrb[20].mxu0 }
 0x5d7   :  { %v8469_v55 = vsub.f32 %v41999_v31, %v42083_v30  ;;  %v8458_v13 = vpop.f32.mrb[21].mxu0 }
 0x5d8   :  { %v8468_v54 = vsub.f32 %v7444_v39, %v8458_v13 }
 0x5d9   :  { %v8473_v27 = vmul.f32 %v8469_v55, %v49090_v16  ;;  %v8481_v10 = vmul.f32 %v8469_v55, %v49092_v59 }
 0x5da   :  { %v8472_v38 = vmul.f32 %v8468_v54, %v49094_v29  ;;  %v8480_v1 = vmul.f32 %v8468_v54, %v49096_v2 }
 0x5fd   :  { %v42041_v46 = vpop.f32.mrb[18].mxu1 }
 0x5fe   :  { %v8471_v22 = vadd.f32 %v42041_v46, %v41999_v31  ;;  %v7948_v50 = vpop.f32.mrb[19].mxu1 }
 0x5ff   :  { %v8470_v0 = vadd.f32 %v7948_v50, %v7444_v39 }
 0x600   :  { %v8475_v57 = vmul.f32 %v8471_v22, %v49092_v59  ;;  %v8483_v34 = vmul.f32 %v8471_v22, %v49090_v16 }
 0x601   :  { %v8474_v61 = vmul.f32 %v8470_v0, %v49096_v2  ;;  %v8482_v24 = vmul.f32 %v8470_v0, %v49094_v29 }
 0x602   :  { %v8477_v20 = vsub.f32 %v8473_v27, %v8475_v57  ;;  %v8485_v53 = vadd.f32 %v8483_v34, %v8481_v10 }
 0x603   :  { %v8476_v44 = vsub.f32 %v8472_v38, %v8474_v61  ;;  %v8484_v51 = vadd.f32 %v8482_v24, %v8480_v1  ;;  %v42167_v45 = vpop.f32.mrb[22].mxu0 }
 0x604   :  { %8479 = vst.msk [vmem:[#allocation2 + $0x8] sm:$0xff] %vm213_vm0, %v8477_v20  ;;  %8487 = vst.msk [vmem:[#allocation3 + $0x8] sm:$0xff] %vm213_vm0, %v8485_v53  ;;  %v9484_v63 = vpop.f32.mrb[23].mxu0 }
 0x605   :  { %8478 = vst.msk [vmem:[#allocation2] sm:$0xff] %vm213_vm0, %v8476_v44  ;;  %8486 = vst.msk [vmem:[#allocation3] sm:$0xff] %vm213_vm0, %v8484_v51 }
 0x60b   :  { %v10019_v56 = vld [vmem:[#allocation2 + $0x8] sm:$0xff] }
 0x60c   :  { %v49110_v43 = vld [vmem:[#allocation3 + $0x8] sm:$0xff]  ;;  %v10018_v58 = vld [vmem:[#allocation2] sm:$0xff]  ;;  %v10634_v25 = vsel %vm213_vm0, %v10019_v56, 0 }
 0x60d   :  { %v49113_v19 = vld [vmem:[#allocation3] sm:$0xff]  ;;  %v10027_v17 = vadd.f32 %v49110_v43, %v10019_v56  ;;  %v10631_v21 = vsel %vm213_vm0, %v10018_v58, 0  ;;  %v49117_v49 = vand.u32 4294901760, %v10634_v25  ;;  %v51717_v56 = vld [vmem:[#allocation39_spill] sm:$0xff] }
 0x60e   :  { %v10026_v31 = vadd.f32 %v49113_v19, %v10018_v58  ;;  %v49120_v39 = vand.u32 4294901760, %v10631_v21  ;;  %v51718_v58 = vld [vmem:[#allocation37_spill] sm:$0xff] }
 0x60f   :  { %v10034_v30 = vsel %vm213_vm0, %v10027_v17, 0  ;;  %v49124_v55 = vsub.f32 %v10634_v25, %v49117_v49 }
 0x610   :  { %v10031_v13 = vsel %vm213_vm0, %v10026_v31, 0  ;;  %v49127_v54 = vand.u32 4294901760, %v10034_v30  ;;  %v49130_v46 = vsub.f32 %v10631_v21, %v49120_v39 }
 0x611   :  { %v49132_v22 = vand.u32 4294901760, %v10031_v13  ;;  %v51525_v50 = vand.u32 4294901760, %v49124_v55 }
 0x612   :  { %v49136_v0 = vsub.f32 %v10034_v30, %v49127_v54  ;;  %v51527_v27 = vand.u32 4294901760, %v49130_v46 }
 0x613   :  { %v49140_v10 = vsub.f32 %v10031_v13, %v49132_v22  ;;  %v10722_v57 = vsub.f32 %v49124_v55, %v51525_v50 }
 0x614   :  { %v51524_v34 = vand.u32 4294901760, %v49136_v0  ;;  %v10712_v38 = vsub.f32 %v49130_v46, %v51527_v27 }
 0x615   :  { %v51526_v1 = vand.u32 4294901760, %v49140_v10  ;;  %v10723_v53 = vand.u32 4294901760, %v10722_v57 }
 0x616   :  { %v10122_v61 = vsub.f32 %v49136_v0, %v51524_v34  ;;  %v10713_v24 = vand.u32 4294901760, %v10712_v38 }
 0x617   :  { %v10112_v20 = vsub.f32 %v49140_v10, %v51526_v1 }
 0x618   :  { %42274 = vmatprep.mubr.f32.mxu1 %v10713_v24  ;;  %v10123_v51 = vand.u32 4294901760, %v10122_v61 }
 0x619   :  { %v10113_v44 = vand.u32 4294901760, %v10112_v20  ;;  %42275 = vmatmul.mubr.f32.vlgmr.msra.gmra.mrb[24].mxu1 %v10723_v53 }
 0x61a   :  { %45265 = vmatpush3.bf16.xpose.msra.mxu1 %v51716_v23  ;;  %v51733_v23 = vld [vmem:[#allocation61_spill] sm:$0xff] }
 0x61b   :  { %42214 = vmatprep.mubr.f32.mxu0 %v10113_v44  ;;  %45267 = vmatprep.subr.bf16.mxu1 %v51717_v56 }
 0x61c   :  { %42215 = vmatmul.mubr.f32.vlgmr.msra.gmra.mrb[24].mxu0 %v10123_v51 }
 0x61d   :  { %45241 = vmatpush3.bf16.xpose.msra.mxu0 %v51714_v32 }
 0x61e   :  { %45243 = vmatprep.subr.bf16.mxu0 %v51718_v58 }
 0x629   :  { %v42125_v25 = vpop.f32.mrb[20].mxu1 }
 0x62a   :  { %v10001_v17 = vadd.f32 %v42167_v45, %v42125_v25  ;;  %v8980_v21 = vpop.f32.mrb[21].mxu1 }
 0x62b   :  { %v10000_v31 = vadd.f32 %v9484_v63, %v8980_v21 }
 0x62c   :  { %v10005_v61 = vmul.f32 %v10001_v17, %v49092_v59  ;;  %v10013_v24 = vmul.f32 %v10001_v17, %v49090_v16 }
 0x62d   :  { %v10004_v44 = vmul.f32 %v10000_v31, %v49096_v2  ;;  %v10012_v51 = vmul.f32 %v10000_v31, %v49094_v29 }
 0x655   :  { %v42209_v30 = vpop.f32.mrb[22].mxu1 }
 0x656   :  { %v9999_v13 = vsub.f32 %v42125_v25, %v42209_v30  ;;  %v9988_v57 = vpop.f32.mrb[23].mxu1 }
 0x657   :  { %v9998_v38 = vsub.f32 %v8980_v21, %v9988_v57 }
 0x658   :  { %v10003_v20 = vmul.f32 %v9999_v13, %v49090_v16  ;;  %v10011_v53 = vmul.f32 %v9999_v13, %v49092_v59 }
 0x659   :  { %v10002_v45 = vmul.f32 %v9998_v38, %v49094_v29  ;;  %v10010_v63 = vmul.f32 %v9998_v38, %v49096_v2 }
 0x65a   :  { %v10007_v34 = vsub.f32 %v10003_v20, %v10005_v61  ;;  %v10015_v25 = vadd.f32 %v10013_v24, %v10011_v53 }
 0x65b   :  { %v10006_v30 = vsub.f32 %v10002_v45, %v10004_v44  ;;  %v10014_v21 = vadd.f32 %v10012_v51, %v10010_v63 }
 0x65c   :  { %10009 = vst.msk [vmem:[#allocation2 + $0x18] sm:$0xff] %vm213_vm0, %v10007_v34  ;;  %10017 = vst.msk [vmem:[#allocation3 + $0x18] sm:$0xff] %vm213_vm0, %v10015_v25 }
 0x65d   :  { %10008 = vst.msk [vmem:[#allocation2 + $0x10] sm:$0xff] %vm213_vm0, %v10006_v30  ;;  %10016 = vst.msk [vmem:[#allocation3 + $0x10] sm:$0xff] %vm213_vm0, %v10014_v21 }
 0x663   :  { %v10021_v16 = vld [vmem:[#allocation2 + $0x18] sm:$0xff] }
 0x664   :  { %v49172_v59 = vld [vmem:[#allocation3 + $0x18] sm:$0xff]  ;;  %v10020_v17 = vld [vmem:[#allocation2 + $0x10] sm:$0xff]  ;;  %v10640_v29 = vsel %vm213_vm0, %v10021_v16, 0 }
 0x665   :  { %v49175_v31 = vld [vmem:[#allocation3 + $0x10] sm:$0xff]  ;;  %v10029_v2 = vadd.f32 %v49172_v59, %v10021_v16  ;;  %v10637_v13 = vsel %vm213_vm0, %v10020_v17, 0  ;;  %v49179_v57 = vand.u32 4294901760, %v10640_v29 }
 0x666   :  { %v10028_v34 = vadd.f32 %v49175_v31, %v10020_v17  ;;  %v49182_v38 = vand.u32 4294901760, %v10637_v13 }
 0x667   :  { %v10040_v61 = vsel %vm213_vm0, %v10029_v2, 0  ;;  %v10740_v24 = vsub.f32 %v10640_v29, %v49179_v57 }
 0x668   :  { %v10037_v20 = vsel %vm213_vm0, %v10028_v34, 0  ;;  %v49187_v53 = vand.u32 4294901760, %v10040_v61  ;;  %v10730_v44 = vsub.f32 %v10637_v13, %v49182_v38 }
 0x669   :  { %v49190_v51 = vand.u32 4294901760, %v10037_v20  ;;  %v10741_v45 = vand.u32 4294901760, %v10740_v24 }
 0x66a   :  { %v10140_v63 = vsub.f32 %v10040_v61, %v49187_v53  ;;  %v10731_v25 = vand.u32 4294901760, %v10730_v44  ;;  %v51722_v61 = vand.u32 4294901760, %v49140_v10 }
 0x66b   :  { %v10130_v30 = vsub.f32 %v10037_v20, %v49190_v51  ;;  %v10742_v21 = vsub.f32 %v10740_v24, %v10741_v45  ;;  %v51723_v20 = vand.u32 4294901760, %v49124_v55 }
 0x66c   :  { %v10141_v16 = vand.u32 4294901760, %v10140_v63  ;;  %v10732_v17 = vsub.f32 %v10730_v44, %v10731_v25 }
 0x66d   :  { %v10131_v2 = vand.u32 4294901760, %v10130_v30  ;;  %v10743_v34 = vand.u32 4294901760, %v10742_v21 }
 0x66e   :  { %v10142_v50 = vsub.f32 %v10140_v63, %v10141_v16  ;;  %v10733_v29 = vand.u32 4294901760, %v10732_v17 }
 0x66f   :  { %v10132_v1 = vsub.f32 %v10130_v30, %v10131_v2 }
 0x670   :  { %42277 = vmatprep.mubr.f32.mxu1 %v10733_v29  ;;  %v10143_v13 = vand.u32 4294901760, %v10142_v50  ;;  %v51719_v50 = vld [vmem:[#allocation40_spill] sm:$0xff]  ;;  %v51726_v29 = vld [vmem:[#allocation51_spill] sm:$0xff] }
 0x671   :  { %v10133_v27 = vand.u32 4294901760, %v10132_v1  ;;  %42278 = vmatmul.mubr.f32.gmra.mrb[26].mxu1 %v10743_v34  ;;  %v51721_v1 = vand.u32 4294901760, %v49130_v46 }
 0x672   :  { %42284 = vmatprep.mubr.f32.mxu1 %v49120_v39 }
 0x673   :  { %42217 = vmatprep.mubr.f32.mxu0 %v10133_v27  ;;  %v51720_v27 = vld [vmem:[#allocation41_spill] sm:$0xff] }
 0x674   :  { %42218 = vmatmul.mubr.f32.gmra.mrb[26].mxu0 %v10143_v13  ;;  %v51727_v13 = vld [vmem:[#allocation49_spill] sm:$0xff] }
 0x675   :  { %42224 = vmatprep.mubr.f32.mxu0 %v49132_v22  ;;  %42285 = vmatmul.mubr.f32.vlgmr.msra.gmra.mrb[24].mxu1 %v49117_v49 }
 0x676   :  { %42287 = vmatprep.mubr.f32.mxu1 %v49182_v38  ;;  %45269 = vmatpush3.bf16.xpose.msra.mxu1 %v51717_v56  ;;  %v51732_v56 = vld [vmem:[#allocation42_spill] sm:$0xff] }
 0x677   :  { %45271 = vmatprep.subr.bf16.mxu1 %v51715_v33 }
 0x678   :  { %42225 = vmatmul.mubr.f32.vlgmr.msra.gmra.mrb[24].mxu0 %v49127_v54 }
 0x679   :  { %42227 = vmatprep.mubr.f32.mxu0 %v49190_v51  ;;  %45245 = vmatpush3.bf16.xpose.msra.mxu0 %v51718_v58 }
 0x67a   :  { %42288 = vmatmul.mubr.f32.gmra.mrb[26].mxu1 %v49179_v57  ;;  %45247 = vmatprep.subr.bf16.mxu0 %v51713_v5 }
 0x67b   :  { %42294 = vmatprep.mubr.f32.mxu1 %v49130_v46  ;;  %v11234_v46 = vsel %vm213_vm0, %v49110_v43, 0  ;;  %v11240_v43 = vsel %vm213_vm0, %v49172_v59, 0 }
 0x67c   :  { %42228 = vmatmul.mubr.f32.gmra.mrb[26].mxu0 %v49187_v53 }
 0x67d   :  { %42234 = vmatprep.mubr.f32.mxu0 %v49140_v10 }
 0x67e   :  { %42295 = vmatmul.mubr.f32.vlgmr.msra.gmra.mrb[24].mxu1 %v49124_v55 }
 0x67f   :  { %42297 = vmatprep.mubr.f32.mxu1 %v10730_v44  ;;  %45273 = vmatpush3.bf16.xpose.msra.mxu1 %v51715_v33  ;;  %v51724_v44 = vand.u32 4294901760, %v49136_v0 }
 0x680   :  { %42235 = vmatmul.mubr.f32.vlgmr.msra.gmra.mrb[24].mxu0 %v49136_v0  ;;  %45275 = vmatprep.subr.bf16.mxu1 %v51719_v50  ;;  %v11237_v0 = vsel %vm213_vm0, %v49175_v31, 0  ;;  %v51725_v31 = vld [vmem:[#allocation48_spill] sm:$0xff] }
 0x681   :  { %42237 = vmatprep.mubr.f32.mxu0 %v10130_v30  ;;  %45249 = vmatpush3.bf16.xpose.msra.mxu0 %v51713_v5 }
 0x682   :  { %42298 = vmatmul.mubr.f32.gmra.mrb[26].mxu1 %v10740_v24  ;;  %45251 = vmatprep.subr.bf16.mxu0 %v51720_v27  ;;  %v11231_v24 = vsel %vm213_vm0, %v49113_v19, 0  ;;  %v49237_v19 = vand.u32 4294901760, %v11234_v46 }
 0x683   :  { %42304 = vmatprep.mubr.f32.mxu1 %v51721_v1  ;;  %v49229_v55 = vand.u32 4294901760, %v11231_v24 }
 0x684   :  { %42238 = vmatmul.mubr.f32.gmra.mrb[26].mxu0 %v10140_v63  ;;  %v11320_v63 = vsub.f32 %v11234_v46, %v49237_v19 }
 0x685   :  { %42244 = vmatprep.mubr.f32.mxu0 %v51722_v61  ;;  %v11310_v10 = vsub.f32 %v11231_v24, %v49229_v55  ;;  %v51730_v61 = vld [vmem:[#allocation57_spill] sm:$0xff] }
 0x686   :  { %42305 = vmatmul.mubr.f32.vlgmr.msra.gmra.mrb[24].mxu1 %v51723_v20  ;;  %v11321_v59 = vand.u32 4294901760, %v11320_v63 }
 0x687   :  { %42307 = vmatprep.mubr.f32.mxu1 %v10731_v25  ;;  %45277 = vmatpush3.bf16.xpose.msra.mxu1 %v51719_v50  ;;  %v11339_v25 = vand.u32 4294901760, %v11240_v43  ;;  %v11311_v30 = vand.u32 4294901760, %v11310_v10 }
 0x688   :  { %42245 = vmatmul.mubr.f32.vlgmr.msra.gmra.mrb[24].mxu0 %v51724_v44  ;;  %45279 = vmatprep.subr.bf16.mxu1 %v51715_v33 }
 0x689   :  { %42247 = vmatprep.mubr.f32.mxu0 %v10131_v2  ;;  %45253 = vmatpush3.bf16.xpose.msra.mxu0 %v51720_v27  ;;  %v11312_v17 = vsub.f32 %v11310_v10, %v11311_v30 }
 0x68a   :  { %42308 = vmatmul.mubr.f32.gmra.mrb[26].mxu1 %v10741_v45  ;;  %45255 = vmatprep.subr.bf16.mxu0 %v51713_v5  ;;  %v49242_v45 = vand.u32 4294901760, %v11237_v0 }
 0x68b   :  { %42314 = vmatprep.mubr.f32.mxu1 %v49120_v39  ;;  %v11313_v34 = vand.u32 4294901760, %v11312_v17 }
 0x68c   :  { %42248 = vmatmul.mubr.f32.gmra.mrb[26].mxu0 %v10141_v16  ;;  %v11330_v21 = vsub.f32 %v11237_v0, %v49242_v45  ;;  %v11340_v16 = vsub.f32 %v11240_v43, %v11339_v25 }
 0x68d   :  { %42254 = vmatprep.mubr.f32.mxu0 %v49132_v22 }
 0x68e   :  { %42315 = vmatmul.mubr.f32.vlgmr.msra.gmra.mrb[24].mxu1 %v49117_v49  ;;  %v11331_v2 = vand.u32 4294901760, %v11330_v21 }
 0x68f   :  { %42317 = vmatprep.mubr.f32.mxu1 %v49182_v38  ;;  %45281 = vmatpush3.bf16.xpose.msra.mxu1 %v51715_v33 }
 0x690   :  { %42255 = vmatmul.mubr.f32.vlgmr.msra.gmra.mrb[24].mxu0 %v49127_v54 }
 0x691   :  { %42257 = vmatprep.mubr.f32.mxu0 %v49190_v51  ;;  %45257 = vmatpush3.bf16.xpose.msra.mxu0 %v51713_v5 }
 0x692   :  { %42318 = vmatmul.mubr.f32.gmra.mrb[26].mxu1 %v49179_v57  ;;  %45283 = vmatprep.subr.bf16.mxu0 %v51725_v31 }
 0x693   :  { %42324 = vmatprep.mubr.f32.mxu1 %v49120_v39  ;;  %v11322_v39 = vsub.f32 %v11320_v63, %v11321_v59 }
 0x694   :  { %42258 = vmatmul.mubr.f32.gmra.mrb[26].mxu0 %v49187_v53 }
 0x695   :  { %42264 = vmatprep.mubr.f32.mxu0 %v49132_v22  ;;  %v11341_v22 = vand.u32 4294901760, %v11340_v16 }
 0x696   :  { %42325 = vmatmul.mubr.f32.vlgmr.msra.gmra.mrb[24].mxu1 %v49117_v49  ;;  %v11332_v49 = vsub.f32 %v11330_v21, %v11331_v2 }
 0x697   :  { %42327 = vmatprep.mubr.f32.mxu1 %v49182_v38  ;;  %v11323_v38 = vand.u32 4294901760, %v11322_v39  ;;  %v11342_v1 = vsub.f32 %v11340_v16, %v11341_v22 }
 0x698   :  { %42265 = vmatmul.mubr.f32.vlgmr.msra.gmra.mrb[24].mxu0 %v49127_v54  ;;  %v11333_v54 = vand.u32 4294901760, %v11332_v49 }
 0x699   :  { %42267 = vmatprep.mubr.f32.mxu0 %v49190_v51  ;;  %45285 = vmatpush3.bf16.xpose.msra.mxu0 %v51725_v31  ;;  %v11343_v51 = vand.u32 4294901760, %v11342_v1 }
 0x69a   :  { %42328 = vmatmul.mubr.f32.gmra.mrb[26].mxu1 %v49179_v57  ;;  %45287 = vmatprep.subr.bf16.mxu0 %v51726_v29  ;;  %v51728_v57 = vld [vmem:[#allocation52_spill] sm:$0xff] }
 0x69b   :  { %42394 = vmatprep.mubr.f32.mxu1 %v51727_v13 }
 0x69c   :  { %42268 = vmatmul.mubr.f32.gmra.mrb[26].mxu0 %v49187_v53  ;;  %v51729_v53 = vld [vmem:[#allocation53_spill] sm:$0xff] }
 0x69d   :  { %42334 = vmatprep.mubr.f32.mxu0 %v11313_v34 }
 0x6a0   :  { %42335 = vmatmul.mubr.f32.vlgmr.msra.gmra.mrb[28].mxu0 %v11323_v38 }
 0x6a1   :  { %42337 = vmatprep.mubr.f32.mxu0 %v11333_v54  ;;  %45289 = vmatpush3.bf16.xpose.msra.mxu0 %v51726_v29 }
 0x6a2   :  { %45291 = vmatprep.subr.bf16.mxu0 %v51728_v57 }
 0x6a4   :  { %42338 = vmatmul.mubr.f32.gmra.mrb[30].mxu0 %v11343_v51 }
 0x6a5   :  { %42344 = vmatprep.mubr.f32.mxu0 %v49229_v55 }
 0x6a8   :  { %42345 = vmatmul.mubr.f32.vlgmr.msra.gmra.mrb[28].mxu0 %v49237_v19 }
 0x6a9   :  { %42347 = vmatprep.mubr.f32.mxu0 %v49242_v45  ;;  %45293 = vmatpush3.bf16.xpose.msra.mxu0 %v51728_v57 }
 0x6aa   :  { %45295 = vmatprep.subr.bf16.mxu0 %v51725_v31 }
 0x6ac   :  { %42348 = vmatmul.mubr.f32.gmra.mrb[30].mxu0 %v11339_v25 }
 0x6ad   :  { %42354 = vmatprep.mubr.f32.mxu0 %v11310_v10 }
 0x6b0   :  { %42355 = vmatmul.mubr.f32.vlgmr.msra.gmra.mrb[28].mxu0 %v11320_v63 }
 0x6b1   :  { %42357 = vmatprep.mubr.f32.mxu0 %v11330_v21  ;;  %45297 = vmatpush3.bf16.xpose.msra.mxu0 %v51725_v31 }
 0x6b2   :  { %45299 = vmatprep.subr.bf16.mxu0 %v51729_v53 }
 0x6b4   :  { %42358 = vmatmul.mubr.f32.gmra.mrb[30].mxu0 %v11340_v16 }
 0x6b5   :  { %42364 = vmatprep.mubr.f32.mxu0 %v11311_v30 }
 0x6b8   :  { %42365 = vmatmul.mubr.f32.vlgmr.msra.gmra.mrb[28].mxu0 %v11321_v59 }
 0x6b9   :  { %42367 = vmatprep.mubr.f32.mxu0 %v11331_v2  ;;  %45301 = vmatpush3.bf16.xpose.msra.mxu0 %v51729_v53 }
 0x6ba   :  { %45303 = vmatprep.subr.bf16.mxu0 %v51725_v31 }
 0x6bc   :  { %42368 = vmatmul.mubr.f32.gmra.mrb[30].mxu0 %v11341_v22 }
 0x6bd   :  { %42374 = vmatprep.mubr.f32.mxu0 %v49229_v55 }
 0x6c0   :  { %42375 = vmatmul.mubr.f32.vlgmr.msra.gmra.mrb[28].mxu0 %v49237_v19 }
 0x6c1   :  { %42377 = vmatprep.mubr.f32.mxu0 %v49242_v45  ;;  %45305 = vmatpush3.bf16.xpose.msra.mxu0 %v51725_v31 }
 0x6c4   :  { %42378 = vmatmul.mubr.f32.gmra.mrb[30].mxu0 %v11339_v25 }
 0x6c5   :  { %42384 = vmatprep.mubr.f32.mxu0 %v49229_v55 }
 0x6c8   :  { %42385 = vmatmul.mubr.f32.vlgmr.msra.gmra.mrb[28].mxu0 %v49237_v19 }
 0x6c9   :  { %42387 = vmatprep.mubr.f32.mxu0 %v49242_v45 }
 0x6cc   :  { %42388 = vmatmul.mubr.f32.gmra.mrb[30].mxu0 %v11339_v25 }
 0x6cd   :  { %42478 = vmatprep.mubr.f32.mxu0 %v51730_v61 }
 0x769   :  { %v42326_v20 = vpop.f32.mrb[24].mxu1 }
 0x76a   :  { %v11208_v44 = vpop.f32.mrb[25].mxu1 }
 0x76b   :  { %v42266_v24 = vpop.f32.mrb[24].mxu0 }
 0x76c   :  { %v11835_v46 = vadd.f32 %v42326_v20, %v42266_v24  ;;  %v10608_v0 = vpop.f32.mrb[25].mxu0 }
 0x76d   :  { %v11834_v10 = vadd.f32 %v11208_v44, %v10608_v0  ;;  %v42329_v43 = vpop.f32.mrb[26].mxu1 }
 0x76e   :  { %v11220_v63 = vpop.f32.mrb[27].mxu1 }
 0x76f   :  { %v42269_v30 = vpop.f32.mrb[26].mxu0 }
 0x770   :  { %v11837_v21 = vadd.f32 %v42329_v43, %v42269_v30  ;;  %v10620_v59 = vpop.f32.mrb[27].mxu0 }
 0x771   :  { %v11836_v16 = vadd.f32 %v11220_v63, %v10620_v59 }
 0x79b   :  { %v42386_v55 = vpop.f32.mrb[28].mxu0 }
 0x79c   :  { %v11831_v17 = vsub.f32 %v42266_v24, %v42386_v55  ;;  %v11808_v19 = vpop.f32.mrb[29].mxu0 }
 0x79d   :  { %v11830_v2 = vsub.f32 %v10608_v0, %v11808_v19 }
 0x79e   :  { %v11848_v45 = vand.u32 4294901760, %v11831_v17  ;;  %v12347_v25 = vsub.f32 %v11835_v46, %v11831_v17  ;;  %v12851_v39 = vadd.f32 %v11835_v46, %v11831_v17 }
 0x79f   :  { %v11845_v22 = vand.u32 4294901760, %v11830_v2  ;;  %v12346_v34 = vsub.f32 %v11834_v10, %v11830_v2  ;;  %v12850_v49 = vadd.f32 %v11834_v10, %v11830_v2  ;;  %v42389_v38 = vpop.f32.mrb[30].mxu0 }
 0x7a0   :  { %v11940_v1 = vsub.f32 %v11831_v17, %v11848_v45  ;;  %v12352_v54 = vand.u32 4294901760, %v12347_v25  ;;  %v12856_v51 = vand.u32 4294901760, %v12851_v39  ;;  %v11833_v20 = vsub.f32 %v42269_v30, %v42389_v38  ;;  %v11820_v44 = vpop.f32.mrb[31].mxu0 }
 0x7a1   :  { %v49284_v53 = vpack.c.bf16 %v11848_v45, %v11845_v22  ;;  %v11933_v43 = vsub.f32 %v11830_v2, %v11845_v22  ;;  %v12349_v63 = vand.u32 4294901760, %v12346_v34  ;;  %v12853_v57 = vand.u32 4294901760, %v12850_v49 }
 0x7a2   :  { %v12444_v24 = vsub.f32 %v12347_v25, %v12352_v54  ;;  %v12948_v55 = vsub.f32 %v12851_v39, %v12856_v51  ;;  %v13378_v0 = vand.u32 4294901760, %v11833_v20  ;;  %v13877_v19 = vsub.f32 %v11837_v21, %v11833_v20 }
 0x7a3   :  { %v49286_v29 = vpack.c.bf16 %v12352_v54, %v12349_v63  ;;  %v12437_v46 = vsub.f32 %v12346_v34, %v12349_v63  ;;  %v49288_v31 = vpack.c.bf16 %v12856_v51, %v12853_v57  ;;  %v12941_v10 = vsub.f32 %v12850_v49, %v12853_v57  ;;  %45307 = vmatprep.subr.bf16.mxu1 %v49284_v53  ;;  %v51731_v49 = vld [vmem:[#allocation50_spill] sm:$0xff] }
 0x7a4   :  { %v49291_v17 = vsub.f32 %v11833_v20, %v13378_v0  ;;  %v13882_v30 = vand.u32 4294901760, %v13877_v19  ;;  %v14381_v45 = vadd.f32 %v11837_v21, %v11833_v20  ;;  %v11832_v38 = vsub.f32 %v10620_v59, %v11820_v44  ;;  %45309 = vmatpush3.bf16.msra.mxu1 %v49284_v53 }
 0x7a5   :  { %45355 = vmatprep.subr.bf16.mxu0 %v49288_v31  ;;  %v11934_v2 = vand.u32 4294901760, %v11933_v43  ;;  %v11941_v25 = vand.u32 4294901760, %v11940_v1  ;;  %v45314_v39 = vpack.c.bf16 %v11940_v1, %v11933_v43  ;;  %v12942_v22 = vand.u32 4294901760, %v12941_v10 }
 0x7a6   :  { %v13974_v54 = vsub.f32 %v13877_v19, %v13882_v30  ;;  %v14386_v34 = vand.u32 4294901760, %v14381_v45  ;;  %v13375_v51 = vand.u32 4294901760, %v11832_v38  ;;  %v13876_v63 = vsub.f32 %v11836_v16, %v11832_v38  ;;  %45357 = vmatpush3.bf16.msra.mxu0 %v49288_v31 }
 0x7a7   :  { %v14380_v57 = vadd.f32 %v11836_v16, %v11832_v38  ;;  %42395 = vmatmul.mubr.f32.vlgmr.msra.gmra.mrb[28].mxu1 %v51731_v49  ;;  %v11935_v27 = vsub.f32 %v11933_v43, %v11934_v2  ;;  %v11942_v21 = vsub.f32 %v11940_v1, %v11941_v25  ;;  %v12943_v59 = vsub.f32 %v12941_v10, %v12942_v22 }
 0x7a8   :  { %v49297_v20 = vsub.f32 %v14381_v45, %v14386_v34  ;;  %v49299_v44 = vpack.c.bf16 %v13378_v0, %v13375_v51  ;;  %v13463_v50 = vsub.f32 %v11832_v38, %v13375_v51  ;;  %v13879_v58 = vand.u32 4294901760, %v13876_v63  ;;  %42401 = vmatprep.mubr.f32.mxu1 %v51732_v56 }
 0x7a9   :  { %v14383_v19 = vand.u32 4294901760, %v14380_v57  ;;  %42479 = vmatmul.mubr.f32.vlgmr.msra.gmra.mrb[32].mxu0 %v51733_v23  ;;  %v11936_v33 = vand.u32 4294901760, %v11935_v27  ;;  %v11943_v32 = vand.u32 4294901760, %v11942_v21  ;;  %v12944_v5 = vand.u32 4294901760, %v12943_v59 }
 0x7aa   :  { %v49303_v16 = vpack.c.bf16 %v13882_v30, %v13879_v58  ;;  %v13967_v7 = vsub.f32 %v13876_v63, %v13879_v58  ;;  %v12949_v43 = vand.u32 4294901760, %v12948_v55  ;;  %v45362_v1 = vpack.c.bf16 %v12948_v55, %v12941_v10  ;;  %42485 = vmatprep.mubr.f32.mxu0 %v51734_v8 }
 0x7ab   :  { %v49306_v45 = vpack.c.bf16 %v14386_v34, %v14383_v19  ;;  %v14471_v0 = vsub.f32 %v14380_v57, %v14383_v19  ;;  %v45310_v38 = vpack.c.bf16 %v11943_v32, %v11936_v33  ;;  %v49308_v51 = vpack.c.bf16 %v11941_v25, %v11934_v2 }
 0x7ac   :  { %v12950_v26 = vsub.f32 %v12948_v55, %v12949_v43  ;;  %v49310_v12 = vpack.c.bf16 %v12949_v43, %v12942_v22  ;;  %v12438_v48 = vand.u32 4294901760, %v12437_v46  ;;  %v12445_v27 = vand.u32 4294901760, %v12444_v24 }
 0x7ad   :  { %45311 = vmatprep.subr.bf16.mxu1 %v45310_v38  ;;  %v13968_v21 = vand.u32 4294901760, %v13967_v7  ;;  %v13975_v30 = vand.u32 4294901760, %v13974_v54  ;;  %v49312_v59 = vpack.c.bf16 %v12444_v24, %v12437_v46  ;;  %v49314_v58 = vpack.c.bf16 %v13974_v54, %v13967_v7 }
 0x7ae   :  { %45313 = vmatpush3.bf16.msra.mxu1 %v45310_v38  ;;  %v12951_v10 = vand.u32 4294901760, %v12950_v26  ;;  %v12439_v34 = vsub.f32 %v12437_v46, %v12438_v48  ;;  %v12446_v63 = vsub.f32 %v12444_v24, %v12445_v27  ;;  %v49316_v57 = vpack.c.bf16 %v12445_v27, %v12438_v48 }
 0x7af   :  { %45315 = vmatprep.subr.bf16.mxu1 %v45314_v39  ;;  %v13969_v32 = vsub.f32 %v13967_v7, %v13968_v21  ;;  %v13976_v33 = vsub.f32 %v13974_v54, %v13975_v30  ;;  %v49318_v55 = vpack.c.bf16 %v13975_v30, %v13968_v21  ;;  %v13464_v2 = vand.u32 4294901760, %v13463_v50 }
 0x7b0   :  { %v45358_v25 = vpack.c.bf16 %v12951_v10, %v12944_v5  ;;  %v12440_v22 = vand.u32 4294901760, %v12439_v34  ;;  %v12447_v19 = vand.u32 4294901760, %v12446_v63  ;;  %v13471_v43 = vand.u32 4294901760, %v49291_v17  ;;  %v51737_v63 = vld [vmem:[#allocation58_spill] sm:$0xff] }
 0x7b1   :  { %42402 = vmatmul.mubr.f32.vlgmr.msra.gmra.mrb[28].mxu1 %v51735_v47  ;;  %v13970_v35 = vand.u32 4294901760, %v13969_v32  ;;  %v13977_v38 = vand.u32 4294901760, %v13976_v33  ;;  %v13465_v26 = vsub.f32 %v13463_v50, %v13464_v2  ;;  %v49323_v24 = vpack.c.bf16 %v49291_v17, %v13463_v50  ;;  %v51736_v50 = vld [vmem:[#allocation44_spill] sm:$0xff]  ;;  %v51738_v33 = vld [vmem:[#allocation55_spill] sm:$0xff] }
 0x7b2   :  { %45359 = vmatprep.subr.bf16.mxu0 %v45358_v25  ;;  %45317 = vmatpush3.bf16.msra.mxu1 %v45314_v39  ;;  %v45334_v48 = vpack.c.bf16 %v12447_v19, %v12440_v22  ;;  %v13472_v7 = vsub.f32 %v49291_v17, %v13471_v43  ;;  %v49326_v46 = vpack.c.bf16 %v13471_v43, %v13464_v2  ;;  %v14472_v5 = vand.u32 4294901760, %v14471_v0  ;;  %v51743_v19 = vld [vmem:[#allocation47_spill] sm:$0xff]  ;;  %v51744_v43 = vld [vmem:[#allocation60_spill] sm:$0xff] }
 0x7b3   :  { %45361 = vmatpush3.bf16.msra.mxu0 %v45358_v25  ;;  %45319 = vmatprep.subr.bf16.mxu1 %v49284_v53  ;;  %v45406_v54 = vpack.c.bf16 %v13977_v38, %v13970_v35  ;;  %v13466_v27 = vand.u32 4294901760, %v13465_v26  ;;  %v14479_v21 = vand.u32 4294901760, %v49297_v20  ;;  %v49331_v30 = vpack.c.bf16 %v49297_v20, %v14471_v0  ;;  %v51739_v25 = vld [vmem:[#allocation45_spill] sm:$0xff]  ;;  %v51750_v26 = vld [vmem:[#allocation32_spill] sm:$0xff] }
 0x7b4   :  { %45363 = vmatprep.subr.bf16.mxu0 %v45362_v1  ;;  %42408 = vmatprep.mubr.f32.mxu1 %v51736_v50  ;;  %v13473_v39 = vand.u32 4294901760, %v13472_v7  ;;  %v14473_v10 = vsub.f32 %v14471_v0, %v14472_v5  ;;  %v51741_v0 = vld [vmem:[#allocation59_spill] sm:$0xff]  ;;  %v51749_v38 = vld [vmem:[#allocation29_spill] sm:$0xff] }
 0x7b5   :  { %v14480_v17 = vsub.f32 %v49297_v20, %v14479_v21  ;;  %v49335_v34 = vpack.c.bf16 %v14479_v21, %v14472_v5  ;;  %v51740_v20 = vld [vmem:[#allocation46_spill] sm:$0xff]  ;;  %v49479_v21 = vld [vmem:[%s51418_s10 + $0x10] sm:$0xff] }
 0x7b6   :  { %42486 = vmatmul.mubr.f32.vlgmr.msra.gmra.mrb[32].mxu0 %v51737_v63  ;;  %v49338_v32 = vpack.c.bf16 %v13473_v39, %v13466_v27  ;;  %v14474_v35 = vand.u32 4294901760, %v14473_v10 }
 0x7b7   :  { %45365 = vmatpush3.bf16.msra.mxu0 %v45362_v1  ;;  %42492 = vmatprep.mubr.f32.mxu0 %v51738_v33  ;;  %v14481_v2 = vand.u32 4294901760, %v14480_v17  ;;  %v51742_v1 = vld [vmem:[#allocation56_spill] sm:$0xff] }
 0x7b8   :  { %45367 = vmatprep.subr.bf16.mxu0 %v49288_v31 }
 0x7b9   :  { %42409 = vmatmul.mubr.f32.vlgmr.msra.gmra.mrb[28].mxu1 %v51739_v25  ;;  %v49343_v22 = vpack.c.bf16 %v14481_v2, %v14474_v35 }
 0x7ba   :  { %45321 = vmatpush3.bf16.msra.mxu1 %v49284_v53  ;;  %42415 = vmatprep.mubr.f32.mxu1 %v51740_v20 }
 0x7bb   :  { %45323 = vmatprep.subr.bf16.mxu1 %v49308_v51 }
 0x7be   :  { %42493 = vmatmul.mubr.f32.vlgmr.msra.gmra.mrb[32].mxu0 %v51741_v0 }
 0x7bf   :  { %45369 = vmatpush3.bf16.msra.mxu0 %v49288_v31  ;;  %42499 = vmatprep.mubr.f32.mxu0 %v51742_v1 }
 0x7c0   :  { %45371 = vmatprep.subr.bf16.mxu0 %v49310_v12 }
 0x7c1   :  { %42416 = vmatmul.mubr.f32.vlgmr.msra.gmra.mrb[28].mxu1 %v51743_v19 }
 0x7c2   :  { %45325 = vmatpush3.bf16.msra.mxu1 %v49308_v51  ;;  %42422 = vmatprep.mubr.f32.mxu1 %v51732_v56  ;;  %v51748_v51 = vld [vmem:[#allocation27_spill] sm:$0xff] }
 0x7c3   :  { %45327 = vmatprep.subr.bf16.mxu1 %v49284_v53 }
 0x7c6   :  { %42500 = vmatmul.mubr.f32.vlgmr.msra.gmra.mrb[32].mxu0 %v51744_v43 }
 0x7c7   :  { %45373 = vmatpush3.bf16.msra.mxu0 %v49310_v12  ;;  %42506 = vmatprep.mubr.f32.mxu0 %v51734_v8  ;;  %v51745_v12 = vld [vmem:[#allocation34_spill] sm:$0xff] }
 0x7c8   :  { %45375 = vmatprep.subr.bf16.mxu0 %v49288_v31 }
 0x7c9   :  { %42423 = vmatmul.mubr.f32.vlgmr.msra.gmra.mrb[28].mxu1 %v51735_v47 }
 0x7ca   :  { %45329 = vmatpush3.bf16.msra.mxu1 %v49284_v53  ;;  %42429 = vmatprep.mubr.f32.mxu1 %v51732_v56  ;;  %v51746_v53 = vld [vmem:[#allocation35_spill] sm:$0xff] }
 0x7cb   :  { %45331 = vmatprep.subr.bf16.mxu1 %v49286_v29 }
 0x7ce   :  { %42507 = vmatmul.mubr.f32.vlgmr.msra.gmra.mrb[32].mxu0 %v51737_v63 }
 0x7cf   :  { %45377 = vmatpush3.bf16.msra.mxu0 %v49288_v31  ;;  %42513 = vmatprep.mubr.f32.mxu0 %v51734_v8  ;;  %v51747_v31 = vld [vmem:[#allocation26_spill] sm:$0xff] }
 0x7d0   :  { %45403 = vmatprep.subr.bf16.mxu0 %v49303_v16 }
 0x7d1   :  { %42430 = vmatmul.mubr.f32.vlgmr.msra.gmra.mrb[28].mxu1 %v51735_v47 }
 0x7d2   :  { %45333 = vmatpush3.bf16.msra.mxu1 %v49286_v29  ;;  %42436 = vmatprep.mubr.f32.mxu1 %v51745_v12 }
 0x7d3   :  { %45335 = vmatprep.subr.bf16.mxu1 %v45334_v48 }
 0x7d5   :  { %42437 = vmatmul.mubr.f32.vlgmr.msra.gmra.mrb[30].mxu1 %v51746_v53 }
 0x7d6   :  { %42514 = vmatmul.mubr.f32.vlgmr.msra.gmra.mrb[32].mxu0 %v51737_v63  ;;  %45337 = vmatpush3.bf16.msra.mxu1 %v45334_v48  ;;  %v51751_v48 = vld [vmem:[#allocation31_spill] sm:$0xff] }
 0x7d7   :  { %45405 = vmatpush3.bf16.msra.mxu0 %v49303_v16  ;;  %45339 = vmatprep.subr.bf16.mxu1 %v49312_v59 }
 0x7d8   :  { %45407 = vmatprep.subr.bf16.mxu0 %v45406_v54  ;;  %42562 = vmatprep.mubr.f32.mxu0 %v51745_v12 }
 0x7d9   :  { %42443 = vmatprep.mubr.f32.mxu1 %v51747_v31 }
 0x7da   :  { %42563 = vmatmul.mubr.f32.vlgmr.msra.gmra.mrb[34].mxu0 %v51746_v53 }
 0x7db   :  { %45409 = vmatpush3.bf16.msra.mxu0 %v45406_v54  ;;  %42569 = vmatprep.mubr.f32.mxu0 %v51747_v31  ;;  %v49474_v54 = vld [vmem:[%s51419_s11 + $0x18] sm:$0xff] }
 0x7dc   :  { %45411 = vmatprep.subr.bf16.mxu0 %v49314_v58 }
 0x7dd   :  { %42444 = vmatmul.mubr.f32.vlgmr.msra.gmra.mrb[30].mxu1 %v51748_v51 }
 0x7de   :  { %45341 = vmatpush3.bf16.msra.mxu1 %v49312_v59  ;;  %42450 = vmatprep.mubr.f32.mxu1 %v51749_v38  ;;  %v51752_v59 = vld [vmem:[#allocation33_spill] sm:$0xff] }
 0x7df   :  { %45343 = vmatprep.subr.bf16.mxu1 %v49286_v29 }
 0x7e2   :  { %42570 = vmatmul.mubr.f32.vlgmr.msra.gmra.mrb[34].mxu0 %v51748_v51 }
 0x7e3   :  { %45413 = vmatpush3.bf16.msra.mxu0 %v49314_v58  ;;  %42576 = vmatprep.mubr.f32.mxu0 %v51749_v38  ;;  %v51753_v58 = vld [vmem:[#allocation65_spill] sm:$0xff] }
 0x7e4   :  { %45415 = vmatprep.subr.bf16.mxu0 %v49303_v16 }
 0x7e5   :  { %42451 = vmatmul.mubr.f32.vlgmr.msra.gmra.mrb[30].mxu1 %v51750_v26 }
 0x7e6   :  { %45345 = vmatpush3.bf16.msra.mxu1 %v49286_v29  ;;  %42457 = vmatprep.mubr.f32.mxu1 %v51751_v48 }
 0x7e7   :  { %45347 = vmatprep.subr.bf16.mxu1 %v49316_v57 }
 0x7ea   :  { %42577 = vmatmul.mubr.f32.vlgmr.msra.gmra.mrb[34].mxu0 %v51750_v26 }
 0x7eb   :  { %45417 = vmatpush3.bf16.msra.mxu0 %v49303_v16  ;;  %42583 = vmatprep.mubr.f32.mxu0 %v51751_v48 }
 0x7ec   :  { %45419 = vmatprep.subr.bf16.mxu0 %v49318_v55 }
 0x7ed   :  { %42458 = vmatmul.mubr.f32.vlgmr.msra.gmra.mrb[30].mxu1 %v51752_v59 }
 0x7ee   :  { %45349 = vmatpush3.bf16.msra.mxu1 %v49316_v57  ;;  %42464 = vmatprep.mubr.f32.mxu1 %v51747_v31 }
 0x7ef   :  { %45351 = vmatprep.subr.bf16.mxu1 %v49286_v29 }
 0x7f2   :  { %42584 = vmatmul.mubr.f32.vlgmr.msra.gmra.mrb[34].mxu0 %v51752_v59 }
 0x7f3   :  { %45421 = vmatpush3.bf16.msra.mxu0 %v49318_v55  ;;  %42590 = vmatprep.mubr.f32.mxu0 %v51747_v31 }
 0x7f4   :  { %45423 = vmatprep.subr.bf16.mxu0 %v49303_v16 }
 0x7f5   :  { %42465 = vmatmul.mubr.f32.vlgmr.msra.gmra.mrb[30].mxu1 %v51748_v51 }
 0x7f6   :  { %45353 = vmatpush3.bf16.msra.mxu1 %v49286_v29  ;;  %42471 = vmatprep.mubr.f32.mxu1 %v51747_v31  ;;  %v51754_v29 = vld [vmem:[#allocation72_spill] sm:$0xff] }
 0x7f7   :  { %45379 = vmatprep.subr.bf16.mxu1 %v49299_v44 }
 0x7fa   :  { %42591 = vmatmul.mubr.f32.vlgmr.msra.gmra.mrb[34].mxu0 %v51748_v51 }
 0x7fb   :  { %45425 = vmatpush3.bf16.msra.mxu0 %v49303_v16  ;;  %42597 = vmatprep.mubr.f32.mxu0 %v51747_v31  ;;  %v51756_v16 = vld [vmem:[#allocation71_spill] sm:$0xff] }
 0x7fc   :  { %45451 = vmatprep.subr.bf16.mxu0 %v51753_v58 }
 0x7fd   :  { %42472 = vmatmul.mubr.f32.vlgmr.msra.gmra.mrb[30].mxu1 %v51748_v51 }
 0x7fe   :  { %45381 = vmatpush3.bf16.msra.mxu1 %v49299_v44  ;;  %42520 = vmatprep.mubr.f32.mxu1 %v51727_v13 }
 0x7ff   :  { %45383 = vmatprep.subr.bf16.mxu1 %v49338_v32 }
 0x801   :  { %42521 = vmatmul.mubr.f32.vlgmr.msra.gmra.mrb[32].mxu1 %v51731_v49 }
 0x802   :  { %45385 = vmatpush3.bf16.msra.mxu1 %v49338_v32  ;;  %42527 = vmatprep.mubr.f32.mxu1 %v51732_v56 }
 0x803   :  { %45387 = vmatprep.subr.bf16.mxu1 %v49323_v24  ;;  %42598 = vmatmul.mubr.f32.vlgmr.msra.gmra.mrb[34].mxu0 %v51748_v51 }
 0x804   :  { %45453 = vmatpush3.bf16.xpose.msra.mxu0 %v51753_v58 }
 0x805   :  { %45455 = vmatprep.subr.bf16.mxu0 %v51754_v29 }
 0x809   :  { %42528 = vmatmul.mubr.f32.vlgmr.msra.gmra.mrb[32].mxu1 %v51735_v47 }
 0x80a   :  { %45389 = vmatpush3.bf16.msra.mxu1 %v49323_v24  ;;  %42534 = vmatprep.mubr.f32.mxu1 %v51736_v50 }
 0x80b   :  { %45391 = vmatprep.subr.bf16.mxu1 %v49299_v44 }
 0x811   :  { %42535 = vmatmul.mubr.f32.vlgmr.msra.gmra.mrb[32].mxu1 %v51739_v25 }
 0x812   :  { %45393 = vmatpush3.bf16.msra.mxu1 %v49299_v44  ;;  %42541 = vmatprep.mubr.f32.mxu1 %v51740_v20 }
 0x813   :  { %45395 = vmatprep.subr.bf16.mxu1 %v49326_v46 }
 0x819   :  { %42542 = vmatmul.mubr.f32.vlgmr.msra.gmra.mrb[32].mxu1 %v51743_v19 }
 0x81a   :  { %45397 = vmatpush3.bf16.msra.mxu1 %v49326_v46  ;;  %42548 = vmatprep.mubr.f32.mxu1 %v51732_v56 }
 0x81b   :  { %45399 = vmatprep.subr.bf16.mxu1 %v49299_v44 }
 0x821   :  { %42549 = vmatmul.mubr.f32.vlgmr.msra.gmra.mrb[32].mxu1 %v51735_v47 }
 0x822   :  { %45401 = vmatpush3.bf16.msra.mxu1 %v49299_v44  ;;  %42555 = vmatprep.mubr.f32.mxu1 %v51732_v56  ;;  %v51755_v44 = vld [vmem:[#allocation64_spill] sm:$0xff] }
 0x823   :  { %45427 = vmatprep.subr.bf16.mxu1 %v49306_v45 }
 0x829   :  { %42556 = vmatmul.mubr.f32.vlgmr.msra.gmra.mrb[32].mxu1 %v51735_v47 }
 0x82a   :  { %45429 = vmatpush3.bf16.msra.mxu1 %v49306_v45  ;;  %42604 = vmatprep.mubr.f32.mxu1 %v51730_v61 }
 0x82b   :  { %45431 = vmatprep.subr.bf16.mxu1 %v49343_v22 }
 0x82d   :  { %42605 = vmatmul.mubr.f32.vlgmr.msra.gmra.mrb[34].mxu1 %v51733_v23 }
 0x82e   :  { %45433 = vmatpush3.bf16.msra.mxu1 %v49343_v22  ;;  %42611 = vmatprep.mubr.f32.mxu1 %v51734_v8 }
 0x82f   :  { %45435 = vmatprep.subr.bf16.mxu1 %v49331_v30 }
 0x835   :  { %42612 = vmatmul.mubr.f32.vlgmr.msra.gmra.mrb[34].mxu1 %v51737_v63 }
 0x836   :  { %45437 = vmatpush3.bf16.msra.mxu1 %v49331_v30  ;;  %42618 = vmatprep.mubr.f32.mxu1 %v51738_v33  ;;  %v49484_v30 = vld [vmem:[%s51419_s11 + $0x10] sm:$0xff] }
 0x837   :  { %45439 = vmatprep.subr.bf16.mxu1 %v49306_v45 }
 0x83d   :  { %42619 = vmatmul.mubr.f32.vlgmr.msra.gmra.mrb[34].mxu1 %v51741_v0 }
 0x83e   :  { %45441 = vmatpush3.bf16.msra.mxu1 %v49306_v45  ;;  %42625 = vmatprep.mubr.f32.mxu1 %v51742_v1 }
 0x83f   :  { %45443 = vmatprep.subr.bf16.mxu1 %v49335_v34 }
 0x845   :  { %42626 = vmatmul.mubr.f32.vlgmr.msra.gmra.mrb[34].mxu1 %v51744_v43  ;;  %v51758_v43 = vld [vmem:[#allocation75_spill] sm:$0xff] }
 0x846   :  { %45445 = vmatpush3.bf16.msra.mxu1 %v49335_v34  ;;  %42632 = vmatprep.mubr.f32.mxu1 %v51734_v8 }
 0x847   :  { %45447 = vmatprep.subr.bf16.mxu1 %v49306_v45 }
 0x84d   :  { %42633 = vmatmul.mubr.f32.vlgmr.msra.gmra.mrb[34].mxu1 %v51737_v63 }
 0x84e   :  { %45449 = vmatpush3.bf16.msra.mxu1 %v49306_v45  ;;  %42639 = vmatprep.mubr.f32.mxu1 %v51734_v8  ;;  %v49469_v45 = vld [vmem:[%s51418_s10 + $0x18] sm:$0xff] }
 0x84f   :  { %45475 = vmatprep.subr.bf16.mxu1 %v51755_v44 }
 0x855   :  { %42640 = vmatmul.mubr.f32.vlgmr.msra.gmra.mrb[34].mxu1 %v51737_v63 }
 0x857   :  { %45477 = vmatpush3.bf16.xpose.msra.mxu1 %v51755_v44 }
 0x858   :  { %45479 = vmatprep.subr.bf16.mxu1 %v51756_v16 }
 0x8a4   :  { %v42431_v57 = vpop.f32.mrb[28].mxu1 }
 0x8a5   :  { %v12336_v55 = vpop.f32.mrb[29].mxu1 }
 0x8a9   :  { %v42515_v24 = vpop.f32.mrb[32].mxu0 }
 0x8aa   :  { %v13355_v7 = vsub.f32 %v42431_v57, %v42515_v24  ;;  %v13344_v46 = vpop.f32.mrb[33].mxu0 }
 0x8ab   :  { %v13354_v5 = vsub.f32 %v12336_v55, %v13344_v46 }
 0x8ac   :  { %v13359_v34 = vmul.f32 %v49469_v45, %v13355_v7  ;;  %v13367_v32 = vmul.f32 %v49474_v54, %v13355_v7 }
 0x8ad   :  { %v13358_v22 = vmul.f32 %v49479_v21, %v13354_v5  ;;  %v13366_v24 = vmul.f32 %v49484_v30, %v13354_v5 }
 0x8d0   :  { %v42473_v27 = vpop.f32.mrb[30].mxu1 }
 0x8d1   :  { %v13357_v39 = vadd.f32 %v42473_v27, %v42431_v57  ;;  %v12840_v10 = vpop.f32.mrb[31].mxu1 }
 0x8d2   :  { %v13356_v17 = vadd.f32 %v12840_v10, %v12336_v55 }
 0x8d3   :  { %v13361_v35 = vmul.f32 %v49474_v54, %v13357_v39  ;;  %v13369_v2 = vmul.f32 %v49469_v45, %v13357_v39 }
 0x8d4   :  { %v13360_v46 = vmul.f32 %v49484_v30, %v13356_v17  ;;  %v13368_v59 = vmul.f32 %v49479_v21, %v13356_v17 }
 0x8d5   :  { %v13363_v48 = vsub.f32 %v13359_v34, %v13361_v35  ;;  %v13371_v57 = vadd.f32 %v13369_v2, %v13367_v32 }
 0x8d6   :  { %v13362_v27 = vsub.f32 %v13358_v22, %v13360_v46  ;;  %v13370_v55 = vadd.f32 %v13368_v59, %v13366_v24  ;;  %v42599_v10 = vpop.f32.mrb[34].mxu0 }
 0x8d7   :  { %13365 = vst.msk [vmem:[#allocation2 + $0x8] sm:$0xff] %vm213_vm0, %v13363_v48  ;;  %13373 = vst.msk [vmem:[#allocation3 + $0x8] sm:$0xff] %vm213_vm0, %v13371_v57  ;;  %v14370_v7 = vpop.f32.mrb[35].mxu0 }
 0x8d8   :  { %13364 = vst.msk [vmem:[#allocation2] sm:$0xff] %vm213_vm0, %v13362_v27  ;;  %13372 = vst.msk [vmem:[#allocation3] sm:$0xff] %vm213_vm0, %v13370_v55 }
 0x8de   :  { %v14905_v39 = vld [vmem:[#allocation2 + $0x8] sm:$0xff] }
 0x8df   :  { %v49498_v5 = vld [vmem:[#allocation3 + $0x8] sm:$0xff]  ;;  %v14904_v26 = vld [vmem:[#allocation2] sm:$0xff]  ;;  %v15520_v17 = vsel %vm213_vm0, %v14905_v39, 0 }
 0x8e0   :  { %v49501_v34 = vld [vmem:[#allocation3] sm:$0xff]  ;;  %v14913_v59 = vadd.f32 %v49498_v5, %v14905_v39  ;;  %v15517_v32 = vsel %vm213_vm0, %v14904_v26, 0  ;;  %v49505_v48 = vand.u32 4294901760, %v15520_v17 }
 0x8e1   :  { %v14912_v35 = vadd.f32 %v49501_v34, %v14904_v26  ;;  %v49508_v2 = vand.u32 4294901760, %v15517_v32 }
 0x8e2   :  { %v14920_v22 = vsel %vm213_vm0, %v14913_v59, 0  ;;  %v49512_v24 = vsub.f32 %v15520_v17, %v49505_v48 }
 0x8e3   :  { %v14917_v46 = vsel %vm213_vm0, %v14912_v35, 0  ;;  %v49515_v57 = vand.u32 4294901760, %v14920_v22  ;;  %v49518_v27 = vsub.f32 %v15517_v32, %v49508_v2 }
 0x8e4   :  { %v49520_v55 = vand.u32 4294901760, %v14917_v46  ;;  %v51561_v39 = vand.u32 4294901760, %v49512_v24 }
 0x8e5   :  { %v49524_v26 = vsub.f32 %v14920_v22, %v49515_v57  ;;  %v51563_v38 = vand.u32 4294901760, %v49518_v27 }
 0x8e6   :  { %v49528_v59 = vsub.f32 %v14917_v46, %v49520_v55  ;;  %v15608_v17 = vsub.f32 %v49512_v24, %v51561_v39 }
 0x8e7   :  { %v51565_v35 = vand.u32 4294901760, %v49524_v26  ;;  %v15598_v32 = vsub.f32 %v49518_v27, %v51563_v38  ;;  %v51757_v38 = vld [vmem:[#allocation74_spill] sm:$0xff] }
 0x8e8   :  { %v51568_v51 = vand.u32 4294901760, %v49528_v59  ;;  %v15609_v53 = vand.u32 4294901760, %v15608_v17 }
 0x8e9   :  { %v15008_v22 = vsub.f32 %v49524_v26, %v51565_v35  ;;  %v15599_v31 = vand.u32 4294901760, %v15598_v32 }
 0x8ea   :  { %v14998_v46 = vsub.f32 %v49528_v59, %v51568_v51 }
 0x8eb   :  { %42706 = vmatprep.mubr.f32.mxu1 %v15599_v31  ;;  %v15009_v12 = vand.u32 4294901760, %v15008_v22 }
 0x8ec   :  { %v14999_v39 = vand.u32 4294901760, %v14998_v46  ;;  %42707 = vmatmul.mubr.f32.vlgmr.msra.gmra.mrb[36].mxu1 %v15609_v53 }
 0x8ed   :  { %45481 = vmatpush3.bf16.xpose.msra.mxu1 %v51756_v16 }
 0x8ee   :  { %42646 = vmatprep.mubr.f32.mxu0 %v14999_v39  ;;  %45483 = vmatprep.subr.bf16.mxu1 %v51757_v38 }
 0x8ef   :  { %42647 = vmatmul.mubr.f32.vlgmr.msra.gmra.mrb[36].mxu0 %v15009_v12 }
 0x8f0   :  { %45457 = vmatpush3.bf16.xpose.msra.mxu0 %v51754_v29 }
 0x8f1   :  { %45459 = vmatprep.subr.bf16.mxu0 %v51758_v43 }
 0x8fc   :  { %v42557_v32 = vpop.f32.mrb[32].mxu1 }
 0x8fd   :  { %v14887_v35 = vadd.f32 %v42599_v10, %v42557_v32  ;;  %v13866_v19 = vpop.f32.mrb[33].mxu1 }
 0x8fe   :  { %v14886_v1 = vadd.f32 %v14370_v7, %v13866_v19 }
 0x8ff   :  { %v14891_v53 = vmul.f32 %v49474_v54, %v14887_v35  ;;  %v14899_v39 = vmul.f32 %v49469_v45, %v14887_v35 }
 0x900   :  { %v14890_v16 = vmul.f32 %v49484_v30, %v14886_v1  ;;  %v14898_v29 = vmul.f32 %v49479_v21, %v14886_v1 }
 0x928   :  { %v42641_v51 = vpop.f32.mrb[34].mxu1 }
 0x929   :  { %v14885_v17 = vsub.f32 %v42557_v32, %v42641_v51  ;;  %v14874_v31 = vpop.f32.mrb[35].mxu1 }
 0x92a   :  { %v14884_v46 = vsub.f32 %v13866_v19, %v14874_v31 }
 0x92b   :  { %v14889_v12 = vmul.f32 %v49469_v45, %v14885_v17  ;;  %v14897_v22 = vmul.f32 %v49474_v54, %v14885_v17 }
 0x92c   :  { %v14888_v10 = vmul.f32 %v49479_v21, %v14884_v46  ;;  %v14896_v7 = vmul.f32 %v49484_v30, %v14884_v46 }
 0x92d   :  { %v14893_v0 = vsub.f32 %v14889_v12, %v14891_v53  ;;  %v14901_v51 = vadd.f32 %v14899_v39, %v14897_v22 }
 0x92e   :  { %v14892_v32 = vsub.f32 %v14888_v10, %v14890_v16  ;;  %v14900_v19 = vadd.f32 %v14898_v29, %v14896_v7 }
 0x92f   :  { %14895 = vst.msk [vmem:[#allocation2 + $0x18] sm:$0xff] %vm213_vm0, %v14893_v0  ;;  %14903 = vst.msk [vmem:[#allocation3 + $0x18] sm:$0xff] %vm213_vm0, %v14901_v51 }
 0x930   :  { %14894 = vst.msk [vmem:[#allocation2 + $0x10] sm:$0xff] %vm213_vm0, %v14892_v32  ;;  %14902 = vst.msk [vmem:[#allocation3 + $0x10] sm:$0xff] %vm213_vm0, %v14900_v19 }
 0x936   :  { %v14907_v45 = vld [vmem:[#allocation2 + $0x18] sm:$0xff] }
 0x937   :  { %v49560_v54 = vld [vmem:[#allocation3 + $0x18] sm:$0xff]  ;;  %v14906_v1 = vld [vmem:[#allocation2 + $0x10] sm:$0xff]  ;;  %v15526_v21 = vsel %vm213_vm0, %v14907_v45, 0 }
 0x938   :  { %v49563_v35 = vld [vmem:[#allocation3 + $0x10] sm:$0xff]  ;;  %v14915_v30 = vadd.f32 %v49560_v54, %v14907_v45  ;;  %v15523_v29 = vsel %vm213_vm0, %v14906_v1, 0  ;;  %v49567_v16 = vand.u32 4294901760, %v15526_v21 }
 0x939   :  { %v14914_v0 = vadd.f32 %v49563_v35, %v14906_v1  ;;  %v49570_v17 = vand.u32 4294901760, %v15523_v29 }
 0x93a   :  { %v14926_v31 = vsel %vm213_vm0, %v14915_v30, 0  ;;  %v15626_v46 = vsub.f32 %v15526_v21, %v49567_v16 }
 0x93b   :  { %v14923_v53 = vsel %vm213_vm0, %v14914_v0, 0  ;;  %v49575_v39 = vand.u32 4294901760, %v14926_v31  ;;  %v15616_v12 = vsub.f32 %v15523_v29, %v49570_v17 }
 0x93c   :  { %v49578_v22 = vand.u32 4294901760, %v14923_v53  ;;  %v15627_v10 = vand.u32 4294901760, %v15626_v46 }
 0x93d   :  { %v15026_v7 = vsub.f32 %v14926_v31, %v49575_v39  ;;  %v15617_v51 = vand.u32 4294901760, %v15616_v12  ;;  %v51762_v31 = vand.u32 4294901760, %v49528_v59 }
 0x93e   :  { %v15016_v32 = vsub.f32 %v14923_v53, %v49578_v22  ;;  %v15628_v19 = vsub.f32 %v15626_v46, %v15627_v10  ;;  %v51763_v53 = vand.u32 4294901760, %v49512_v24 }
 0x93f   :  { %v15027_v45 = vand.u32 4294901760, %v15026_v7  ;;  %v15618_v1 = vsub.f32 %v15616_v12, %v15617_v51 }
 0x940   :  { %v15017_v30 = vand.u32 4294901760, %v15016_v32  ;;  %v15629_v0 = vand.u32 4294901760, %v15628_v19 }
 0x941   :  { %v15028_v20 = vsub.f32 %v15026_v7, %v15027_v45  ;;  %v15619_v21 = vand.u32 4294901760, %v15618_v1 }
 0x942   :  { %v15018_v25 = vsub.f32 %v15016_v32, %v15017_v30 }
 0x943   :  { %42709 = vmatprep.mubr.f32.mxu1 %v15619_v21  ;;  %v15029_v29 = vand.u32 4294901760, %v15028_v20  ;;  %v51761_v20 = vand.u32 4294901760, %v49518_v27  ;;  %v51766_v21 = vld [vmem:[#allocation78_spill] sm:$0xff] }
 0x944   :  { %v15019_v33 = vand.u32 4294901760, %v15018_v25  ;;  %42710 = vmatmul.mubr.f32.gmra.mrb[38].mxu1 %v15629_v0  ;;  %v51760_v25 = vld [vmem:[#allocation76_spill] sm:$0xff] }
 0x945   :  { %42716 = vmatprep.mubr.f32.mxu1 %v49508_v2 }
 0x946   :  { %42649 = vmatprep.mubr.f32.mxu0 %v15019_v33  ;;  %v51759_v33 = vld [vmem:[#allocation73_spill] sm:$0xff] }
 0x947   :  { %42650 = vmatmul.mubr.f32.gmra.mrb[38].mxu0 %v15029_v29 }
 0x948   :  { %42656 = vmatprep.mubr.f32.mxu0 %v49520_v55  ;;  %42717 = vmatmul.mubr.f32.vlgmr.msra.gmra.mrb[36].mxu1 %v49505_v48 }
 0x949   :  { %42719 = vmatprep.mubr.f32.mxu1 %v49570_v17  ;;  %45485 = vmatpush3.bf16.xpose.msra.mxu1 %v51757_v38 }
 0x94a   :  { %45487 = vmatprep.subr.bf16.mxu1 %v51755_v44 }
 0x94b   :  { %42657 = vmatmul.mubr.f32.vlgmr.msra.gmra.mrb[36].mxu0 %v49515_v57 }
 0x94c   :  { %42659 = vmatprep.mubr.f32.mxu0 %v49578_v22  ;;  %45461 = vmatpush3.bf16.xpose.msra.mxu0 %v51758_v43 }
 0x94d   :  { %42720 = vmatmul.mubr.f32.gmra.mrb[38].mxu1 %v49567_v16  ;;  %45463 = vmatprep.subr.bf16.mxu0 %v51753_v58 }
 0x94e   :  { %42726 = vmatprep.mubr.f32.mxu1 %v49518_v27  ;;  %v16120_v27 = vsel %vm213_vm0, %v49498_v5, 0  ;;  %v16126_v5 = vsel %vm213_vm0, %v49560_v54, 0 }
 0x94f   :  { %42660 = vmatmul.mubr.f32.gmra.mrb[38].mxu0 %v49575_v39 }
 0x950   :  { %42666 = vmatprep.mubr.f32.mxu0 %v49528_v59 }
 0x951   :  { %42727 = vmatmul.mubr.f32.vlgmr.msra.gmra.mrb[36].mxu1 %v49512_v24 }
 0x952   :  { %42729 = vmatprep.mubr.f32.mxu1 %v15616_v12  ;;  %45489 = vmatpush3.bf16.xpose.msra.mxu1 %v51755_v44  ;;  %v51764_v12 = vand.u32 4294901760, %v49524_v26 }
 0x953   :  { %42667 = vmatmul.mubr.f32.vlgmr.msra.gmra.mrb[36].mxu0 %v49524_v26  ;;  %45491 = vmatprep.subr.bf16.mxu1 %v51759_v33  ;;  %v16123_v26 = vsel %vm213_vm0, %v49563_v35, 0  ;;  %v51765_v35 = vld [vmem:[#allocation77_spill] sm:$0xff] }
 0x954   :  { %42669 = vmatprep.mubr.f32.mxu0 %v15016_v32  ;;  %45465 = vmatpush3.bf16.xpose.msra.mxu0 %v51753_v58 }
 0x955   :  { %42730 = vmatmul.mubr.f32.gmra.mrb[38].mxu1 %v15626_v46  ;;  %45467 = vmatprep.subr.bf16.mxu0 %v51760_v25  ;;  %v16117_v46 = vsel %vm213_vm0, %v49501_v34, 0  ;;  %v49625_v34 = vand.u32 4294901760, %v16120_v27 }
 0x956   :  { %42736 = vmatprep.mubr.f32.mxu1 %v51761_v20  ;;  %v49617_v24 = vand.u32 4294901760, %v16117_v46 }
 0x957   :  { %42670 = vmatmul.mubr.f32.gmra.mrb[38].mxu0 %v15026_v7  ;;  %v16206_v7 = vsub.f32 %v16120_v27, %v49625_v34 }
 0x958   :  { %42676 = vmatprep.mubr.f32.mxu0 %v51762_v31  ;;  %v16196_v59 = vsub.f32 %v16117_v46, %v49617_v24 }
 0x959   :  { %42737 = vmatmul.mubr.f32.vlgmr.msra.gmra.mrb[36].mxu1 %v51763_v53  ;;  %v16207_v54 = vand.u32 4294901760, %v16206_v7 }
 0x95a   :  { %42739 = vmatprep.mubr.f32.mxu1 %v15617_v51  ;;  %45493 = vmatpush3.bf16.xpose.msra.mxu1 %v51759_v33  ;;  %v16225_v51 = vand.u32 4294901760, %v16126_v5  ;;  %v16197_v32 = vand.u32 4294901760, %v16196_v59 }
 0x95b   :  { %42677 = vmatmul.mubr.f32.vlgmr.msra.gmra.mrb[36].mxu0 %v51764_v12  ;;  %45495 = vmatprep.subr.bf16.mxu1 %v51755_v44 }
 0x95c   :  { %42679 = vmatprep.mubr.f32.mxu0 %v15017_v30  ;;  %45469 = vmatpush3.bf16.xpose.msra.mxu0 %v51760_v25  ;;  %v16198_v1 = vsub.f32 %v16196_v59, %v16197_v32 }
 0x95d   :  { %42740 = vmatmul.mubr.f32.gmra.mrb[38].mxu1 %v15627_v10  ;;  %45471 = vmatprep.subr.bf16.mxu0 %v51753_v58  ;;  %v49630_v10 = vand.u32 4294901760, %v16123_v26 }
 0x95e   :  { %42746 = vmatprep.mubr.f32.mxu1 %v49508_v2  ;;  %v16199_v0 = vand.u32 4294901760, %v16198_v1 }
 0x95f   :  { %42680 = vmatmul.mubr.f32.gmra.mrb[38].mxu0 %v15027_v45  ;;  %v16216_v19 = vsub.f32 %v16123_v26, %v49630_v10  ;;  %v16226_v45 = vsub.f32 %v16126_v5, %v16225_v51 }
 0x960   :  { %42686 = vmatprep.mubr.f32.mxu0 %v49520_v55 }
 0x961   :  { %42747 = vmatmul.mubr.f32.vlgmr.msra.gmra.mrb[36].mxu1 %v49505_v48  ;;  %v16217_v30 = vand.u32 4294901760, %v16216_v19 }
 0x962   :  { %42749 = vmatprep.mubr.f32.mxu1 %v49570_v17  ;;  %45497 = vmatpush3.bf16.xpose.msra.mxu1 %v51755_v44 }
 0x963   :  { %42687 = vmatmul.mubr.f32.vlgmr.msra.gmra.mrb[36].mxu0 %v49515_v57 }
 0x964   :  { %42689 = vmatprep.mubr.f32.mxu0 %v49578_v22  ;;  %45473 = vmatpush3.bf16.xpose.msra.mxu0 %v51753_v58 }
 0x965   :  { %42750 = vmatmul.mubr.f32.gmra.mrb[38].mxu1 %v49567_v16  ;;  %45499 = vmatprep.subr.bf16.mxu0 %v51765_v35 }
 0x966   :  { %42756 = vmatprep.mubr.f32.mxu1 %v49508_v2  ;;  %v16208_v2 = vsub.f32 %v16206_v7, %v16207_v54 }
 0x967   :  { %42690 = vmatmul.mubr.f32.gmra.mrb[38].mxu0 %v49575_v39 }
 0x968   :  { %42696 = vmatprep.mubr.f32.mxu0 %v49520_v55  ;;  %v16227_v55 = vand.u32 4294901760, %v16226_v45 }
 0x969   :  { %42757 = vmatmul.mubr.f32.vlgmr.msra.gmra.mrb[36].mxu1 %v49505_v48  ;;  %v16218_v48 = vsub.f32 %v16216_v19, %v16217_v30 }
 0x96a   :  { %42759 = vmatprep.mubr.f32.mxu1 %v49570_v17  ;;  %v16209_v17 = vand.u32 4294901760, %v16208_v2  ;;  %v16228_v29 = vsub.f32 %v16226_v45, %v16227_v55 }
 0x96b   :  { %42697 = vmatmul.mubr.f32.vlgmr.msra.gmra.mrb[36].mxu0 %v49515_v57  ;;  %v16219_v57 = vand.u32 4294901760, %v16218_v48 }
 0x96c   :  { %42699 = vmatprep.mubr.f32.mxu0 %v49578_v22  ;;  %45501 = vmatpush3.bf16.xpose.msra.mxu0 %v51765_v35  ;;  %v16229_v22 = vand.u32 4294901760, %v16228_v29 }
 0x96d   :  { %42760 = vmatmul.mubr.f32.gmra.mrb[38].mxu1 %v49567_v16  ;;  %45503 = vmatprep.subr.bf16.mxu0 %v51766_v21  ;;  %v51767_v16 = vld [vmem:[#allocation79_spill] sm:$0xff] }
 0x96e   :  { %42826 = vmatprep.mubr.f32.mxu1 %v48834_v3 }
 0x96f   :  { %42700 = vmatmul.mubr.f32.gmra.mrb[38].mxu0 %v49575_v39  ;;  %v51768_v39 = vld [vmem:[#allocation80_spill] sm:$0xff] }
 0x970   :  { %42766 = vmatprep.mubr.f32.mxu0 %v16199_v0 }
 0x973   :  { %42767 = vmatmul.mubr.f32.vlgmr.msra.gmra.mrb[40].mxu0 %v16209_v17 }
 0x974   :  { %42769 = vmatprep.mubr.f32.mxu0 %v16219_v57  ;;  %45505 = vmatpush3.bf16.xpose.msra.mxu0 %v51766_v21 }
 0x975   :  { %45507 = vmatprep.subr.bf16.mxu0 %v51767_v16 }
 0x977   :  { %42770 = vmatmul.mubr.f32.gmra.mrb[42].mxu0 %v16229_v22 }
 0x978   :  { %42776 = vmatprep.mubr.f32.mxu0 %v49617_v24 }
 0x97b   :  { %42777 = vmatmul.mubr.f32.vlgmr.msra.gmra.mrb[40].mxu0 %v49625_v34 }
 0x97c   :  { %42779 = vmatprep.mubr.f32.mxu0 %v49630_v10  ;;  %45509 = vmatpush3.bf16.xpose.msra.mxu0 %v51767_v16 }
 0x97d   :  { %45511 = vmatprep.subr.bf16.mxu0 %v51765_v35 }
 0x97f   :  { %42780 = vmatmul.mubr.f32.gmra.mrb[42].mxu0 %v16225_v51 }
 0x980   :  { %42786 = vmatprep.mubr.f32.mxu0 %v16196_v59 }
 0x983   :  { %42787 = vmatmul.mubr.f32.vlgmr.msra.gmra.mrb[40].mxu0 %v16206_v7 }
 0x984   :  { %42789 = vmatprep.mubr.f32.mxu0 %v16216_v19  ;;  %45513 = vmatpush3.bf16.xpose.msra.mxu0 %v51765_v35 }
 0x985   :  { %45515 = vmatprep.subr.bf16.mxu0 %v51768_v39 }
 0x987   :  { %42790 = vmatmul.mubr.f32.gmra.mrb[42].mxu0 %v16226_v45 }
 0x988   :  { %42796 = vmatprep.mubr.f32.mxu0 %v16197_v32 }
 0x98b   :  { %42797 = vmatmul.mubr.f32.vlgmr.msra.gmra.mrb[40].mxu0 %v16207_v54 }
 0x98c   :  { %42799 = vmatprep.mubr.f32.mxu0 %v16217_v30  ;;  %45517 = vmatpush3.bf16.xpose.msra.mxu0 %v51768_v39 }
 0x98d   :  { %45519 = vmatprep.subr.bf16.mxu0 %v51765_v35 }
 0x98f   :  { %42800 = vmatmul.mubr.f32.gmra.mrb[42].mxu0 %v16227_v55 }
 0x990   :  { %42806 = vmatprep.mubr.f32.mxu0 %v49617_v24 }
 0x993   :  { %42807 = vmatmul.mubr.f32.vlgmr.msra.gmra.mrb[40].mxu0 %v49625_v34 }
 0x994   :  { %42809 = vmatprep.mubr.f32.mxu0 %v49630_v10  ;;  %45521 = vmatpush3.bf16.xpose.msra.mxu0 %v51765_v35 }
 0x997   :  { %42810 = vmatmul.mubr.f32.gmra.mrb[42].mxu0 %v16225_v51 }
 0x998   :  { %42816 = vmatprep.mubr.f32.mxu0 %v49617_v24 }
 0x99b   :  { %42817 = vmatmul.mubr.f32.vlgmr.msra.gmra.mrb[40].mxu0 %v49625_v34 }
 0x99c   :  { %42819 = vmatprep.mubr.f32.mxu0 %v49630_v10 }
 0x99f   :  { %42820 = vmatmul.mubr.f32.gmra.mrb[42].mxu0 %v16225_v51 }
 0x9a0   :  { %42910 = vmatprep.mubr.f32.mxu0 %v48892_v42 }
 0xa3c   :  { %v42758_v20 = vpop.f32.mrb[36].mxu1 }
 0xa3d   :  { %v16094_v31 = vpop.f32.mrb[37].mxu1 }
 0xa3e   :  { %v42698_v53 = vpop.f32.mrb[36].mxu0 }
 0xa3f   :  { %v16721_v12 = vadd.f32 %v42758_v20, %v42698_v53  ;;  %v15494_v46 = vpop.f32.mrb[37].mxu0 }
 0xa40   :  { %v16720_v27 = vadd.f32 %v16094_v31, %v15494_v46  ;;  %v42761_v26 = vpop.f32.mrb[38].mxu1 }
 0xa41   :  { %v16106_v59 = vpop.f32.mrb[39].mxu1 }
 0xa42   :  { %v42701_v5 = vpop.f32.mrb[38].mxu0 }
 0xa43   :  { %v16723_v7 = vadd.f32 %v42761_v26, %v42701_v5  ;;  %v15506_v32 = vpop.f32.mrb[39].mxu0 }
 0xa44   :  { %v16722_v19 = vadd.f32 %v16106_v59, %v15506_v32 }
 0xa6e   :  { %v42818_v24 = vpop.f32.mrb[40].mxu0 }
 0xa6f   :  { %v16717_v54 = vsub.f32 %v42698_v53, %v42818_v24  ;;  %v16694_v34 = vpop.f32.mrb[41].mxu0 }
 0xa70   :  { %v16716_v45 = vsub.f32 %v15494_v46, %v16694_v34 }
 0xa71   :  { %v16734_v10 = vand.u32 4294901760, %v16717_v54  ;;  %v17233_v51 = vsub.f32 %v16721_v12, %v16717_v54  ;;  %v17737_v1 = vadd.f32 %v16721_v12, %v16717_v54 }
 0xa72   :  { %v16731_v30 = vand.u32 4294901760, %v16716_v45  ;;  %v17232_v2 = vsub.f32 %v16720_v27, %v16716_v45  ;;  %v17736_v55 = vadd.f32 %v16720_v27, %v16716_v45  ;;  %v42821_v0 = vpop.f32.mrb[42].mxu0 }
 0xa73   :  { %v16826_v48 = vsub.f32 %v16717_v54, %v16734_v10  ;;  %v17238_v17 = vand.u32 4294901760, %v17233_v51  ;;  %v17742_v29 = vand.u32 4294901760, %v17737_v1  ;;  %v16719_v57 = vsub.f32 %v42701_v5, %v42821_v0  ;;  %v16706_v22 = vpop.f32.mrb[43].mxu0 }
 0xa74   :  { %v49672_v20 = vpack.c.bf16 %v16734_v10, %v16731_v30  ;;  %v16819_v31 = vsub.f32 %v16716_v45, %v16731_v30  ;;  %v17235_v26 = vand.u32 4294901760, %v17232_v2  ;;  %v17739_v59 = vand.u32 4294901760, %v17736_v55 }
 0xa75   :  { %v17330_v53 = vsub.f32 %v17233_v51, %v17238_v17  ;;  %v17834_v24 = vsub.f32 %v17737_v1, %v17742_v29  ;;  %v18264_v46 = vand.u32 4294901760, %v16719_v57  ;;  %v18763_v34 = vsub.f32 %v16723_v7, %v16719_v57 }
 0xa76   :  { %v49674_v39 = vpack.c.bf16 %v17238_v17, %v17235_v26  ;;  %v17323_v12 = vsub.f32 %v17232_v2, %v17235_v26  ;;  %v49676_v16 = vpack.c.bf16 %v17742_v29, %v17739_v59  ;;  %v17827_v27 = vsub.f32 %v17736_v55, %v17739_v59  ;;  %45523 = vmatprep.subr.bf16.mxu1 %v49672_v20 }
 0xa77   :  { %v49679_v54 = vsub.f32 %v16719_v57, %v18264_v46  ;;  %v18768_v5 = vand.u32 4294901760, %v18763_v34  ;;  %v19267_v10 = vadd.f32 %v16723_v7, %v16719_v57  ;;  %v16718_v0 = vsub.f32 %v15506_v32, %v16706_v22  ;;  %45525 = vmatpush3.bf16.msra.mxu1 %v49672_v20 }
 0xa78   :  { %45571 = vmatprep.subr.bf16.mxu0 %v49676_v16  ;;  %v16820_v45 = vand.u32 4294901760, %v16819_v31  ;;  %v16827_v51 = vand.u32 4294901760, %v16826_v48  ;;  %v45530_v1 = vpack.c.bf16 %v16826_v48, %v16819_v31  ;;  %v17828_v30 = vand.u32 4294901760, %v17827_v27 }
 0xa79   :  { %v18860_v17 = vsub.f32 %v18763_v34, %v18768_v5  ;;  %v19272_v2 = vand.u32 4294901760, %v19267_v10  ;;  %v18261_v29 = vand.u32 4294901760, %v16718_v0  ;;  %v18762_v26 = vsub.f32 %v16722_v19, %v16718_v0  ;;  %45573 = vmatpush3.bf16.msra.mxu0 %v49676_v16 }
 0xa7a   :  { %v19266_v55 = vadd.f32 %v16722_v19, %v16718_v0  ;;  %42827 = vmatmul.mubr.f32.vlgmr.msra.gmra.mrb[40].mxu1 %v48836_v4  ;;  %v16821_v59 = vsub.f32 %v16819_v31, %v16820_v45  ;;  %v16828_v7 = vsub.f32 %v16826_v48, %v16827_v51  ;;  %v17829_v32 = vsub.f32 %v17827_v27, %v17828_v30 }
 0xa7b   :  { %v49685_v57 = vsub.f32 %v19267_v10, %v19272_v2  ;;  %v49687_v22 = vpack.c.bf16 %v18264_v46, %v18261_v29  ;;  %v18349_v21 = vsub.f32 %v16718_v0, %v18261_v29  ;;  %v18765_v35 = vand.u32 4294901760, %v18762_v26  ;;  %42833 = vmatprep.mubr.f32.mxu1 %v48769_v15 }
 0xa7c   :  { %v19269_v34 = vand.u32 4294901760, %v19266_v55  ;;  %42911 = vmatmul.mubr.f32.vlgmr.msra.gmra.mrb[44].mxu0 %v48906_v41  ;;  %v16822_v25 = vand.u32 4294901760, %v16821_v59  ;;  %v16829_v33 = vand.u32 4294901760, %v16828_v7  ;;  %v17830_v43 = vand.u32 4294901760, %v17829_v32 }
 0xa7d   :  { %v49691_v19 = vpack.c.bf16 %v18768_v5, %v18765_v35  ;;  %v18853_v38 = vsub.f32 %v18762_v26, %v18765_v35  ;;  %v17835_v31 = vand.u32 4294901760, %v17834_v24  ;;  %v45578_v48 = vpack.c.bf16 %v17834_v24, %v17827_v27  ;;  %42917 = vmatprep.mubr.f32.mxu0 %v48882_v60 }
 0xa7e   :  { %v49694_v10 = vpack.c.bf16 %v19272_v2, %v19269_v34  ;;  %v19357_v46 = vsub.f32 %v19266_v55, %v19269_v34  ;;  %v45526_v0 = vpack.c.bf16 %v16829_v33, %v16822_v25  ;;  %v49696_v29 = vpack.c.bf16 %v16827_v51, %v16820_v45 }
 0xa7f   :  { %v17836_v44 = vsub.f32 %v17834_v24, %v17835_v31  ;;  %v49698_v58 = vpack.c.bf16 %v17835_v31, %v17828_v30  ;;  %v17324_v63 = vand.u32 4294901760, %v17323_v12  ;;  %v17331_v59 = vand.u32 4294901760, %v17330_v53 }
 0xa80   :  { %45527 = vmatprep.subr.bf16.mxu1 %v45526_v0  ;;  %v18854_v7 = vand.u32 4294901760, %v18853_v38  ;;  %v18861_v5 = vand.u32 4294901760, %v18860_v17  ;;  %v49700_v32 = vpack.c.bf16 %v17330_v53, %v17323_v12  ;;  %v49702_v35 = vpack.c.bf16 %v18860_v17, %v18853_v38 }
 0xa81   :  { %45529 = vmatpush3.bf16.msra.mxu1 %v45526_v0  ;;  %v17837_v27 = vand.u32 4294901760, %v17836_v44  ;;  %v17325_v2 = vsub.f32 %v17323_v12, %v17324_v63  ;;  %v17332_v26 = vsub.f32 %v17330_v53, %v17331_v59  ;;  %v49704_v55 = vpack.c.bf16 %v17331_v59, %v17324_v63 }
 0xa82   :  { %45531 = vmatprep.subr.bf16.mxu1 %v45530_v1  ;;  %v18855_v33 = vsub.f32 %v18853_v38, %v18854_v7  ;;  %v18862_v25 = vsub.f32 %v18860_v17, %v18861_v5  ;;  %v49706_v24 = vpack.c.bf16 %v18861_v5, %v18854_v7  ;;  %v18350_v45 = vand.u32 4294901760, %v18349_v21 }
 0xa83   :  { %v45574_v51 = vpack.c.bf16 %v17837_v27, %v17830_v43  ;;  %v17326_v30 = vand.u32 4294901760, %v17325_v2  ;;  %v17333_v34 = vand.u32 4294901760, %v17332_v26  ;;  %v18357_v31 = vand.u32 4294901760, %v49679_v54 }
 0xa84   :  { %42834 = vmatmul.mubr.f32.vlgmr.msra.gmra.mrb[40].mxu1 %v48771_v28  ;;  %v18856_v50 = vand.u32 4294901760, %v18855_v33  ;;  %v18863_v0 = vand.u32 4294901760, %v18862_v25  ;;  %v18351_v44 = vsub.f32 %v18349_v21, %v18350_v45  ;;  %v49711_v53 = vpack.c.bf16 %v49679_v54, %v18349_v21 }
 0xa85   :  { %45575 = vmatprep.subr.bf16.mxu0 %v45574_v51  ;;  %45533 = vmatpush3.bf16.msra.mxu1 %v45530_v1  ;;  %v45550_v63 = vpack.c.bf16 %v17333_v34, %v17326_v30  ;;  %v18358_v38 = vsub.f32 %v49679_v54, %v18357_v31  ;;  %v49714_v12 = vpack.c.bf16 %v18357_v31, %v18350_v45  ;;  %v19358_v43 = vand.u32 4294901760, %v19357_v46  ;;  %v49854_v30 = vld [vmem:[#allocation17 + $0x18] sm:$0xff]  ;;  %v49856_v34 = vld [vmem:[#allocation18 + $0x18] sm:$0xff]  ;;  %v49858_v31 = vld [vmem:[#allocation17 + $0x10] sm:$0xff] }
 0xa86   :  { %45577 = vmatpush3.bf16.msra.mxu0 %v45574_v51  ;;  %45535 = vmatprep.subr.bf16.mxu1 %v49672_v20  ;;  %v45622_v17 = vpack.c.bf16 %v18863_v0, %v18856_v50  ;;  %v18352_v59 = vand.u32 4294901760, %v18351_v44  ;;  %v19365_v7 = vand.u32 4294901760, %v49685_v57  ;;  %v49719_v5 = vpack.c.bf16 %v49685_v57, %v19357_v46  ;;  %v49860_v0 = vld [vmem:[#allocation18 + $0x10] sm:$0xff] }
 0xa87   :  { %45579 = vmatprep.subr.bf16.mxu0 %v45578_v48  ;;  %42840 = vmatprep.mubr.f32.mxu1 %v48781_v52  ;;  %v18359_v21 = vand.u32 4294901760, %v18358_v38  ;;  %v19359_v1 = vsub.f32 %v19357_v46, %v19358_v43  ;;  %v51774_v46 = vld [vmem:[#allocation68_spill] sm:$0xff] }
 0xa88   :  { %v19366_v54 = vsub.f32 %v49685_v57, %v19365_v7  ;;  %v49723_v27 = vpack.c.bf16 %v19365_v7, %v19358_v43  ;;  %v51772_v57 = vld [vmem:[#allocation66_spill] sm:$0xff] }
 0xa89   :  { %42918 = vmatmul.mubr.f32.vlgmr.msra.gmra.mrb[44].mxu0 %v48896_v14  ;;  %v49726_v2 = vpack.c.bf16 %v18359_v21, %v18352_v59  ;;  %v19360_v50 = vand.u32 4294901760, %v19359_v1 }
 0xa8a   :  { %45581 = vmatpush3.bf16.msra.mxu0 %v45578_v48  ;;  %42924 = vmatprep.mubr.f32.mxu0 %v48885_v36  ;;  %v19367_v26 = vand.u32 4294901760, %v19366_v54  ;;  %v51773_v48 = vld [vmem:[#allocation67_spill] sm:$0xff] }
 0xa8b   :  { %45583 = vmatprep.subr.bf16.mxu0 %v49676_v16 }
 0xa8c   :  { %42841 = vmatmul.mubr.f32.vlgmr.msra.gmra.mrb[40].mxu1 %v48784_v62  ;;  %v49731_v33 = vpack.c.bf16 %v19367_v26, %v19360_v50 }
 0xa8d   :  { %45537 = vmatpush3.bf16.msra.mxu1 %v49672_v20  ;;  %42847 = vmatprep.mubr.f32.mxu1 %v48795_v18 }
 0xa8e   :  { %45539 = vmatprep.subr.bf16.mxu1 %v49696_v29 }
 0xa91   :  { %42925 = vmatmul.mubr.f32.vlgmr.msra.gmra.mrb[44].mxu0 %v48899_v9 }
 0xa92   :  { %45585 = vmatpush3.bf16.msra.mxu0 %v49676_v16  ;;  %42931 = vmatprep.mubr.f32.mxu0 %v48888_v11 }
 0xa93   :  { %45587 = vmatprep.subr.bf16.mxu0 %v49698_v58 }
 0xa94   :  { %42848 = vmatmul.mubr.f32.vlgmr.msra.gmra.mrb[40].mxu1 %v48798_v6 }
 0xa95   :  { %45541 = vmatpush3.bf16.msra.mxu1 %v49696_v29  ;;  %42854 = vmatprep.mubr.f32.mxu1 %v48769_v15  ;;  %v51775_v29 = vld [vmem:[#allocation69_spill] sm:$0xff] }
 0xa96   :  { %45543 = vmatprep.subr.bf16.mxu1 %v49672_v20 }
 0xa99   :  { %42932 = vmatmul.mubr.f32.vlgmr.msra.gmra.mrb[44].mxu0 %v48902_v37 }
 0xa9a   :  { %45589 = vmatpush3.bf16.msra.mxu0 %v49698_v58  ;;  %42938 = vmatprep.mubr.f32.mxu0 %v48882_v60  ;;  %v51769_v58 = vld [vmem:[#allocation70_spill] sm:$0xff] }
 0xa9b   :  { %45591 = vmatprep.subr.bf16.mxu0 %v49676_v16 }
 0xa9c   :  { %42855 = vmatmul.mubr.f32.vlgmr.msra.gmra.mrb[40].mxu1 %v48771_v28 }
 0xa9d   :  { %45545 = vmatpush3.bf16.msra.mxu1 %v49672_v20  ;;  %42861 = vmatprep.mubr.f32.mxu1 %v48769_v15  ;;  %v51771_v20 = vld [vmem:[#allocation63_spill] sm:$0xff] }
 0xa9e   :  { %45547 = vmatprep.subr.bf16.mxu1 %v49674_v39 }
 0xaa1   :  { %42939 = vmatmul.mubr.f32.vlgmr.msra.gmra.mrb[44].mxu0 %v48896_v14 }
 0xaa2   :  { %45593 = vmatpush3.bf16.msra.mxu0 %v49676_v16  ;;  %42945 = vmatprep.mubr.f32.mxu0 %v48882_v60  ;;  %v51770_v16 = vld [vmem:[#allocation62_spill] sm:$0xff] }
 0xaa3   :  { %45619 = vmatprep.subr.bf16.mxu0 %v49691_v19 }
 0xaa4   :  { %42862 = vmatmul.mubr.f32.vlgmr.msra.gmra.mrb[40].mxu1 %v48771_v28 }
 0xaa5   :  { %45549 = vmatpush3.bf16.msra.mxu1 %v49674_v39  ;;  %42868 = vmatprep.mubr.f32.mxu1 %v48594_v40 }
 0xaa6   :  { %45551 = vmatprep.subr.bf16.mxu1 %v45550_v63 }
 0xaa8   :  { %42869 = vmatmul.mubr.f32.vlgmr.msra.gmra.mrb[42].mxu1 %v51769_v58 }
 0xaa9   :  { %42946 = vmatmul.mubr.f32.vlgmr.msra.gmra.mrb[44].mxu0 %v48896_v14  ;;  %45553 = vmatpush3.bf16.msra.mxu1 %v45550_v63 }
 0xaaa   :  { %45621 = vmatpush3.bf16.msra.mxu0 %v49691_v19  ;;  %45555 = vmatprep.subr.bf16.mxu1 %v49700_v32 }
 0xaab   :  { %45623 = vmatprep.subr.bf16.mxu0 %v45622_v17  ;;  %42994 = vmatprep.mubr.f32.mxu0 %v48594_v40 }
 0xaac   :  { %42875 = vmatprep.mubr.f32.mxu1 %v51770_v16 }
 0xaad   :  { %42995 = vmatmul.mubr.f32.vlgmr.msra.gmra.mrb[46].mxu0 %v51769_v58 }
 0xaae   :  { %45625 = vmatpush3.bf16.msra.mxu0 %v45622_v17  ;;  %43001 = vmatprep.mubr.f32.mxu0 %v51770_v16 }
 0xaaf   :  { %45627 = vmatprep.subr.bf16.mxu0 %v49702_v35 }
 0xab0   :  { %42876 = vmatmul.mubr.f32.vlgmr.msra.gmra.mrb[42].mxu1 %v51771_v20 }
 0xab1   :  { %45557 = vmatpush3.bf16.msra.mxu1 %v49700_v32  ;;  %42882 = vmatprep.mubr.f32.mxu1 %v51772_v57  ;;  %v51776_v32 = vld [vmem:[#allocation28_spill] sm:$0xff] }
 0xab2   :  { %45559 = vmatprep.subr.bf16.mxu1 %v49674_v39 }
 0xab5   :  { %43002 = vmatmul.mubr.f32.vlgmr.msra.gmra.mrb[46].mxu0 %v51771_v20 }
 0xab6   :  { %45629 = vmatpush3.bf16.msra.mxu0 %v49702_v35  ;;  %43008 = vmatprep.mubr.f32.mxu0 %v51772_v57 }
 0xab7   :  { %45631 = vmatprep.subr.bf16.mxu0 %v49691_v19 }
 0xab8   :  { %42883 = vmatmul.mubr.f32.vlgmr.msra.gmra.mrb[42].mxu1 %v51773_v48 }
 0xab9   :  { %45561 = vmatpush3.bf16.msra.mxu1 %v49674_v39  ;;  %42889 = vmatprep.mubr.f32.mxu1 %v51774_v46 }
 0xaba   :  { %45563 = vmatprep.subr.bf16.mxu1 %v49704_v55 }
 0xabd   :  { %43009 = vmatmul.mubr.f32.vlgmr.msra.gmra.mrb[46].mxu0 %v51773_v48 }
 0xabe   :  { %45633 = vmatpush3.bf16.msra.mxu0 %v49691_v19  ;;  %43015 = vmatprep.mubr.f32.mxu0 %v51774_v46 }
 0xabf   :  { %45635 = vmatprep.subr.bf16.mxu0 %v49706_v24 }
 0xac0   :  { %42890 = vmatmul.mubr.f32.vlgmr.msra.gmra.mrb[42].mxu1 %v51775_v29 }
 0xac1   :  { %45565 = vmatpush3.bf16.msra.mxu1 %v49704_v55  ;;  %42896 = vmatprep.mubr.f32.mxu1 %v51770_v16 }
 0xac2   :  { %45567 = vmatprep.subr.bf16.mxu1 %v49674_v39 }
 0xac5   :  { %43016 = vmatmul.mubr.f32.vlgmr.msra.gmra.mrb[46].mxu0 %v51775_v29 }
 0xac6   :  { %45637 = vmatpush3.bf16.msra.mxu0 %v49706_v24  ;;  %43022 = vmatprep.mubr.f32.mxu0 %v51770_v16 }
 0xac7   :  { %45639 = vmatprep.subr.bf16.mxu0 %v49691_v19 }
 0xac8   :  { %42897 = vmatmul.mubr.f32.vlgmr.msra.gmra.mrb[42].mxu1 %v51771_v20 }
 0xac9   :  { %45569 = vmatpush3.bf16.msra.mxu1 %v49674_v39  ;;  %42903 = vmatprep.mubr.f32.mxu1 %v51770_v16  ;;  %v51777_v39 = vld [vmem:[#allocation36_spill] sm:$0xff] }
 0xaca   :  { %45595 = vmatprep.subr.bf16.mxu1 %v49687_v22 }
 0xacd   :  { %43023 = vmatmul.mubr.f32.vlgmr.msra.gmra.mrb[46].mxu0 %v51771_v20 }
 0xace   :  { %45641 = vmatpush3.bf16.msra.mxu0 %v49691_v19  ;;  %43029 = vmatprep.mubr.f32.mxu0 %v51770_v16  ;;  %v51779_v19 = vld [vmem:[#allocation38_spill] sm:$0xff] }
 0xacf   :  { %45667 = vmatprep.subr.bf16.mxu0 %v51776_v32 }
 0xad0   :  { %42904 = vmatmul.mubr.f32.vlgmr.msra.gmra.mrb[42].mxu1 %v51771_v20 }
 0xad1   :  { %45597 = vmatpush3.bf16.msra.mxu1 %v49687_v22  ;;  %42952 = vmatprep.mubr.f32.mxu1 %v48834_v3 }
 0xad2   :  { %45599 = vmatprep.subr.bf16.mxu1 %v49726_v2 }
 0xad4   :  { %42953 = vmatmul.mubr.f32.vlgmr.msra.gmra.mrb[44].mxu1 %v48836_v4 }
 0xad5   :  { %45601 = vmatpush3.bf16.msra.mxu1 %v49726_v2  ;;  %42959 = vmatprep.mubr.f32.mxu1 %v48769_v15 }
 0xad6   :  { %45603 = vmatprep.subr.bf16.mxu1 %v49711_v53  ;;  %43030 = vmatmul.mubr.f32.vlgmr.msra.gmra.mrb[46].mxu0 %v51771_v20 }
 0xad7   :  { %45669 = vmatpush3.bf16.xpose.msra.mxu0 %v51776_v32 }
 0xad8   :  { %45671 = vmatprep.subr.bf16.mxu0 %v51777_v39 }
 0xadc   :  { %42960 = vmatmul.mubr.f32.vlgmr.msra.gmra.mrb[44].mxu1 %v48771_v28 }
 0xadd   :  { %45605 = vmatpush3.bf16.msra.mxu1 %v49711_v53  ;;  %42966 = vmatprep.mubr.f32.mxu1 %v48781_v52 }
 0xade   :  { %45607 = vmatprep.subr.bf16.mxu1 %v49687_v22 }
 0xae4   :  { %42967 = vmatmul.mubr.f32.vlgmr.msra.gmra.mrb[44].mxu1 %v48784_v62 }
 0xae5   :  { %45609 = vmatpush3.bf16.msra.mxu1 %v49687_v22  ;;  %42973 = vmatprep.mubr.f32.mxu1 %v48795_v18 }
 0xae6   :  { %45611 = vmatprep.subr.bf16.mxu1 %v49714_v12 }
 0xaec   :  { %42974 = vmatmul.mubr.f32.vlgmr.msra.gmra.mrb[44].mxu1 %v48798_v6 }
 0xaed   :  { %45613 = vmatpush3.bf16.msra.mxu1 %v49714_v12  ;;  %42980 = vmatprep.mubr.f32.mxu1 %v48769_v15 }
 0xaee   :  { %45615 = vmatprep.subr.bf16.mxu1 %v49687_v22 }
 0xaf4   :  { %42981 = vmatmul.mubr.f32.vlgmr.msra.gmra.mrb[44].mxu1 %v48771_v28 }
 0xaf5   :  { %45617 = vmatpush3.bf16.msra.mxu1 %v49687_v22  ;;  %42987 = vmatprep.mubr.f32.mxu1 %v48769_v15  ;;  %v51778_v22 = vld [vmem:[#allocation30_spill] sm:$0xff] }
 0xaf6   :  { %45643 = vmatprep.subr.bf16.mxu1 %v49694_v10 }
 0xafc   :  { %42988 = vmatmul.mubr.f32.vlgmr.msra.gmra.mrb[44].mxu1 %v48771_v28 }
 0xafd   :  { %45645 = vmatpush3.bf16.msra.mxu1 %v49694_v10  ;;  %43036 = vmatprep.mubr.f32.mxu1 %v48892_v42 }
 0xafe   :  { %45647 = vmatprep.subr.bf16.mxu1 %v49731_v33 }
 0xb00   :  { %43037 = vmatmul.mubr.f32.vlgmr.msra.gmra.mrb[46].mxu1 %v48906_v41 }
 0xb01   :  { %45649 = vmatpush3.bf16.msra.mxu1 %v49731_v33  ;;  %43043 = vmatprep.mubr.f32.mxu1 %v48882_v60 }
 0xb02   :  { %45651 = vmatprep.subr.bf16.mxu1 %v49719_v5 }
 0xb08   :  { %43044 = vmatmul.mubr.f32.vlgmr.msra.gmra.mrb[46].mxu1 %v48896_v14 }
 0xb09   :  { %45653 = vmatpush3.bf16.msra.mxu1 %v49719_v5  ;;  %43050 = vmatprep.mubr.f32.mxu1 %v48885_v36 }
 0xb0a   :  { %45655 = vmatprep.subr.bf16.mxu1 %v49694_v10 }
 0xb10   :  { %43051 = vmatmul.mubr.f32.vlgmr.msra.gmra.mrb[46].mxu1 %v48899_v9 }
 0xb11   :  { %45657 = vmatpush3.bf16.msra.mxu1 %v49694_v10  ;;  %43057 = vmatprep.mubr.f32.mxu1 %v48888_v11 }
 0xb12   :  { %45659 = vmatprep.subr.bf16.mxu1 %v49723_v27 }
 0xb18   :  { %43058 = vmatmul.mubr.f32.vlgmr.msra.gmra.mrb[46].mxu1 %v48902_v37 }
 0xb19   :  { %45661 = vmatpush3.bf16.msra.mxu1 %v49723_v27  ;;  %43064 = vmatprep.mubr.f32.mxu1 %v48882_v60 }
 0xb1a   :  { %45663 = vmatprep.subr.bf16.mxu1 %v49694_v10 }
 0xb20   :  { %43065 = vmatmul.mubr.f32.vlgmr.msra.gmra.mrb[46].mxu1 %v48896_v14 }
 0xb21   :  { %45665 = vmatpush3.bf16.msra.mxu1 %v49694_v10  ;;  %43071 = vmatprep.mubr.f32.mxu1 %v48882_v60 }
 0xb22   :  { %45691 = vmatprep.subr.bf16.mxu1 %v51778_v22 }
 0xb28   :  { %43072 = vmatmul.mubr.f32.vlgmr.msra.gmra.mrb[46].mxu1 %v48896_v14 }
 0xb2a   :  { %45693 = vmatpush3.bf16.xpose.msra.mxu1 %v51778_v22 }
 0xb2b   :  { %45695 = vmatprep.subr.bf16.mxu1 %v51779_v19 }
 0xb77   :  { %v42863_v35 = vpop.f32.mrb[40].mxu1 }
 0xb78   :  { %v17222_v55 = vpop.f32.mrb[41].mxu1 }
 0xb7c   :  { %v42947_v25 = vpop.f32.mrb[44].mxu0 }
 0xb7d   :  { %v18241_v24 = vsub.f32 %v42863_v35, %v42947_v25  ;;  %v18230_v45 = vpop.f32.mrb[45].mxu0 }
 0xb7e   :  { %v18240_v51 = vsub.f32 %v17222_v55, %v18230_v45 }
 0xb7f   :  { %v18245_v38 = vmul.f32 %v18241_v24, %v49854_v30  ;;  %v18253_v12 = vmul.f32 %v18241_v24, %v49856_v34 }
 0xb80   :  { %v18244_v59 = vmul.f32 %v18240_v51, %v49858_v31  ;;  %v18252_v7 = vmul.f32 %v18240_v51, %v49860_v0 }
 0xba3   :  { %v42905_v10 = vpop.f32.mrb[42].mxu1 }
 0xba4   :  { %v18243_v44 = vadd.f32 %v42905_v10, %v42863_v35  ;;  %v17726_v53 = vpop.f32.mrb[43].mxu1 }
 0xba5   :  { %v18242_v63 = vadd.f32 %v17726_v53, %v17222_v55 }
 0xba6   :  { %v18247_v43 = vmul.f32 %v18243_v44, %v49856_v34  ;;  %v18255_v17 = vmul.f32 %v18243_v44, %v49854_v30 }
 0xba7   :  { %v18246_v5 = vmul.f32 %v18242_v63, %v49860_v0  ;;  %v18254_v21 = vmul.f32 %v18242_v63, %v49858_v31 }
 0xba8   :  { %v18249_v1 = vsub.f32 %v18245_v38, %v18247_v43  ;;  %v18257_v54 = vadd.f32 %v18255_v17, %v18253_v12 }
 0xba9   :  { %v18248_v27 = vsub.f32 %v18244_v59, %v18246_v5  ;;  %v18256_v2 = vadd.f32 %v18254_v21, %v18252_v7  ;;  %v43031_v50 = vpop.f32.mrb[46].mxu0 }
 0xbaa   :  { %18251 = vst.msk [vmem:[#allocation2 + $0x8] sm:$0xff] %vm213_vm0, %v18249_v1  ;;  %18259 = vst.msk [vmem:[#allocation3 + $0x8] sm:$0xff] %vm213_vm0, %v18257_v54  ;;  %v19256_v26 = vpop.f32.mrb[47].mxu0 }
 0xbab   :  { %18250 = vst.msk [vmem:[#allocation2] sm:$0xff] %vm213_vm0, %v18248_v27  ;;  %18258 = vst.msk [vmem:[#allocation3] sm:$0xff] %vm213_vm0, %v18256_v2 }
 0xbb1   :  { %v19791_v33 = vld [vmem:[#allocation2 + $0x8] sm:$0xff] }
 0xbb2   :  { %v49874_v35 = vld [vmem:[#allocation3 + $0x8] sm:$0xff]  ;;  %v19790_v55 = vld [vmem:[#allocation2] sm:$0xff]  ;;  %v20406_v25 = vsel %vm213_vm0, %v19791_v33, 0 }
 0xbb3   :  { %v49877_v24 = vld [vmem:[#allocation3] sm:$0xff]  ;;  %v19799_v45 = vadd.f32 %v49874_v35, %v19791_v33  ;;  %v20403_v51 = vsel %vm213_vm0, %v19790_v55, 0  ;;  %v49881_v10 = vand.u32 4294901760, %v20406_v25 }
 0xbb4   :  { %v19798_v44 = vadd.f32 %v49877_v24, %v19790_v55  ;;  %v49884_v53 = vand.u32 4294901760, %v20403_v51 }
 0xbb5   :  { %v19806_v63 = vsel %vm213_vm0, %v19799_v45, 0  ;;  %v49888_v38 = vsub.f32 %v20406_v25, %v49881_v10 }
 0xbb6   :  { %v19803_v12 = vsel %vm213_vm0, %v19798_v44, 0  ;;  %v49891_v43 = vand.u32 4294901760, %v19806_v63  ;;  %v49894_v17 = vsub.f32 %v20403_v51, %v49884_v53 }
 0xbb7   :  { %v49896_v59 = vand.u32 4294901760, %v19803_v12  ;;  %v51587_v7 = vand.u32 4294901760, %v49888_v38 }
 0xbb8   :  { %v49900_v5 = vsub.f32 %v19806_v63, %v49891_v43  ;;  %v51589_v21 = vand.u32 4294901760, %v49894_v17 }
 0xbb9   :  { %v49904_v1 = vsub.f32 %v19803_v12, %v49896_v59  ;;  %v20494_v54 = vsub.f32 %v49888_v38, %v51587_v7  ;;  %v51780_v12 = vld [vmem:[#allocation39_spill] sm:$0xff]  ;;  %v51781_v7 = vld [vmem:[#allocation37_spill] sm:$0xff] }
 0xbba   :  { %v51588_v27 = vand.u32 4294901760, %v49900_v5  ;;  %v20484_v2 = vsub.f32 %v49894_v17, %v51589_v21 }
 0xbbb   :  { %v51591_v33 = vand.u32 4294901760, %v49904_v1  ;;  %v20495_v51 = vand.u32 4294901760, %v20494_v54 }
 0xbbc   :  { %v19894_v55 = vsub.f32 %v49900_v5, %v51588_v27  ;;  %v20485_v25 = vand.u32 4294901760, %v20484_v2 }
 0xbbd   :  { %v19884_v45 = vsub.f32 %v49904_v1, %v51591_v33 }
 0xbbe   :  { %43138 = vmatprep.mubr.f32.mxu1 %v20485_v25  ;;  %v19895_v63 = vand.u32 4294901760, %v19894_v55 }
 0xbbf   :  { %v19885_v44 = vand.u32 4294901760, %v19884_v45  ;;  %43139 = vmatmul.mubr.f32.vlgmr.msra.gmra.mrb[48].mxu1 %v20495_v51 }
 0xbc0   :  { %45697 = vmatpush3.bf16.xpose.msra.mxu1 %v51779_v19 }
 0xbc1   :  { %43078 = vmatprep.mubr.f32.mxu0 %v19885_v44  ;;  %45699 = vmatprep.subr.bf16.mxu1 %v51780_v12 }
 0xbc2   :  { %43079 = vmatmul.mubr.f32.vlgmr.msra.gmra.mrb[48].mxu0 %v19895_v63 }
 0xbc3   :  { %45673 = vmatpush3.bf16.xpose.msra.mxu0 %v51777_v39 }
 0xbc4   :  { %45675 = vmatprep.subr.bf16.mxu0 %v51781_v7 }
 0xbcf   :  { %v42989_v2 = vpop.f32.mrb[44].mxu1 }
 0xbd0   :  { %v19773_v27 = vadd.f32 %v43031_v50, %v42989_v2  ;;  %v18752_v21 = vpop.f32.mrb[45].mxu1 }
 0xbd1   :  { %v19772_v29 = vadd.f32 %v19256_v26, %v18752_v21 }
 0xbd2   :  { %v19777_v55 = vmul.f32 %v19773_v27, %v49856_v34  ;;  %v19785_v51 = vmul.f32 %v19773_v27, %v49854_v30 }
 0xbd3   :  { %v19776_v19 = vmul.f32 %v19772_v29, %v49860_v0  ;;  %v19784_v39 = vmul.f32 %v19772_v29, %v49858_v31 }
 0xbfb   :  { %v43073_v33 = vpop.f32.mrb[46].mxu1 }
 0xbfc   :  { %v19771_v54 = vsub.f32 %v42989_v2, %v43073_v33  ;;  %v19760_v25 = vpop.f32.mrb[47].mxu1 }
 0xbfd   :  { %v19770_v45 = vsub.f32 %v18752_v21, %v19760_v25 }
 0xbfe   :  { %v19775_v44 = vmul.f32 %v19771_v54, %v49854_v30  ;;  %v19783_v63 = vmul.f32 %v19771_v54, %v49856_v34 }
 0xbff   :  { %v19774_v50 = vmul.f32 %v19770_v45, %v49858_v31  ;;  %v19782_v26 = vmul.f32 %v19770_v45, %v49860_v0 }
 0xc00   :  { %v19779_v46 = vsub.f32 %v19775_v44, %v19777_v55  ;;  %v19787_v33 = vadd.f32 %v19785_v51, %v19783_v63 }
 0xc01   :  { %v19778_v2 = vsub.f32 %v19774_v50, %v19776_v19  ;;  %v19786_v21 = vadd.f32 %v19784_v39, %v19782_v26 }
 0xc02   :  { %19781 = vst.msk [vmem:[#allocation2 + $0x18] sm:$0xff] %vm213_vm0, %v19779_v46  ;;  %19789 = vst.msk [vmem:[#allocation3 + $0x18] sm:$0xff] %vm213_vm0, %v19787_v33 }
 0xc03   :  { %19780 = vst.msk [vmem:[#allocation2 + $0x10] sm:$0xff] %vm213_vm0, %v19778_v2  ;;  %19788 = vst.msk [vmem:[#allocation3 + $0x10] sm:$0xff] %vm213_vm0, %v19786_v21 }
 0xc09   :  { %v19793_v30 = vld [vmem:[#allocation2 + $0x18] sm:$0xff] }
 0xc0a   :  { %v49936_v34 = vld [vmem:[#allocation3 + $0x18] sm:$0xff]  ;;  %v19792_v29 = vld [vmem:[#allocation2 + $0x10] sm:$0xff]  ;;  %v20412_v31 = vsel %vm213_vm0, %v19793_v30, 0 }
 0xc0b   :  { %v49939_v27 = vld [vmem:[#allocation3 + $0x10] sm:$0xff]  ;;  %v19801_v0 = vadd.f32 %v49936_v34, %v19793_v30  ;;  %v20409_v39 = vsel %vm213_vm0, %v19792_v29, 0  ;;  %v49943_v19 = vand.u32 4294901760, %v20412_v31 }
 0xc0c   :  { %v19800_v46 = vadd.f32 %v49939_v27, %v19792_v29  ;;  %v49946_v54 = vand.u32 4294901760, %v20409_v39 }
 0xc0d   :  { %v19812_v25 = vsel %vm213_vm0, %v19801_v0, 0  ;;  %v20512_v45 = vsub.f32 %v20412_v31, %v49943_v19 }
 0xc0e   :  { %v19809_v55 = vsel %vm213_vm0, %v19800_v46, 0  ;;  %v49951_v51 = vand.u32 4294901760, %v19812_v25  ;;  %v20502_v44 = vsub.f32 %v20409_v39, %v49946_v54 }
 0xc0f   :  { %v49954_v63 = vand.u32 4294901760, %v19809_v55  ;;  %v20513_v50 = vand.u32 4294901760, %v20512_v45 }
 0xc10   :  { %v19912_v26 = vsub.f32 %v19812_v25, %v49951_v51  ;;  %v20503_v33 = vand.u32 4294901760, %v20502_v44  ;;  %v51785_v25 = vand.u32 4294901760, %v49904_v1 }
 0xc11   :  { %v19902_v2 = vsub.f32 %v19809_v55, %v49954_v63  ;;  %v20514_v21 = vsub.f32 %v20512_v45, %v20513_v50  ;;  %v51786_v55 = vand.u32 4294901760, %v49888_v38 }
 0xc12   :  { %v19913_v30 = vand.u32 4294901760, %v19912_v26  ;;  %v20504_v29 = vsub.f32 %v20502_v44, %v20503_v33 }
 0xc13   :  { %v19903_v0 = vand.u32 4294901760, %v19902_v2  ;;  %v20515_v46 = vand.u32 4294901760, %v20514_v21 }
 0xc14   :  { %v19914_v48 = vsub.f32 %v19912_v26, %v19913_v30  ;;  %v20505_v31 = vand.u32 4294901760, %v20504_v29 }
 0xc15   :  { %v19904_v57 = vsub.f32 %v19902_v2, %v19903_v0 }
 0xc16   :  { %43141 = vmatprep.mubr.f32.mxu1 %v20505_v31  ;;  %v19915_v39 = vand.u32 4294901760, %v19914_v48  ;;  %v51784_v48 = vand.u32 4294901760, %v49894_v17  ;;  %v51789_v31 = vld [vmem:[#allocation51_spill] sm:$0xff] }
 0xc17   :  { %v19905_v20 = vand.u32 4294901760, %v19904_v57  ;;  %43142 = vmatmul.mubr.f32.gmra.mrb[50].mxu1 %v20515_v46  ;;  %v51783_v57 = vld [vmem:[#allocation41_spill] sm:$0xff] }
 0xc18   :  { %43148 = vmatprep.mubr.f32.mxu1 %v49884_v53 }
 0xc19   :  { %43081 = vmatprep.mubr.f32.mxu0 %v19905_v20  ;;  %v51782_v20 = vld [vmem:[#allocation40_spill] sm:$0xff] }
 0xc1a   :  { %43082 = vmatmul.mubr.f32.gmra.mrb[50].mxu0 %v19915_v39 }
 0xc1b   :  { %43088 = vmatprep.mubr.f32.mxu0 %v49896_v59  ;;  %43149 = vmatmul.mubr.f32.vlgmr.msra.gmra.mrb[48].mxu1 %v49881_v10 }
 0xc1c   :  { %43151 = vmatprep.mubr.f32.mxu1 %v49946_v54  ;;  %45701 = vmatpush3.bf16.xpose.msra.mxu1 %v51780_v12 }
 0xc1d   :  { %45703 = vmatprep.subr.bf16.mxu1 %v51778_v22 }
 0xc1e   :  { %43089 = vmatmul.mubr.f32.vlgmr.msra.gmra.mrb[48].mxu0 %v49891_v43 }
 0xc1f   :  { %43091 = vmatprep.mubr.f32.mxu0 %v49954_v63  ;;  %45677 = vmatpush3.bf16.xpose.msra.mxu0 %v51781_v7 }
 0xc20   :  { %43152 = vmatmul.mubr.f32.gmra.mrb[50].mxu1 %v49943_v19  ;;  %45679 = vmatprep.subr.bf16.mxu0 %v51776_v32 }
 0xc21   :  { %43158 = vmatprep.mubr.f32.mxu1 %v49894_v17  ;;  %v21006_v17 = vsel %vm213_vm0, %v49874_v35, 0  ;;  %v21012_v35 = vsel %vm213_vm0, %v49936_v34, 0 }
 0xc22   :  { %43092 = vmatmul.mubr.f32.gmra.mrb[50].mxu0 %v49951_v51 }
 0xc23   :  { %43098 = vmatprep.mubr.f32.mxu0 %v49904_v1 }
 0xc24   :  { %43159 = vmatmul.mubr.f32.vlgmr.msra.gmra.mrb[48].mxu1 %v49888_v38 }
 0xc25   :  { %43161 = vmatprep.mubr.f32.mxu1 %v20502_v44  ;;  %45705 = vmatpush3.bf16.xpose.msra.mxu1 %v51778_v22  ;;  %v51787_v44 = vand.u32 4294901760, %v49900_v5 }
 0xc26   :  { %43099 = vmatmul.mubr.f32.vlgmr.msra.gmra.mrb[48].mxu0 %v49900_v5  ;;  %45707 = vmatprep.subr.bf16.mxu1 %v51782_v20  ;;  %v21009_v5 = vsel %vm213_vm0, %v49939_v27, 0  ;;  %v51788_v27 = vld [vmem:[#allocation48_spill] sm:$0xff] }
 0xc27   :  { %43101 = vmatprep.mubr.f32.mxu0 %v19902_v2  ;;  %45681 = vmatpush3.bf16.xpose.msra.mxu0 %v51776_v32 }
 0xc28   :  { %43162 = vmatmul.mubr.f32.gmra.mrb[50].mxu1 %v20512_v45  ;;  %45683 = vmatprep.subr.bf16.mxu0 %v51783_v57  ;;  %v21003_v45 = vsel %vm213_vm0, %v49877_v24, 0  ;;  %v50001_v24 = vand.u32 4294901760, %v21006_v17 }
 0xc29   :  { %43168 = vmatprep.mubr.f32.mxu1 %v51784_v48  ;;  %v49993_v38 = vand.u32 4294901760, %v21003_v45 }
 0xc2a   :  { %43102 = vmatmul.mubr.f32.gmra.mrb[50].mxu0 %v19912_v26  ;;  %v21092_v26 = vsub.f32 %v21006_v17, %v50001_v24 }
 0xc2b   :  { %43108 = vmatprep.mubr.f32.mxu0 %v51785_v25  ;;  %v21082_v1 = vsub.f32 %v21003_v45, %v49993_v38 }
 0xc2c   :  { %43169 = vmatmul.mubr.f32.vlgmr.msra.gmra.mrb[48].mxu1 %v51786_v55  ;;  %v21093_v34 = vand.u32 4294901760, %v21092_v26 }
 0xc2d   :  { %43171 = vmatprep.mubr.f32.mxu1 %v20503_v33  ;;  %45709 = vmatpush3.bf16.xpose.msra.mxu1 %v51782_v20  ;;  %v21111_v33 = vand.u32 4294901760, %v21012_v35  ;;  %v21083_v2 = vand.u32 4294901760, %v21082_v1 }
 0xc2e   :  { %43109 = vmatmul.mubr.f32.vlgmr.msra.gmra.mrb[48].mxu0 %v51787_v44  ;;  %45711 = vmatprep.subr.bf16.mxu1 %v51778_v22 }
 0xc2f   :  { %43111 = vmatprep.mubr.f32.mxu0 %v19903_v0  ;;  %45685 = vmatpush3.bf16.xpose.msra.mxu0 %v51783_v57  ;;  %v21084_v29 = vsub.f32 %v21082_v1, %v21083_v2 }
 0xc30   :  { %43172 = vmatmul.mubr.f32.gmra.mrb[50].mxu1 %v20513_v50  ;;  %45687 = vmatprep.subr.bf16.mxu0 %v51776_v32  ;;  %v50006_v50 = vand.u32 4294901760, %v21009_v5 }
 0xc31   :  { %43178 = vmatprep.mubr.f32.mxu1 %v49884_v53  ;;  %v21085_v46 = vand.u32 4294901760, %v21084_v29 }
 0xc32   :  { %43112 = vmatmul.mubr.f32.gmra.mrb[50].mxu0 %v19913_v30  ;;  %v21102_v21 = vsub.f32 %v21009_v5, %v50006_v50  ;;  %v21112_v30 = vsub.f32 %v21012_v35, %v21111_v33 }
 0xc33   :  { %43118 = vmatprep.mubr.f32.mxu0 %v49896_v59 }
 0xc34   :  { %43179 = vmatmul.mubr.f32.vlgmr.msra.gmra.mrb[48].mxu1 %v49881_v10  ;;  %v21103_v0 = vand.u32 4294901760, %v21102_v21 }
 0xc35   :  { %43181 = vmatprep.mubr.f32.mxu1 %v49946_v54  ;;  %45713 = vmatpush3.bf16.xpose.msra.mxu1 %v51778_v22 }
 0xc36   :  { %43119 = vmatmul.mubr.f32.vlgmr.msra.gmra.mrb[48].mxu0 %v49891_v43 }
 0xc37   :  { %43121 = vmatprep.mubr.f32.mxu0 %v49954_v63  ;;  %45689 = vmatpush3.bf16.xpose.msra.mxu0 %v51776_v32 }
 0xc38   :  { %43182 = vmatmul.mubr.f32.gmra.mrb[50].mxu1 %v49943_v19  ;;  %45715 = vmatprep.subr.bf16.mxu0 %v51788_v27 }
 0xc39   :  { %43188 = vmatprep.mubr.f32.mxu1 %v49884_v53  ;;  %v21094_v53 = vsub.f32 %v21092_v26, %v21093_v34 }
 0xc3a   :  { %43122 = vmatmul.mubr.f32.gmra.mrb[50].mxu0 %v49951_v51 }
 0xc3b   :  { %43128 = vmatprep.mubr.f32.mxu0 %v49896_v59  ;;  %v21113_v59 = vand.u32 4294901760, %v21112_v30 }
 0xc3c   :  { %43189 = vmatmul.mubr.f32.vlgmr.msra.gmra.mrb[48].mxu1 %v49881_v10  ;;  %v21104_v10 = vsub.f32 %v21102_v21, %v21103_v0 }
 0xc3d   :  { %43191 = vmatprep.mubr.f32.mxu1 %v49946_v54  ;;  %v21095_v54 = vand.u32 4294901760, %v21094_v53  ;;  %v21114_v39 = vsub.f32 %v21112_v30, %v21113_v59 }
 0xc3e   :  { %43129 = vmatmul.mubr.f32.vlgmr.msra.gmra.mrb[48].mxu0 %v49891_v43  ;;  %v21105_v43 = vand.u32 4294901760, %v21104_v10 }
 0xc3f   :  { %43131 = vmatprep.mubr.f32.mxu0 %v49954_v63  ;;  %45717 = vmatpush3.bf16.xpose.msra.mxu0 %v51788_v27  ;;  %v21115_v63 = vand.u32 4294901760, %v21114_v39 }
 0xc40   :  { %43192 = vmatmul.mubr.f32.gmra.mrb[50].mxu1 %v49943_v19  ;;  %45719 = vmatprep.subr.bf16.mxu0 %v51789_v31  ;;  %v51790_v19 = vld [vmem:[#allocation52_spill] sm:$0xff] }
 0xc41   :  { %43258 = vmatprep.mubr.f32.mxu1 %v51727_v13 }
 0xc42   :  { %43132 = vmatmul.mubr.f32.gmra.mrb[50].mxu0 %v49951_v51  ;;  %v51791_v51 = vld [vmem:[#allocation53_spill] sm:$0xff] }
 0xc43   :  { %43198 = vmatprep.mubr.f32.mxu0 %v21085_v46 }
 0xc46   :  { %43199 = vmatmul.mubr.f32.vlgmr.msra.gmra.mrb[52].mxu0 %v21095_v54 }
 0xc47   :  { %43201 = vmatprep.mubr.f32.mxu0 %v21105_v43  ;;  %45721 = vmatpush3.bf16.xpose.msra.mxu0 %v51789_v31 }
 0xc48   :  { %45723 = vmatprep.subr.bf16.mxu0 %v51790_v19 }
 0xc4a   :  { %43202 = vmatmul.mubr.f32.gmra.mrb[54].mxu0 %v21115_v63 }
 0xc4b   :  { %43208 = vmatprep.mubr.f32.mxu0 %v49993_v38 }
 0xc4e   :  { %43209 = vmatmul.mubr.f32.vlgmr.msra.gmra.mrb[52].mxu0 %v50001_v24 }
 0xc4f   :  { %43211 = vmatprep.mubr.f32.mxu0 %v50006_v50  ;;  %45725 = vmatpush3.bf16.xpose.msra.mxu0 %v51790_v19 }
 0xc50   :  { %45727 = vmatprep.subr.bf16.mxu0 %v51788_v27 }
 0xc52   :  { %43212 = vmatmul.mubr.f32.gmra.mrb[54].mxu0 %v21111_v33 }
 0xc53   :  { %43218 = vmatprep.mubr.f32.mxu0 %v21082_v1 }
 0xc56   :  { %43219 = vmatmul.mubr.f32.vlgmr.msra.gmra.mrb[52].mxu0 %v21092_v26 }
 0xc57   :  { %43221 = vmatprep.mubr.f32.mxu0 %v21102_v21  ;;  %45729 = vmatpush3.bf16.xpose.msra.mxu0 %v51788_v27 }
 0xc58   :  { %45731 = vmatprep.subr.bf16.mxu0 %v51791_v51 }
 0xc5a   :  { %43222 = vmatmul.mubr.f32.gmra.mrb[54].mxu0 %v21112_v30 }
 0xc5b   :  { %43228 = vmatprep.mubr.f32.mxu0 %v21083_v2 }
 0xc5e   :  { %43229 = vmatmul.mubr.f32.vlgmr.msra.gmra.mrb[52].mxu0 %v21093_v34 }
 0xc5f   :  { %43231 = vmatprep.mubr.f32.mxu0 %v21103_v0  ;;  %45733 = vmatpush3.bf16.xpose.msra.mxu0 %v51791_v51 }
 0xc60   :  { %45735 = vmatprep.subr.bf16.mxu0 %v51788_v27 }
 0xc62   :  { %43232 = vmatmul.mubr.f32.gmra.mrb[54].mxu0 %v21113_v59 }
 0xc63   :  { %43238 = vmatprep.mubr.f32.mxu0 %v49993_v38 }
 0xc66   :  { %43239 = vmatmul.mubr.f32.vlgmr.msra.gmra.mrb[52].mxu0 %v50001_v24 }
 0xc67   :  { %43241 = vmatprep.mubr.f32.mxu0 %v50006_v50  ;;  %45737 = vmatpush3.bf16.xpose.msra.mxu0 %v51788_v27 }
 0xc6a   :  { %43242 = vmatmul.mubr.f32.gmra.mrb[54].mxu0 %v21111_v33 }
 0xc6b   :  { %43248 = vmatprep.mubr.f32.mxu0 %v49993_v38 }
 0xc6e   :  { %43249 = vmatmul.mubr.f32.vlgmr.msra.gmra.mrb[52].mxu0 %v50001_v24 }
 0xc6f   :  { %43251 = vmatprep.mubr.f32.mxu0 %v50006_v50 }
 0xc72   :  { %43252 = vmatmul.mubr.f32.gmra.mrb[54].mxu0 %v21111_v33 }
 0xc73   :  { %43342 = vmatprep.mubr.f32.mxu0 %v51730_v61 }
 0xd0f   :  { %v43190_v48 = vpop.f32.mrb[48].mxu1 }
 0xd10   :  { %v20980_v25 = vpop.f32.mrb[49].mxu1 }
 0xd11   :  { %v43130_v55 = vpop.f32.mrb[48].mxu0 }
 0xd12   :  { %v21607_v44 = vadd.f32 %v43190_v48, %v43130_v55  ;;  %v20380_v45 = vpop.f32.mrb[49].mxu0 }
 0xd13   :  { %v21606_v17 = vadd.f32 %v20980_v25, %v20380_v45  ;;  %v43193_v5 = vpop.f32.mrb[50].mxu1 }
 0xd14   :  { %v20992_v1 = vpop.f32.mrb[51].mxu1 }
 0xd15   :  { %v43133_v35 = vpop.f32.mrb[50].mxu0 }
 0xd16   :  { %v21609_v26 = vadd.f32 %v43193_v5, %v43133_v35  ;;  %v20392_v2 = vpop.f32.mrb[51].mxu0 }
 0xd17   :  { %v21608_v21 = vadd.f32 %v20992_v1, %v20392_v2 }
 0xd41   :  { %v43250_v38 = vpop.f32.mrb[52].mxu0 }
 0xd42   :  { %v21603_v34 = vsub.f32 %v43130_v55, %v43250_v38  ;;  %v21580_v24 = vpop.f32.mrb[53].mxu0 }
 0xd43   :  { %v21602_v30 = vsub.f32 %v20380_v45, %v21580_v24 }
 0xd44   :  { %v21620_v50 = vand.u32 4294901760, %v21603_v34  ;;  %v22119_v33 = vsub.f32 %v21607_v44, %v21603_v34  ;;  %v22623_v29 = vadd.f32 %v21607_v44, %v21603_v34 }
 0xd45   :  { %v21617_v0 = vand.u32 4294901760, %v21602_v30  ;;  %v22118_v53 = vsub.f32 %v21606_v17, %v21602_v30  ;;  %v22622_v59 = vadd.f32 %v21606_v17, %v21602_v30  ;;  %v43253_v46 = vpop.f32.mrb[54].mxu0 }
 0xd46   :  { %v21712_v10 = vsub.f32 %v21603_v34, %v21620_v50  ;;  %v22124_v54 = vand.u32 4294901760, %v22119_v33  ;;  %v22628_v39 = vand.u32 4294901760, %v22623_v29  ;;  %v21605_v43 = vsub.f32 %v43133_v35, %v43253_v46  ;;  %v21592_v63 = vpop.f32.mrb[55].mxu0 }
 0xd47   :  { %v50048_v48 = vpack.c.bf16 %v21620_v50, %v21617_v0  ;;  %v21705_v25 = vsub.f32 %v21602_v30, %v21617_v0  ;;  %v22121_v5 = vand.u32 4294901760, %v22118_v53  ;;  %v22625_v1 = vand.u32 4294901760, %v22622_v59 }
 0xd48   :  { %v22216_v55 = vsub.f32 %v22119_v33, %v22124_v54  ;;  %v22720_v38 = vsub.f32 %v22623_v29, %v22628_v39  ;;  %v23150_v45 = vand.u32 4294901760, %v21605_v43  ;;  %v23649_v24 = vsub.f32 %v21609_v26, %v21605_v43 }
 0xd49   :  { %v50050_v51 = vpack.c.bf16 %v22124_v54, %v22121_v5  ;;  %v22209_v44 = vsub.f32 %v22118_v53, %v22121_v5  ;;  %v50052_v19 = vpack.c.bf16 %v22628_v39, %v22625_v1  ;;  %v22713_v17 = vsub.f32 %v22622_v59, %v22625_v1  ;;  %45739 = vmatprep.subr.bf16.mxu1 %v50048_v48 }
 0xd4a   :  { %v50055_v34 = vsub.f32 %v21605_v43, %v23150_v45  ;;  %v23654_v35 = vand.u32 4294901760, %v23649_v24  ;;  %v24153_v50 = vadd.f32 %v21609_v26, %v21605_v43  ;;  %v21604_v46 = vsub.f32 %v20392_v2, %v21592_v63  ;;  %45741 = vmatpush3.bf16.msra.mxu1 %v50048_v48 }
 0xd4b   :  { %45787 = vmatprep.subr.bf16.mxu0 %v50052_v19  ;;  %v21706_v30 = vand.u32 4294901760, %v21705_v25  ;;  %v21713_v33 = vand.u32 4294901760, %v21712_v10  ;;  %v45746_v29 = vpack.c.bf16 %v21712_v10, %v21705_v25  ;;  %v22714_v0 = vand.u32 4294901760, %v22713_v17 }
 0xd4c   :  { %v23746_v54 = vsub.f32 %v23649_v24, %v23654_v35  ;;  %v24158_v53 = vand.u32 4294901760, %v24153_v50  ;;  %v23147_v39 = vand.u32 4294901760, %v21604_v46  ;;  %v23648_v5 = vsub.f32 %v21608_v21, %v21604_v46  ;;  %45789 = vmatpush3.bf16.msra.mxu0 %v50052_v19 }
 0xd4d   :  { %v24152_v59 = vadd.f32 %v21608_v21, %v21604_v46  ;;  %43259 = vmatmul.mubr.f32.vlgmr.msra.gmra.mrb[52].mxu1 %v51731_v49  ;;  %v21707_v1 = vsub.f32 %v21705_v25, %v21706_v30  ;;  %v21714_v26 = vsub.f32 %v21712_v10, %v21713_v33  ;;  %v22715_v2 = vsub.f32 %v22713_v17, %v22714_v0 }
 0xd4e   :  { %v50061_v43 = vsub.f32 %v24153_v50, %v24158_v53  ;;  %v50063_v63 = vpack.c.bf16 %v23150_v45, %v23147_v39  ;;  %v23235_v31 = vsub.f32 %v21604_v46, %v23147_v39  ;;  %v23651_v27 = vand.u32 4294901760, %v23648_v5  ;;  %43265 = vmatprep.mubr.f32.mxu1 %v51732_v56 }
 0xd4f   :  { %v24155_v24 = vand.u32 4294901760, %v24152_v59  ;;  %43343 = vmatmul.mubr.f32.vlgmr.msra.gmra.mrb[56].mxu0 %v51733_v23  ;;  %v21708_v57 = vand.u32 4294901760, %v21707_v1  ;;  %v21715_v20 = vand.u32 4294901760, %v21714_v26  ;;  %v22716_v7 = vand.u32 4294901760, %v22715_v2 }
 0xd50   :  { %v50067_v21 = vpack.c.bf16 %v23654_v35, %v23651_v27  ;;  %v23739_v12 = vsub.f32 %v23648_v5, %v23651_v27  ;;  %v22721_v25 = vand.u32 4294901760, %v22720_v38  ;;  %v45794_v10 = vpack.c.bf16 %v22720_v38, %v22713_v17  ;;  %43349 = vmatprep.mubr.f32.mxu0 %v51734_v8 }
 0xd51   :  { %v50070_v50 = vpack.c.bf16 %v24158_v53, %v24155_v24  ;;  %v24243_v45 = vsub.f32 %v24152_v59, %v24155_v24  ;;  %v45742_v46 = vpack.c.bf16 %v21715_v20, %v21708_v57  ;;  %v50072_v39 = vpack.c.bf16 %v21713_v33, %v21706_v30 }
 0xd52   :  { %v22722_v22 = vsub.f32 %v22720_v38, %v22721_v25  ;;  %v50074_v32 = vpack.c.bf16 %v22721_v25, %v22714_v0  ;;  %v22210_v16 = vand.u32 4294901760, %v22209_v44  ;;  %v22217_v1 = vand.u32 4294901760, %v22216_v55 }
 0xd53   :  { %45743 = vmatprep.subr.bf16.mxu1 %v45742_v46  ;;  %v23740_v26 = vand.u32 4294901760, %v23739_v12  ;;  %v23747_v35 = vand.u32 4294901760, %v23746_v54  ;;  %v50076_v2 = vpack.c.bf16 %v22216_v55, %v22209_v44  ;;  %v50078_v27 = vpack.c.bf16 %v23746_v54, %v23739_v12 }
 0xd54   :  { %45745 = vmatpush3.bf16.msra.mxu1 %v45742_v46  ;;  %v22723_v17 = vand.u32 4294901760, %v22722_v22  ;;  %v22211_v53 = vsub.f32 %v22209_v44, %v22210_v16  ;;  %v22218_v5 = vsub.f32 %v22216_v55, %v22217_v1  ;;  %v50080_v59 = vpack.c.bf16 %v22217_v1, %v22210_v16 }
 0xd55   :  { %45747 = vmatprep.subr.bf16.mxu1 %v45746_v29  ;;  %v23741_v20 = vsub.f32 %v23739_v12, %v23740_v26  ;;  %v23748_v57 = vsub.f32 %v23746_v54, %v23747_v35  ;;  %v50082_v38 = vpack.c.bf16 %v23747_v35, %v23740_v26  ;;  %v23236_v30 = vand.u32 4294901760, %v23235_v31 }
 0xd56   :  { %v45790_v33 = vpack.c.bf16 %v22723_v17, %v22716_v7  ;;  %v22212_v0 = vand.u32 4294901760, %v22211_v53  ;;  %v22219_v24 = vand.u32 4294901760, %v22218_v5  ;;  %v23243_v25 = vand.u32 4294901760, %v50055_v34  ;;  %v51793_v5 = vld [vmem:[#allocation58_spill] sm:$0xff] }
 0xd57   :  { %43266 = vmatmul.mubr.f32.vlgmr.msra.gmra.mrb[52].mxu1 %v51735_v47  ;;  %v23742_v58 = vand.u32 4294901760, %v23741_v20  ;;  %v23749_v46 = vand.u32 4294901760, %v23748_v57  ;;  %v23237_v22 = vsub.f32 %v23235_v31, %v23236_v30  ;;  %v50087_v55 = vpack.c.bf16 %v50055_v34, %v23235_v31  ;;  %v51792_v31 = vld [vmem:[#allocation44_spill] sm:$0xff]  ;;  %v51794_v57 = vld [vmem:[#allocation55_spill] sm:$0xff] }
 0xd58   :  { %45791 = vmatprep.subr.bf16.mxu0 %v45790_v33  ;;  %45749 = vmatpush3.bf16.msra.mxu1 %v45746_v29  ;;  %v45766_v16 = vpack.c.bf16 %v22219_v24, %v22212_v0  ;;  %v23244_v12 = vsub.f32 %v50055_v34, %v23243_v25  ;;  %v50090_v44 = vpack.c.bf16 %v23243_v25, %v23236_v30  ;;  %v24244_v7 = vand.u32 4294901760, %v24243_v45  ;;  %v51799_v24 = vld [vmem:[#allocation47_spill] sm:$0xff]  ;;  %v51800_v25 = vld [vmem:[#allocation60_spill] sm:$0xff] }
 0xd59   :  { %45793 = vmatpush3.bf16.msra.mxu0 %v45790_v33  ;;  %45751 = vmatprep.subr.bf16.mxu1 %v50048_v48  ;;  %v45838_v54 = vpack.c.bf16 %v23749_v46, %v23742_v58  ;;  %v23238_v1 = vand.u32 4294901760, %v23237_v22  ;;  %v24251_v26 = vand.u32 4294901760, %v50061_v43  ;;  %v50095_v35 = vpack.c.bf16 %v50061_v43, %v24243_v45  ;;  %v51795_v33 = vld [vmem:[#allocation45_spill] sm:$0xff]  ;;  %v51806_v22 = vld [vmem:[#allocation32_spill] sm:$0xff] }
 0xd5a   :  { %45795 = vmatprep.subr.bf16.mxu0 %v45794_v10  ;;  %43272 = vmatprep.mubr.f32.mxu1 %v51792_v31  ;;  %v23245_v29 = vand.u32 4294901760, %v23244_v12  ;;  %v24245_v17 = vsub.f32 %v24243_v45, %v24244_v7  ;;  %v51797_v45 = vld [vmem:[#allocation59_spill] sm:$0xff]  ;;  %v51805_v46 = vld [vmem:[#allocation29_spill] sm:$0xff] }
 0xd5b   :  { %v24252_v34 = vsub.f32 %v50061_v43, %v24251_v26  ;;  %v50099_v53 = vpack.c.bf16 %v24251_v26, %v24244_v7  ;;  %v51796_v43 = vld [vmem:[#allocation46_spill] sm:$0xff] }
 0xd5c   :  { %43350 = vmatmul.mubr.f32.vlgmr.msra.gmra.mrb[56].mxu0 %v51793_v5  ;;  %v50102_v20 = vpack.c.bf16 %v23245_v29, %v23238_v1  ;;  %v24246_v58 = vand.u32 4294901760, %v24245_v17  ;;  %v50243_v26 = vld [vmem:[%s51418_s10 + $0x20] sm:$0xff] }
 0xd5d   :  { %45797 = vmatpush3.bf16.msra.mxu0 %v45794_v10  ;;  %43356 = vmatprep.mubr.f32.mxu0 %v51794_v57  ;;  %v24253_v30 = vand.u32 4294901760, %v24252_v34  ;;  %v51798_v10 = vld [vmem:[#allocation56_spill] sm:$0xff] }
 0xd5e   :  { %45799 = vmatprep.subr.bf16.mxu0 %v50052_v19 }
 0xd5f   :  { %43273 = vmatmul.mubr.f32.vlgmr.msra.gmra.mrb[52].mxu1 %v51795_v33  ;;  %v50107_v0 = vpack.c.bf16 %v24253_v30, %v24246_v58 }
 0xd60   :  { %45753 = vmatpush3.bf16.msra.mxu1 %v50048_v48  ;;  %43279 = vmatprep.mubr.f32.mxu1 %v51796_v43 }
 0xd61   :  { %45755 = vmatprep.subr.bf16.mxu1 %v50072_v39 }
 0xd64   :  { %43357 = vmatmul.mubr.f32.vlgmr.msra.gmra.mrb[56].mxu0 %v51797_v45 }
 0xd65   :  { %45801 = vmatpush3.bf16.msra.mxu0 %v50052_v19  ;;  %43363 = vmatprep.mubr.f32.mxu0 %v51798_v10 }
 0xd66   :  { %45803 = vmatprep.subr.bf16.mxu0 %v50074_v32 }
 0xd67   :  { %43280 = vmatmul.mubr.f32.vlgmr.msra.gmra.mrb[52].mxu1 %v51799_v24 }
 0xd68   :  { %45757 = vmatpush3.bf16.msra.mxu1 %v50072_v39  ;;  %43286 = vmatprep.mubr.f32.mxu1 %v51732_v56  ;;  %v51804_v39 = vld [vmem:[#allocation27_spill] sm:$0xff] }
 0xd69   :  { %45759 = vmatprep.subr.bf16.mxu1 %v50048_v48 }
 0xd6c   :  { %43364 = vmatmul.mubr.f32.vlgmr.msra.gmra.mrb[56].mxu0 %v51800_v25 }
 0xd6d   :  { %45805 = vmatpush3.bf16.msra.mxu0 %v50074_v32  ;;  %43370 = vmatprep.mubr.f32.mxu0 %v51734_v8  ;;  %v51801_v32 = vld [vmem:[#allocation34_spill] sm:$0xff] }
 0xd6e   :  { %45807 = vmatprep.subr.bf16.mxu0 %v50052_v19 }
 0xd6f   :  { %43287 = vmatmul.mubr.f32.vlgmr.msra.gmra.mrb[52].mxu1 %v51735_v47 }
 0xd70   :  { %45761 = vmatpush3.bf16.msra.mxu1 %v50048_v48  ;;  %43293 = vmatprep.mubr.f32.mxu1 %v51732_v56  ;;  %v51802_v48 = vld [vmem:[#allocation35_spill] sm:$0xff] }
 0xd71   :  { %45763 = vmatprep.subr.bf16.mxu1 %v50050_v51 }
 0xd74   :  { %43371 = vmatmul.mubr.f32.vlgmr.msra.gmra.mrb[56].mxu0 %v51793_v5 }
 0xd75   :  { %45809 = vmatpush3.bf16.msra.mxu0 %v50052_v19  ;;  %43377 = vmatprep.mubr.f32.mxu0 %v51734_v8  ;;  %v51803_v19 = vld [vmem:[#allocation26_spill] sm:$0xff] }
 0xd76   :  { %45835 = vmatprep.subr.bf16.mxu0 %v50067_v21 }
 0xd77   :  { %43294 = vmatmul.mubr.f32.vlgmr.msra.gmra.mrb[52].mxu1 %v51735_v47 }
 0xd78   :  { %45765 = vmatpush3.bf16.msra.mxu1 %v50050_v51  ;;  %43300 = vmatprep.mubr.f32.mxu1 %v51801_v32 }
 0xd79   :  { %45767 = vmatprep.subr.bf16.mxu1 %v45766_v16 }
 0xd7b   :  { %43301 = vmatmul.mubr.f32.vlgmr.msra.gmra.mrb[54].mxu1 %v51802_v48 }
 0xd7c   :  { %43378 = vmatmul.mubr.f32.vlgmr.msra.gmra.mrb[56].mxu0 %v51793_v5  ;;  %45769 = vmatpush3.bf16.msra.mxu1 %v45766_v16  ;;  %v51807_v16 = vld [vmem:[#allocation31_spill] sm:$0xff] }
 0xd7d   :  { %45837 = vmatpush3.bf16.msra.mxu0 %v50067_v21  ;;  %45771 = vmatprep.subr.bf16.mxu1 %v50076_v2 }
 0xd7e   :  { %45839 = vmatprep.subr.bf16.mxu0 %v45838_v54  ;;  %43426 = vmatprep.mubr.f32.mxu0 %v51801_v32 }
 0xd7f   :  { %43307 = vmatprep.mubr.f32.mxu1 %v51803_v19 }
 0xd80   :  { %43427 = vmatmul.mubr.f32.vlgmr.msra.gmra.mrb[58].mxu0 %v51802_v48 }
 0xd81   :  { %45841 = vmatpush3.bf16.msra.mxu0 %v45838_v54  ;;  %43433 = vmatprep.mubr.f32.mxu0 %v51803_v19  ;;  %v50238_v54 = vld [vmem:[%s51419_s11 + $0x28] sm:$0xff] }
 0xd82   :  { %45843 = vmatprep.subr.bf16.mxu0 %v50078_v27 }
 0xd83   :  { %43308 = vmatmul.mubr.f32.vlgmr.msra.gmra.mrb[54].mxu1 %v51804_v39 }
 0xd84   :  { %45773 = vmatpush3.bf16.msra.mxu1 %v50076_v2  ;;  %43314 = vmatprep.mubr.f32.mxu1 %v51805_v46  ;;  %v51808_v2 = vld [vmem:[#allocation33_spill] sm:$0xff] }
 0xd85   :  { %45775 = vmatprep.subr.bf16.mxu1 %v50050_v51 }
 0xd88   :  { %43434 = vmatmul.mubr.f32.vlgmr.msra.gmra.mrb[58].mxu0 %v51804_v39 }
 0xd89   :  { %45845 = vmatpush3.bf16.msra.mxu0 %v50078_v27  ;;  %43440 = vmatprep.mubr.f32.mxu0 %v51805_v46  ;;  %v51809_v27 = vld [vmem:[#allocation65_spill] sm:$0xff] }
 0xd8a   :  { %45847 = vmatprep.subr.bf16.mxu0 %v50067_v21 }
 0xd8b   :  { %43315 = vmatmul.mubr.f32.vlgmr.msra.gmra.mrb[54].mxu1 %v51806_v22 }
 0xd8c   :  { %45777 = vmatpush3.bf16.msra.mxu1 %v50050_v51  ;;  %43321 = vmatprep.mubr.f32.mxu1 %v51807_v16 }
 0xd8d   :  { %45779 = vmatprep.subr.bf16.mxu1 %v50080_v59 }
 0xd90   :  { %43441 = vmatmul.mubr.f32.vlgmr.msra.gmra.mrb[58].mxu0 %v51806_v22 }
 0xd91   :  { %45849 = vmatpush3.bf16.msra.mxu0 %v50067_v21  ;;  %43447 = vmatprep.mubr.f32.mxu0 %v51807_v16 }
 0xd92   :  { %45851 = vmatprep.subr.bf16.mxu0 %v50082_v38 }
 0xd93   :  { %43322 = vmatmul.mubr.f32.vlgmr.msra.gmra.mrb[54].mxu1 %v51808_v2 }
 0xd94   :  { %45781 = vmatpush3.bf16.msra.mxu1 %v50080_v59  ;;  %43328 = vmatprep.mubr.f32.mxu1 %v51803_v19 }
 0xd95   :  { %45783 = vmatprep.subr.bf16.mxu1 %v50050_v51 }
 0xd98   :  { %43448 = vmatmul.mubr.f32.vlgmr.msra.gmra.mrb[58].mxu0 %v51808_v2 }
 0xd99   :  { %45853 = vmatpush3.bf16.msra.mxu0 %v50082_v38  ;;  %43454 = vmatprep.mubr.f32.mxu0 %v51803_v19 }
 0xd9a   :  { %45855 = vmatprep.subr.bf16.mxu0 %v50067_v21 }
 0xd9b   :  { %43329 = vmatmul.mubr.f32.vlgmr.msra.gmra.mrb[54].mxu1 %v51804_v39 }
 0xd9c   :  { %45785 = vmatpush3.bf16.msra.mxu1 %v50050_v51  ;;  %43335 = vmatprep.mubr.f32.mxu1 %v51803_v19  ;;  %v51810_v51 = vld [vmem:[#allocation72_spill] sm:$0xff] }
 0xd9d   :  { %45811 = vmatprep.subr.bf16.mxu1 %v50063_v63 }
 0xda0   :  { %43455 = vmatmul.mubr.f32.vlgmr.msra.gmra.mrb[58].mxu0 %v51804_v39 }
 0xda1   :  { %45857 = vmatpush3.bf16.msra.mxu0 %v50067_v21  ;;  %43461 = vmatprep.mubr.f32.mxu0 %v51803_v19  ;;  %v51812_v21 = vld [vmem:[#allocation71_spill] sm:$0xff] }
 0xda2   :  { %45883 = vmatprep.subr.bf16.mxu0 %v51809_v27 }
 0xda3   :  { %43336 = vmatmul.mubr.f32.vlgmr.msra.gmra.mrb[54].mxu1 %v51804_v39 }
 0xda4   :  { %45813 = vmatpush3.bf16.msra.mxu1 %v50063_v63  ;;  %43384 = vmatprep.mubr.f32.mxu1 %v51727_v13 }
 0xda5   :  { %45815 = vmatprep.subr.bf16.mxu1 %v50102_v20 }
 0xda7   :  { %43385 = vmatmul.mubr.f32.vlgmr.msra.gmra.mrb[56].mxu1 %v51731_v49 }
 0xda8   :  { %45817 = vmatpush3.bf16.msra.mxu1 %v50102_v20  ;;  %43391 = vmatprep.mubr.f32.mxu1 %v51732_v56 }
 0xda9   :  { %45819 = vmatprep.subr.bf16.mxu1 %v50087_v55  ;;  %43462 = vmatmul.mubr.f32.vlgmr.msra.gmra.mrb[58].mxu0 %v51804_v39 }
 0xdaa   :  { %45885 = vmatpush3.bf16.xpose.msra.mxu0 %v51809_v27 }
 0xdab   :  { %45887 = vmatprep.subr.bf16.mxu0 %v51810_v51 }
 0xdaf   :  { %43392 = vmatmul.mubr.f32.vlgmr.msra.gmra.mrb[56].mxu1 %v51735_v47 }
 0xdb0   :  { %45821 = vmatpush3.bf16.msra.mxu1 %v50087_v55  ;;  %43398 = vmatprep.mubr.f32.mxu1 %v51792_v31 }
 0xdb1   :  { %45823 = vmatprep.subr.bf16.mxu1 %v50063_v63 }
 0xdb7   :  { %43399 = vmatmul.mubr.f32.vlgmr.msra.gmra.mrb[56].mxu1 %v51795_v33 }
 0xdb8   :  { %45825 = vmatpush3.bf16.msra.mxu1 %v50063_v63  ;;  %43405 = vmatprep.mubr.f32.mxu1 %v51796_v43 }
 0xdb9   :  { %45827 = vmatprep.subr.bf16.mxu1 %v50090_v44 }
 0xdbf   :  { %43406 = vmatmul.mubr.f32.vlgmr.msra.gmra.mrb[56].mxu1 %v51799_v24 }
 0xdc0   :  { %45829 = vmatpush3.bf16.msra.mxu1 %v50090_v44  ;;  %43412 = vmatprep.mubr.f32.mxu1 %v51732_v56 }
 0xdc1   :  { %45831 = vmatprep.subr.bf16.mxu1 %v50063_v63 }
 0xdc7   :  { %43413 = vmatmul.mubr.f32.vlgmr.msra.gmra.mrb[56].mxu1 %v51735_v47 }
 0xdc8   :  { %45833 = vmatpush3.bf16.msra.mxu1 %v50063_v63  ;;  %43419 = vmatprep.mubr.f32.mxu1 %v51732_v56  ;;  %v51811_v63 = vld [vmem:[#allocation64_spill] sm:$0xff] }
 0xdc9   :  { %45859 = vmatprep.subr.bf16.mxu1 %v50070_v50 }
 0xdcf   :  { %43420 = vmatmul.mubr.f32.vlgmr.msra.gmra.mrb[56].mxu1 %v51735_v47 }
 0xdd0   :  { %45861 = vmatpush3.bf16.msra.mxu1 %v50070_v50  ;;  %43468 = vmatprep.mubr.f32.mxu1 %v51730_v61 }
 0xdd1   :  { %45863 = vmatprep.subr.bf16.mxu1 %v50107_v0 }
 0xdd3   :  { %43469 = vmatmul.mubr.f32.vlgmr.msra.gmra.mrb[58].mxu1 %v51733_v23 }
 0xdd4   :  { %45865 = vmatpush3.bf16.msra.mxu1 %v50107_v0  ;;  %43475 = vmatprep.mubr.f32.mxu1 %v51734_v8 }
 0xdd5   :  { %45867 = vmatprep.subr.bf16.mxu1 %v50095_v35 }
 0xddb   :  { %43476 = vmatmul.mubr.f32.vlgmr.msra.gmra.mrb[58].mxu1 %v51793_v5 }
 0xddc   :  { %45869 = vmatpush3.bf16.msra.mxu1 %v50095_v35  ;;  %43482 = vmatprep.mubr.f32.mxu1 %v51794_v57  ;;  %v50248_v35 = vld [vmem:[%s51419_s11 + $0x20] sm:$0xff] }
 0xddd   :  { %45871 = vmatprep.subr.bf16.mxu1 %v50070_v50 }
 0xde3   :  { %43483 = vmatmul.mubr.f32.vlgmr.msra.gmra.mrb[58].mxu1 %v51797_v45 }
 0xde4   :  { %45873 = vmatpush3.bf16.msra.mxu1 %v50070_v50  ;;  %43489 = vmatprep.mubr.f32.mxu1 %v51798_v10 }
 0xde5   :  { %45875 = vmatprep.subr.bf16.mxu1 %v50099_v53 }
 0xdeb   :  { %43490 = vmatmul.mubr.f32.vlgmr.msra.gmra.mrb[58].mxu1 %v51800_v25  ;;  %v51814_v25 = vld [vmem:[#allocation75_spill] sm:$0xff] }
 0xdec   :  { %45877 = vmatpush3.bf16.msra.mxu1 %v50099_v53  ;;  %43496 = vmatprep.mubr.f32.mxu1 %v51734_v8 }
 0xded   :  { %45879 = vmatprep.subr.bf16.mxu1 %v50070_v50 }
 0xdf3   :  { %43497 = vmatmul.mubr.f32.vlgmr.msra.gmra.mrb[58].mxu1 %v51793_v5 }
 0xdf4   :  { %45881 = vmatpush3.bf16.msra.mxu1 %v50070_v50  ;;  %43503 = vmatprep.mubr.f32.mxu1 %v51734_v8  ;;  %v50233_v50 = vld [vmem:[%s51418_s10 + $0x28] sm:$0xff] }
 0xdf5   :  { %45907 = vmatprep.subr.bf16.mxu1 %v51811_v63 }
 0xdfb   :  { %43504 = vmatmul.mubr.f32.vlgmr.msra.gmra.mrb[58].mxu1 %v51793_v5 }
 0xdfd   :  { %45909 = vmatpush3.bf16.xpose.msra.mxu1 %v51811_v63 }
 0xdfe   :  { %45911 = vmatprep.subr.bf16.mxu1 %v51812_v21 }
 0xe4a   :  { %v43295_v59 = vpop.f32.mrb[52].mxu1 }
 0xe4b   :  { %v22108_v38 = vpop.f32.mrb[53].mxu1 }
 0xe4f   :  { %v43379_v55 = vpop.f32.mrb[56].mxu0 }
 0xe50   :  { %v23127_v12 = vsub.f32 %v43295_v59, %v43379_v55  ;;  %v23116_v44 = vpop.f32.mrb[57].mxu0 }
 0xe51   :  { %v23126_v7 = vsub.f32 %v22108_v38, %v23116_v44 }
 0xe52   :  { %v23131_v53 = vmul.f32 %v50233_v50, %v23127_v12  ;;  %v23139_v20 = vmul.f32 %v50238_v54, %v23127_v12 }
 0xe53   :  { %v23130_v0 = vmul.f32 %v50243_v26, %v23126_v7  ;;  %v23138_v55 = vmul.f32 %v50248_v35, %v23126_v7 }
 0xe76   :  { %v43337_v1 = vpop.f32.mrb[54].mxu1 }
 0xe77   :  { %v23129_v29 = vadd.f32 %v43337_v1, %v43295_v59  ;;  %v22612_v17 = vpop.f32.mrb[55].mxu1 }
 0xe78   :  { %v23128_v34 = vadd.f32 %v22612_v17, %v22108_v38 }
 0xe79   :  { %v23133_v58 = vmul.f32 %v50238_v54, %v23129_v29  ;;  %v23141_v30 = vmul.f32 %v50233_v50, %v23129_v29 }
 0xe7a   :  { %v23132_v44 = vmul.f32 %v50248_v35, %v23128_v34  ;;  %v23140_v2 = vmul.f32 %v50243_v26, %v23128_v34 }
 0xe7b   :  { %v23135_v16 = vsub.f32 %v23131_v53, %v23133_v58  ;;  %v23143_v59 = vadd.f32 %v23141_v30, %v23139_v20 }
 0xe7c   :  { %v23134_v1 = vsub.f32 %v23130_v0, %v23132_v44  ;;  %v23142_v38 = vadd.f32 %v23140_v2, %v23138_v55  ;;  %v43463_v17 = vpop.f32.mrb[58].mxu0 }
 0xe7d   :  { %23137 = vst.msk [vmem:[#allocation2 + $0x8] sm:$0xff] %vm213_vm0, %v23135_v16  ;;  %23145 = vst.msk [vmem:[#allocation3 + $0x8] sm:$0xff] %vm213_vm0, %v23143_v59  ;;  %v24142_v12 = vpop.f32.mrb[59].mxu0 }
 0xe7e   :  { %23136 = vst.msk [vmem:[#allocation2] sm:$0xff] %vm213_vm0, %v23134_v1  ;;  %23144 = vst.msk [vmem:[#allocation3] sm:$0xff] %vm213_vm0, %v23142_v38 }
 0xe84   :  { %v24677_v29 = vld [vmem:[#allocation2 + $0x8] sm:$0xff] }
 0xe85   :  { %v50262_v7 = vld [vmem:[#allocation3 + $0x8] sm:$0xff]  ;;  %v24676_v22 = vld [vmem:[#allocation2] sm:$0xff]  ;;  %v25292_v34 = vsel %vm213_vm0, %v24677_v29, 0 }
 0xe86   :  { %v50265_v53 = vld [vmem:[#allocation3] sm:$0xff]  ;;  %v24685_v2 = vadd.f32 %v50262_v7, %v24677_v29  ;;  %v25289_v20 = vsel %vm213_vm0, %v24676_v22, 0  ;;  %v50269_v16 = vand.u32 4294901760, %v25292_v34 }
 0xe87   :  { %v24684_v58 = vadd.f32 %v50265_v53, %v24676_v22  ;;  %v50272_v30 = vand.u32 4294901760, %v25289_v20 }
 0xe88   :  { %v24692_v0 = vsel %vm213_vm0, %v24685_v2, 0  ;;  %v50276_v55 = vsub.f32 %v25292_v34, %v50269_v16 }
 0xe89   :  { %v24689_v44 = vsel %vm213_vm0, %v24684_v58, 0  ;;  %v50279_v59 = vand.u32 4294901760, %v24692_v0  ;;  %v50282_v1 = vsub.f32 %v25289_v20, %v50272_v30 }
 0xe8a   :  { %v50284_v38 = vand.u32 4294901760, %v24689_v44  ;;  %v51617_v29 = vand.u32 4294901760, %v50276_v55 }
 0xe8b   :  { %v50288_v22 = vsub.f32 %v24692_v0, %v50279_v59  ;;  %v51619_v46 = vand.u32 4294901760, %v50282_v1 }
 0xe8c   :  { %v50292_v2 = vsub.f32 %v24689_v44, %v50284_v38  ;;  %v25380_v34 = vsub.f32 %v50276_v55, %v51617_v29 }
 0xe8d   :  { %v51621_v58 = vand.u32 4294901760, %v50288_v22  ;;  %v25370_v20 = vsub.f32 %v50282_v1, %v51619_v46  ;;  %v51813_v46 = vld [vmem:[#allocation74_spill] sm:$0xff] }
 0xe8e   :  { %v51624_v39 = vand.u32 4294901760, %v50292_v2  ;;  %v25381_v48 = vand.u32 4294901760, %v25380_v34 }
 0xe8f   :  { %v24780_v0 = vsub.f32 %v50288_v22, %v51621_v58  ;;  %v25371_v19 = vand.u32 4294901760, %v25370_v20 }
 0xe90   :  { %v24770_v44 = vsub.f32 %v50292_v2, %v51624_v39 }
 0xe91   :  { %43570 = vmatprep.mubr.f32.mxu1 %v25371_v19  ;;  %v24781_v32 = vand.u32 4294901760, %v24780_v0 }
 0xe92   :  { %v24771_v29 = vand.u32 4294901760, %v24770_v44  ;;  %43571 = vmatmul.mubr.f32.vlgmr.msra.gmra.mrb[60].mxu1 %v25381_v48 }
 0xe93   :  { %45913 = vmatpush3.bf16.xpose.msra.mxu1 %v51812_v21 }
 0xe94   :  { %43510 = vmatprep.mubr.f32.mxu0 %v24771_v29  ;;  %45915 = vmatprep.subr.bf16.mxu1 %v51813_v46 }
 0xe95   :  { %43511 = vmatmul.mubr.f32.vlgmr.msra.gmra.mrb[60].mxu0 %v24781_v32 }
 0xe96   :  { %45889 = vmatpush3.bf16.xpose.msra.mxu0 %v51810_v51 }
 0xe97   :  { %45891 = vmatprep.subr.bf16.mxu0 %v51814_v25 }
 0xea2   :  { %v43421_v20 = vpop.f32.mrb[56].mxu1 }
 0xea3   :  { %v24659_v58 = vadd.f32 %v43463_v17, %v43421_v20  ;;  %v23638_v24 = vpop.f32.mrb[57].mxu1 }
 0xea4   :  { %v24658_v10 = vadd.f32 %v24142_v12, %v23638_v24 }
 0xea5   :  { %v24663_v48 = vmul.f32 %v50238_v54, %v24659_v58  ;;  %v24671_v29 = vmul.f32 %v50233_v50, %v24659_v58 }
 0xea6   :  { %v24662_v21 = vmul.f32 %v50248_v35, %v24658_v10  ;;  %v24670_v51 = vmul.f32 %v50243_v26, %v24658_v10 }
 0xece   :  { %v43505_v39 = vpop.f32.mrb[58].mxu1 }
 0xecf   :  { %v24657_v34 = vsub.f32 %v43421_v20, %v43505_v39  ;;  %v24646_v19 = vpop.f32.mrb[59].mxu1 }
 0xed0   :  { %v24656_v44 = vsub.f32 %v23638_v24, %v24646_v19 }
 0xed1   :  { %v24661_v32 = vmul.f32 %v50233_v50, %v24657_v34  ;;  %v24669_v0 = vmul.f32 %v50238_v54, %v24657_v34 }
 0xed2   :  { %v24660_v17 = vmul.f32 %v50243_v26, %v24656_v44  ;;  %v24668_v12 = vmul.f32 %v50248_v35, %v24656_v44 }
 0xed3   :  { %v24665_v45 = vsub.f32 %v24661_v32, %v24663_v48  ;;  %v24673_v39 = vadd.f32 %v24671_v29, %v24669_v0 }
 0xed4   :  { %v24664_v20 = vsub.f32 %v24660_v17, %v24662_v21  ;;  %v24672_v24 = vadd.f32 %v24670_v51, %v24668_v12 }
 0xed5   :  { %24667 = vst.msk [vmem:[#allocation2 + $0x18] sm:$0xff] %vm213_vm0, %v24665_v45  ;;  %24675 = vst.msk [vmem:[#allocation3 + $0x18] sm:$0xff] %vm213_vm0, %v24673_v39 }
 0xed6   :  { %24666 = vst.msk [vmem:[#allocation2 + $0x10] sm:$0xff] %vm213_vm0, %v24664_v20  ;;  %24674 = vst.msk [vmem:[#allocation3 + $0x10] sm:$0xff] %vm213_vm0, %v24672_v24 }
 0xedc   :  { %v24679_v50 = vld [vmem:[#allocation2 + $0x18] sm:$0xff] }
 0xedd   :  { %v50324_v54 = vld [vmem:[#allocation3 + $0x18] sm:$0xff]  ;;  %v24678_v10 = vld [vmem:[#allocation2 + $0x10] sm:$0xff]  ;;  %v25298_v26 = vsel %vm213_vm0, %v24679_v50, 0 }
 0xede   :  { %v50327_v58 = vld [vmem:[#allocation3 + $0x10] sm:$0xff]  ;;  %v24687_v35 = vadd.f32 %v50324_v54, %v24679_v50  ;;  %v25295_v51 = vsel %vm213_vm0, %v24678_v10, 0  ;;  %v50331_v21 = vand.u32 4294901760, %v25298_v26 }
 0xedf   :  { %v24686_v45 = vadd.f32 %v50327_v58, %v24678_v10  ;;  %v50334_v34 = vand.u32 4294901760, %v25295_v51 }
 0xee0   :  { %v24698_v19 = vsel %vm213_vm0, %v24687_v35, 0  ;;  %v25398_v44 = vsub.f32 %v25298_v26, %v50331_v21 }
 0xee1   :  { %v24695_v48 = vsel %vm213_vm0, %v24686_v45, 0  ;;  %v50339_v29 = vand.u32 4294901760, %v24698_v19  ;;  %v25388_v32 = vsub.f32 %v25295_v51, %v50334_v34 }
 0xee2   :  { %v50342_v0 = vand.u32 4294901760, %v24695_v48  ;;  %v25399_v17 = vand.u32 4294901760, %v25398_v44 }
 0xee3   :  { %v24798_v12 = vsub.f32 %v24698_v19, %v50339_v29  ;;  %v25389_v39 = vand.u32 4294901760, %v25388_v32  ;;  %v51818_v19 = vand.u32 4294901760, %v50292_v2 }
 0xee4   :  { %v24788_v20 = vsub.f32 %v24695_v48, %v50342_v0  ;;  %v25400_v24 = vsub.f32 %v25398_v44, %v25399_v17  ;;  %v51819_v48 = vand.u32 4294901760, %v50276_v55 }
 0xee5   :  { %v24799_v50 = vand.u32 4294901760, %v24798_v12  ;;  %v25390_v10 = vsub.f32 %v25388_v32, %v25389_v39 }
 0xee6   :  { %v24789_v35 = vand.u32 4294901760, %v24788_v20  ;;  %v25401_v45 = vand.u32 4294901760, %v25400_v24 }
 0xee7   :  { %v24800_v43 = vsub.f32 %v24798_v12, %v24799_v50  ;;  %v25391_v26 = vand.u32 4294901760, %v25390_v10 }
 0xee8   :  { %v24790_v33 = vsub.f32 %v24788_v20, %v24789_v35 }
 0xee9   :  { %43573 = vmatprep.mubr.f32.mxu1 %v25391_v26  ;;  %v24801_v51 = vand.u32 4294901760, %v24800_v43  ;;  %v51817_v43 = vand.u32 4294901760, %v50282_v1  ;;  %v51822_v26 = vld [vmem:[#allocation78_spill] sm:$0xff] }
 0xeea   :  { %v24791_v57 = vand.u32 4294901760, %v24790_v33  ;;  %43574 = vmatmul.mubr.f32.gmra.mrb[62].mxu1 %v25401_v45  ;;  %v51816_v33 = vld [vmem:[#allocation76_spill] sm:$0xff] }
 0xeeb   :  { %43580 = vmatprep.mubr.f32.mxu1 %v50272_v30 }
 0xeec   :  { %43513 = vmatprep.mubr.f32.mxu0 %v24791_v57  ;;  %v51815_v57 = vld [vmem:[#allocation73_spill] sm:$0xff] }
 0xeed   :  { %43514 = vmatmul.mubr.f32.gmra.mrb[62].mxu0 %v24801_v51 }
 0xeee   :  { %43520 = vmatprep.mubr.f32.mxu0 %v50284_v38  ;;  %43581 = vmatmul.mubr.f32.vlgmr.msra.gmra.mrb[60].mxu1 %v50269_v16 }
 0xeef   :  { %43583 = vmatprep.mubr.f32.mxu1 %v50334_v34  ;;  %45917 = vmatpush3.bf16.xpose.msra.mxu1 %v51813_v46 }
 0xef0   :  { %45919 = vmatprep.subr.bf16.mxu1 %v51811_v63 }
 0xef1   :  { %43521 = vmatmul.mubr.f32.vlgmr.msra.gmra.mrb[60].mxu0 %v50279_v59 }
 0xef2   :  { %43523 = vmatprep.mubr.f32.mxu0 %v50342_v0  ;;  %45893 = vmatpush3.bf16.xpose.msra.mxu0 %v51814_v25 }
 0xef3   :  { %43584 = vmatmul.mubr.f32.gmra.mrb[62].mxu1 %v50331_v21  ;;  %45895 = vmatprep.subr.bf16.mxu0 %v51809_v27 }
 0xef4   :  { %43590 = vmatprep.mubr.f32.mxu1 %v50282_v1  ;;  %v25892_v1 = vsel %vm213_vm0, %v50262_v7, 0  ;;  %v25898_v7 = vsel %vm213_vm0, %v50324_v54, 0 }
 0xef5   :  { %43524 = vmatmul.mubr.f32.gmra.mrb[62].mxu0 %v50339_v29 }
 0xef6   :  { %43530 = vmatprep.mubr.f32.mxu0 %v50292_v2 }
 0xef7   :  { %43591 = vmatmul.mubr.f32.vlgmr.msra.gmra.mrb[60].mxu1 %v50276_v55 }
 0xef8   :  { %43593 = vmatprep.mubr.f32.mxu1 %v25388_v32  ;;  %45921 = vmatpush3.bf16.xpose.msra.mxu1 %v51811_v63  ;;  %v51820_v32 = vand.u32 4294901760, %v50288_v22 }
 0xef9   :  { %43531 = vmatmul.mubr.f32.vlgmr.msra.gmra.mrb[60].mxu0 %v50288_v22  ;;  %45923 = vmatprep.subr.bf16.mxu1 %v51815_v57  ;;  %v25895_v22 = vsel %vm213_vm0, %v50327_v58, 0  ;;  %v51821_v58 = vld [vmem:[#allocation77_spill] sm:$0xff] }
 0xefa   :  { %43533 = vmatprep.mubr.f32.mxu0 %v24788_v20  ;;  %45897 = vmatpush3.bf16.xpose.msra.mxu0 %v51809_v27 }
 0xefb   :  { %43594 = vmatmul.mubr.f32.gmra.mrb[62].mxu1 %v25398_v44  ;;  %45899 = vmatprep.subr.bf16.mxu0 %v51816_v33  ;;  %v25889_v44 = vsel %vm213_vm0, %v50265_v53, 0  ;;  %v50389_v53 = vand.u32 4294901760, %v25892_v1 }
 0xefc   :  { %43600 = vmatprep.mubr.f32.mxu1 %v51817_v43  ;;  %v50381_v55 = vand.u32 4294901760, %v25889_v44 }
 0xefd   :  { %43534 = vmatmul.mubr.f32.gmra.mrb[62].mxu0 %v24798_v12  ;;  %v25978_v12 = vsub.f32 %v25892_v1, %v50389_v53 }
 0xefe   :  { %43540 = vmatprep.mubr.f32.mxu0 %v51818_v19  ;;  %v25968_v2 = vsub.f32 %v25889_v44, %v50381_v55 }
 0xeff   :  { %43601 = vmatmul.mubr.f32.vlgmr.msra.gmra.mrb[60].mxu1 %v51819_v48  ;;  %v25979_v54 = vand.u32 4294901760, %v25978_v12 }
 0xf00   :  { %43603 = vmatprep.mubr.f32.mxu1 %v25389_v39  ;;  %45925 = vmatpush3.bf16.xpose.msra.mxu1 %v51815_v57  ;;  %v25997_v39 = vand.u32 4294901760, %v25898_v7  ;;  %v25969_v20 = vand.u32 4294901760, %v25968_v2 }
 0xf01   :  { %43541 = vmatmul.mubr.f32.vlgmr.msra.gmra.mrb[60].mxu0 %v51820_v32  ;;  %45927 = vmatprep.subr.bf16.mxu1 %v51811_v63 }
 0xf02   :  { %43543 = vmatprep.mubr.f32.mxu0 %v24789_v35  ;;  %45901 = vmatpush3.bf16.xpose.msra.mxu0 %v51816_v33  ;;  %v25970_v10 = vsub.f32 %v25968_v2, %v25969_v20 }
 0xf03   :  { %43604 = vmatmul.mubr.f32.gmra.mrb[62].mxu1 %v25399_v17  ;;  %45903 = vmatprep.subr.bf16.mxu0 %v51809_v27  ;;  %v50394_v17 = vand.u32 4294901760, %v25895_v22 }
 0xf04   :  { %43610 = vmatprep.mubr.f32.mxu1 %v50272_v30  ;;  %v25971_v45 = vand.u32 4294901760, %v25970_v10 }
 0xf05   :  { %43544 = vmatmul.mubr.f32.gmra.mrb[62].mxu0 %v24799_v50  ;;  %v25988_v24 = vsub.f32 %v25895_v22, %v50394_v17  ;;  %v25998_v50 = vsub.f32 %v25898_v7, %v25997_v39 }
 0xf06   :  { %43550 = vmatprep.mubr.f32.mxu0 %v50284_v38 }
 0xf07   :  { %43611 = vmatmul.mubr.f32.vlgmr.msra.gmra.mrb[60].mxu1 %v50269_v16  ;;  %v25989_v35 = vand.u32 4294901760, %v25988_v24 }
 0xf08   :  { %43613 = vmatprep.mubr.f32.mxu1 %v50334_v34  ;;  %45929 = vmatpush3.bf16.xpose.msra.mxu1 %v51811_v63 }
 0xf09   :  { %43551 = vmatmul.mubr.f32.vlgmr.msra.gmra.mrb[60].mxu0 %v50279_v59 }
 0xf0a   :  { %43553 = vmatprep.mubr.f32.mxu0 %v50342_v0  ;;  %45905 = vmatpush3.bf16.xpose.msra.mxu0 %v51809_v27 }
 0xf0b   :  { %43614 = vmatmul.mubr.f32.gmra.mrb[62].mxu1 %v50331_v21  ;;  %45931 = vmatprep.subr.bf16.mxu0 %v51821_v58 }
 0xf0c   :  { %43620 = vmatprep.mubr.f32.mxu1 %v50272_v30  ;;  %v25980_v30 = vsub.f32 %v25978_v12, %v25979_v54 }
 0xf0d   :  { %43554 = vmatmul.mubr.f32.gmra.mrb[62].mxu0 %v50339_v29 }
 0xf0e   :  { %43560 = vmatprep.mubr.f32.mxu0 %v50284_v38  ;;  %v25999_v38 = vand.u32 4294901760, %v25998_v50 }
 0xf0f   :  { %43621 = vmatmul.mubr.f32.vlgmr.msra.gmra.mrb[60].mxu1 %v50269_v16  ;;  %v25990_v16 = vsub.f32 %v25988_v24, %v25989_v35 }
 0xf10   :  { %43623 = vmatprep.mubr.f32.mxu1 %v50334_v34  ;;  %v25981_v34 = vand.u32 4294901760, %v25980_v30  ;;  %v26000_v51 = vsub.f32 %v25998_v50, %v25999_v38 }
 0xf11   :  { %43561 = vmatmul.mubr.f32.vlgmr.msra.gmra.mrb[60].mxu0 %v50279_v59  ;;  %v25991_v59 = vand.u32 4294901760, %v25990_v16 }
 0xf12   :  { %43563 = vmatprep.mubr.f32.mxu0 %v50342_v0  ;;  %45933 = vmatpush3.bf16.xpose.msra.mxu0 %v51821_v58  ;;  %v26001_v0 = vand.u32 4294901760, %v26000_v51 }
 0xf13   :  { %43624 = vmatmul.mubr.f32.gmra.mrb[62].mxu1 %v50331_v21  ;;  %45935 = vmatprep.subr.bf16.mxu0 %v51822_v26  ;;  %v51823_v21 = vld [vmem:[#allocation79_spill] sm:$0xff] }
 0xf14   :  { %43690 = vmatprep.mubr.f32.mxu1 %v48834_v3 }
 0xf15   :  { %43564 = vmatmul.mubr.f32.gmra.mrb[62].mxu0 %v50339_v29  ;;  %v51824_v29 = vld [vmem:[#allocation80_spill] sm:$0xff] }
 0xf16   :  { %43630 = vmatprep.mubr.f32.mxu0 %v25971_v45 }
 0xf19   :  { %43631 = vmatmul.mubr.f32.vlgmr.msra.gmra.mrb[64].mxu0 %v25981_v34 }
 0xf1a   :  { %43633 = vmatprep.mubr.f32.mxu0 %v25991_v59  ;;  %45937 = vmatpush3.bf16.xpose.msra.mxu0 %v51822_v26 }
 0xf1b   :  { %45939 = vmatprep.subr.bf16.mxu0 %v51823_v21 }
 0xf1d   :  { %43634 = vmatmul.mubr.f32.gmra.mrb[66].mxu0 %v26001_v0 }
 0xf1e   :  { %43640 = vmatprep.mubr.f32.mxu0 %v50381_v55 }
 0xf21   :  { %43641 = vmatmul.mubr.f32.vlgmr.msra.gmra.mrb[64].mxu0 %v50389_v53 }
 0xf22   :  { %43643 = vmatprep.mubr.f32.mxu0 %v50394_v17  ;;  %45941 = vmatpush3.bf16.xpose.msra.mxu0 %v51823_v21 }
 0xf23   :  { %45943 = vmatprep.subr.bf16.mxu0 %v51821_v58 }
 0xf25   :  { %43644 = vmatmul.mubr.f32.gmra.mrb[66].mxu0 %v25997_v39 }
 0xf26   :  { %43650 = vmatprep.mubr.f32.mxu0 %v25968_v2 }
 0xf29   :  { %43651 = vmatmul.mubr.f32.vlgmr.msra.gmra.mrb[64].mxu0 %v25978_v12 }
 0xf2a   :  { %43653 = vmatprep.mubr.f32.mxu0 %v25988_v24  ;;  %45945 = vmatpush3.bf16.xpose.msra.mxu0 %v51821_v58 }
 0xf2b   :  { %45947 = vmatprep.subr.bf16.mxu0 %v51824_v29 }
 0xf2d   :  { %43654 = vmatmul.mubr.f32.gmra.mrb[66].mxu0 %v25998_v50 }
 0xf2e   :  { %43660 = vmatprep.mubr.f32.mxu0 %v25969_v20 }
 0xf31   :  { %43661 = vmatmul.mubr.f32.vlgmr.msra.gmra.mrb[64].mxu0 %v25979_v54 }
 0xf32   :  { %43663 = vmatprep.mubr.f32.mxu0 %v25989_v35  ;;  %45949 = vmatpush3.bf16.xpose.msra.mxu0 %v51824_v29 }
 0xf33   :  { %45951 = vmatprep.subr.bf16.mxu0 %v51821_v58 }
 0xf35   :  { %43664 = vmatmul.mubr.f32.gmra.mrb[66].mxu0 %v25999_v38 }
 0xf36   :  { %43670 = vmatprep.mubr.f32.mxu0 %v50381_v55 }
 0xf39   :  { %43671 = vmatmul.mubr.f32.vlgmr.msra.gmra.mrb[64].mxu0 %v50389_v53 }
 0xf3a   :  { %43673 = vmatprep.mubr.f32.mxu0 %v50394_v17  ;;  %45953 = vmatpush3.bf16.xpose.msra.mxu0 %v51821_v58 }
 0xf3d   :  { %43674 = vmatmul.mubr.f32.gmra.mrb[66].mxu0 %v25997_v39 }
 0xf3e   :  { %43680 = vmatprep.mubr.f32.mxu0 %v50381_v55 }
 0xf41   :  { %43681 = vmatmul.mubr.f32.vlgmr.msra.gmra.mrb[64].mxu0 %v50389_v53 }
 0xf42   :  { %43683 = vmatprep.mubr.f32.mxu0 %v50394_v17 }
 0xf45   :  { %43684 = vmatmul.mubr.f32.gmra.mrb[66].mxu0 %v25997_v39 }
 0xf46   :  { %43774 = vmatprep.mubr.f32.mxu0 %v48892_v42 }
 0xfe2   :  { %v43622_v43 = vpop.f32.mrb[60].mxu1 }
 0xfe3   :  { %v25866_v19 = vpop.f32.mrb[61].mxu1 }
 0xfe4   :  { %v43562_v48 = vpop.f32.mrb[60].mxu0 }
 0xfe5   :  { %v26493_v32 = vadd.f32 %v43622_v43, %v43562_v48  ;;  %v25266_v44 = vpop.f32.mrb[61].mxu0 }
 0xfe6   :  { %v26492_v1 = vadd.f32 %v25866_v19, %v25266_v44  ;;  %v43625_v22 = vpop.f32.mrb[62].mxu1 }
 0xfe7   :  { %v25878_v2 = vpop.f32.mrb[63].mxu1 }
 0xfe8   :  { %v43565_v7 = vpop.f32.mrb[62].mxu0 }
 0xfe9   :  { %v26495_v12 = vadd.f32 %v43625_v22, %v43565_v7  ;;  %v25278_v20 = vpop.f32.mrb[63].mxu0 }
 0xfea   :  { %v26494_v24 = vadd.f32 %v25878_v2, %v25278_v20 }
0x1014   :  { %v43682_v55 = vpop.f32.mrb[64].mxu0 }
0x1015   :  { %v26489_v54 = vsub.f32 %v43562_v48, %v43682_v55  ;;  %v26466_v53 = vpop.f32.mrb[65].mxu0 }
0x1016   :  { %v26488_v50 = vsub.f32 %v25266_v44, %v26466_v53 }
0x1017   :  { %v26506_v17 = vand.u32 4294901760, %v26489_v54  ;;  %v27005_v39 = vsub.f32 %v26493_v32, %v26489_v54  ;;  %v27509_v10 = vadd.f32 %v26493_v32, %v26489_v54 }
0x1018   :  { %v26503_v35 = vand.u32 4294901760, %v26488_v50  ;;  %v27004_v30 = vsub.f32 %v26492_v1, %v26488_v50  ;;  %v27508_v38 = vadd.f32 %v26492_v1, %v26488_v50  ;;  %v43685_v45 = vpop.f32.mrb[66].mxu0 }
0x1019   :  { %v26598_v16 = vsub.f32 %v26489_v54, %v26506_v17  ;;  %v27010_v34 = vand.u32 4294901760, %v27005_v39  ;;  %v27514_v51 = vand.u32 4294901760, %v27509_v10  ;;  %v26491_v59 = vsub.f32 %v43565_v7, %v43685_v45  ;;  %v26478_v0 = vpop.f32.mrb[67].mxu0 }
0x101a   :  { %v50436_v43 = vpack.c.bf16 %v26506_v17, %v26503_v35  ;;  %v26591_v19 = vsub.f32 %v26488_v50, %v26503_v35  ;;  %v27007_v22 = vand.u32 4294901760, %v27004_v30  ;;  %v27511_v2 = vand.u32 4294901760, %v27508_v38 }
0x101b   :  { %v27102_v48 = vsub.f32 %v27005_v39, %v27010_v34  ;;  %v27606_v55 = vsub.f32 %v27509_v10, %v27514_v51  ;;  %v28036_v44 = vand.u32 4294901760, %v26491_v59  ;;  %v28535_v53 = vsub.f32 %v26495_v12, %v26491_v59 }
0x101c   :  { %v50438_v29 = vpack.c.bf16 %v27010_v34, %v27007_v22  ;;  %v27095_v32 = vsub.f32 %v27004_v30, %v27007_v22  ;;  %v50440_v21 = vpack.c.bf16 %v27514_v51, %v27511_v2  ;;  %v27599_v1 = vsub.f32 %v27508_v38, %v27511_v2  ;;  %45955 = vmatprep.subr.bf16.mxu1 %v50436_v43 }
0x101d   :  { %v50443_v54 = vsub.f32 %v26491_v59, %v28036_v44  ;;  %v28540_v7 = vand.u32 4294901760, %v28535_v53  ;;  %v29039_v17 = vadd.f32 %v26495_v12, %v26491_v59  ;;  %v26490_v45 = vsub.f32 %v25278_v20, %v26478_v0  ;;  %45957 = vmatpush3.bf16.msra.mxu1 %v50436_v43 }
0x101e   :  { %46003 = vmatprep.subr.bf16.mxu0 %v50440_v21  ;;  %v26592_v50 = vand.u32 4294901760, %v26591_v19  ;;  %v26599_v39 = vand.u32 4294901760, %v26598_v16  ;;  %v45962_v10 = vpack.c.bf16 %v26598_v16, %v26591_v19  ;;  %v27600_v35 = vand.u32 4294901760, %v27599_v1 }
0x101f   :  { %v28632_v34 = vsub.f32 %v28535_v53, %v28540_v7  ;;  %v29044_v30 = vand.u32 4294901760, %v29039_v17  ;;  %v28033_v51 = vand.u32 4294901760, %v26490_v45  ;;  %v28534_v22 = vsub.f32 %v26494_v24, %v26490_v45  ;;  %46005 = vmatpush3.bf16.msra.mxu0 %v50440_v21 }
0x1020   :  { %v29038_v38 = vadd.f32 %v26494_v24, %v26490_v45  ;;  %43691 = vmatmul.mubr.f32.vlgmr.msra.gmra.mrb[64].mxu1 %v48836_v4  ;;  %v26593_v2 = vsub.f32 %v26591_v19, %v26592_v50  ;;  %v26600_v12 = vsub.f32 %v26598_v16, %v26599_v39  ;;  %v27601_v20 = vsub.f32 %v27599_v1, %v27600_v35 }
0x1021   :  { %v50449_v59 = vsub.f32 %v29039_v17, %v29044_v30  ;;  %v50451_v0 = vpack.c.bf16 %v28036_v44, %v28033_v51  ;;  %v28121_v26 = vsub.f32 %v26490_v45, %v28033_v51  ;;  %v28537_v58 = vand.u32 4294901760, %v28534_v22  ;;  %43697 = vmatprep.mubr.f32.mxu1 %v48769_v15 }
0x1022   :  { %v29041_v53 = vand.u32 4294901760, %v29038_v38  ;;  %43775 = vmatmul.mubr.f32.vlgmr.msra.gmra.mrb[68].mxu0 %v48906_v41  ;;  %v26594_v33 = vand.u32 4294901760, %v26593_v2  ;;  %v26601_v57 = vand.u32 4294901760, %v26600_v12  ;;  %v27602_v25 = vand.u32 4294901760, %v27601_v20 }
0x1023   :  { %v50455_v24 = vpack.c.bf16 %v28540_v7, %v28537_v58  ;;  %v28625_v46 = vsub.f32 %v28534_v22, %v28537_v58  ;;  %v27607_v19 = vand.u32 4294901760, %v27606_v55  ;;  %v46010_v16 = vpack.c.bf16 %v27606_v55, %v27599_v1  ;;  %43781 = vmatprep.mubr.f32.mxu0 %v48882_v60 }
0x1024   :  { %v50458_v17 = vpack.c.bf16 %v29044_v30, %v29041_v53  ;;  %v29129_v44 = vsub.f32 %v29038_v38, %v29041_v53  ;;  %v45958_v45 = vpack.c.bf16 %v26601_v57, %v26594_v33  ;;  %v50460_v51 = vpack.c.bf16 %v26599_v39, %v26592_v50 }
0x1025   :  { %v27608_v63 = vsub.f32 %v27606_v55, %v27607_v19  ;;  %v50462_v27 = vpack.c.bf16 %v27607_v19, %v27600_v35  ;;  %v27096_v5 = vand.u32 4294901760, %v27095_v32  ;;  %v27103_v2 = vand.u32 4294901760, %v27102_v48 }
0x1026   :  { %45959 = vmatprep.subr.bf16.mxu1 %v45958_v45  ;;  %v28626_v12 = vand.u32 4294901760, %v28625_v46  ;;  %v28633_v7 = vand.u32 4294901760, %v28632_v34  ;;  %v50464_v20 = vpack.c.bf16 %v27102_v48, %v27095_v32  ;;  %v50466_v58 = vpack.c.bf16 %v28632_v34, %v28625_v46 }
0x1027   :  { %45961 = vmatpush3.bf16.msra.mxu1 %v45958_v45  ;;  %v27609_v1 = vand.u32 4294901760, %v27608_v63  ;;  %v27097_v30 = vsub.f32 %v27095_v32, %v27096_v5  ;;  %v27104_v22 = vsub.f32 %v27102_v48, %v27103_v2  ;;  %v50468_v38 = vpack.c.bf16 %v27103_v2, %v27096_v5 }
0x1028   :  { %45963 = vmatprep.subr.bf16.mxu1 %v45962_v10  ;;  %v28627_v57 = vsub.f32 %v28625_v46, %v28626_v12  ;;  %v28634_v33 = vsub.f32 %v28632_v34, %v28633_v7  ;;  %v50470_v55 = vpack.c.bf16 %v28633_v7, %v28626_v12  ;;  %v28122_v50 = vand.u32 4294901760, %v28121_v26 }
0x1029   :  { %v46006_v39 = vpack.c.bf16 %v27609_v1, %v27602_v25  ;;  %v27098_v35 = vand.u32 4294901760, %v27097_v30  ;;  %v27105_v53 = vand.u32 4294901760, %v27104_v22  ;;  %v28129_v19 = vand.u32 4294901760, %v50443_v54 }
0x102a   :  { %43698 = vmatmul.mubr.f32.vlgmr.msra.gmra.mrb[64].mxu1 %v48771_v28  ;;  %v28628_v31 = vand.u32 4294901760, %v28627_v57  ;;  %v28635_v45 = vand.u32 4294901760, %v28634_v33  ;;  %v28123_v63 = vsub.f32 %v28121_v26, %v28122_v50  ;;  %v50475_v48 = vpack.c.bf16 %v50443_v54, %v28121_v26 }
0x102b   :  { %46007 = vmatprep.subr.bf16.mxu0 %v46006_v39  ;;  %45965 = vmatpush3.bf16.msra.mxu1 %v45962_v10  ;;  %v45982_v5 = vpack.c.bf16 %v27105_v53, %v27098_v35  ;;  %v28130_v46 = vsub.f32 %v50443_v54, %v28129_v19  ;;  %v50478_v32 = vpack.c.bf16 %v28129_v19, %v28122_v50  ;;  %v29130_v25 = vand.u32 4294901760, %v29129_v44  ;;  %v50618_v35 = vld [vmem:[#allocation17 + $0x28] sm:$0xff]  ;;  %v50620_v53 = vld [vmem:[#allocation18 + $0x28] sm:$0xff]  ;;  %v50622_v19 = vld [vmem:[#allocation17 + $0x20] sm:$0xff] }
0x102c   :  { %46009 = vmatpush3.bf16.msra.mxu0 %v46006_v39  ;;  %45967 = vmatprep.subr.bf16.mxu1 %v50436_v43  ;;  %v46054_v34 = vpack.c.bf16 %v28635_v45, %v28628_v31  ;;  %v28124_v2 = vand.u32 4294901760, %v28123_v63  ;;  %v29137_v12 = vand.u32 4294901760, %v50449_v59  ;;  %v50483_v7 = vpack.c.bf16 %v50449_v59, %v29129_v44  ;;  %v50624_v45 = vld [vmem:[#allocation18 + $0x20] sm:$0xff] }
0x102d   :  { %46011 = vmatprep.subr.bf16.mxu0 %v46010_v16  ;;  %43704 = vmatprep.mubr.f32.mxu1 %v48781_v52  ;;  %v28131_v26 = vand.u32 4294901760, %v28130_v46  ;;  %v29131_v10 = vsub.f32 %v29129_v44, %v29130_v25  ;;  %v51830_v44 = vld [vmem:[#allocation68_spill] sm:$0xff] }
0x102e   :  { %v29138_v54 = vsub.f32 %v50449_v59, %v29137_v12  ;;  %v50487_v1 = vpack.c.bf16 %v29137_v12, %v29130_v25  ;;  %v51828_v59 = vld [vmem:[#allocation66_spill] sm:$0xff] }
0x102f   :  { %43782 = vmatmul.mubr.f32.vlgmr.msra.gmra.mrb[68].mxu0 %v48896_v14  ;;  %v50490_v30 = vpack.c.bf16 %v28131_v26, %v28124_v2  ;;  %v29132_v31 = vand.u32 4294901760, %v29131_v10 }
0x1030   :  { %46013 = vmatpush3.bf16.msra.mxu0 %v46010_v16  ;;  %43788 = vmatprep.mubr.f32.mxu0 %v48885_v36  ;;  %v29139_v22 = vand.u32 4294901760, %v29138_v54  ;;  %v51829_v16 = vld [vmem:[#allocation67_spill] sm:$0xff] }
0x1031   :  { %46015 = vmatprep.subr.bf16.mxu0 %v50440_v21 }
0x1032   :  { %43705 = vmatmul.mubr.f32.vlgmr.msra.gmra.mrb[64].mxu1 %v48784_v62  ;;  %v50495_v57 = vpack.c.bf16 %v29139_v22, %v29132_v31 }
0x1033   :  { %45969 = vmatpush3.bf16.msra.mxu1 %v50436_v43  ;;  %43711 = vmatprep.mubr.f32.mxu1 %v48795_v18 }
0x1034   :  { %45971 = vmatprep.subr.bf16.mxu1 %v50460_v51 }
0x1037   :  { %43789 = vmatmul.mubr.f32.vlgmr.msra.gmra.mrb[68].mxu0 %v48899_v9 }
0x1038   :  { %46017 = vmatpush3.bf16.msra.mxu0 %v50440_v21  ;;  %43795 = vmatprep.mubr.f32.mxu0 %v48888_v11 }
0x1039   :  { %46019 = vmatprep.subr.bf16.mxu0 %v50462_v27 }
0x103a   :  { %43712 = vmatmul.mubr.f32.vlgmr.msra.gmra.mrb[64].mxu1 %v48798_v6 }
0x103b   :  { %45973 = vmatpush3.bf16.msra.mxu1 %v50460_v51  ;;  %43718 = vmatprep.mubr.f32.mxu1 %v48769_v15  ;;  %v51831_v51 = vld [vmem:[#allocation69_spill] sm:$0xff] }
0x103c   :  { %45975 = vmatprep.subr.bf16.mxu1 %v50436_v43 }
0x103f   :  { %43796 = vmatmul.mubr.f32.vlgmr.msra.gmra.mrb[68].mxu0 %v48902_v37 }
0x1040   :  { %46021 = vmatpush3.bf16.msra.mxu0 %v50462_v27  ;;  %43802 = vmatprep.mubr.f32.mxu0 %v48882_v60  ;;  %v51825_v27 = vld [vmem:[#allocation70_spill] sm:$0xff] }
0x1041   :  { %46023 = vmatprep.subr.bf16.mxu0 %v50440_v21 }
0x1042   :  { %43719 = vmatmul.mubr.f32.vlgmr.msra.gmra.mrb[64].mxu1 %v48771_v28 }
0x1043   :  { %45977 = vmatpush3.bf16.msra.mxu1 %v50436_v43  ;;  %43725 = vmatprep.mubr.f32.mxu1 %v48769_v15  ;;  %v51827_v43 = vld [vmem:[#allocation63_spill] sm:$0xff] }
0x1044   :  { %45979 = vmatprep.subr.bf16.mxu1 %v50438_v29 }
0x1047   :  { %43803 = vmatmul.mubr.f32.vlgmr.msra.gmra.mrb[68].mxu0 %v48896_v14 }
0x1048   :  { %46025 = vmatpush3.bf16.msra.mxu0 %v50440_v21  ;;  %43809 = vmatprep.mubr.f32.mxu0 %v48882_v60  ;;  %v51826_v21 = vld [vmem:[#allocation62_spill] sm:$0xff] }
0x1049   :  { %46051 = vmatprep.subr.bf16.mxu0 %v50455_v24 }
0x104a   :  { %43726 = vmatmul.mubr.f32.vlgmr.msra.gmra.mrb[64].mxu1 %v48771_v28 }
0x104b   :  { %45981 = vmatpush3.bf16.msra.mxu1 %v50438_v29  ;;  %43732 = vmatprep.mubr.f32.mxu1 %v48594_v40 }
0x104c   :  { %45983 = vmatprep.subr.bf16.mxu1 %v45982_v5 }
0x104e   :  { %43733 = vmatmul.mubr.f32.vlgmr.msra.gmra.mrb[66].mxu1 %v51825_v27 }
0x104f   :  { %43810 = vmatmul.mubr.f32.vlgmr.msra.gmra.mrb[68].mxu0 %v48896_v14  ;;  %45985 = vmatpush3.bf16.msra.mxu1 %v45982_v5 }
0x1050   :  { %46053 = vmatpush3.bf16.msra.mxu0 %v50455_v24  ;;  %45987 = vmatprep.subr.bf16.mxu1 %v50464_v20 }
0x1051   :  { %46055 = vmatprep.subr.bf16.mxu0 %v46054_v34  ;;  %43858 = vmatprep.mubr.f32.mxu0 %v48594_v40 }
0x1052   :  { %43739 = vmatprep.mubr.f32.mxu1 %v51826_v21 }
0x1053   :  { %43859 = vmatmul.mubr.f32.vlgmr.msra.gmra.mrb[70].mxu0 %v51825_v27 }
0x1054   :  { %46057 = vmatpush3.bf16.msra.mxu0 %v46054_v34  ;;  %43865 = vmatprep.mubr.f32.mxu0 %v51826_v21 }
0x1055   :  { %46059 = vmatprep.subr.bf16.mxu0 %v50466_v58 }
0x1056   :  { %43740 = vmatmul.mubr.f32.vlgmr.msra.gmra.mrb[66].mxu1 %v51827_v43 }
0x1057   :  { %45989 = vmatpush3.bf16.msra.mxu1 %v50464_v20  ;;  %43746 = vmatprep.mubr.f32.mxu1 %v51828_v59  ;;  %v51832_v20 = vld [vmem:[#allocation28_spill] sm:$0xff] }
0x1058   :  { %45991 = vmatprep.subr.bf16.mxu1 %v50438_v29 }
0x105b   :  { %43866 = vmatmul.mubr.f32.vlgmr.msra.gmra.mrb[70].mxu0 %v51827_v43 }
0x105c   :  { %46061 = vmatpush3.bf16.msra.mxu0 %v50466_v58  ;;  %43872 = vmatprep.mubr.f32.mxu0 %v51828_v59 }
0x105d   :  { %46063 = vmatprep.subr.bf16.mxu0 %v50455_v24 }
0x105e   :  { %43747 = vmatmul.mubr.f32.vlgmr.msra.gmra.mrb[66].mxu1 %v51829_v16 }
0x105f   :  { %45993 = vmatpush3.bf16.msra.mxu1 %v50438_v29  ;;  %43753 = vmatprep.mubr.f32.mxu1 %v51830_v44 }
0x1060   :  { %45995 = vmatprep.subr.bf16.mxu1 %v50468_v38 }
0x1063   :  { %43873 = vmatmul.mubr.f32.vlgmr.msra.gmra.mrb[70].mxu0 %v51829_v16 }
0x1064   :  { %46065 = vmatpush3.bf16.msra.mxu0 %v50455_v24  ;;  %43879 = vmatprep.mubr.f32.mxu0 %v51830_v44 }
0x1065   :  { %46067 = vmatprep.subr.bf16.mxu0 %v50470_v55 }
0x1066   :  { %43754 = vmatmul.mubr.f32.vlgmr.msra.gmra.mrb[66].mxu1 %v51831_v51 }
0x1067   :  { %45997 = vmatpush3.bf16.msra.mxu1 %v50468_v38  ;;  %43760 = vmatprep.mubr.f32.mxu1 %v51826_v21 }
0x1068   :  { %45999 = vmatprep.subr.bf16.mxu1 %v50438_v29 }
0x106b   :  { %43880 = vmatmul.mubr.f32.vlgmr.msra.gmra.mrb[70].mxu0 %v51831_v51 }
0x106c   :  { %46069 = vmatpush3.bf16.msra.mxu0 %v50470_v55  ;;  %43886 = vmatprep.mubr.f32.mxu0 %v51826_v21 }
0x106d   :  { %46071 = vmatprep.subr.bf16.mxu0 %v50455_v24 }
0x106e   :  { %43761 = vmatmul.mubr.f32.vlgmr.msra.gmra.mrb[66].mxu1 %v51827_v43 }
0x106f   :  { %46001 = vmatpush3.bf16.msra.mxu1 %v50438_v29  ;;  %43767 = vmatprep.mubr.f32.mxu1 %v51826_v21  ;;  %v51833_v29 = vld [vmem:[#allocation36_spill] sm:$0xff] }
0x1070   :  { %46027 = vmatprep.subr.bf16.mxu1 %v50451_v0 }
0x1073   :  { %43887 = vmatmul.mubr.f32.vlgmr.msra.gmra.mrb[70].mxu0 %v51827_v43 }
0x1074   :  { %46073 = vmatpush3.bf16.msra.mxu0 %v50455_v24  ;;  %43893 = vmatprep.mubr.f32.mxu0 %v51826_v21  ;;  %v51835_v24 = vld [vmem:[#allocation38_spill] sm:$0xff] }
0x1075   :  { %46099 = vmatprep.subr.bf16.mxu0 %v51832_v20 }
0x1076   :  { %43768 = vmatmul.mubr.f32.vlgmr.msra.gmra.mrb[66].mxu1 %v51827_v43 }
0x1077   :  { %46029 = vmatpush3.bf16.msra.mxu1 %v50451_v0  ;;  %43816 = vmatprep.mubr.f32.mxu1 %v48834_v3 }
0x1078   :  { %46031 = vmatprep.subr.bf16.mxu1 %v50490_v30 }
0x107a   :  { %43817 = vmatmul.mubr.f32.vlgmr.msra.gmra.mrb[68].mxu1 %v48836_v4 }
0x107b   :  { %46033 = vmatpush3.bf16.msra.mxu1 %v50490_v30  ;;  %43823 = vmatprep.mubr.f32.mxu1 %v48769_v15 }
0x107c   :  { %46035 = vmatprep.subr.bf16.mxu1 %v50475_v48  ;;  %43894 = vmatmul.mubr.f32.vlgmr.msra.gmra.mrb[70].mxu0 %v51827_v43 }
0x107d   :  { %46101 = vmatpush3.bf16.xpose.msra.mxu0 %v51832_v20 }
0x107e   :  { %46103 = vmatprep.subr.bf16.mxu0 %v51833_v29 }
0x1082   :  { %43824 = vmatmul.mubr.f32.vlgmr.msra.gmra.mrb[68].mxu1 %v48771_v28 }
0x1083   :  { %46037 = vmatpush3.bf16.msra.mxu1 %v50475_v48  ;;  %43830 = vmatprep.mubr.f32.mxu1 %v48781_v52 }
0x1084   :  { %46039 = vmatprep.subr.bf16.mxu1 %v50451_v0 }
0x108a   :  { %43831 = vmatmul.mubr.f32.vlgmr.msra.gmra.mrb[68].mxu1 %v48784_v62 }
0x108b   :  { %46041 = vmatpush3.bf16.msra.mxu1 %v50451_v0  ;;  %43837 = vmatprep.mubr.f32.mxu1 %v48795_v18 }
0x108c   :  { %46043 = vmatprep.subr.bf16.mxu1 %v50478_v32 }
0x1092   :  { %43838 = vmatmul.mubr.f32.vlgmr.msra.gmra.mrb[68].mxu1 %v48798_v6 }
0x1093   :  { %46045 = vmatpush3.bf16.msra.mxu1 %v50478_v32  ;;  %43844 = vmatprep.mubr.f32.mxu1 %v48769_v15 }
0x1094   :  { %46047 = vmatprep.subr.bf16.mxu1 %v50451_v0 }
0x109a   :  { %43845 = vmatmul.mubr.f32.vlgmr.msra.gmra.mrb[68].mxu1 %v48771_v28 }
0x109b   :  { %46049 = vmatpush3.bf16.msra.mxu1 %v50451_v0  ;;  %43851 = vmatprep.mubr.f32.mxu1 %v48769_v15  ;;  %v51834_v0 = vld [vmem:[#allocation30_spill] sm:$0xff] }
0x109c   :  { %46075 = vmatprep.subr.bf16.mxu1 %v50458_v17 }
0x10a2   :  { %43852 = vmatmul.mubr.f32.vlgmr.msra.gmra.mrb[68].mxu1 %v48771_v28 }
0x10a3   :  { %46077 = vmatpush3.bf16.msra.mxu1 %v50458_v17  ;;  %43900 = vmatprep.mubr.f32.mxu1 %v48892_v42 }
0x10a4   :  { %46079 = vmatprep.subr.bf16.mxu1 %v50495_v57 }
0x10a6   :  { %43901 = vmatmul.mubr.f32.vlgmr.msra.gmra.mrb[70].mxu1 %v48906_v41 }
0x10a7   :  { %46081 = vmatpush3.bf16.msra.mxu1 %v50495_v57  ;;  %43907 = vmatprep.mubr.f32.mxu1 %v48882_v60 }
0x10a8   :  { %46083 = vmatprep.subr.bf16.mxu1 %v50483_v7 }
0x10ae   :  { %43908 = vmatmul.mubr.f32.vlgmr.msra.gmra.mrb[70].mxu1 %v48896_v14 }
0x10af   :  { %46085 = vmatpush3.bf16.msra.mxu1 %v50483_v7  ;;  %43914 = vmatprep.mubr.f32.mxu1 %v48885_v36 }
0x10b0   :  { %46087 = vmatprep.subr.bf16.mxu1 %v50458_v17 }
0x10b6   :  { %43915 = vmatmul.mubr.f32.vlgmr.msra.gmra.mrb[70].mxu1 %v48899_v9 }
0x10b7   :  { %46089 = vmatpush3.bf16.msra.mxu1 %v50458_v17  ;;  %43921 = vmatprep.mubr.f32.mxu1 %v48888_v11 }
0x10b8   :  { %46091 = vmatprep.subr.bf16.mxu1 %v50487_v1 }
0x10be   :  { %43922 = vmatmul.mubr.f32.vlgmr.msra.gmra.mrb[70].mxu1 %v48902_v37 }
0x10bf   :  { %46093 = vmatpush3.bf16.msra.mxu1 %v50487_v1  ;;  %43928 = vmatprep.mubr.f32.mxu1 %v48882_v60 }
0x10c0   :  { %46095 = vmatprep.subr.bf16.mxu1 %v50458_v17 }
0x10c6   :  { %43929 = vmatmul.mubr.f32.vlgmr.msra.gmra.mrb[70].mxu1 %v48896_v14 }
0x10c7   :  { %46097 = vmatpush3.bf16.msra.mxu1 %v50458_v17  ;;  %43935 = vmatprep.mubr.f32.mxu1 %v48882_v60 }
0x10c8   :  { %46123 = vmatprep.subr.bf16.mxu1 %v51834_v0 }
0x10ce   :  { %43936 = vmatmul.mubr.f32.vlgmr.msra.gmra.mrb[70].mxu1 %v48896_v14 }
0x10d0   :  { %46125 = vmatpush3.bf16.xpose.msra.mxu1 %v51834_v0 }
0x10d1   :  { %46127 = vmatprep.subr.bf16.mxu1 %v51835_v24 }
0x111d   :  { %v43727_v58 = vpop.f32.mrb[64].mxu1 }
0x111e   :  { %v26994_v38 = vpop.f32.mrb[65].mxu1 }
0x1122   :  { %v43811_v33 = vpop.f32.mrb[68].mxu0 }
0x1123   :  { %v28013_v55 = vsub.f32 %v43727_v58, %v43811_v33  ;;  %v28002_v50 = vpop.f32.mrb[69].mxu0 }
0x1124   :  { %v28012_v39 = vsub.f32 %v26994_v38, %v28002_v50 }
0x1125   :  { %v28017_v46 = vmul.f32 %v28013_v55, %v50618_v35  ;;  %v28025_v32 = vmul.f32 %v28013_v55, %v50620_v53 }
0x1126   :  { %v28016_v2 = vmul.f32 %v28012_v39, %v50622_v19  ;;  %v28024_v12 = vmul.f32 %v28012_v39, %v50624_v45 }
0x1149   :  { %v43769_v17 = vpop.f32.mrb[66].mxu1 }
0x114a   :  { %v28015_v63 = vadd.f32 %v43769_v17, %v43727_v58  ;;  %v27498_v48 = vpop.f32.mrb[67].mxu1 }
0x114b   :  { %v28014_v5 = vadd.f32 %v27498_v48, %v26994_v38 }
0x114c   :  { %v28019_v25 = vmul.f32 %v28015_v63, %v50620_v53  ;;  %v28027_v34 = vmul.f32 %v28015_v63, %v50618_v35 }
0x114d   :  { %v28018_v7 = vmul.f32 %v28014_v5, %v50624_v45  ;;  %v28026_v26 = vmul.f32 %v28014_v5, %v50622_v19 }
0x114e   :  { %v28021_v10 = vsub.f32 %v28017_v46, %v28019_v25  ;;  %v28029_v54 = vadd.f32 %v28027_v34, %v28025_v32 }
0x114f   :  { %v28020_v1 = vsub.f32 %v28016_v2, %v28018_v7  ;;  %v28028_v30 = vadd.f32 %v28026_v26, %v28024_v12  ;;  %v43895_v31 = vpop.f32.mrb[70].mxu0 }
0x1150   :  { %28023 = vst.msk [vmem:[#allocation2 + $0x8] sm:$0xff] %vm213_vm0, %v28021_v10  ;;  %28031 = vst.msk [vmem:[#allocation3 + $0x8] sm:$0xff] %vm213_vm0, %v28029_v54  ;;  %v29028_v22 = vpop.f32.mrb[71].mxu0 }
0x1151   :  { %28022 = vst.msk [vmem:[#allocation2] sm:$0xff] %vm213_vm0, %v28020_v1  ;;  %28030 = vst.msk [vmem:[#allocation3] sm:$0xff] %vm213_vm0, %v28028_v30 }
0x1157   :  { %v29563_v57 = vld [vmem:[#allocation2 + $0x8] sm:$0xff] }
0x1158   :  { %v50638_v58 = vld [vmem:[#allocation3 + $0x8] sm:$0xff]  ;;  %v29562_v38 = vld [vmem:[#allocation2] sm:$0xff]  ;;  %v30178_v33 = vsel %vm213_vm0, %v29563_v57, 0 }
0x1159   :  { %v50641_v55 = vld [vmem:[#allocation3] sm:$0xff]  ;;  %v29571_v50 = vadd.f32 %v50638_v58, %v29563_v57  ;;  %v30175_v39 = vsel %vm213_vm0, %v29562_v38, 0  ;;  %v50645_v17 = vand.u32 4294901760, %v30178_v33 }
0x115a   :  { %v29570_v63 = vadd.f32 %v50641_v55, %v29562_v38  ;;  %v50648_v48 = vand.u32 4294901760, %v30175_v39 }
0x115b   :  { %v29578_v5 = vsel %vm213_vm0, %v29571_v50, 0  ;;  %v50652_v46 = vsub.f32 %v30178_v33, %v50645_v17 }
0x115c   :  { %v29575_v32 = vsel %vm213_vm0, %v29570_v63, 0  ;;  %v50655_v25 = vand.u32 4294901760, %v29578_v5  ;;  %v50658_v34 = vsub.f32 %v30175_v39, %v50648_v48 }
0x115d   :  { %v50660_v2 = vand.u32 4294901760, %v29575_v32  ;;  %v51643_v12 = vand.u32 4294901760, %v50652_v46 }
0x115e   :  { %v50664_v7 = vsub.f32 %v29578_v5, %v50655_v25  ;;  %v51645_v26 = vand.u32 4294901760, %v50658_v34 }
0x115f   :  { %v50668_v10 = vsub.f32 %v29575_v32, %v50660_v2  ;;  %v30266_v54 = vsub.f32 %v50652_v46, %v51643_v12  ;;  %v51836_v32 = vld [vmem:[#allocation39_spill] sm:$0xff]  ;;  %v51837_v12 = vld [vmem:[#allocation37_spill] sm:$0xff] }
0x1160   :  { %v51644_v1 = vand.u32 4294901760, %v50664_v7  ;;  %v30256_v30 = vsub.f32 %v50658_v34, %v51645_v26 }
0x1161   :  { %v51647_v57 = vand.u32 4294901760, %v50668_v10  ;;  %v30267_v39 = vand.u32 4294901760, %v30266_v54 }
0x1162   :  { %v29666_v38 = vsub.f32 %v50664_v7, %v51644_v1  ;;  %v30257_v33 = vand.u32 4294901760, %v30256_v30 }
0x1163   :  { %v29656_v50 = vsub.f32 %v50668_v10, %v51647_v57 }
0x1164   :  { %44002 = vmatprep.mubr.f32.mxu1 %v30257_v33  ;;  %v29667_v5 = vand.u32 4294901760, %v29666_v38 }
0x1165   :  { %v29657_v63 = vand.u32 4294901760, %v29656_v50  ;;  %44003 = vmatmul.mubr.f32.vlgmr.msra.gmra.mrb[72].mxu1 %v30267_v39 }
0x1166   :  { %46129 = vmatpush3.bf16.xpose.msra.mxu1 %v51835_v24 }
0x1167   :  { %43942 = vmatprep.mubr.f32.mxu0 %v29657_v63  ;;  %46131 = vmatprep.subr.bf16.mxu1 %v51836_v32 }
0x1168   :  { %43943 = vmatmul.mubr.f32.vlgmr.msra.gmra.mrb[72].mxu0 %v29667_v5 }
0x1169   :  { %46105 = vmatpush3.bf16.xpose.msra.mxu0 %v51833_v29 }
0x116a   :  { %46107 = vmatprep.subr.bf16.mxu0 %v51837_v12 }
0x1175   :  { %v43853_v30 = vpop.f32.mrb[68].mxu1 }
0x1176   :  { %v29545_v1 = vadd.f32 %v43895_v31, %v43853_v30  ;;  %v28524_v26 = vpop.f32.mrb[69].mxu1 }
0x1177   :  { %v29544_v51 = vadd.f32 %v29028_v22, %v28524_v26 }
0x1178   :  { %v29549_v38 = vmul.f32 %v29545_v1, %v50620_v53  ;;  %v29557_v39 = vmul.f32 %v29545_v1, %v50618_v35 }
0x1179   :  { %v29548_v29 = vmul.f32 %v29544_v51, %v50624_v45  ;;  %v29556_v5 = vmul.f32 %v29544_v51, %v50622_v19 }
0x11a1   :  { %v43937_v57 = vpop.f32.mrb[70].mxu1 }
0x11a2   :  { %v29543_v54 = vsub.f32 %v43853_v30, %v43937_v57  ;;  %v29532_v33 = vpop.f32.mrb[71].mxu1 }
0x11a3   :  { %v29542_v50 = vsub.f32 %v28524_v26, %v29532_v33 }
0x11a4   :  { %v29547_v24 = vmul.f32 %v29543_v54, %v50618_v35  ;;  %v29555_v63 = vmul.f32 %v29543_v54, %v50620_v53 }
0x11a5   :  { %v29546_v31 = vmul.f32 %v29542_v50, %v50622_v19  ;;  %v29554_v22 = vmul.f32 %v29542_v50, %v50624_v45 }
0x11a6   :  { %v29551_v44 = vsub.f32 %v29547_v24, %v29549_v38  ;;  %v29559_v57 = vadd.f32 %v29557_v39, %v29555_v63 }
0x11a7   :  { %v29550_v30 = vsub.f32 %v29546_v31, %v29548_v29  ;;  %v29558_v26 = vadd.f32 %v29556_v5, %v29554_v22 }
0x11a8   :  { %29553 = vst.msk [vmem:[#allocation2 + $0x18] sm:$0xff] %vm213_vm0, %v29551_v44  ;;  %29561 = vst.msk [vmem:[#allocation3 + $0x18] sm:$0xff] %vm213_vm0, %v29559_v57 }
0x11a9   :  { %29552 = vst.msk [vmem:[#allocation2 + $0x10] sm:$0xff] %vm213_vm0, %v29550_v30  ;;  %29560 = vst.msk [vmem:[#allocation3 + $0x10] sm:$0xff] %vm213_vm0, %v29558_v26 }
0x11af   :  { %v29565_v35 = vld [vmem:[#allocation2 + $0x18] sm:$0xff] }
0x11b0   :  { %v50700_v53 = vld [vmem:[#allocation3 + $0x18] sm:$0xff]  ;;  %v29564_v51 = vld [vmem:[#allocation2 + $0x10] sm:$0xff]  ;;  %v30184_v19 = vsel %vm213_vm0, %v29565_v35, 0 }
0x11b1   :  { %v50703_v1 = vld [vmem:[#allocation3 + $0x10] sm:$0xff]  ;;  %v29573_v45 = vadd.f32 %v50700_v53, %v29565_v35  ;;  %v30181_v54 = vsel %vm213_vm0, %v29564_v51, 0  ;;  %v50707_v33 = vand.u32 4294901760, %v30184_v19 }
0x11b2   :  { %v29572_v44 = vadd.f32 %v50703_v1, %v29564_v51  ;;  %v50710_v50 = vand.u32 4294901760, %v30181_v54 }
0x11b3   :  { %v29584_v38 = vsel %vm213_vm0, %v29573_v45, 0  ;;  %v30284_v39 = vsub.f32 %v30184_v19, %v50707_v33 }
0x11b4   :  { %v29581_v24 = vsel %vm213_vm0, %v29572_v44, 0  ;;  %v50715_v63 = vand.u32 4294901760, %v29584_v38  ;;  %v30274_v29 = vsub.f32 %v30181_v54, %v50710_v50 }
0x11b5   :  { %v50718_v5 = vand.u32 4294901760, %v29581_v24  ;;  %v30285_v31 = vand.u32 4294901760, %v30284_v39 }
0x11b6   :  { %v29684_v22 = vsub.f32 %v29584_v38, %v50715_v63  ;;  %v30275_v57 = vand.u32 4294901760, %v30274_v29  ;;  %v51843_v38 = vand.u32 4294901760, %v50664_v7 }
0x11b7   :  { %v29674_v30 = vsub.f32 %v29581_v24, %v50718_v5  ;;  %v30286_v26 = vsub.f32 %v30284_v39, %v30285_v31 }
0x11b8   :  { %v29685_v35 = vand.u32 4294901760, %v29684_v22  ;;  %v30276_v51 = vsub.f32 %v30274_v29, %v30275_v57 }
0x11b9   :  { %v29675_v45 = vand.u32 4294901760, %v29674_v30  ;;  %v30287_v44 = vand.u32 4294901760, %v30286_v26  ;;  %v51845_v26 = vld [vmem:[#allocation51_spill] sm:$0xff] }
0x11ba   :  { %v29686_v16 = vsub.f32 %v29684_v22, %v29685_v35  ;;  %v30277_v19 = vand.u32 4294901760, %v30276_v51 }
0x11bb   :  { %v29676_v59 = vsub.f32 %v29674_v30, %v29675_v45 }
0x11bc   :  { %44005 = vmatprep.mubr.f32.mxu1 %v30277_v19  ;;  %v29687_v54 = vand.u32 4294901760, %v29686_v16  ;;  %v51840_v16 = vand.u32 4294901760, %v50658_v34 }
0x11bd   :  { %v29677_v43 = vand.u32 4294901760, %v29676_v59  ;;  %44006 = vmatmul.mubr.f32.gmra.mrb[74].mxu1 %v30287_v44  ;;  %v51839_v59 = vld [vmem:[#allocation41_spill] sm:$0xff] }
0x11be   :  { %44012 = vmatprep.mubr.f32.mxu1 %v50648_v48 }
0x11bf   :  { %43945 = vmatprep.mubr.f32.mxu0 %v29677_v43  ;;  %v51838_v43 = vld [vmem:[#allocation40_spill] sm:$0xff] }
0x11c0   :  { %43946 = vmatmul.mubr.f32.gmra.mrb[74].mxu0 %v29687_v54 }
0x11c1   :  { %43952 = vmatprep.mubr.f32.mxu0 %v50660_v2  ;;  %44013 = vmatmul.mubr.f32.vlgmr.msra.gmra.mrb[72].mxu1 %v50645_v17 }
0x11c2   :  { %44015 = vmatprep.mubr.f32.mxu1 %v50710_v50  ;;  %46133 = vmatpush3.bf16.xpose.msra.mxu1 %v51836_v32  ;;  %v51842_v32 = vand.u32 4294901760, %v50652_v46 }
0x11c3   :  { %46135 = vmatprep.subr.bf16.mxu1 %v51834_v0 }
0x11c4   :  { %43953 = vmatmul.mubr.f32.vlgmr.msra.gmra.mrb[72].mxu0 %v50655_v25 }
0x11c5   :  { %43955 = vmatprep.mubr.f32.mxu0 %v50718_v5  ;;  %46109 = vmatpush3.bf16.xpose.msra.mxu0 %v51837_v12  ;;  %v51841_v12 = vand.u32 4294901760, %v50668_v10 }
0x11c6   :  { %44016 = vmatmul.mubr.f32.gmra.mrb[74].mxu1 %v50707_v33  ;;  %46111 = vmatprep.subr.bf16.mxu0 %v51832_v20 }
0x11c7   :  { %44022 = vmatprep.mubr.f32.mxu1 %v50658_v34  ;;  %v30778_v34 = vsel %vm213_vm0, %v50638_v58, 0  ;;  %v30784_v58 = vsel %vm213_vm0, %v50700_v53, 0 }
0x11c8   :  { %43956 = vmatmul.mubr.f32.gmra.mrb[74].mxu0 %v50715_v63 }
0x11c9   :  { %43962 = vmatprep.mubr.f32.mxu0 %v50668_v10 }
0x11ca   :  { %44023 = vmatmul.mubr.f32.vlgmr.msra.gmra.mrb[72].mxu1 %v50652_v46 }
0x11cb   :  { %44025 = vmatprep.mubr.f32.mxu1 %v30274_v29  ;;  %46137 = vmatpush3.bf16.xpose.msra.mxu1 %v51834_v0 }
0x11cc   :  { %43963 = vmatmul.mubr.f32.vlgmr.msra.gmra.mrb[72].mxu0 %v50664_v7  ;;  %46139 = vmatprep.subr.bf16.mxu1 %v51838_v43  ;;  %v30781_v7 = vsel %vm213_vm0, %v50703_v1, 0  ;;  %v51844_v1 = vld [vmem:[#allocation48_spill] sm:$0xff] }
0x11cd   :  { %43965 = vmatprep.mubr.f32.mxu0 %v29674_v30  ;;  %46113 = vmatpush3.bf16.xpose.msra.mxu0 %v51832_v20  ;;  %v50770_v24 = vand.u32 4294901760, %v30781_v7 }
0x11ce   :  { %44026 = vmatmul.mubr.f32.gmra.mrb[74].mxu1 %v30284_v39  ;;  %46115 = vmatprep.subr.bf16.mxu0 %v51839_v59  ;;  %v30775_v39 = vsel %vm213_vm0, %v50641_v55, 0  ;;  %v50765_v55 = vand.u32 4294901760, %v30778_v34 }
0x11cf   :  { %44032 = vmatprep.mubr.f32.mxu1 %v51840_v16  ;;  %v50757_v46 = vand.u32 4294901760, %v30775_v39 }
0x11d0   :  { %43966 = vmatmul.mubr.f32.gmra.mrb[74].mxu0 %v29684_v22  ;;  %v30864_v29 = vsub.f32 %v30778_v34, %v50765_v55  ;;  %v30874_v22 = vsub.f32 %v30781_v7, %v50770_v24 }
0x11d1   :  { %43972 = vmatprep.mubr.f32.mxu0 %v51841_v12  ;;  %v30854_v10 = vsub.f32 %v30775_v39, %v50757_v46 }
0x11d2   :  { %44033 = vmatmul.mubr.f32.vlgmr.msra.gmra.mrb[72].mxu1 %v51842_v32  ;;  %v30865_v53 = vand.u32 4294901760, %v30864_v29  ;;  %v30875_v30 = vand.u32 4294901760, %v30874_v22 }
0x11d3   :  { %44035 = vmatprep.mubr.f32.mxu1 %v30275_v57  ;;  %46141 = vmatpush3.bf16.xpose.msra.mxu1 %v51838_v43 }
0x11d4   :  { %43973 = vmatmul.mubr.f32.vlgmr.msra.gmra.mrb[72].mxu0 %v51843_v38  ;;  %46143 = vmatprep.subr.bf16.mxu1 %v51834_v0 }
0x11d5   :  { %43975 = vmatprep.mubr.f32.mxu0 %v29675_v45  ;;  %46117 = vmatpush3.bf16.xpose.msra.mxu0 %v51839_v59 }
0x11d6   :  { %44036 = vmatmul.mubr.f32.gmra.mrb[74].mxu1 %v30285_v31  ;;  %46119 = vmatprep.subr.bf16.mxu0 %v51832_v20  ;;  %v30855_v31 = vand.u32 4294901760, %v30854_v10 }
0x11d7   :  { %44042 = vmatprep.mubr.f32.mxu1 %v50648_v48 }
0x11d8   :  { %43976 = vmatmul.mubr.f32.gmra.mrb[74].mxu0 %v29685_v35  ;;  %v30856_v57 = vsub.f32 %v30854_v10, %v30855_v31 }
0x11d9   :  { %43982 = vmatprep.mubr.f32.mxu0 %v50660_v2 }
0x11da   :  { %44043 = vmatmul.mubr.f32.vlgmr.msra.gmra.mrb[72].mxu1 %v50645_v17  ;;  %v30857_v35 = vand.u32 4294901760, %v30856_v57 }
0x11db   :  { %44045 = vmatprep.mubr.f32.mxu1 %v50710_v50  ;;  %46145 = vmatpush3.bf16.xpose.msra.mxu1 %v51834_v0  ;;  %v30883_v0 = vand.u32 4294901760, %v30784_v58 }
0x11dc   :  { %43983 = vmatmul.mubr.f32.vlgmr.msra.gmra.mrb[72].mxu0 %v50655_v25 }
0x11dd   :  { %43985 = vmatprep.mubr.f32.mxu0 %v50718_v5  ;;  %46121 = vmatpush3.bf16.xpose.msra.mxu0 %v51832_v20  ;;  %v30884_v20 = vsub.f32 %v30784_v58, %v30883_v0 }
0x11de   :  { %44046 = vmatmul.mubr.f32.gmra.mrb[74].mxu1 %v50707_v33  ;;  %46147 = vmatprep.subr.bf16.mxu0 %v51844_v1 }
0x11df   :  { %44052 = vmatprep.mubr.f32.mxu1 %v50648_v48  ;;  %v30866_v48 = vsub.f32 %v30864_v29, %v30865_v53 }
0x11e0   :  { %43986 = vmatmul.mubr.f32.gmra.mrb[74].mxu0 %v50715_v63 }
0x11e1   :  { %43992 = vmatprep.mubr.f32.mxu0 %v50660_v2  ;;  %v30885_v2 = vand.u32 4294901760, %v30884_v20 }
0x11e2   :  { %44053 = vmatmul.mubr.f32.vlgmr.msra.gmra.mrb[72].mxu1 %v50645_v17  ;;  %v30876_v17 = vsub.f32 %v30874_v22, %v30875_v30 }
0x11e3   :  { %44055 = vmatprep.mubr.f32.mxu1 %v50710_v50  ;;  %v30867_v50 = vand.u32 4294901760, %v30866_v48  ;;  %v30886_v51 = vsub.f32 %v30884_v20, %v30885_v2 }
0x11e4   :  { %43993 = vmatmul.mubr.f32.vlgmr.msra.gmra.mrb[72].mxu0 %v50655_v25  ;;  %v30877_v25 = vand.u32 4294901760, %v30876_v17 }
0x11e5   :  { %43995 = vmatprep.mubr.f32.mxu0 %v50718_v5  ;;  %46149 = vmatpush3.bf16.xpose.msra.mxu0 %v51844_v1  ;;  %v30887_v5 = vand.u32 4294901760, %v30886_v51 }
0x11e6   :  { %44056 = vmatmul.mubr.f32.gmra.mrb[74].mxu1 %v50707_v33  ;;  %46151 = vmatprep.subr.bf16.mxu0 %v51845_v26  ;;  %v51846_v33 = vld [vmem:[#allocation52_spill] sm:$0xff] }
0x11e7   :  { %44122 = vmatprep.mubr.f32.mxu1 %v51727_v13 }
0x11e8   :  { %43996 = vmatmul.mubr.f32.gmra.mrb[74].mxu0 %v50715_v63  ;;  %v51847_v63 = vld [vmem:[#allocation53_spill] sm:$0xff] }
0x11e9   :  { %44062 = vmatprep.mubr.f32.mxu0 %v30857_v35 }
0x11ec   :  { %44063 = vmatmul.mubr.f32.vlgmr.msra.gmra.mrb[76].mxu0 %v30867_v50 }
0x11ed   :  { %44065 = vmatprep.mubr.f32.mxu0 %v30877_v25  ;;  %46153 = vmatpush3.bf16.xpose.msra.mxu0 %v51845_v26 }
0x11ee   :  { %46155 = vmatprep.subr.bf16.mxu0 %v51846_v33 }
0x11f0   :  { %44066 = vmatmul.mubr.f32.gmra.mrb[78].mxu0 %v30887_v5 }
0x11f1   :  { %44072 = vmatprep.mubr.f32.mxu0 %v50757_v46 }
0x11f4   :  { %44073 = vmatmul.mubr.f32.vlgmr.msra.gmra.mrb[76].mxu0 %v50765_v55 }
0x11f5   :  { %44075 = vmatprep.mubr.f32.mxu0 %v50770_v24  ;;  %46157 = vmatpush3.bf16.xpose.msra.mxu0 %v51846_v33 }
0x11f6   :  { %46159 = vmatprep.subr.bf16.mxu0 %v51844_v1 }
0x11f8   :  { %44076 = vmatmul.mubr.f32.gmra.mrb[78].mxu0 %v30883_v0 }
0x11f9   :  { %44082 = vmatprep.mubr.f32.mxu0 %v30854_v10 }
0x11fc   :  { %44083 = vmatmul.mubr.f32.vlgmr.msra.gmra.mrb[76].mxu0 %v30864_v29 }
0x11fd   :  { %44085 = vmatprep.mubr.f32.mxu0 %v30874_v22  ;;  %46161 = vmatpush3.bf16.xpose.msra.mxu0 %v51844_v1 }
0x11fe   :  { %46163 = vmatprep.subr.bf16.mxu0 %v51847_v63 }
0x1200   :  { %44086 = vmatmul.mubr.f32.gmra.mrb[78].mxu0 %v30884_v20 }
0x1201   :  { %44092 = vmatprep.mubr.f32.mxu0 %v30855_v31 }
0x1204   :  { %44093 = vmatmul.mubr.f32.vlgmr.msra.gmra.mrb[76].mxu0 %v30865_v53 }
0x1205   :  { %44095 = vmatprep.mubr.f32.mxu0 %v30875_v30  ;;  %46165 = vmatpush3.bf16.xpose.msra.mxu0 %v51847_v63 }
0x1206   :  { %46167 = vmatprep.subr.bf16.mxu0 %v51844_v1 }
0x1208   :  { %44096 = vmatmul.mubr.f32.gmra.mrb[78].mxu0 %v30885_v2 }
0x1209   :  { %44102 = vmatprep.mubr.f32.mxu0 %v50757_v46 }
0x120c   :  { %44103 = vmatmul.mubr.f32.vlgmr.msra.gmra.mrb[76].mxu0 %v50765_v55 }
0x120d   :  { %44105 = vmatprep.mubr.f32.mxu0 %v50770_v24  ;;  %46169 = vmatpush3.bf16.xpose.msra.mxu0 %v51844_v1 }
0x1210   :  { %44106 = vmatmul.mubr.f32.gmra.mrb[78].mxu0 %v30883_v0 }
0x1211   :  { %44112 = vmatprep.mubr.f32.mxu0 %v50757_v46 }
0x1214   :  { %44113 = vmatmul.mubr.f32.vlgmr.msra.gmra.mrb[76].mxu0 %v50765_v55 }
0x1215   :  { %44115 = vmatprep.mubr.f32.mxu0 %v50770_v24 }
0x1218   :  { %44116 = vmatmul.mubr.f32.gmra.mrb[78].mxu0 %v30883_v0 }
0x1219   :  { %44206 = vmatprep.mubr.f32.mxu0 %v51730_v61 }
0x12b5   :  { %v44054_v45 = vpop.f32.mrb[72].mxu1 }
0x12b6   :  { %v30752_v19 = vpop.f32.mrb[73].mxu1 }
0x12b7   :  { %v43994_v44 = vpop.f32.mrb[72].mxu0 }
0x12b8   :  { %v31379_v54 = vadd.f32 %v44054_v45, %v43994_v44  ;;  %v30152_v43 = vpop.f32.mrb[73].mxu0 }
0x12b9   :  { %v31378_v59 = vadd.f32 %v30752_v19, %v30152_v43  ;;  %v44057_v16 = vpop.f32.mrb[74].mxu1 }
0x12ba   :  { %v30764_v12 = vpop.f32.mrb[75].mxu1 }
0x12bb   :  { %v43997_v32 = vpop.f32.mrb[74].mxu0 }
0x12bc   :  { %v31381_v38 = vadd.f32 %v44057_v16, %v43997_v32  ;;  %v30164_v39 = vpop.f32.mrb[75].mxu0 }
0x12bd   :  { %v31380_v34 = vadd.f32 %v30764_v12, %v30164_v39 }
0x12e7   :  { %v44114_v46 = vpop.f32.mrb[76].mxu0 }
0x12e8   :  { %v31375_v7 = vsub.f32 %v43994_v44, %v44114_v46  ;;  %v31352_v55 = vpop.f32.mrb[77].mxu0 }
0x12e9   :  { %v31374_v10 = vsub.f32 %v30152_v43, %v31352_v55 }
0x12ea   :  { %v31392_v24 = vand.u32 4294901760, %v31375_v7  ;;  %v31891_v58 = vsub.f32 %v31379_v54, %v31375_v7  ;;  %v32395_v1 = vadd.f32 %v31379_v54, %v31375_v7 }
0x12eb   :  { %v31389_v29 = vand.u32 4294901760, %v31374_v10  ;;  %v31890_v0 = vsub.f32 %v31378_v59, %v31374_v10  ;;  %v32394_v31 = vadd.f32 %v31378_v59, %v31374_v10  ;;  %v44117_v22 = vpop.f32.mrb[78].mxu0 }
0x12ec   :  { %v31484_v53 = vsub.f32 %v31375_v7, %v31392_v24  ;;  %v31896_v20 = vand.u32 4294901760, %v31891_v58  ;;  %v32400_v57 = vand.u32 4294901760, %v32395_v1  ;;  %v31377_v30 = vsub.f32 %v43997_v32, %v44117_v22  ;;  %v31364_v48 = vpop.f32.mrb[79].mxu0 }
0x12ed   :  { %v50812_v26 = vpack.c.bf16 %v31392_v24, %v31389_v29  ;;  %v31477_v2 = vsub.f32 %v31374_v10, %v31389_v29  ;;  %v31893_v35 = vand.u32 4294901760, %v31890_v0  ;;  %v32397_v17 = vand.u32 4294901760, %v32394_v31 }
0x12ee   :  { %v31988_v50 = vsub.f32 %v31891_v58, %v31896_v20  ;;  %v32492_v51 = vsub.f32 %v32395_v1, %v32400_v57  ;;  %v32922_v25 = vand.u32 4294901760, %v31377_v30  ;;  %v33421_v5 = vsub.f32 %v31381_v38, %v31377_v30 }
0x12ef   :  { %v50814_v33 = vpack.c.bf16 %v31896_v20, %v31893_v35  ;;  %v31981_v63 = vsub.f32 %v31890_v0, %v31893_v35  ;;  %v50816_v45 = vpack.c.bf16 %v32400_v57, %v32397_v17  ;;  %v32485_v19 = vsub.f32 %v32394_v31, %v32397_v17  ;;  %46171 = vmatprep.subr.bf16.mxu1 %v50812_v26 }
0x12f0   :  { %v50819_v44 = vsub.f32 %v31377_v30, %v32922_v25  ;;  %v33426_v54 = vand.u32 4294901760, %v33421_v5  ;;  %v33925_v43 = vadd.f32 %v31381_v38, %v31377_v30  ;;  %v31376_v59 = vsub.f32 %v30164_v39, %v31364_v48  ;;  %46173 = vmatpush3.bf16.msra.mxu1 %v50812_v26 }
0x12f1   :  { %46219 = vmatprep.subr.bf16.mxu0 %v50816_v45  ;;  %v31478_v16 = vand.u32 4294901760, %v31477_v2  ;;  %v31485_v12 = vand.u32 4294901760, %v31484_v53  ;;  %v46178_v32 = vpack.c.bf16 %v31484_v53, %v31477_v2  ;;  %v32486_v46 = vand.u32 4294901760, %v32485_v19 }
0x12f2   :  { %v33518_v7 = vsub.f32 %v33421_v5, %v33426_v54  ;;  %v33930_v55 = vand.u32 4294901760, %v33925_v43  ;;  %v32919_v10 = vand.u32 4294901760, %v31376_v59  ;;  %v33420_v24 = vsub.f32 %v31380_v34, %v31376_v59  ;;  %46221 = vmatpush3.bf16.msra.mxu0 %v50816_v45 }
0x12f3   :  { %v33924_v58 = vadd.f32 %v31380_v34, %v31376_v59  ;;  %44123 = vmatmul.mubr.f32.vlgmr.msra.gmra.mrb[76].mxu1 %v51731_v49  ;;  %v31479_v1 = vsub.f32 %v31477_v2, %v31478_v16  ;;  %v31486_v38 = vsub.f32 %v31484_v53, %v31485_v12  ;;  %v32487_v39 = vsub.f32 %v32485_v19, %v32486_v46 }
0x12f4   :  { %v50825_v29 = vsub.f32 %v33925_v43, %v33930_v55  ;;  %v50827_v0 = vpack.c.bf16 %v32922_v25, %v32919_v10  ;;  %v33007_v31 = vsub.f32 %v31376_v59, %v32919_v10  ;;  %v33423_v22 = vand.u32 4294901760, %v33420_v24  ;;  %44129 = vmatprep.mubr.f32.mxu1 %v51732_v56 }
0x12f5   :  { %v33927_v20 = vand.u32 4294901760, %v33924_v58  ;;  %44207 = vmatmul.mubr.f32.vlgmr.msra.gmra.mrb[80].mxu0 %v51733_v23  ;;  %v31480_v57 = vand.u32 4294901760, %v31479_v1  ;;  %v31487_v30 = vand.u32 4294901760, %v31486_v38  ;;  %v32488_v48 = vand.u32 4294901760, %v32487_v39 }
0x12f6   :  { %v50831_v34 = vpack.c.bf16 %v33426_v54, %v33423_v22  ;;  %v33511_v35 = vsub.f32 %v33420_v24, %v33423_v22  ;;  %v32493_v2 = vand.u32 4294901760, %v32492_v51  ;;  %v46226_v53 = vpack.c.bf16 %v32492_v51, %v32485_v19  ;;  %44213 = vmatprep.mubr.f32.mxu0 %v51734_v8 }
0x12f7   :  { %v50834_v17 = vpack.c.bf16 %v33930_v55, %v33927_v20  ;;  %v34015_v25 = vsub.f32 %v33924_v58, %v33927_v20  ;;  %v46174_v5 = vpack.c.bf16 %v31487_v30, %v31480_v57  ;;  %v50836_v43 = vpack.c.bf16 %v31485_v12, %v31478_v16 }
0x12f8   :  { %v32494_v59 = vsub.f32 %v32492_v51, %v32493_v2  ;;  %v50838_v10 = vpack.c.bf16 %v32493_v2, %v32486_v46  ;;  %v31982_v21 = vand.u32 4294901760, %v31981_v63  ;;  %v31989_v1 = vand.u32 4294901760, %v31988_v50 }
0x12f9   :  { %46175 = vmatprep.subr.bf16.mxu1 %v46174_v5  ;;  %v33512_v38 = vand.u32 4294901760, %v33511_v35  ;;  %v33519_v54 = vand.u32 4294901760, %v33518_v7  ;;  %v50840_v39 = vpack.c.bf16 %v31988_v50, %v31981_v63  ;;  %v50842_v24 = vpack.c.bf16 %v33518_v7, %v33511_v35 }
0x12fa   :  { %46177 = vmatpush3.bf16.msra.mxu1 %v46174_v5  ;;  %v32495_v19 = vand.u32 4294901760, %v32494_v59  ;;  %v31983_v55 = vsub.f32 %v31981_v63, %v31982_v21  ;;  %v31990_v22 = vsub.f32 %v31988_v50, %v31989_v1  ;;  %v50844_v58 = vpack.c.bf16 %v31989_v1, %v31982_v21 }
0x12fb   :  { %46179 = vmatprep.subr.bf16.mxu1 %v46178_v32  ;;  %v33513_v16 = vsub.f32 %v33511_v35, %v33512_v38  ;;  %v33520_v51 = vsub.f32 %v33518_v7, %v33519_v54  ;;  %v50846_v12 = vpack.c.bf16 %v33519_v54, %v33512_v38  ;;  %v33008_v46 = vand.u32 4294901760, %v33007_v31 }
0x12fc   :  { %v46222_v20 = vpack.c.bf16 %v32495_v19, %v32488_v48  ;;  %v31984_v57 = vand.u32 4294901760, %v31983_v55  ;;  %v31991_v30 = vand.u32 4294901760, %v31990_v22  ;;  %v33015_v2 = vand.u32 4294901760, %v50819_v44  ;;  %v51849_v22 = vld [vmem:[#allocation58_spill] sm:$0xff] }
0x12fd   :  { %44130 = vmatmul.mubr.f32.vlgmr.msra.gmra.mrb[76].mxu1 %v51735_v47  ;;  %v33514_v27 = vand.u32 4294901760, %v33513_v16  ;;  %v33521_v5 = vand.u32 4294901760, %v33520_v51  ;;  %v33009_v59 = vsub.f32 %v33007_v31, %v33008_v46  ;;  %v50851_v50 = vpack.c.bf16 %v50819_v44, %v33007_v31  ;;  %v51848_v31 = vld [vmem:[#allocation44_spill] sm:$0xff]  ;;  %v51850_v51 = vld [vmem:[#allocation55_spill] sm:$0xff] }
0x12fe   :  { %46223 = vmatprep.subr.bf16.mxu0 %v46222_v20  ;;  %46181 = vmatpush3.bf16.msra.mxu1 %v46178_v32  ;;  %v46198_v21 = vpack.c.bf16 %v31991_v30, %v31984_v57  ;;  %v33016_v63 = vsub.f32 %v50819_v44, %v33015_v2  ;;  %v50854_v7 = vpack.c.bf16 %v33015_v2, %v33008_v46  ;;  %v34016_v48 = vand.u32 4294901760, %v34015_v25  ;;  %v51855_v30 = vld [vmem:[#allocation47_spill] sm:$0xff]  ;;  %v51856_v2 = vld [vmem:[#allocation60_spill] sm:$0xff] }
0x12ff   :  { %46225 = vmatpush3.bf16.msra.mxu0 %v46222_v20  ;;  %46183 = vmatprep.subr.bf16.mxu1 %v50812_v26  ;;  %v46270_v35 = vpack.c.bf16 %v33521_v5, %v33514_v27  ;;  %v33010_v1 = vand.u32 4294901760, %v33009_v59  ;;  %v34023_v38 = vand.u32 4294901760, %v50825_v29  ;;  %v50859_v54 = vpack.c.bf16 %v50825_v29, %v34015_v25  ;;  %v51851_v20 = vld [vmem:[#allocation45_spill] sm:$0xff]  ;;  %v51862_v59 = vld [vmem:[#allocation32_spill] sm:$0xff] }
0x1300   :  { %46227 = vmatprep.subr.bf16.mxu0 %v46226_v53  ;;  %44136 = vmatprep.mubr.f32.mxu1 %v51848_v31  ;;  %v33017_v32 = vand.u32 4294901760, %v33016_v63  ;;  %v34017_v19 = vsub.f32 %v34015_v25, %v34016_v48  ;;  %v51853_v25 = vld [vmem:[#allocation59_spill] sm:$0xff]  ;;  %v51861_v5 = vld [vmem:[#allocation29_spill] sm:$0xff] }
0x1301   :  { %v34024_v44 = vsub.f32 %v50825_v29, %v34023_v38  ;;  %v50863_v55 = vpack.c.bf16 %v34023_v38, %v34016_v48  ;;  %v51852_v29 = vld [vmem:[#allocation46_spill] sm:$0xff] }
0x1302   :  { %44214 = vmatmul.mubr.f32.vlgmr.msra.gmra.mrb[80].mxu0 %v51849_v22  ;;  %v50866_v16 = vpack.c.bf16 %v33017_v32, %v33010_v1  ;;  %v34018_v27 = vand.u32 4294901760, %v34017_v19 }
0x1303   :  { %46229 = vmatpush3.bf16.msra.mxu0 %v46226_v53  ;;  %44220 = vmatprep.mubr.f32.mxu0 %v51850_v51  ;;  %v34025_v46 = vand.u32 4294901760, %v34024_v44  ;;  %v51854_v53 = vld [vmem:[#allocation56_spill] sm:$0xff] }
0x1304   :  { %46231 = vmatprep.subr.bf16.mxu0 %v50816_v45 }
0x1305   :  { %44137 = vmatmul.mubr.f32.vlgmr.msra.gmra.mrb[76].mxu1 %v51851_v20  ;;  %v50871_v57 = vpack.c.bf16 %v34025_v46, %v34018_v27 }
0x1306   :  { %46185 = vmatpush3.bf16.msra.mxu1 %v50812_v26  ;;  %44143 = vmatprep.mubr.f32.mxu1 %v51852_v29 }
0x1307   :  { %46187 = vmatprep.subr.bf16.mxu1 %v50836_v43 }
0x130a   :  { %44221 = vmatmul.mubr.f32.vlgmr.msra.gmra.mrb[80].mxu0 %v51853_v25 }
0x130b   :  { %46233 = vmatpush3.bf16.msra.mxu0 %v50816_v45  ;;  %44227 = vmatprep.mubr.f32.mxu0 %v51854_v53 }
0x130c   :  { %46235 = vmatprep.subr.bf16.mxu0 %v50838_v10 }
0x130d   :  { %44144 = vmatmul.mubr.f32.vlgmr.msra.gmra.mrb[76].mxu1 %v51855_v30 }
0x130e   :  { %46189 = vmatpush3.bf16.msra.mxu1 %v50836_v43  ;;  %44150 = vmatprep.mubr.f32.mxu1 %v51732_v56  ;;  %v51857_v43 = vld [vmem:[#allocation34_spill] sm:$0xff] }
0x130f   :  { %46191 = vmatprep.subr.bf16.mxu1 %v50812_v26 }
0x1312   :  { %44228 = vmatmul.mubr.f32.vlgmr.msra.gmra.mrb[80].mxu0 %v51856_v2 }
0x1313   :  { %46237 = vmatpush3.bf16.msra.mxu0 %v50838_v10  ;;  %44234 = vmatprep.mubr.f32.mxu0 %v51734_v8  ;;  %v51860_v10 = vld [vmem:[#allocation27_spill] sm:$0xff] }
0x1314   :  { %46239 = vmatprep.subr.bf16.mxu0 %v50816_v45 }
0x1315   :  { %44151 = vmatmul.mubr.f32.vlgmr.msra.gmra.mrb[76].mxu1 %v51735_v47 }
0x1316   :  { %46193 = vmatpush3.bf16.msra.mxu1 %v50812_v26  ;;  %44157 = vmatprep.mubr.f32.mxu1 %v51732_v56  ;;  %v51858_v26 = vld [vmem:[#allocation35_spill] sm:$0xff] }
0x1317   :  { %46195 = vmatprep.subr.bf16.mxu1 %v50814_v33 }
0x131a   :  { %44235 = vmatmul.mubr.f32.vlgmr.msra.gmra.mrb[80].mxu0 %v51849_v22 }
0x131b   :  { %46241 = vmatpush3.bf16.msra.mxu0 %v50816_v45  ;;  %44241 = vmatprep.mubr.f32.mxu0 %v51734_v8  ;;  %v51859_v45 = vld [vmem:[#allocation26_spill] sm:$0xff] }
0x131c   :  { %46267 = vmatprep.subr.bf16.mxu0 %v50831_v34 }
0x131d   :  { %44158 = vmatmul.mubr.f32.vlgmr.msra.gmra.mrb[76].mxu1 %v51735_v47 }
0x131e   :  { %46197 = vmatpush3.bf16.msra.mxu1 %v50814_v33  ;;  %44164 = vmatprep.mubr.f32.mxu1 %v51857_v43 }
0x131f   :  { %46199 = vmatprep.subr.bf16.mxu1 %v46198_v21 }
0x1321   :  { %44165 = vmatmul.mubr.f32.vlgmr.msra.gmra.mrb[78].mxu1 %v51858_v26 }
0x1322   :  { %44242 = vmatmul.mubr.f32.vlgmr.msra.gmra.mrb[80].mxu0 %v51849_v22  ;;  %46201 = vmatpush3.bf16.msra.mxu1 %v46198_v21  ;;  %v51863_v21 = vld [vmem:[#allocation31_spill] sm:$0xff] }
0x1323   :  { %46269 = vmatpush3.bf16.msra.mxu0 %v50831_v34  ;;  %46203 = vmatprep.subr.bf16.mxu1 %v50840_v39 }
0x1324   :  { %46271 = vmatprep.subr.bf16.mxu0 %v46270_v35  ;;  %44290 = vmatprep.mubr.f32.mxu0 %v51857_v43 }
0x1325   :  { %44171 = vmatprep.mubr.f32.mxu1 %v51859_v45 }
0x1326   :  { %44291 = vmatmul.mubr.f32.vlgmr.msra.gmra.mrb[82].mxu0 %v51858_v26 }
0x1327   :  { %46273 = vmatpush3.bf16.msra.mxu0 %v46270_v35  ;;  %44297 = vmatprep.mubr.f32.mxu0 %v51859_v45 }
0x1328   :  { %46275 = vmatprep.subr.bf16.mxu0 %v50842_v24 }
0x1329   :  { %44172 = vmatmul.mubr.f32.vlgmr.msra.gmra.mrb[78].mxu1 %v51860_v10 }
0x132a   :  { %46205 = vmatpush3.bf16.msra.mxu1 %v50840_v39  ;;  %44178 = vmatprep.mubr.f32.mxu1 %v51861_v5  ;;  %v51864_v39 = vld [vmem:[#allocation33_spill] sm:$0xff] }
0x132b   :  { %46207 = vmatprep.subr.bf16.mxu1 %v50814_v33 }
0x132e   :  { %44298 = vmatmul.mubr.f32.vlgmr.msra.gmra.mrb[82].mxu0 %v51860_v10 }
0x132f   :  { %46277 = vmatpush3.bf16.msra.mxu0 %v50842_v24  ;;  %44304 = vmatprep.mubr.f32.mxu0 %v51861_v5  ;;  %v51865_v24 = vld [vmem:[#allocation65_spill] sm:$0xff] }
0x1330   :  { %46279 = vmatprep.subr.bf16.mxu0 %v50831_v34 }
0x1331   :  { %44179 = vmatmul.mubr.f32.vlgmr.msra.gmra.mrb[78].mxu1 %v51862_v59 }
0x1332   :  { %46209 = vmatpush3.bf16.msra.mxu1 %v50814_v33  ;;  %44185 = vmatprep.mubr.f32.mxu1 %v51863_v21 }
0x1333   :  { %46211 = vmatprep.subr.bf16.mxu1 %v50844_v58 }
0x1336   :  { %44305 = vmatmul.mubr.f32.vlgmr.msra.gmra.mrb[82].mxu0 %v51862_v59 }
0x1337   :  { %46281 = vmatpush3.bf16.msra.mxu0 %v50831_v34  ;;  %44311 = vmatprep.mubr.f32.mxu0 %v51863_v21 }
0x1338   :  { %46283 = vmatprep.subr.bf16.mxu0 %v50846_v12 }
0x1339   :  { %44186 = vmatmul.mubr.f32.vlgmr.msra.gmra.mrb[78].mxu1 %v51864_v39 }
0x133a   :  { %46213 = vmatpush3.bf16.msra.mxu1 %v50844_v58  ;;  %44192 = vmatprep.mubr.f32.mxu1 %v51859_v45 }
0x133b   :  { %46215 = vmatprep.subr.bf16.mxu1 %v50814_v33 }
0x133e   :  { %44312 = vmatmul.mubr.f32.vlgmr.msra.gmra.mrb[82].mxu0 %v51864_v39 }
0x133f   :  { %46285 = vmatpush3.bf16.msra.mxu0 %v50846_v12  ;;  %44318 = vmatprep.mubr.f32.mxu0 %v51859_v45  ;;  %v51007_v12 = vld [vmem:[%s51418_s10 + $0x30] sm:$0xff] }
0x1340   :  { %46287 = vmatprep.subr.bf16.mxu0 %v50831_v34 }
0x1341   :  { %44193 = vmatmul.mubr.f32.vlgmr.msra.gmra.mrb[78].mxu1 %v51860_v10 }
0x1342   :  { %46217 = vmatpush3.bf16.msra.mxu1 %v50814_v33  ;;  %44199 = vmatprep.mubr.f32.mxu1 %v51859_v45  ;;  %v51866_v33 = vld [vmem:[#allocation72_spill] sm:$0xff] }
0x1343   :  { %46243 = vmatprep.subr.bf16.mxu1 %v50827_v0 }
0x1346   :  { %44319 = vmatmul.mubr.f32.vlgmr.msra.gmra.mrb[82].mxu0 %v51860_v10 }
0x1347   :  { %46289 = vmatpush3.bf16.msra.mxu0 %v50831_v34  ;;  %44325 = vmatprep.mubr.f32.mxu0 %v51859_v45 }
0x1348   :  { %46315 = vmatprep.subr.bf16.mxu0 %v51865_v24 }
0x1349   :  { %44200 = vmatmul.mubr.f32.vlgmr.msra.gmra.mrb[78].mxu1 %v51860_v10 }
0x134a   :  { %46245 = vmatpush3.bf16.msra.mxu1 %v50827_v0  ;;  %44248 = vmatprep.mubr.f32.mxu1 %v51727_v13 }
0x134b   :  { %46247 = vmatprep.subr.bf16.mxu1 %v50866_v16 }
0x134d   :  { %44249 = vmatmul.mubr.f32.vlgmr.msra.gmra.mrb[80].mxu1 %v51731_v49 }
0x134e   :  { %46249 = vmatpush3.bf16.msra.mxu1 %v50866_v16  ;;  %44255 = vmatprep.mubr.f32.mxu1 %v51732_v56 }
0x134f   :  { %46251 = vmatprep.subr.bf16.mxu1 %v50851_v50  ;;  %44326 = vmatmul.mubr.f32.vlgmr.msra.gmra.mrb[82].mxu0 %v51860_v10 }
0x1350   :  { %46317 = vmatpush3.bf16.xpose.msra.mxu0 %v51865_v24 }
0x1351   :  { %46319 = vmatprep.subr.bf16.mxu0 %v51866_v33 }
0x1355   :  { %44256 = vmatmul.mubr.f32.vlgmr.msra.gmra.mrb[80].mxu1 %v51735_v47 }
0x1356   :  { %46253 = vmatpush3.bf16.msra.mxu1 %v50851_v50  ;;  %44262 = vmatprep.mubr.f32.mxu1 %v51848_v31  ;;  %v51012_v50 = vld [vmem:[%s51419_s11 + $0x30] sm:$0xff] }
0x1357   :  { %46255 = vmatprep.subr.bf16.mxu1 %v50827_v0 }
0x135d   :  { %44263 = vmatmul.mubr.f32.vlgmr.msra.gmra.mrb[80].mxu1 %v51851_v20 }
0x135e   :  { %46257 = vmatpush3.bf16.msra.mxu1 %v50827_v0  ;;  %44269 = vmatprep.mubr.f32.mxu1 %v51852_v29 }
0x135f   :  { %46259 = vmatprep.subr.bf16.mxu1 %v50854_v7 }
0x1365   :  { %44270 = vmatmul.mubr.f32.vlgmr.msra.gmra.mrb[80].mxu1 %v51855_v30 }
0x1366   :  { %46261 = vmatpush3.bf16.msra.mxu1 %v50854_v7  ;;  %44276 = vmatprep.mubr.f32.mxu1 %v51732_v56 }
0x1367   :  { %46263 = vmatprep.subr.bf16.mxu1 %v50827_v0 }
0x136d   :  { %44277 = vmatmul.mubr.f32.vlgmr.msra.gmra.mrb[80].mxu1 %v51735_v47 }
0x136e   :  { %46265 = vmatpush3.bf16.msra.mxu1 %v50827_v0  ;;  %44283 = vmatprep.mubr.f32.mxu1 %v51732_v56 }
0x136f   :  { %46291 = vmatprep.subr.bf16.mxu1 %v50834_v17 }
0x1375   :  { %44284 = vmatmul.mubr.f32.vlgmr.msra.gmra.mrb[80].mxu1 %v51735_v47  ;;  %v51867_v47 = vld [vmem:[#allocation64_spill] sm:$0xff] }
0x1376   :  { %46293 = vmatpush3.bf16.msra.mxu1 %v50834_v17  ;;  %44332 = vmatprep.mubr.f32.mxu1 %v51730_v61 }
0x1377   :  { %46295 = vmatprep.subr.bf16.mxu1 %v50871_v57 }
0x1379   :  { %44333 = vmatmul.mubr.f32.vlgmr.msra.gmra.mrb[82].mxu1 %v51733_v23  ;;  %v51868_v23 = vld [vmem:[#allocation71_spill] sm:$0xff] }
0x137a   :  { %46297 = vmatpush3.bf16.msra.mxu1 %v50871_v57  ;;  %44339 = vmatprep.mubr.f32.mxu1 %v51734_v8 }
0x137b   :  { %46299 = vmatprep.subr.bf16.mxu1 %v50859_v54 }
0x1381   :  { %44340 = vmatmul.mubr.f32.vlgmr.msra.gmra.mrb[82].mxu1 %v51849_v22 }
0x1382   :  { %46301 = vmatpush3.bf16.msra.mxu1 %v50859_v54  ;;  %44346 = vmatprep.mubr.f32.mxu1 %v51850_v51 }
0x1383   :  { %46303 = vmatprep.subr.bf16.mxu1 %v50834_v17 }
0x1389   :  { %44347 = vmatmul.mubr.f32.vlgmr.msra.gmra.mrb[82].mxu1 %v51853_v25 }
0x138a   :  { %46305 = vmatpush3.bf16.msra.mxu1 %v50834_v17  ;;  %44353 = vmatprep.mubr.f32.mxu1 %v51854_v53 }
0x138b   :  { %46307 = vmatprep.subr.bf16.mxu1 %v50863_v55 }
0x1391   :  { %44354 = vmatmul.mubr.f32.vlgmr.msra.gmra.mrb[82].mxu1 %v51856_v2 }
0x1392   :  { %46309 = vmatpush3.bf16.msra.mxu1 %v50863_v55  ;;  %44360 = vmatprep.mubr.f32.mxu1 %v51734_v8 }
0x1393   :  { %46311 = vmatprep.subr.bf16.mxu1 %v50834_v17 }
0x1399   :  { %44361 = vmatmul.mubr.f32.vlgmr.msra.gmra.mrb[82].mxu1 %v51849_v22 }
0x139a   :  { %46313 = vmatpush3.bf16.msra.mxu1 %v50834_v17  ;;  %44367 = vmatprep.mubr.f32.mxu1 %v51734_v8  ;;  %v50997_v17 = vld [vmem:[%s51418_s10 + $0x38] sm:$0xff] }
0x139b   :  { %46339 = vmatprep.subr.bf16.mxu1 %v51867_v47  ;;  %v51002_v8 = vld [vmem:[%s51419_s11 + $0x38] sm:$0xff] }
0x13a1   :  { %44368 = vmatmul.mubr.f32.vlgmr.msra.gmra.mrb[82].mxu1 %v51849_v22 }
0x13a3   :  { %46341 = vmatpush3.bf16.xpose.msra.mxu1 %v51867_v47 }
0x13a4   :  { %46343 = vmatprep.subr.bf16.mxu1 %v51868_v23 }
0x13f0   :  { %v44159_v56 = vpop.f32.mrb[76].mxu1 }
0x13f1   :  { %v31880_v13 = vpop.f32.mrb[77].mxu1 }
0x13f5   :  { %v44243_v61 = vpop.f32.mrb[80].mxu0 }
0x13f6   :  { %v32899_v49 = vsub.f32 %v44159_v56, %v44243_v61  ;;  %v32888_v0 = vpop.f32.mrb[81].mxu0 }
0x13f7   :  { %v32898_v34 = vsub.f32 %v31880_v13, %v32888_v0 }
0x13f8   :  { %v32903_v35 = vmul.f32 %v50997_v17, %v32899_v49  ;;  %v32911_v1 = vmul.f32 %v51002_v8, %v32899_v49 }
0x13f9   :  { %v32902_v31 = vmul.f32 %v51007_v12, %v32898_v34  ;;  %v32910_v32 = vmul.f32 %v51012_v50, %v32898_v34 }
0x141c   :  { %v44201_v58 = vpop.f32.mrb[78].mxu1 }
0x141d   :  { %v32901_v63 = vadd.f32 %v44201_v58, %v44159_v56  ;;  %v32384_v7 = vpop.f32.mrb[79].mxu1 }
0x141e   :  { %v32900_v48 = vadd.f32 %v32384_v7, %v31880_v13 }
0x141f   :  { %v32905_v38 = vmul.f32 %v51002_v8, %v32901_v63  ;;  %v32913_v54 = vmul.f32 %v50997_v17, %v32901_v63 }
0x1420   :  { %v32904_v19 = vmul.f32 %v51012_v50, %v32900_v48  ;;  %v32912_v44 = vmul.f32 %v51007_v12, %v32900_v48 }
0x1421   :  { %v32907_v55 = vsub.f32 %v32903_v35, %v32905_v38  ;;  %v32915_v22 = vadd.f32 %v32913_v54, %v32911_v1 }
0x1422   :  { %v32906_v16 = vsub.f32 %v32902_v31, %v32904_v19  ;;  %v32914_v27 = vadd.f32 %v32912_v44, %v32910_v32  ;;  %v44327_v51 = vpop.f32.mrb[82].mxu0  ;;  %v51869_v32 = vld [vmem:[#allocation74_spill] sm:$0xff]  ;;  %v51870_v19 = vld [vmem:[#allocation75_spill] sm:$0xff] }
0x1423   :  { %32909 = vst.msk [vmem:[#allocation2 + $0x8] sm:$0xff] %vm213_vm0, %v32907_v55  ;;  %32917 = vst.msk [vmem:[#allocation3 + $0x8] sm:$0xff] %vm213_vm0, %v32915_v22  ;;  %v33914_v46 = vpop.f32.mrb[83].mxu0 }
0x1424   :  { %32908 = vst.msk [vmem:[#allocation2] sm:$0xff] %vm213_vm0, %v32906_v16  ;;  %32916 = vst.msk [vmem:[#allocation3] sm:$0xff] %vm213_vm0, %v32914_v27 }
0x142a   :  { %v34449_v20 = vld [vmem:[#allocation2 + $0x8] sm:$0xff] }
0x142b   :  { %v51026_v57 = vld [vmem:[#allocation3 + $0x8] sm:$0xff]  ;;  %v34448_v29 = vld [vmem:[#allocation2] sm:$0xff]  ;;  %v35064_v25 = vsel %vm213_vm0, %v34449_v20, 0 }
0x142c   :  { %v51029_v53 = vld [vmem:[#allocation3] sm:$0xff]  ;;  %v34457_v30 = vadd.f32 %v51026_v57, %v34449_v20  ;;  %v35061_v2 = vsel %vm213_vm0, %v34448_v29, 0  ;;  %v51033_v43 = vand.u32 4294901760, %v35064_v25 }
0x142d   :  { %v34456_v26 = vadd.f32 %v51029_v53, %v34448_v29  ;;  %v51036_v45 = vand.u32 4294901760, %v35061_v2 }
0x142e   :  { %v34464_v10 = vsel %vm213_vm0, %v34457_v30, 0  ;;  %v51040_v5 = vsub.f32 %v35064_v25, %v51033_v43 }
0x142f   :  { %v34461_v59 = vsel %vm213_vm0, %v34456_v26, 0  ;;  %v51043_v21 = vand.u32 4294901760, %v34464_v10  ;;  %v51046_v39 = vsub.f32 %v35061_v2, %v51036_v45 }
0x1430   :  { %v51048_v56 = vand.u32 4294901760, %v34461_v59  ;;  %v35151_v13 = vand.u32 4294901760, %v51040_v5 }
0x1431   :  { %v51052_v61 = vsub.f32 %v34464_v10, %v51043_v21  ;;  %v35141_v49 = vand.u32 4294901760, %v51046_v39 }
0x1432   :  { %v51056_v0 = vsub.f32 %v34461_v59, %v51048_v56  ;;  %v35152_v34 = vsub.f32 %v51040_v5, %v35151_v13 }
0x1433   :  { %v34551_v58 = vand.u32 4294901760, %v51052_v61  ;;  %v35142_v63 = vsub.f32 %v51046_v39, %v35141_v49 }
0x1434   :  { %v34541_v7 = vand.u32 4294901760, %v51056_v0  ;;  %v35153_v38 = vand.u32 4294901760, %v35152_v34 }
0x1435   :  { %v34552_v48 = vsub.f32 %v51052_v61, %v34551_v58  ;;  %v35143_v35 = vand.u32 4294901760, %v35142_v63 }
0x1436   :  { %v34542_v1 = vsub.f32 %v51056_v0, %v34541_v7 }
0x1437   :  { %44434 = vmatprep.mubr.f32.mxu1 %v35143_v35  ;;  %v34553_v31 = vand.u32 4294901760, %v34552_v48 }
0x1438   :  { %v34543_v54 = vand.u32 4294901760, %v34542_v1  ;;  %44435 = vmatmul.mubr.f32.vlgmr.msra.gmra.mrb[84].mxu1 %v35153_v38 }
0x1439   :  { %46345 = vmatpush3.bf16.xpose.msra.mxu1 %v51868_v23 }
0x143a   :  { %44374 = vmatprep.mubr.f32.mxu0 %v34543_v54  ;;  %46347 = vmatprep.subr.bf16.mxu1 %v51869_v32 }
0x143b   :  { %44375 = vmatmul.mubr.f32.vlgmr.msra.gmra.mrb[84].mxu0 %v34553_v31 }
0x143c   :  { %46321 = vmatpush3.bf16.xpose.msra.mxu0 %v51866_v33 }
0x143d   :  { %46323 = vmatprep.subr.bf16.mxu0 %v51870_v19 }
0x1448   :  { %v44285_v44 = vpop.f32.mrb[80].mxu1 }
0x1449   :  { %v34431_v55 = vadd.f32 %v44327_v51, %v44285_v44  ;;  %v33410_v22 = vpop.f32.mrb[81].mxu1 }
0x144a   :  { %v34430_v16 = vadd.f32 %v33914_v46, %v33410_v22 }
0x144b   :  { %v34435_v30 = vmul.f32 %v51002_v8, %v34431_v55  ;;  %v34443_v2 = vmul.f32 %v50997_v17, %v34431_v55 }
0x144c   :  { %v34434_v33 = vmul.f32 %v51012_v50, %v34430_v16  ;;  %v34442_v10 = vmul.f32 %v51007_v12, %v34430_v16 }
0x1474   :  { %v44369_v27 = vpop.f32.mrb[82].mxu1 }
0x1475   :  { %v34429_v20 = vsub.f32 %v44285_v44, %v44369_v27  ;;  %v34418_v29 = vpop.f32.mrb[83].mxu1 }
0x1476   :  { %v34428_v25 = vsub.f32 %v33410_v22, %v34418_v29 }
0x1477   :  { %v34433_v23 = vmul.f32 %v50997_v17, %v34429_v20  ;;  %v34441_v26 = vmul.f32 %v51002_v8, %v34429_v20 }
0x1478   :  { %v34432_v51 = vmul.f32 %v51007_v12, %v34428_v25  ;;  %v34440_v46 = vmul.f32 %v51012_v50, %v34428_v25 }
0x1479   :  { %v34437_v59 = vsub.f32 %v34433_v23, %v34435_v30  ;;  %v34445_v34 = vadd.f32 %v34443_v2, %v34441_v26 }
0x147a   :  { %v34436_v63 = vsub.f32 %v34432_v51, %v34434_v33  ;;  %v34444_v48 = vadd.f32 %v34442_v10, %v34440_v46 }
0x147b   :  { %34439 = vst.msk [vmem:[#allocation2 + $0x18] sm:$0xff] %vm213_vm0, %v34437_v59  ;;  %34447 = vst.msk [vmem:[#allocation3 + $0x18] sm:$0xff] %vm213_vm0, %v34445_v34 }
0x147c   :  { %34438 = vst.msk [vmem:[#allocation2 + $0x10] sm:$0xff] %vm213_vm0, %v34436_v63  ;;  %34446 = vst.msk [vmem:[#allocation3 + $0x10] sm:$0xff] %vm213_vm0, %v34444_v48 }
0x1482   :  { %v34451_v17 = vld [vmem:[#allocation2 + $0x18] sm:$0xff] }
0x1483   :  { %v51088_v8 = vld [vmem:[#allocation3 + $0x18] sm:$0xff]  ;;  %v34450_v35 = vld [vmem:[#allocation2 + $0x10] sm:$0xff]  ;;  %v35070_v12 = vsel %vm213_vm0, %v34451_v17, 0 }
0x1484   :  { %v51091_v1 = vld [vmem:[#allocation3 + $0x10] sm:$0xff]  ;;  %v34459_v50 = vadd.f32 %v51088_v8, %v34451_v17  ;;  %v35067_v38 = vsel %vm213_vm0, %v34450_v35, 0  ;;  %v51095_v54 = vand.u32 4294901760, %v35070_v12 }
0x1485   :  { %v34458_v31 = vadd.f32 %v51091_v1, %v34450_v35  ;;  %v51098_v44 = vand.u32 4294901760, %v35067_v38  ;;  %v35661_v35 = vsel %vm213_vm0, %v51029_v53, 0 }
0x1486   :  { %v34470_v55 = vsel %vm213_vm0, %v34459_v50, 0  ;;  %v35170_v22 = vsub.f32 %v35070_v12, %v51095_v54 }
0x1487   :  { %v34467_v16 = vsel %vm213_vm0, %v34458_v31, 0  ;;  %v51103_v27 = vand.u32 4294901760, %v34470_v55  ;;  %v35160_v20 = vsub.f32 %v35067_v38, %v51098_v44  ;;  %v51874_v38 = vld [vmem:[#allocation78_spill] sm:$0xff] }
0x1488   :  { %v51106_v29 = vand.u32 4294901760, %v34467_v16  ;;  %v35171_v25 = vand.u32 4294901760, %v35170_v22 }
0x1489   :  { %v34570_v30 = vsub.f32 %v34470_v55, %v51103_v27  ;;  %v35161_v2 = vand.u32 4294901760, %v35160_v20 }
0x148a   :  { %v34560_v23 = vsub.f32 %v34467_v16, %v51106_v29  ;;  %v35172_v26 = vsub.f32 %v35170_v22, %v35171_v25  ;;  %v51876_v16 = vld [vmem:[#allocation80_spill] sm:$0xff] }
0x148b   :  { %v34571_v33 = vand.u32 4294901760, %v34570_v30  ;;  %v35162_v10 = vsub.f32 %v35160_v20, %v35161_v2 }
0x148c   :  { %v34561_v51 = vand.u32 4294901760, %v34560_v23  ;;  %v35173_v63 = vand.u32 4294901760, %v35172_v26 }
0x148d   :  { %v34572_v46 = vsub.f32 %v34570_v30, %v34571_v33  ;;  %v35163_v59 = vand.u32 4294901760, %v35162_v10 }
0x148e   :  { %v34562_v34 = vsub.f32 %v34560_v23, %v34561_v51 }
0x148f   :  { %44437 = vmatprep.mubr.f32.mxu1 %v35163_v59  ;;  %v34573_v17 = vand.u32 4294901760, %v34572_v46 }
0x1490   :  { %v34563_v48 = vand.u32 4294901760, %v34562_v34  ;;  %44438 = vmatmul.mubr.f32.gmra.mrb[86].mxu1 %v35173_v63 }
0x1491   :  { %44444 = vmatprep.mubr.f32.mxu1 %v51036_v45 }
0x1492   :  { %44377 = vmatprep.mubr.f32.mxu0 %v34563_v48 }
0x1493   :  { %44378 = vmatmul.mubr.f32.gmra.mrb[86].mxu0 %v34573_v17 }
0x1494   :  { %44384 = vmatprep.mubr.f32.mxu0 %v51048_v56  ;;  %44445 = vmatmul.mubr.f32.vlgmr.msra.gmra.mrb[84].mxu1 %v51033_v43 }
0x1495   :  { %44447 = vmatprep.mubr.f32.mxu1 %v51098_v44  ;;  %46349 = vmatpush3.bf16.xpose.msra.mxu1 %v51869_v32  ;;  %v51871_v32 = vld [vmem:[#allocation73_spill] sm:$0xff] }
0x1496   :  { %46351 = vmatprep.subr.bf16.mxu1 %v51867_v47 }
0x1497   :  { %44385 = vmatmul.mubr.f32.vlgmr.msra.gmra.mrb[84].mxu0 %v51043_v21 }
0x1498   :  { %44387 = vmatprep.mubr.f32.mxu0 %v51106_v29  ;;  %46325 = vmatpush3.bf16.xpose.msra.mxu0 %v51870_v19  ;;  %v51872_v19 = vld [vmem:[#allocation76_spill] sm:$0xff] }
0x1499   :  { %44448 = vmatmul.mubr.f32.gmra.mrb[86].mxu1 %v51095_v54  ;;  %46327 = vmatprep.subr.bf16.mxu0 %v51865_v24 }
0x149a   :  { %44454 = vmatprep.mubr.f32.mxu1 %v51046_v39  ;;  %v51147_v39 = vand.u32 4294901760, %v35661_v35 }
0x149b   :  { %44388 = vmatmul.mubr.f32.gmra.mrb[86].mxu0 %v51103_v27 }
0x149c   :  { %44394 = vmatprep.mubr.f32.mxu0 %v51056_v0  ;;  %v51873_v0 = vld [vmem:[#allocation77_spill] sm:$0xff] }
0x149d   :  { %44455 = vmatmul.mubr.f32.vlgmr.msra.gmra.mrb[84].mxu1 %v51040_v5  ;;  %v35664_v5 = vsel %vm213_vm0, %v51026_v57, 0  ;;  %v35740_v57 = vsub.f32 %v35661_v35, %v51147_v39 }
0x149e   :  { %44457 = vmatprep.mubr.f32.mxu1 %v35160_v20  ;;  %46353 = vmatpush3.bf16.xpose.msra.mxu1 %v51867_v47  ;;  %v51152_v53 = vand.u32 4294901760, %v35664_v5 }
0x149f   :  { %44395 = vmatmul.mubr.f32.vlgmr.msra.gmra.mrb[84].mxu0 %v51052_v61  ;;  %46355 = vmatprep.subr.bf16.mxu1 %v51871_v32 }
0x14a0   :  { %44397 = vmatprep.mubr.f32.mxu0 %v34560_v23  ;;  %46329 = vmatpush3.bf16.xpose.msra.mxu0 %v51865_v24 }
0x14a1   :  { %44458 = vmatmul.mubr.f32.gmra.mrb[86].mxu1 %v35170_v22  ;;  %46331 = vmatprep.subr.bf16.mxu0 %v51872_v19 }
0x14a2   :  { %44464 = vmatprep.mubr.f32.mxu1 %v35141_v49  ;;  %v35670_v49 = vsel %vm213_vm0, %v51088_v8, 0 }
0x14a3   :  { %44398 = vmatmul.mubr.f32.gmra.mrb[86].mxu0 %v34570_v30 }
0x14a4   :  { %44404 = vmatprep.mubr.f32.mxu0 %v34541_v7  ;;  %v35741_v7 = vand.u32 4294901760, %v35740_v57 }
0x14a5   :  { %44465 = vmatmul.mubr.f32.vlgmr.msra.gmra.mrb[84].mxu1 %v35151_v13  ;;  %v35667_v13 = vsel %vm213_vm0, %v51091_v1, 0 }
0x14a6   :  { %44467 = vmatprep.mubr.f32.mxu1 %v35161_v2  ;;  %46357 = vmatpush3.bf16.xpose.msra.mxu1 %v51871_v32  ;;  %v51158_v61 = vand.u32 4294901760, %v35667_v13  ;;  %v35742_v1 = vsub.f32 %v35740_v57, %v35741_v7 }
0x14a7   :  { %44405 = vmatmul.mubr.f32.vlgmr.msra.gmra.mrb[84].mxu0 %v34551_v58  ;;  %46359 = vmatprep.subr.bf16.mxu1 %v51867_v47  ;;  %v35750_v58 = vsub.f32 %v35664_v5, %v51152_v53 }
0x14a8   :  { %44407 = vmatprep.mubr.f32.mxu0 %v34561_v51  ;;  %46333 = vmatpush3.bf16.xpose.msra.mxu0 %v51872_v19  ;;  %v35760_v12 = vsub.f32 %v35667_v13, %v51158_v61  ;;  %v35743_v31 = vand.u32 4294901760, %v35742_v1 }
0x14a9   :  { %44468 = vmatmul.mubr.f32.gmra.mrb[86].mxu1 %v35171_v25  ;;  %46335 = vmatprep.subr.bf16.mxu0 %v51865_v24  ;;  %v35751_v8 = vand.u32 4294901760, %v35750_v58 }
0x14aa   :  { %44474 = vmatprep.mubr.f32.mxu1 %v51036_v45  ;;  %v35761_v50 = vand.u32 4294901760, %v35760_v12 }
0x14ab   :  { %44408 = vmatmul.mubr.f32.gmra.mrb[86].mxu0 %v34571_v33 }
0x14ac   :  { %44414 = vmatprep.mubr.f32.mxu0 %v51048_v56 }
0x14ad   :  { %44475 = vmatmul.mubr.f32.vlgmr.msra.gmra.mrb[84].mxu1 %v51033_v43 }
0x14ae   :  { %44477 = vmatprep.mubr.f32.mxu1 %v51098_v44  ;;  %46361 = vmatpush3.bf16.xpose.msra.mxu1 %v51867_v47  ;;  %v35769_v47 = vand.u32 4294901760, %v35670_v49 }
0x14af   :  { %44415 = vmatmul.mubr.f32.vlgmr.msra.gmra.mrb[84].mxu0 %v51043_v21 }
0x14b0   :  { %44417 = vmatprep.mubr.f32.mxu0 %v51106_v29  ;;  %46337 = vmatpush3.bf16.xpose.msra.mxu0 %v51865_v24  ;;  %v35770_v24 = vsub.f32 %v35670_v49, %v35769_v47 }
0x14b1   :  { %44478 = vmatmul.mubr.f32.gmra.mrb[86].mxu1 %v51095_v54  ;;  %46363 = vmatprep.subr.bf16.mxu0 %v51873_v0 }
0x14b2   :  { %44484 = vmatprep.mubr.f32.mxu1 %v51036_v45  ;;  %v35752_v45 = vsub.f32 %v35750_v58, %v35751_v8 }
0x14b3   :  { %44418 = vmatmul.mubr.f32.gmra.mrb[86].mxu0 %v51103_v27 }
0x14b4   :  { %44424 = vmatprep.mubr.f32.mxu0 %v51048_v56  ;;  %v35771_v56 = vand.u32 4294901760, %v35770_v24 }
0x14b5   :  { %44485 = vmatmul.mubr.f32.vlgmr.msra.gmra.mrb[84].mxu1 %v51033_v43  ;;  %v35762_v43 = vsub.f32 %v35760_v12, %v35761_v50 }
0x14b6   :  { %44487 = vmatprep.mubr.f32.mxu1 %v51098_v44  ;;  %v35753_v44 = vand.u32 4294901760, %v35752_v45  ;;  %v35772_v55 = vsub.f32 %v35770_v24, %v35771_v56 }
0x14b7   :  { %44425 = vmatmul.mubr.f32.vlgmr.msra.gmra.mrb[84].mxu0 %v51043_v21  ;;  %v35763_v21 = vand.u32 4294901760, %v35762_v43 }
0x14b8   :  { %44427 = vmatprep.mubr.f32.mxu0 %v51106_v29  ;;  %46365 = vmatpush3.bf16.xpose.msra.mxu0 %v51873_v0  ;;  %v35773_v22 = vand.u32 4294901760, %v35772_v55 }
0x14b9   :  { %44488 = vmatmul.mubr.f32.gmra.mrb[86].mxu1 %v51095_v54  ;;  %46367 = vmatprep.subr.bf16.mxu0 %v51874_v38  ;;  %v51875_v54 = vld [vmem:[#allocation79_spill] sm:$0xff] }
0x14ba   :  { %44554 = vmatprep.mubr.f32.mxu1 %v48834_v3 }
0x14bb   :  { %44428 = vmatmul.mubr.f32.gmra.mrb[86].mxu0 %v51103_v27 }
0x14bc   :  { %44494 = vmatprep.mubr.f32.mxu0 %v35743_v31 }
0x14bf   :  { %44495 = vmatmul.mubr.f32.vlgmr.msra.gmra.mrb[88].mxu0 %v35753_v44 }
0x14c0   :  { %44497 = vmatprep.mubr.f32.mxu0 %v35763_v21  ;;  %46369 = vmatpush3.bf16.xpose.msra.mxu0 %v51874_v38 }
0x14c1   :  { %46371 = vmatprep.subr.bf16.mxu0 %v51875_v54 }
0x14c3   :  { %44498 = vmatmul.mubr.f32.gmra.mrb[90].mxu0 %v35773_v22 }
0x14c4   :  { %44504 = vmatprep.mubr.f32.mxu0 %v51147_v39 }
0x14c7   :  { %44505 = vmatmul.mubr.f32.vlgmr.msra.gmra.mrb[88].mxu0 %v51152_v53 }
0x14c8   :  { %44507 = vmatprep.mubr.f32.mxu0 %v51158_v61  ;;  %46373 = vmatpush3.bf16.xpose.msra.mxu0 %v51875_v54 }
0x14c9   :  { %46375 = vmatprep.subr.bf16.mxu0 %v51873_v0 }
0x14cb   :  { %44508 = vmatmul.mubr.f32.gmra.mrb[90].mxu0 %v35769_v47 }
0x14cc   :  { %44514 = vmatprep.mubr.f32.mxu0 %v35740_v57 }
0x14cf   :  { %44515 = vmatmul.mubr.f32.vlgmr.msra.gmra.mrb[88].mxu0 %v35750_v58 }
0x14d0   :  { %44517 = vmatprep.mubr.f32.mxu0 %v35760_v12  ;;  %46377 = vmatpush3.bf16.xpose.msra.mxu0 %v51873_v0 }
0x14d1   :  { %46379 = vmatprep.subr.bf16.mxu0 %v51876_v16 }
0x14d3   :  { %44518 = vmatmul.mubr.f32.gmra.mrb[90].mxu0 %v35770_v24 }
0x14d4   :  { %44524 = vmatprep.mubr.f32.mxu0 %v35741_v7 }
0x14d7   :  { %44525 = vmatmul.mubr.f32.vlgmr.msra.gmra.mrb[88].mxu0 %v35751_v8 }
0x14d8   :  { %44527 = vmatprep.mubr.f32.mxu0 %v35761_v50  ;;  %46381 = vmatpush3.bf16.xpose.msra.mxu0 %v51876_v16 }
0x14d9   :  { %46383 = vmatprep.subr.bf16.mxu0 %v51873_v0 }
0x14db   :  { %44528 = vmatmul.mubr.f32.gmra.mrb[90].mxu0 %v35771_v56 }
0x14dc   :  { %44534 = vmatprep.mubr.f32.mxu0 %v51147_v39 }
0x14df   :  { %44535 = vmatmul.mubr.f32.vlgmr.msra.gmra.mrb[88].mxu0 %v51152_v53 }
0x14e0   :  { %44537 = vmatprep.mubr.f32.mxu0 %v51158_v61  ;;  %46385 = vmatpush3.bf16.xpose.msra.mxu0 %v51873_v0 }
0x14e3   :  { %44538 = vmatmul.mubr.f32.gmra.mrb[90].mxu0 %v35769_v47 }
0x14e4   :  { %44544 = vmatprep.mubr.f32.mxu0 %v51147_v39 }
0x14e7   :  { %44545 = vmatmul.mubr.f32.vlgmr.msra.gmra.mrb[88].mxu0 %v51152_v53 }
0x14e8   :  { %44547 = vmatprep.mubr.f32.mxu0 %v51158_v61 }
0x14eb   :  { %44548 = vmatmul.mubr.f32.gmra.mrb[90].mxu0 %v35769_v47 }
0x14ec   :  { %44638 = vmatprep.mubr.f32.mxu0 %v48892_v42 }
0x1588   :  { %v44486_v27 = vpop.f32.mrb[84].mxu1 }
0x1589   :  { %v35638_v20 = vpop.f32.mrb[85].mxu1 }
0x158a   :  { %v44426_v29 = vpop.f32.mrb[84].mxu0 }
0x158b   :  { %v36265_v25 = vadd.f32 %v44486_v27, %v44426_v29  ;;  %v35038_v30 = vpop.f32.mrb[85].mxu0 }
0x158c   :  { %v36264_v2 = vadd.f32 %v35638_v20, %v35038_v30  ;;  %v44489_v23 = vpop.f32.mrb[86].mxu1 }
0x158d   :  { %v35650_v26 = vpop.f32.mrb[87].mxu1 }
0x158e   :  { %v44429_v33 = vpop.f32.mrb[86].mxu0 }
0x158f   :  { %v36267_v10 = vadd.f32 %v44489_v23, %v44429_v33  ;;  %v35050_v51 = vpop.f32.mrb[87].mxu0 }
0x1590   :  { %v36266_v46 = vadd.f32 %v35650_v26, %v35050_v51 }
0x15ba   :  { %v44546_v59 = vpop.f32.mrb[88].mxu0 }
0x15bb   :  { %v36261_v34 = vsub.f32 %v44426_v29, %v44546_v59  ;;  %v36238_v63 = vpop.f32.mrb[89].mxu0 }
0x15bc   :  { %v36260_v48 = vsub.f32 %v35038_v30, %v36238_v63 }
0x15bd   :  { %v36272_v17 = vand.u32 4294901760, %v36261_v34  ;;  %v36771_v32 = vsub.f32 %v36265_v25, %v36261_v34  ;;  %v37275_v19 = vadd.f32 %v36265_v25, %v36261_v34 }
0x15be   :  { %v36269_v35 = vand.u32 4294901760, %v36260_v48  ;;  %v36770_v5 = vsub.f32 %v36264_v2, %v36260_v48  ;;  %v37274_v39 = vadd.f32 %v36264_v2, %v36260_v48  ;;  %v44549_v13 = vpop.f32.mrb[90].mxu0 }
0x15bf   :  { %v36364_v53 = vsub.f32 %v36261_v34, %v36272_v17  ;;  %v36776_v57 = vand.u32 4294901760, %v36771_v32  ;;  %v37280_v61 = vand.u32 4294901760, %v37275_v19  ;;  %v36263_v49 = vsub.f32 %v44429_v33, %v44549_v13  ;;  %v36250_v0 = vpop.f32.mrb[91].mxu0 }
0x15c0   :  { %v51200_v58 = vpack.c.bf16 %v36272_v17, %v36269_v35  ;;  %v36357_v47 = vsub.f32 %v36260_v48, %v36269_v35  ;;  %v36773_v7 = vand.u32 4294901760, %v36770_v5  ;;  %v37277_v12 = vand.u32 4294901760, %v37274_v39 }
0x15c1   :  { %v36868_v8 = vsub.f32 %v36771_v32, %v36776_v57  ;;  %v37372_v24 = vsub.f32 %v37275_v19, %v37280_v61  ;;  %v37790_v1 = vand.u32 4294901760, %v36263_v49  ;;  %v38289_v50 = vsub.f32 %v36267_v10, %v36263_v49 }
0x15c2   :  { %v51202_v45 = vpack.c.bf16 %v36776_v57, %v36773_v7  ;;  %v36861_v38 = vsub.f32 %v36770_v5, %v36773_v7  ;;  %v51204_v56 = vpack.c.bf16 %v37280_v61, %v37277_v12  ;;  %v37365_v31 = vsub.f32 %v37274_v39, %v37277_v12  ;;  %46387 = vmatprep.subr.bf16.mxu1 %v51200_v58 }
0x15c3   :  { %v51207_v43 = vsub.f32 %v36263_v49, %v37790_v1  ;;  %v38294_v44 = vand.u32 4294901760, %v38289_v50  ;;  %v38793_v55 = vadd.f32 %v36267_v10, %v36263_v49  ;;  %v36262_v21 = vsub.f32 %v35050_v51, %v36250_v0  ;;  %46389 = vmatpush3.bf16.msra.mxu1 %v51200_v58 }
0x15c4   :  { %46435 = vmatprep.subr.bf16.mxu0 %v51204_v56  ;;  %v36358_v22 = vand.u32 4294901760, %v36357_v47  ;;  %v36365_v54 = vand.u32 4294901760, %v36364_v53  ;;  %v46394_v16 = vpack.c.bf16 %v36364_v53, %v36357_v47  ;;  %v37366_v27 = vand.u32 4294901760, %v37365_v31 }
0x15c5   :  { %v38386_v20 = vsub.f32 %v38289_v50, %v38294_v44  ;;  %v38798_v29 = vand.u32 4294901760, %v38793_v55  ;;  %v37787_v25 = vand.u32 4294901760, %v36262_v21  ;;  %v38288_v30 = vsub.f32 %v36266_v46, %v36262_v21  ;;  %46437 = vmatpush3.bf16.msra.mxu0 %v51204_v56 }
0x15c6   :  { %v38792_v2 = vadd.f32 %v36266_v46, %v36262_v21  ;;  %44555 = vmatmul.mubr.f32.vlgmr.msra.gmra.mrb[88].mxu1 %v48836_v4  ;;  %v36359_v23 = vsub.f32 %v36357_v47, %v36358_v22  ;;  %v36366_v26 = vsub.f32 %v36364_v53, %v36365_v54  ;;  %v37367_v33 = vsub.f32 %v37365_v31, %v37366_v27 }
0x15c7   :  { %v51213_v10 = vsub.f32 %v38793_v55, %v38798_v29  ;;  %v51215_v51 = vpack.c.bf16 %v37790_v1, %v37787_v25  ;;  %v37875_v59 = vsub.f32 %v36262_v21, %v37787_v25  ;;  %v38291_v34 = vand.u32 4294901760, %v38288_v30  ;;  %44561 = vmatprep.mubr.f32.mxu1 %v48769_v15 }
0x15c8   :  { %v38795_v63 = vand.u32 4294901760, %v38792_v2  ;;  %44639 = vmatmul.mubr.f32.vlgmr.msra.gmra.mrb[92].mxu0 %v48906_v41  ;;  %v36360_v48 = vand.u32 4294901760, %v36359_v23  ;;  %v36367_v17 = vand.u32 4294901760, %v36366_v26  ;;  %v37368_v32 = vand.u32 4294901760, %v37367_v33 }
0x15c9   :  { %v51219_v46 = vpack.c.bf16 %v38294_v44, %v38291_v34  ;;  %v38379_v19 = vsub.f32 %v38288_v30, %v38291_v34  ;;  %v37373_v35 = vand.u32 4294901760, %v37372_v24  ;;  %v46442_v5 = vpack.c.bf16 %v37372_v24, %v37365_v31  ;;  %44645 = vmatprep.mubr.f32.mxu0 %v48882_v60 }
0x15ca   :  { %v51222_v39 = vpack.c.bf16 %v38798_v29, %v38795_v63  ;;  %v38883_v13 = vsub.f32 %v38792_v2, %v38795_v63  ;;  %v46390_v53 = vpack.c.bf16 %v36367_v17, %v36360_v48  ;;  %v51224_v57 = vpack.c.bf16 %v36365_v54, %v36358_v22 }
0x15cb   :  { %v37374_v61 = vsub.f32 %v37372_v24, %v37373_v35  ;;  %v51226_v49 = vpack.c.bf16 %v37373_v35, %v37366_v27  ;;  %v36862_v0 = vand.u32 4294901760, %v36861_v38  ;;  %v36869_v47 = vand.u32 4294901760, %v36868_v8 }
0x15cc   :  { %46391 = vmatprep.subr.bf16.mxu1 %v46390_v53  ;;  %v38380_v7 = vand.u32 4294901760, %v38379_v19  ;;  %v38387_v12 = vand.u32 4294901760, %v38386_v20  ;;  %v51228_v1 = vpack.c.bf16 %v36868_v8, %v36861_v38  ;;  %v51230_v50 = vpack.c.bf16 %v38386_v20, %v38379_v19 }
0x15cd   :  { %46393 = vmatpush3.bf16.msra.mxu1 %v46390_v53  ;;  %v37375_v31 = vand.u32 4294901760, %v37374_v61  ;;  %v36863_v44 = vsub.f32 %v36861_v38, %v36862_v0  ;;  %v36870_v55 = vsub.f32 %v36868_v8, %v36869_v47  ;;  %v51232_v21 = vpack.c.bf16 %v36869_v47, %v36862_v0 }
0x15ce   :  { %46395 = vmatprep.subr.bf16.mxu1 %v46394_v16  ;;  %v38381_v22 = vsub.f32 %v38379_v19, %v38380_v7  ;;  %v38388_v24 = vsub.f32 %v38386_v20, %v38387_v12  ;;  %v51234_v54 = vpack.c.bf16 %v38387_v12, %v38380_v7  ;;  %v37876_v27 = vand.u32 4294901760, %v37875_v59 }
0x15cf   :  { %v46438_v29 = vpack.c.bf16 %v37375_v31, %v37368_v32  ;;  %v36864_v25 = vand.u32 4294901760, %v36863_v44  ;;  %v36871_v30 = vand.u32 4294901760, %v36870_v55  ;;  %v37883_v2 = vand.u32 4294901760, %v51207_v43 }
0x15d0   :  { %44562 = vmatmul.mubr.f32.vlgmr.msra.gmra.mrb[88].mxu1 %v48771_v28  ;;  %v38382_v23 = vand.u32 4294901760, %v38381_v22  ;;  %v38389_v26 = vand.u32 4294901760, %v38388_v24  ;;  %v37877_v33 = vsub.f32 %v37875_v59, %v37876_v27  ;;  %v51239_v8 = vpack.c.bf16 %v51207_v43, %v37875_v59 }
0x15d1   :  { %46439 = vmatprep.subr.bf16.mxu0 %v46438_v29  ;;  %46397 = vmatpush3.bf16.msra.mxu1 %v46394_v16  ;;  %v46414_v38 = vpack.c.bf16 %v36871_v30, %v36864_v25  ;;  %v37884_v20 = vsub.f32 %v51207_v43, %v37883_v2  ;;  %v51242_v34 = vpack.c.bf16 %v37883_v2, %v37876_v27  ;;  %v38884_v63 = vand.u32 4294901760, %v38883_v13 }
0x15d2   :  { %46441 = vmatpush3.bf16.msra.mxu0 %v46438_v29  ;;  %46399 = vmatprep.subr.bf16.mxu1 %v51200_v58  ;;  %v46486_v48 = vpack.c.bf16 %v38389_v26, %v38382_v23  ;;  %v37878_v17 = vand.u32 4294901760, %v37877_v33  ;;  %v38891_v32 = vand.u32 4294901760, %v51213_v10  ;;  %v51247_v19 = vpack.c.bf16 %v51213_v10, %v38883_v13 }
0x15d3   :  { %46443 = vmatprep.subr.bf16.mxu0 %v46442_v5  ;;  %44568 = vmatprep.mubr.f32.mxu1 %v48781_v52  ;;  %v37885_v16 = vand.u32 4294901760, %v37884_v20  ;;  %v38885_v59 = vsub.f32 %v38883_v13, %v38884_v63  ;;  %v51882_v13 = vld [vmem:[#allocation68_spill] sm:$0xff] }
0x15d4   :  { %v38892_v43 = vsub.f32 %v51213_v10, %v38891_v32  ;;  %v51251_v35 = vpack.c.bf16 %v38891_v32, %v38884_v63  ;;  %v51879_v10 = vld [vmem:[#allocation63_spill] sm:$0xff] }
0x15d5   :  { %44646 = vmatmul.mubr.f32.vlgmr.msra.gmra.mrb[92].mxu0 %v48896_v14  ;;  %v51254_v53 = vpack.c.bf16 %v37885_v16, %v37878_v17  ;;  %v38886_v61 = vand.u32 4294901760, %v38885_v59 }
0x15d6   :  { %46445 = vmatpush3.bf16.msra.mxu0 %v46442_v5  ;;  %44652 = vmatprep.mubr.f32.mxu0 %v48885_v36  ;;  %v38893_v0 = vand.u32 4294901760, %v38892_v43  ;;  %v51880_v5 = vld [vmem:[#allocation66_spill] sm:$0xff] }
0x15d7   :  { %46447 = vmatprep.subr.bf16.mxu0 %v51204_v56 }
0x15d8   :  { %44569 = vmatmul.mubr.f32.vlgmr.msra.gmra.mrb[88].mxu1 %v48784_v62  ;;  %v51259_v47 = vpack.c.bf16 %v38893_v0, %v38886_v61 }
0x15d9   :  { %46401 = vmatpush3.bf16.msra.mxu1 %v51200_v58  ;;  %44575 = vmatprep.mubr.f32.mxu1 %v48795_v18 }
0x15da   :  { %46403 = vmatprep.subr.bf16.mxu1 %v51224_v57 }
0x15dd   :  { %44653 = vmatmul.mubr.f32.vlgmr.msra.gmra.mrb[92].mxu0 %v48899_v9 }
0x15de   :  { %46449 = vmatpush3.bf16.msra.mxu0 %v51204_v56  ;;  %44659 = vmatprep.mubr.f32.mxu0 %v48888_v11 }
0x15df   :  { %46451 = vmatprep.subr.bf16.mxu0 %v51226_v49 }
0x15e0   :  { %44576 = vmatmul.mubr.f32.vlgmr.msra.gmra.mrb[88].mxu1 %v48798_v6 }
0x15e1   :  { %46405 = vmatpush3.bf16.msra.mxu1 %v51224_v57  ;;  %44582 = vmatprep.mubr.f32.mxu1 %v48769_v15  ;;  %v51883_v57 = vld [vmem:[#allocation69_spill] sm:$0xff] }
0x15e2   :  { %46407 = vmatprep.subr.bf16.mxu1 %v51200_v58 }
0x15e5   :  { %44660 = vmatmul.mubr.f32.vlgmr.msra.gmra.mrb[92].mxu0 %v48902_v37 }
0x15e6   :  { %46453 = vmatpush3.bf16.msra.mxu0 %v51226_v49  ;;  %44666 = vmatprep.mubr.f32.mxu0 %v48882_v60 }
0x15e7   :  { %46455 = vmatprep.subr.bf16.mxu0 %v51204_v56 }
0x15e8   :  { %44583 = vmatmul.mubr.f32.vlgmr.msra.gmra.mrb[88].mxu1 %v48771_v28 }
0x15e9   :  { %46409 = vmatpush3.bf16.msra.mxu1 %v51200_v58  ;;  %44589 = vmatprep.mubr.f32.mxu1 %v48769_v15  ;;  %v51877_v58 = vld [vmem:[#allocation70_spill] sm:$0xff] }
0x15ea   :  { %46411 = vmatprep.subr.bf16.mxu1 %v51202_v45 }
0x15ed   :  { %44667 = vmatmul.mubr.f32.vlgmr.msra.gmra.mrb[92].mxu0 %v48896_v14 }
0x15ee   :  { %46457 = vmatpush3.bf16.msra.mxu0 %v51204_v56  ;;  %44673 = vmatprep.mubr.f32.mxu0 %v48882_v60  ;;  %v51878_v56 = vld [vmem:[#allocation62_spill] sm:$0xff] }
0x15ef   :  { %46483 = vmatprep.subr.bf16.mxu0 %v51219_v46 }
0x15f0   :  { %44590 = vmatmul.mubr.f32.vlgmr.msra.gmra.mrb[88].mxu1 %v48771_v28 }
0x15f1   :  { %46413 = vmatpush3.bf16.msra.mxu1 %v51202_v45  ;;  %44596 = vmatprep.mubr.f32.mxu1 %v48594_v40 }
0x15f2   :  { %46415 = vmatprep.subr.bf16.mxu1 %v46414_v38 }
0x15f4   :  { %44597 = vmatmul.mubr.f32.vlgmr.msra.gmra.mrb[90].mxu1 %v51877_v58 }
0x15f5   :  { %44674 = vmatmul.mubr.f32.vlgmr.msra.gmra.mrb[92].mxu0 %v48896_v14  ;;  %46417 = vmatpush3.bf16.msra.mxu1 %v46414_v38 }
0x15f6   :  { %46485 = vmatpush3.bf16.msra.mxu0 %v51219_v46  ;;  %46419 = vmatprep.subr.bf16.mxu1 %v51228_v1 }
0x15f7   :  { %46487 = vmatprep.subr.bf16.mxu0 %v46486_v48  ;;  %44722 = vmatprep.mubr.f32.mxu0 %v48594_v40  ;;  %v51881_v40 = vld [vmem:[#allocation67_spill] sm:$0xff] }
0x15f8   :  { %44603 = vmatprep.mubr.f32.mxu1 %v51878_v56 }
0x15f9   :  { %44723 = vmatmul.mubr.f32.vlgmr.msra.gmra.mrb[94].mxu0 %v51877_v58 }
0x15fa   :  { %46489 = vmatpush3.bf16.msra.mxu0 %v46486_v48  ;;  %44729 = vmatprep.mubr.f32.mxu0 %v51878_v56 }
0x15fb   :  { %46491 = vmatprep.subr.bf16.mxu0 %v51230_v50 }
0x15fc   :  { %44604 = vmatmul.mubr.f32.vlgmr.msra.gmra.mrb[90].mxu1 %v51879_v10 }
0x15fd   :  { %46421 = vmatpush3.bf16.msra.mxu1 %v51228_v1  ;;  %44610 = vmatprep.mubr.f32.mxu1 %v51880_v5 }
0x15fe   :  { %46423 = vmatprep.subr.bf16.mxu1 %v51202_v45 }
0x1601   :  { %44730 = vmatmul.mubr.f32.vlgmr.msra.gmra.mrb[94].mxu0 %v51879_v10 }
0x1602   :  { %46493 = vmatpush3.bf16.msra.mxu0 %v51230_v50  ;;  %44736 = vmatprep.mubr.f32.mxu0 %v51880_v5 }
0x1603   :  { %46495 = vmatprep.subr.bf16.mxu0 %v51219_v46 }
0x1604   :  { %44611 = vmatmul.mubr.f32.vlgmr.msra.gmra.mrb[90].mxu1 %v51881_v40 }
0x1605   :  { %46425 = vmatpush3.bf16.msra.mxu1 %v51202_v45  ;;  %44617 = vmatprep.mubr.f32.mxu1 %v51882_v13 }
0x1606   :  { %46427 = vmatprep.subr.bf16.mxu1 %v51232_v21 }
0x1609   :  { %44737 = vmatmul.mubr.f32.vlgmr.msra.gmra.mrb[94].mxu0 %v51881_v40 }
0x160a   :  { %46497 = vmatpush3.bf16.msra.mxu0 %v51219_v46  ;;  %44743 = vmatprep.mubr.f32.mxu0 %v51882_v13 }
0x160b   :  { %46499 = vmatprep.subr.bf16.mxu0 %v51234_v54 }
0x160c   :  { %44618 = vmatmul.mubr.f32.vlgmr.msra.gmra.mrb[90].mxu1 %v51883_v57 }
0x160d   :  { %46429 = vmatpush3.bf16.msra.mxu1 %v51232_v21  ;;  %44624 = vmatprep.mubr.f32.mxu1 %v51878_v56 }
0x160e   :  { %46431 = vmatprep.subr.bf16.mxu1 %v51202_v45 }
0x1611   :  { %44744 = vmatmul.mubr.f32.vlgmr.msra.gmra.mrb[94].mxu0 %v51883_v57 }
0x1612   :  { %46501 = vmatpush3.bf16.msra.mxu0 %v51234_v54  ;;  %44750 = vmatprep.mubr.f32.mxu0 %v51878_v56 }
0x1613   :  { %46503 = vmatprep.subr.bf16.mxu0 %v51219_v46 }
0x1614   :  { %44625 = vmatmul.mubr.f32.vlgmr.msra.gmra.mrb[90].mxu1 %v51879_v10 }
0x1615   :  { %46433 = vmatpush3.bf16.msra.mxu1 %v51202_v45  ;;  %44631 = vmatprep.mubr.f32.mxu1 %v51878_v56 }
0x1616   :  { %46459 = vmatprep.subr.bf16.mxu1 %v51215_v51 }
0x1619   :  { %44751 = vmatmul.mubr.f32.vlgmr.msra.gmra.mrb[94].mxu0 %v51879_v10 }
0x161a   :  { %46505 = vmatpush3.bf16.msra.mxu0 %v51219_v46  ;;  %44757 = vmatprep.mubr.f32.mxu0 %v51878_v56 }
0x161c   :  { %44632 = vmatmul.mubr.f32.vlgmr.msra.gmra.mrb[90].mxu1 %v51879_v10 }
0x161d   :  { %46461 = vmatpush3.bf16.msra.mxu1 %v51215_v51  ;;  %44680 = vmatprep.mubr.f32.mxu1 %v48834_v3 }
0x161e   :  { %46463 = vmatprep.subr.bf16.mxu1 %v51254_v53 }
0x1620   :  { %44681 = vmatmul.mubr.f32.vlgmr.msra.gmra.mrb[92].mxu1 %v48836_v4 }
0x1621   :  { %46465 = vmatpush3.bf16.msra.mxu1 %v51254_v53  ;;  %44687 = vmatprep.mubr.f32.mxu1 %v48769_v15 }
0x1622   :  { %46467 = vmatprep.subr.bf16.mxu1 %v51239_v8  ;;  %44758 = vmatmul.mubr.f32.vlgmr.msra.gmra.mrb[94].mxu0 %v51879_v10 }
0x1628   :  { %44688 = vmatmul.mubr.f32.vlgmr.msra.gmra.mrb[92].mxu1 %v48771_v28 }
0x1629   :  { %46469 = vmatpush3.bf16.msra.mxu1 %v51239_v8  ;;  %44694 = vmatprep.mubr.f32.mxu1 %v48781_v52 }
0x162a   :  { %46471 = vmatprep.subr.bf16.mxu1 %v51215_v51 }
0x1630   :  { %44695 = vmatmul.mubr.f32.vlgmr.msra.gmra.mrb[92].mxu1 %v48784_v62 }
0x1631   :  { %46473 = vmatpush3.bf16.msra.mxu1 %v51215_v51  ;;  %44701 = vmatprep.mubr.f32.mxu1 %v48795_v18 }
0x1632   :  { %46475 = vmatprep.subr.bf16.mxu1 %v51242_v34 }
0x1638   :  { %44702 = vmatmul.mubr.f32.vlgmr.msra.gmra.mrb[92].mxu1 %v48798_v6 }
0x1639   :  { %46477 = vmatpush3.bf16.msra.mxu1 %v51242_v34  ;;  %44708 = vmatprep.mubr.f32.mxu1 %v48769_v15 }
0x163a   :  { %46479 = vmatprep.subr.bf16.mxu1 %v51215_v51 }
0x1640   :  { %44709 = vmatmul.mubr.f32.vlgmr.msra.gmra.mrb[92].mxu1 %v48771_v28 }
0x1641   :  { %46481 = vmatpush3.bf16.msra.mxu1 %v51215_v51  ;;  %44715 = vmatprep.mubr.f32.mxu1 %v48769_v15 }
0x1642   :  { %46507 = vmatprep.subr.bf16.mxu1 %v51222_v39 }
0x1648   :  { %44716 = vmatmul.mubr.f32.vlgmr.msra.gmra.mrb[92].mxu1 %v48771_v28 }
0x1649   :  { %46509 = vmatpush3.bf16.msra.mxu1 %v51222_v39  ;;  %44764 = vmatprep.mubr.f32.mxu1 %v48892_v42 }
0x164a   :  { %46511 = vmatprep.subr.bf16.mxu1 %v51259_v47 }
0x164c   :  { %44765 = vmatmul.mubr.f32.vlgmr.msra.gmra.mrb[94].mxu1 %v48906_v41 }
0x164d   :  { %46513 = vmatpush3.bf16.msra.mxu1 %v51259_v47  ;;  %44771 = vmatprep.mubr.f32.mxu1 %v48882_v60 }
0x164e   :  { %46515 = vmatprep.subr.bf16.mxu1 %v51247_v19 }
0x1654   :  { %44772 = vmatmul.mubr.f32.vlgmr.msra.gmra.mrb[94].mxu1 %v48896_v14 }
0x1655   :  { %46517 = vmatpush3.bf16.msra.mxu1 %v51247_v19  ;;  %44778 = vmatprep.mubr.f32.mxu1 %v48885_v36 }
0x1656   :  { %46519 = vmatprep.subr.bf16.mxu1 %v51222_v39 }
0x165c   :  { %44779 = vmatmul.mubr.f32.vlgmr.msra.gmra.mrb[94].mxu1 %v48899_v9 }
0x165d   :  { %46521 = vmatpush3.bf16.msra.mxu1 %v51222_v39  ;;  %44785 = vmatprep.mubr.f32.mxu1 %v48888_v11 }
0x165e   :  { %46523 = vmatprep.subr.bf16.mxu1 %v51251_v35 }
0x1664   :  { %44786 = vmatmul.mubr.f32.vlgmr.msra.gmra.mrb[94].mxu1 %v48902_v37 }
0x1665   :  { %46525 = vmatpush3.bf16.msra.mxu1 %v51251_v35  ;;  %44792 = vmatprep.mubr.f32.mxu1 %v48882_v60 }
0x1666   :  { %46527 = vmatprep.subr.bf16.mxu1 %v51222_v39 }
0x166c   :  { %44793 = vmatmul.mubr.f32.vlgmr.msra.gmra.mrb[94].mxu1 %v48896_v14 }
0x166d   :  { %46529 = vmatpush3.bf16.msra.mxu1 %v51222_v39  ;;  %44799 = vmatprep.mubr.f32.mxu1 %v48882_v60 }
0x1674   :  { %44800 = vmatmul.mubr.f32.vlgmr.msra.gmra.mrb[94].mxu1 %v48896_v14 }
0x16c3   :  { %v44591_v41 = vpop.f32.mrb[88].mxu1 }
0x16c4   :  { %v36760_v15 = vpop.f32.mrb[89].mxu1 }
0x16c8   :  { %v44675_v28 = vpop.f32.mrb[92].mxu0 }
0x16c9   :  { %v37779_v52 = vsub.f32 %v44591_v41, %v44675_v28  ;;  %v37768_v62 = vpop.f32.mrb[93].mxu0 }
0x16ca   :  { %v37778_v18 = vsub.f32 %v36760_v15, %v37768_v62 }
0x16cb   :  { %37783 = vst.msk [vmem:[%s51422_s14 + $0x8] sm:$0xff] %vm213_vm0, %v37779_v52 }
0x16cc   :  { %37782 = vst.msk [vmem:[%s51422_s14] sm:$0xff] %vm213_vm0, %v37778_v18 }
0x16ef   :  { %v44633_v6 = vpop.f32.mrb[90].mxu1 }
0x16f0   :  { %v37781_v3 = vadd.f32 %v44633_v6, %v44591_v41  ;;  %v37264_v4 = vpop.f32.mrb[91].mxu1 }
0x16f1   :  { %v37780_v37 = vadd.f32 %v37264_v4, %v36760_v15 }
0x16f2   :  { %37785 = vst.msk [vmem:[%s51423_s15 + $0x8] sm:$0xff] %vm213_vm0, %v37781_v3 }
0x16f3   :  { %37784 = vst.msk [vmem:[%s51423_s15] sm:$0xff] %vm213_vm0, %v37780_v37 }
0x16f5   :  { %v44759_v60 = vpop.f32.mrb[94].mxu0 }
0x16f6   :  { %v38782_v36 = vpop.f32.mrb[95].mxu0 }
0x171b   :  { %v44717_v11 = vpop.f32.mrb[92].mxu1 }
0x171c   :  { %v39299_v42 = vadd.f32 %v44759_v60, %v44717_v11  ;;  %v38278_v14 = vpop.f32.mrb[93].mxu1 }
0x171d   :  { %v39298_v9 = vadd.f32 %v38782_v36, %v38278_v14 }
0x171e   :  { %39303 = vst.msk [vmem:[%s51423_s15 + $0x18] sm:$0xff] %vm213_vm0, %v39299_v42 }
0x171f   :  { %39302 = vst.msk [vmem:[%s51423_s15 + $0x10] sm:$0xff] %vm213_vm0, %v39298_v9 }
0x1747   :  { %v44801_v45 = vpop.f32.mrb[94].mxu1 }
0x1748   :  { %v39297_v51 = vsub.f32 %v44717_v11, %v44801_v45  ;;  %v39286_v46 = vpop.f32.mrb[95].mxu1 }
0x1749   :  { %v39296_v39 = vsub.f32 %v38278_v14, %v39286_v46 }
0x174a   :  { %39301 = vst.msk [vmem:[%s51422_s14 + $0x18] sm:$0xff] %vm213_vm0, %v39297_v51 }
0x174b   :  { %39300 = vst.msk [vmem:[%s51422_s14 + $0x10] sm:$0xff] %vm213_vm0, %v39296_v39 }
0x174c   :  { %39312 = vsyncpa [#allocation5], 1 }
0x174d   :  { %39313 = vsyncpa [#allocation7], 1 }
0x174e   :  { %39314 = vsyncpa [#allocation10], 1 }
0x174f   :  { %39315 = vsyncpa [#allocation13], 1 }
0x1750   :  { %39316 = vsyncpa [#allocation16], 1 }
0x1751   :  { %39317 = vsyncpa [#allocation19], 1 }

</bundles_post_ra>
